<compile_context>
chip_gen: v7x
topology: tpu7x:2x2x1
jax: 0.10.0
libtpu: 0.0.40
codegen_flags: <defaults>
</compile_context>

<pallas_src>
import jax
import jax.numpy as jnp
from jax.experimental import pallas as pl
from jax.experimental.pallas import tpu as pltpu

BN_EPS = 1e-5


def _full_spec(shape):
    zeros = (0,) * len(shape)
    return pl.BlockSpec(shape, lambda i: zeros)


def _pick_block_batch(n, max_block=8):
    bb = min(n, max_block)
    while n % bb:
        bb -= 1
    return bb


# ---------------------------------------------------------------------------
# Fused Conv1+BN+ReLU+Pool -> Conv2+BN+ReLU+Pool kernel (batch block per grid step)
# ---------------------------------------------------------------------------
def _fused_conv_kernel(g0_ref, g1_ref, g2_ref, g3_ref,
                       w1_ref, s1_ref, b1_ref,
                       w2_ref, s2_ref, b2_ref,
                       o_ref):
    # g0..g3 : (B, 32, 8, 9*Cin) bf16 im2col slabs for conv1 output cols j = 4t+q.
    # w1     : (9*Cin, 32) bf16, rows ordered (dj, di, cin).
    # w2     : (3, 96, 64) bf16: per column-tap dj, rows ordered (di, cin).
    # s*, b* : (1, C) f32 folded BatchNorm scale/shift (conv bias included).
    # o      : (B, 8, 8, 64) bf16 pooled conv2 output (NHWC).
    b = g0_ref.shape[0]
    k1 = g0_ref.shape[-1]
    m1 = b * 32 * 8                       # conv1 rows per column group

    # ---- Conv1: one MXU matmul over all 4 column groups (K = 9*Cin) ----
    xg = jnp.concatenate(
        [g0_ref[...].reshape(m1, k1), g1_ref[...].reshape(m1, k1),
         g2_ref[...].reshape(m1, k1), g3_ref[...].reshape(m1, k1)], axis=0)
    acc1 = jnp.dot(xg, w1_ref[...], preferred_element_type=jnp.float32)
    y1 = jnp.maximum(acc1 * s1_ref[...] + b1_ref[...], 0.0)       # BN + ReLU (f32)

    # ---- MaxPool 2x2: groups (0,1)->even pooled cols, (2,3)->odd pooled cols;
    #      row pairs pool via a leading-dim reshape (pairs never straddle images) ----
    ya = jnp.maximum(y1[0 * m1:1 * m1], y1[1 * m1:2 * m1])        # pooled cols 0,2,..,14
    yb = jnp.maximum(y1[2 * m1:3 * m1], y1[3 * m1:4 * m1])        # pooled cols 1,3,..,15
    ya = ya.reshape(b * 16, 2, 8, 32)
    yb = yb.reshape(b * 16, 2, 8, 32)
    ya = jnp.maximum(ya[:, 0], ya[:, 1]).reshape(b, 16, 8, 32).astype(jnp.bfloat16)
    yb = jnp.maximum(yb[:, 0], yb[:, 1]).reshape(b, 16, 8, 32).astype(jnp.bfloat16)

    # ---- Conv2 input: zero-padded column-parity planes, then row-tap K-concat ----
    zc = jnp.zeros((b, 16, 1, 32), jnp.bfloat16)
    zr = jnp.zeros((b, 1, 9, 32), jnp.bfloat16)
    e2 = jnp.concatenate([zr, jnp.concatenate([zc, yb], axis=2), zr], axis=1)  # (B,18,9,32)
    o2 = jnp.concatenate([zr, jnp.concatenate([ya, zc], axis=2), zr], axis=1)  # (B,18,9,32)
    ec = jnp.concatenate([e2[:, 0:16], e2[:, 1:17], e2[:, 2:18]], axis=-1)     # (B,16,9,96)
    oc = jnp.concatenate([o2[:, 0:16], o2[:, 1:17], o2[:, 2:18]], axis=-1)

    m2 = b * 16 * 8
    ec0 = ec[:, :, 0:8, :].reshape(m2, 96)
    ec1 = ec[:, :, 1:9, :].reshape(m2, 96)
    oc0 = oc[:, :, 0:8, :].reshape(m2, 96)
    oc1 = oc[:, :, 1:9, :].reshape(m2, 96)

    # ---- Conv2: 3 column-tap matmuls (K = 3*32 = 96), both parities stacked in M ----
    t0 = jnp.concatenate([ec0, oc0], axis=0)
    t1 = jnp.concatenate([oc0, ec1], axis=0)
    t2 = jnp.concatenate([ec1, oc1], axis=0)
    acc2 = jnp.dot(t0, w2_ref[0], preferred_element_type=jnp.float32)
    acc2 += jnp.dot(t1, w2_ref[1], preferred_element_type=jnp.float32)
    acc2 += jnp.dot(t2, w2_ref[2], preferred_element_type=jnp.float32)
    y2 = jnp.maximum(acc2 * s2_ref[...] + b2_ref[...], 0.0)       # BN + ReLU (f32)

    # ---- MaxPool 2x2 and store ----
    yw = jnp.maximum(y2[0:m2], y2[m2:2 * m2])                     # pool over W
    yw = yw.reshape(b * 8, 2, 8, 64)
    yo = jnp.maximum(yw[:, 0], yw[:, 1]).reshape(b, 8, 8, 64)     # pool over H
    o_ref[...] = yo.astype(o_ref.dtype)


def fused_conv_blocks(groups, w1, s1, b1, w2, s2, b2, *, block_batch):
    n = groups[0].shape[0]
    k1 = groups[0].shape[-1]
    act_spec = pl.BlockSpec((block_batch, 32, 8, k1), lambda i: (i, 0, 0, 0))
    return pl.pallas_call(
        _fused_conv_kernel,
        out_shape=jax.ShapeDtypeStruct((n, 8, 8, 64), jnp.bfloat16),
        grid=(n // block_batch,),
        in_specs=[act_spec] * 4 + [
            _full_spec((k1, 32)), _full_spec((1, 32)), _full_spec((1, 32)),
            _full_spec((3, 96, 64)), _full_spec((1, 64)), _full_spec((1, 64)),
        ],
        out_specs=pl.BlockSpec((block_batch, 8, 8, 64), lambda i: (i, 0, 0, 0)),
        compiler_params=pltpu.CompilerParams(dimension_semantics=("parallel",)),
    )(*groups, w1, s1, b1, w2, s2, b2)


# ---------------------------------------------------------------------------
# Final Linear layer (bf16 matmul, output lanes padded to 128 for dense stores)
# ---------------------------------------------------------------------------
def _linear_kernel(x_ref, w_ref, b_ref, o_ref):
    o_ref[...] = (
        jnp.dot(x_ref[...], w_ref[...], preferred_element_type=jnp.float32)
        + b_ref[...]
    )


def linear_padded(x, w_pad, b_pad):
    m, k = x.shape
    npad = w_pad.shape[1]
    return pl.pallas_call(
        _linear_kernel,
        out_shape=jax.ShapeDtypeStruct((m, npad), jnp.float32),
        grid=(1,),
        in_specs=[_full_spec((m, k)), _full_spec((k, npad)), _full_spec((1, npad))],
        out_specs=pl.BlockSpec((m, npad), lambda i: (0, 0)),
        compiler_params=pltpu.CompilerParams(dimension_semantics=("arbitrary",)),
    )(x, w_pad, b_pad)


# ---------------------------------------------------------------------------
# Host-side one-pass input prep (network input boundary only; no inter-layer glue)
# ---------------------------------------------------------------------------
def _conv1_im2col_groups(x_nhwc):
    # Returns 4 arrays (N, 32, 8, 9*Cin) bf16, one per output-column group j = 4t+q,
    # with lane order (dj, di, cin) matching params["w1"].  Grouping by (j mod 4)
    # makes the 2x2 pool a max of whole groups AND hands conv2 its column-parity
    # planes without any strided slicing in-kernel.
    xp = jnp.pad(x_nhwc, ((0, 0), (1, 1), (1, 1), (0, 0)))          # (N, 34, 34, Cin)

    def tap(col0):                                                  # padded cols col0+4t
        cols = xp[:, :, col0:col0 + 29:4, :]                        # (N, 34, 8, Cin)
        return jnp.concatenate(
            [cols[:, 0:32], cols[:, 1:33], cols[:, 2:34]], axis=-1)  # rows i, i+1, i+2

    def group(q):
        return jnp.concatenate([tap(q), tap(q + 1), tap(q + 2)], axis=-1)

    return tuple(group(q).astype(jnp.bfloat16) for q in range(4))


# ---------------------------------------------------------------------------
# Forward pass
# ---------------------------------------------------------------------------
def cnn_enhanced_forward(x_nchw, params, num_classes=10):
    x = jnp.transpose(x_nchw, (0, 2, 3, 1)).astype(jnp.bfloat16)    # NCHW -> NHWC
    n, h, w, _ = x.shape
    if h != 32 or w != 32:
        raise NotImplementedError("fused kernel is specialized to 32x32 inputs")

    groups = _conv1_im2col_groups(x)
    bb = _pick_block_batch(n)
    y2 = fused_conv_blocks(
        groups, params["w1"], params["scale1"], params["shift1"],
        params["w2"], params["scale2"], params["shift2"], block_batch=bb)

    # Flatten NHWC -> (N, 4096) (FC weight rows were pre-permuted to (H,W,C) order).
    # Dropout(p=0.5) is the identity in eval/inference mode.
    flat = y2.reshape(n, -1)
    logits = linear_padded(flat, params["w_fc"], params["b_fc"])
    return logits[:, :num_classes]


def init_params(key, input_channels=3, num_classes=10):
    if input_channels == 1:
        raise NotImplementedError(
            "fused kernel supports the 32x32 (CIFAR) path only")
    k = jax.random.split(key, 6)
    # Conv weights in HWIO layout.  Real PyTorch weights (OIHW) would need
    # .transpose(2, 3, 1, 0) before the layout prep below.
    w1 = jax.random.normal(k[0], (3, 3, input_channels, 32), jnp.float32) * 0.1
    b1 = jax.random.normal(k[1], (32,), jnp.float32) * 0.05
    w2 = jax.random.normal(k[2], (3, 3, 32, 64), jnp.float32) * 0.05
    b2 = jax.random.normal(k[3], (64,), jnp.float32) * 0.05
    spatial = 8
    fc_in = 64 * spatial * spatial
    w_fc_chw = jax.random.normal(k[4], (fc_in, num_classes), jnp.float32) * 0.02
    b_fc = jax.random.normal(k[5], (num_classes,), jnp.float32) * 0.02

    def bn_fold(conv_bias, c, gamma=None, beta=None, mean=None, var=None):
        # Inference-mode BatchNorm folded into a per-channel scale/shift.  Defaults
        # are the nn.BatchNorm2d init values; pass real running stats for a checkpoint.
        gamma = jnp.ones((c,), jnp.float32) if gamma is None else gamma
        beta = jnp.zeros((c,), jnp.float32) if beta is None else beta
        mean = jnp.zeros((c,), jnp.float32) if mean is None else mean
        var = jnp.ones((c,), jnp.float32) if var is None else var
        scale = gamma / jnp.sqrt(var + BN_EPS)
        shift = beta + (conv_bias - mean) * scale
        return scale.reshape(1, c), shift.reshape(1, c)

    scale1, shift1 = bn_fold(b1, 32)
    scale2, shift2 = bn_fold(b2, 64)

    # One-time host-side weight prep (free at forward time):
    #  * conv taps flattened to the kernel's im2col K order: rows = (dj, di, cin)
    w1c = jnp.transpose(w1, (1, 0, 2, 3)).reshape(9 * input_channels, 32)
    w2c = jnp.transpose(w2, (1, 0, 2, 3)).reshape(3, 3 * 32, 64)
    #  * FC rows permuted (C,H,W)-flat -> (H,W,C)-flat, out-lane dim padded to 128
    w_fc_hwc = (
        w_fc_chw.reshape(64, spatial, spatial, num_classes)
        .transpose(1, 2, 0, 3)
        .reshape(fc_in, num_classes)
    )
    n_pad = 128
    w_fc_pad = jnp.zeros((fc_in, n_pad), jnp.float32).at[:, :num_classes].set(w_fc_hwc)
    b_fc_pad = jnp.zeros((1, n_pad), jnp.float32).at[0, :num_classes].set(b_fc)

    return dict(
        w1=w1c.astype(jnp.bfloat16), scale1=scale1, shift1=shift1,
        w2=w2c.astype(jnp.bfloat16), scale2=scale2, shift2=shift2,
        w_fc=w_fc_pad.astype(jnp.bfloat16), b_fc=b_fc_pad,
    )


if __name__ == "__main__":
    key = jax.random.PRNGKey(0)
    kp, kx = jax.random.split(key)
    params = init_params(kp, input_channels=3, num_classes=10)
    # CIFAR-like NCHW input (the Linear layer requires 32x32 spatial for C=3).
    x = jax.random.normal(kx, (2, 3, 32, 32), jnp.float32)

    fwd = jax.jit(cnn_enhanced_forward, static_argnames=("num_classes",))
    out = fwd(x, params, num_classes=10)
    out = jax.block_until_ready(out)
    assert out.shape == (2, 10) and out.dtype == jnp.float32
    print("KERNEL_OK")
</pallas_src>

<mosaic_0001>
module attributes {stable_mosaic.version = 11 : i64} {
  func.func @_linear_kernel(%arg0: i32, %arg1: memref<2x4096xbf16, #tpu.memory_space<vmem>>, %arg2: memref<4096x128xbf16, #tpu.memory_space<vmem>>, %arg3: memref<1x128xf32, #tpu.memory_space<vmem>>, %arg4: memref<2x128xf32, #tpu.memory_space<vmem>>) attributes {dimension_semantics = [#tpu.dimension_semantics<arbitrary>], iteration_bounds = array<i64: 1>, scalar_prefetch = 0 : i64, scratch_operands = 0 : i64, tpu.core_type = #tpu.core_type<tc>, window_params = [{pipeline_mode = #tpu.pipeline_mode<synchronous>, transform_indices = @transform_0, window_bounds = array<i64: 2, 4096>}, {pipeline_mode = #tpu.pipeline_mode<synchronous>, transform_indices = @transform_1, window_bounds = array<i64: 4096, 128>}, {pipeline_mode = #tpu.pipeline_mode<synchronous>, transform_indices = @transform_2, window_bounds = array<i64: 1, 128>}, {pipeline_mode = #tpu.pipeline_mode<synchronous>, transform_indices = @transform_3, window_bounds = array<i64: 2, 128>}]} {
    %c0 = arith.constant 0 : index
    %c0_0 = arith.constant 0 : index
    %0 = vector.load %arg1[%c0, %c0_0] : memref<2x4096xbf16, #tpu.memory_space<vmem>>, vector<2x4096xbf16>
    %c0_1 = arith.constant 0 : index
    %c0_2 = arith.constant 0 : index
    %1 = vector.load %arg2[%c0_1, %c0_2] : memref<4096x128xbf16, #tpu.memory_space<vmem>>, vector<4096x128xbf16>
    %cst = arith.constant dense<0.000000e+00> : vector<2x128xf32>
    %2 = tpu.matmul %0, %1, %cst {dimension_numbers = #tpu.dot_dimension_numbers<[1], [0], [0], [1], [0, 0, 1, 1], [], []>} : vector<2x4096xbf16>, vector<4096x128xbf16>, vector<2x128xf32> -> vector<2x128xf32>
    %c0_3 = arith.constant 0 : index
    %c0_4 = arith.constant 0 : index
    %3 = vector.load %arg3[%c0_3, %c0_4] : memref<1x128xf32, #tpu.memory_space<vmem>>, vector<1x128xf32>
    %4 = vector.broadcast %3 : vector<1x128xf32> to vector<2x128xf32>
    %5 = arith.addf %2, %4 : vector<2x128xf32>
    %c0_5 = arith.constant 0 : index
    %c0_6 = arith.constant 0 : index
    %6 = vector.load %arg4[%c0_5, %c0_6] : memref<2x128xf32, #tpu.memory_space<vmem>>, vector<2x128xf32>
    tpu.vector_store %arg4[%c0_5, %c0_6], %5 {strides = array<i32>} : memref<2x128xf32, #tpu.memory_space<vmem>>, vector<2x128xf32>,
    return
  }
  func.func @transform_0(%arg0: i32) -> (i32, i32) {
    %c0_i32 = arith.constant 0 : i32
    %c0_i32_0 = arith.constant 0 : i32
    %c0_i32_1 = arith.constant 0 : i32
    return %c0_i32, %c0_i32_0 : i32, i32
  }
  func.func @transform_1(%arg0: i32) -> (i32, i32) {
    %c0_i32 = arith.constant 0 : i32
    %c0_i32_0 = arith.constant 0 : i32
    %c0_i32_1 = arith.constant 0 : i32
    return %c0_i32, %c0_i32_0 : i32, i32
  }
  func.func @transform_2(%arg0: i32) -> (i32, i32) {
    %c0_i32 = arith.constant 0 : i32
    %c0_i32_0 = arith.constant 0 : i32
    %c0_i32_1 = arith.constant 0 : i32
    return %c0_i32, %c0_i32_0 : i32, i32
  }
  func.func @transform_3(%arg0: i32) -> (i32, i32) {
    %c0_i32 = arith.constant 0 : i32
    %c0_i32_0 = arith.constant 0 : i32
    %c0_i32_1 = arith.constant 0 : i32
    return %c0_i32, %c0_i32_0 : i32, i32
  }
}

module attributes {stable_mosaic.version = 11 : i64} {
  func.func @_fused_conv_kernel(%arg0: i32, %arg1: memref<2x32x8x27xbf16, #tpu.memory_space<vmem>>, %arg2: memref<2x32x8x27xbf16, #tpu.memory_space<vmem>>, %arg3: memref<2x32x8x27xbf16, #tpu.memory_space<vmem>>, %arg4: memref<2x32x8x27xbf16, #tpu.memory_space<vmem>>, %arg5: memref<27x32xbf16, #tpu.memory_space<vmem>>, %arg6: memref<1x32xf32, #tpu.memory_space<vmem>>, %arg7: memref<1x32xf32, #tpu.memory_space<vmem>>, %arg8: memref<3x96x64xbf16, #tpu.memory_space<vmem>>, %arg9: memref<1x64xf32, #tpu.memory_space<vmem>>, %arg10: memref<1x64xf32, #tpu.memory_space<vmem>>, %arg11: memref<2x8x8x64xbf16, #tpu.memory_space<vmem>>) attributes {dimension_semantics = [#tpu.dimension_semantics<parallel>], iteration_bounds = array<i64: 1>, scalar_prefetch = 0 : i64, scratch_operands = 0 : i64, tpu.core_type = #tpu.core_type<tc>, window_params = [{transform_indices = @transform_0, window_bounds = array<i64: 2, 32, 8, 27>}, {transform_indices = @transform_1, window_bounds = array<i64: 2, 32, 8, 27>}, {transform_indices = @transform_2, window_bounds = array<i64: 2, 32, 8, 27>}, {transform_indices = @transform_3, window_bounds = array<i64: 2, 32, 8, 27>}, {pipeline_mode = #tpu.pipeline_mode<synchronous>, transform_indices = @transform_4, window_bounds = array<i64: 27, 32>}, {pipeline_mode = #tpu.pipeline_mode<synchronous>, transform_indices = @transform_5, window_bounds = array<i64: 1, 32>}, {pipeline_mode = #tpu.pipeline_mode<synchronous>, transform_indices = @transform_6, window_bounds = array<i64: 1, 32>}, {pipeline_mode = #tpu.pipeline_mode<synchronous>, transform_indices = @transform_7, window_bounds = array<i64: 3, 96, 64>}, {pipeline_mode = #tpu.pipeline_mode<synchronous>, transform_indices = @transform_8, window_bounds = array<i64: 1, 64>}, {pipeline_mode = #tpu.pipeline_mode<synchronous>, transform_indices = @transform_9, window_bounds = array<i64: 1, 64>}, {transform_indices = @transform_10, window_bounds = array<i64: 2, 8, 8, 64>}]} {
    %c0 = arith.constant 0 : index
    %c0_0 = arith.constant 0 : index
    %c0_1 = arith.constant 0 : index
    %c0_2 = arith.constant 0 : index
    %0 = vector.load %arg1[%c0, %c0_0, %c0_1, %c0_2] : memref<2x32x8x27xbf16, #tpu.memory_space<vmem>>, vector<2x32x8x27xbf16>
    %1 = vector.shape_cast %0 : vector<2x32x8x27xbf16> to vector<512x27xbf16>
    %c0_3 = arith.constant 0 : index
    %c0_4 = arith.constant 0 : index
    %c0_5 = arith.constant 0 : index
    %c0_6 = arith.constant 0 : index
    %2 = vector.load %arg2[%c0_3, %c0_4, %c0_5, %c0_6] : memref<2x32x8x27xbf16, #tpu.memory_space<vmem>>, vector<2x32x8x27xbf16>
    %3 = vector.shape_cast %2 : vector<2x32x8x27xbf16> to vector<512x27xbf16>
    %c0_7 = arith.constant 0 : index
    %c0_8 = arith.constant 0 : index
    %c0_9 = arith.constant 0 : index
    %c0_10 = arith.constant 0 : index
    %4 = vector.load %arg3[%c0_7, %c0_8, %c0_9, %c0_10] : memref<2x32x8x27xbf16, #tpu.memory_space<vmem>>, vector<2x32x8x27xbf16>
    %5 = vector.shape_cast %4 : vector<2x32x8x27xbf16> to vector<512x27xbf16>
    %c0_11 = arith.constant 0 : index
    %c0_12 = arith.constant 0 : index
    %c0_13 = arith.constant 0 : index
    %c0_14 = arith.constant 0 : index
    %6 = vector.load %arg4[%c0_11, %c0_12, %c0_13, %c0_14] : memref<2x32x8x27xbf16, #tpu.memory_space<vmem>>, vector<2x32x8x27xbf16>
    %7 = vector.shape_cast %6 : vector<2x32x8x27xbf16> to vector<512x27xbf16>
    %8 = tpu.concatenate %1, %3, %5, %7 in 0 : vector<512x27xbf16>, vector<512x27xbf16>, vector<512x27xbf16>, vector<512x27xbf16> -> vector<2048x27xbf16>
    %c0_15 = arith.constant 0 : index
    %c0_16 = arith.constant 0 : index
    %9 = vector.load %arg5[%c0_15, %c0_16] : memref<27x32xbf16, #tpu.memory_space<vmem>>, vector<27x32xbf16>
    %cst = arith.constant dense<0.000000e+00> : vector<2048x32xf32>
    %10 = tpu.matmul %8, %9, %cst {dimension_numbers = #tpu.dot_dimension_numbers<[1], [0], [0], [1], [0, 0, 1, 1], [], []>} : vector<2048x27xbf16>, vector<27x32xbf16>, vector<2048x32xf32> -> vector<2048x32xf32>
    %c0_17 = arith.constant 0 : index
    %c0_18 = arith.constant 0 : index
    %11 = vector.load %arg6[%c0_17, %c0_18] : memref<1x32xf32, #tpu.memory_space<vmem>>, vector<1x32xf32>
    %12 = vector.broadcast %11 : vector<1x32xf32> to vector<2048x32xf32>
    %13 = arith.mulf %10, %12 : vector<2048x32xf32>
    %c0_19 = arith.constant 0 : index
    %c0_20 = arith.constant 0 : index
    %14 = vector.load %arg7[%c0_19, %c0_20] : memref<1x32xf32, #tpu.memory_space<vmem>>, vector<1x32xf32>
    %15 = vector.broadcast %14 : vector<1x32xf32> to vector<2048x32xf32>
    %16 = arith.addf %13, %15 : vector<2048x32xf32>
    %cst_21 = arith.constant 0.000000e+00 : f32
    %17 = vector.broadcast %cst_21 : f32 to vector<2048x32xf32>
    %18 = arith.maximumf %16, %17 : vector<2048x32xf32>
    %19 = vector.extract_strided_slice %18 {offsets = [0, 0], sizes = [512, 32], strides = [1, 1]} : vector<2048x32xf32> to vector<512x32xf32>
    %20 = vector.extract_strided_slice %18 {offsets = [512, 0], sizes = [512, 32], strides = [1, 1]} : vector<2048x32xf32> to vector<512x32xf32>
    %21 = arith.maximumf %19, %20 : vector<512x32xf32>
    %22 = vector.extract_strided_slice %18 {offsets = [1024, 0], sizes = [512, 32], strides = [1, 1]} : vector<2048x32xf32> to vector<512x32xf32>
    %23 = vector.extract_strided_slice %18 {offsets = [1536, 0], sizes = [512, 32], strides = [1, 1]} : vector<2048x32xf32> to vector<512x32xf32>
    %24 = arith.maximumf %22, %23 : vector<512x32xf32>
    %25 = vector.shape_cast %21 : vector<512x32xf32> to vector<32x2x8x32xf32>
    %26 = vector.shape_cast %24 : vector<512x32xf32> to vector<32x2x8x32xf32>
    %27 = vector.extract_strided_slice %25 {offsets = [0, 0, 0, 0], sizes = [32, 1, 8, 32], strides = [1, 1, 1, 1]} : vector<32x2x8x32xf32> to vector<32x1x8x32xf32>
    %28 = vector.shape_cast %27 : vector<32x1x8x32xf32> to vector<32x8x32xf32>
    %29 = vector.extract_strided_slice %25 {offsets = [0, 1, 0, 0], sizes = [32, 1, 8, 32], strides = [1, 1, 1, 1]} : vector<32x2x8x32xf32> to vector<32x1x8x32xf32>
    %30 = vector.shape_cast %29 : vector<32x1x8x32xf32> to vector<32x8x32xf32>
    %31 = arith.maximumf %28, %30 : vector<32x8x32xf32>
    %32 = vector.shape_cast %31 : vector<32x8x32xf32> to vector<2x16x8x32xf32>
    %33 = arith.truncf %32 : vector<2x16x8x32xf32> to vector<2x16x8x32xbf16>
    %34 = vector.extract_strided_slice %26 {offsets = [0, 0, 0, 0], sizes = [32, 1, 8, 32], strides = [1, 1, 1, 1]} : vector<32x2x8x32xf32> to vector<32x1x8x32xf32>
    %35 = vector.shape_cast %34 : vector<32x1x8x32xf32> to vector<32x8x32xf32>
    %36 = vector.extract_strided_slice %26 {offsets = [0, 1, 0, 0], sizes = [32, 1, 8, 32], strides = [1, 1, 1, 1]} : vector<32x2x8x32xf32> to vector<32x1x8x32xf32>
    %37 = vector.shape_cast %36 : vector<32x1x8x32xf32> to vector<32x8x32xf32>
    %38 = arith.maximumf %35, %37 : vector<32x8x32xf32>
    %39 = vector.shape_cast %38 : vector<32x8x32xf32> to vector<2x16x8x32xf32>
    %40 = arith.truncf %39 : vector<2x16x8x32xf32> to vector<2x16x8x32xbf16>
    %cst_22 = arith.constant 0.000000e+00 : bf16
    %41 = vector.broadcast %cst_22 : bf16 to vector<2x16x1x32xbf16>
    %cst_23 = arith.constant 0.000000e+00 : bf16
    %42 = vector.broadcast %cst_23 : bf16 to vector<2x1x9x32xbf16>
    %43 = tpu.concatenate %41, %40 in 2 : vector<2x16x1x32xbf16>, vector<2x16x8x32xbf16> -> vector<2x16x9x32xbf16>
    %44 = tpu.concatenate %42, %43, %42 in 1 : vector<2x1x9x32xbf16>, vector<2x16x9x32xbf16>, vector<2x1x9x32xbf16> -> vector<2x18x9x32xbf16>
    %45 = tpu.concatenate %33, %41 in 2 : vector<2x16x8x32xbf16>, vector<2x16x1x32xbf16> -> vector<2x16x9x32xbf16>
    %46 = tpu.concatenate %42, %45, %42 in 1 : vector<2x1x9x32xbf16>, vector<2x16x9x32xbf16>, vector<2x1x9x32xbf16> -> vector<2x18x9x32xbf16>
    %47 = vector.extract_strided_slice %44 {offsets = [0, 0, 0, 0], sizes = [2, 16, 9, 32], strides = [1, 1, 1, 1]} : vector<2x18x9x32xbf16> to vector<2x16x9x32xbf16>
    %48 = vector.extract_strided_slice %44 {offsets = [0, 1, 0, 0], sizes = [2, 16, 9, 32], strides = [1, 1, 1, 1]} : vector<2x18x9x32xbf16> to vector<2x16x9x32xbf16>
    %49 = vector.extract_strided_slice %44 {offsets = [0, 2, 0, 0], sizes = [2, 16, 9, 32], strides = [1, 1, 1, 1]} : vector<2x18x9x32xbf16> to vector<2x16x9x32xbf16>
    %50 = tpu.concatenate %47, %48, %49 in 3 : vector<2x16x9x32xbf16>, vector<2x16x9x32xbf16>, vector<2x16x9x32xbf16> -> vector<2x16x9x96xbf16>
    %51 = vector.extract_strided_slice %46 {offsets = [0, 0, 0, 0], sizes = [2, 16, 9, 32], strides = [1, 1, 1, 1]} : vector<2x18x9x32xbf16> to vector<2x16x9x32xbf16>
    %52 = vector.extract_strided_slice %46 {offsets = [0, 1, 0, 0], sizes = [2, 16, 9, 32], strides = [1, 1, 1, 1]} : vector<2x18x9x32xbf16> to vector<2x16x9x32xbf16>
    %53 = vector.extract_strided_slice %46 {offsets = [0, 2, 0, 0], sizes = [2, 16, 9, 32], strides = [1, 1, 1, 1]} : vector<2x18x9x32xbf16> to vector<2x16x9x32xbf16>
    %54 = tpu.concatenate %51, %52, %53 in 3 : vector<2x16x9x32xbf16>, vector<2x16x9x32xbf16>, vector<2x16x9x32xbf16> -> vector<2x16x9x96xbf16>
    %55 = vector.extract_strided_slice %50 {offsets = [0, 0, 0, 0], sizes = [2, 16, 8, 96], strides = [1, 1, 1, 1]} : vector<2x16x9x96xbf16> to vector<2x16x8x96xbf16>
    %56 = vector.shape_cast %55 : vector<2x16x8x96xbf16> to vector<256x96xbf16>
    %57 = vector.extract_strided_slice %50 {offsets = [0, 0, 1, 0], sizes = [2, 16, 8, 96], strides = [1, 1, 1, 1]} : vector<2x16x9x96xbf16> to vector<2x16x8x96xbf16>
    %58 = vector.shape_cast %57 : vector<2x16x8x96xbf16> to vector<256x96xbf16>
    %59 = vector.extract_strided_slice %54 {offsets = [0, 0, 0, 0], sizes = [2, 16, 8, 96], strides = [1, 1, 1, 1]} : vector<2x16x9x96xbf16> to vector<2x16x8x96xbf16>
    %60 = vector.shape_cast %59 : vector<2x16x8x96xbf16> to vector<256x96xbf16>
    %61 = vector.extract_strided_slice %54 {offsets = [0, 0, 1, 0], sizes = [2, 16, 8, 96], strides = [1, 1, 1, 1]} : vector<2x16x9x96xbf16> to vector<2x16x8x96xbf16>
    %62 = vector.shape_cast %61 : vector<2x16x8x96xbf16> to vector<256x96xbf16>
    %63 = tpu.concatenate %56, %60 in 0 : vector<256x96xbf16>, vector<256x96xbf16> -> vector<512x96xbf16>
    %64 = tpu.concatenate %60, %58 in 0 : vector<256x96xbf16>, vector<256x96xbf16> -> vector<512x96xbf16>
    %65 = tpu.concatenate %58, %62 in 0 : vector<256x96xbf16>, vector<256x96xbf16> -> vector<512x96xbf16>
    %c0_24 = arith.constant 0 : index
    %c0_25 = arith.constant 0 : index
    %c0_26 = arith.constant 0 : index
    %66 = vector.load %arg8[%c0_24, %c0_25, %c0_26] : memref<3x96x64xbf16, #tpu.memory_space<vmem>>, vector<1x96x64xbf16>
    %67 = vector.shape_cast %66 : vector<1x96x64xbf16> to vector<96x64xbf16>
    %cst_27 = arith.constant dense<0.000000e+00> : vector<512x64xf32>
    %68 = tpu.matmul %63, %67, %cst_27 {dimension_numbers = #tpu.dot_dimension_numbers<[1], [0], [0], [1], [0, 0, 1, 1], [], []>} : vector<512x96xbf16>, vector<96x64xbf16>, vector<512x64xf32> -> vector<512x64xf32>
    %c1 = arith.constant 1 : index
    %c0_28 = arith.constant 0 : index
    %c0_29 = arith.constant 0 : index
    %69 = vector.load %arg8[%c1, %c0_28, %c0_29] : memref<3x96x64xbf16, #tpu.memory_space<vmem>>, vector<1x96x64xbf16>
    %70 = vector.shape_cast %69 : vector<1x96x64xbf16> to vector<96x64xbf16>
    %cst_30 = arith.constant dense<0.000000e+00> : vector<512x64xf32>
    %71 = tpu.matmul %64, %70, %cst_30 {dimension_numbers = #tpu.dot_dimension_numbers<[1], [0], [0], [1], [0, 0, 1, 1], [], []>} : vector<512x96xbf16>, vector<96x64xbf16>, vector<512x64xf32> -> vector<512x64xf32>
    %72 = arith.addf %68, %71 : vector<512x64xf32>
    %c2 = arith.constant 2 : index
    %c0_31 = arith.constant 0 : index
    %c0_32 = arith.constant 0 : index
    %73 = vector.load %arg8[%c2, %c0_31, %c0_32] : memref<3x96x64xbf16, #tpu.memory_space<vmem>>, vector<1x96x64xbf16>
    %74 = vector.shape_cast %73 : vector<1x96x64xbf16> to vector<96x64xbf16>
    %cst_33 = arith.constant dense<0.000000e+00> : vector<512x64xf32>
    %75 = tpu.matmul %65, %74, %cst_33 {dimension_numbers = #tpu.dot_dimension_numbers<[1], [0], [0], [1], [0, 0, 1, 1], [], []>} : vector<512x96xbf16>, vector<96x64xbf16>, vector<512x64xf32> -> vector<512x64xf32>
    %76 = arith.addf %72, %75 : vector<512x64xf32>
    %c0_34 = arith.constant 0 : index
    %c0_35 = arith.constant 0 : index
    %77 = vector.load %arg9[%c0_34, %c0_35] : memref<1x64xf32, #tpu.memory_space<vmem>>, vector<1x64xf32>
    %78 = vector.broadcast %77 : vector<1x64xf32> to vector<512x64xf32>
    %79 = arith.mulf %76, %78 : vector<512x64xf32>
    %c0_36 = arith.constant 0 : index
    %c0_37 = arith.constant 0 : index
    %80 = vector.load %arg10[%c0_36, %c0_37] : memref<1x64xf32, #tpu.memory_space<vmem>>, vector<1x64xf32>
    %81 = vector.broadcast %80 : vector<1x64xf32> to vector<512x64xf32>
    %82 = arith.addf %79, %81 : vector<512x64xf32>
    %cst_38 = arith.constant 0.000000e+00 : f32
    %83 = vector.broadcast %cst_38 : f32 to vector<512x64xf32>
    %84 = arith.maximumf %82, %83 : vector<512x64xf32>
    %85 = vector.extract_strided_slice %84 {offsets = [0, 0], sizes = [256, 64], strides = [1, 1]} : vector<512x64xf32> to vector<256x64xf32>
    %86 = vector.extract_strided_slice %84 {offsets = [256, 0], sizes = [256, 64], strides = [1, 1]} : vector<512x64xf32> to vector<256x64xf32>
    %87 = arith.maximumf %85, %86 : vector<256x64xf32>
    %88 = vector.shape_cast %87 : vector<256x64xf32> to vector<16x2x8x64xf32>
    %89 = vector.extract_strided_slice %88 {offsets = [0, 0, 0, 0], sizes = [16, 1, 8, 64], strides = [1, 1, 1, 1]} : vector<16x2x8x64xf32> to vector<16x1x8x64xf32>
    %90 = vector.shape_cast %89 : vector<16x1x8x64xf32> to vector<16x8x64xf32>
    %91 = vector.extract_strided_slice %88 {offsets = [0, 1, 0, 0], sizes = [16, 1, 8, 64], strides = [1, 1, 1, 1]} : vector<16x2x8x64xf32> to vector<16x1x8x64xf32>
    %92 = vector.shape_cast %91 : vector<16x1x8x64xf32> to vector<16x8x64xf32>
    %93 = arith.maximumf %90, %92 : vector<16x8x64xf32>
    %94 = vector.shape_cast %93 : vector<16x8x64xf32> to vector<2x8x8x64xf32>
    %95 = arith.truncf %94 : vector<2x8x8x64xf32> to vector<2x8x8x64xbf16>
    %c0_39 = arith.constant 0 : index
    %c0_40 = arith.constant 0 : index
    %c0_41 = arith.constant 0 : index
    %c0_42 = arith.constant 0 : index
    %96 = vector.load %arg11[%c0_39, %c0_40, %c0_41, %c0_42] : memref<2x8x8x64xbf16, #tpu.memory_space<vmem>>, vector<2x8x8x64xbf16>
    tpu.vector_store %arg11[%c0_39, %c0_40, %c0_41, %c0_42], %95 {strides = array<i32>} : memref<2x8x8x64xbf16, #tpu.memory_space<vmem>>, vector<2x8x8x64xbf16>,
    return
  }
  func.func @transform_0(%arg0: i32) -> (i32, i32, i32, i32) {
    %c0_i32 = arith.constant 0 : i32
    %c0_i32_0 = arith.constant 0 : i32
    %c0_i32_1 = arith.constant 0 : i32
    %c0_i32_2 = arith.constant 0 : i32
    return %arg0, %c0_i32, %c0_i32_0, %c0_i32_1 : i32, i32, i32, i32
  }
  func.func @transform_1(%arg0: i32) -> (i32, i32, i32, i32) {
    %c0_i32 = arith.constant 0 : i32
    %c0_i32_0 = arith.constant 0 : i32
    %c0_i32_1 = arith.constant 0 : i32
    %c0_i32_2 = arith.constant 0 : i32
    return %arg0, %c0_i32, %c0_i32_0, %c0_i32_1 : i32, i32, i32, i32
  }
  func.func @transform_2(%arg0: i32) -> (i32, i32, i32, i32) {
    %c0_i32 = arith.constant 0 : i32
    %c0_i32_0 = arith.constant 0 : i32
    %c0_i32_1 = arith.constant 0 : i32
    %c0_i32_2 = arith.constant 0 : i32
    return %arg0, %c0_i32, %c0_i32_0, %c0_i32_1 : i32, i32, i32, i32
  }
  func.func @transform_3(%arg0: i32) -> (i32, i32, i32, i32) {
    %c0_i32 = arith.constant 0 : i32
    %c0_i32_0 = arith.constant 0 : i32
    %c0_i32_1 = arith.constant 0 : i32
    %c0_i32_2 = arith.constant 0 : i32
    return %arg0, %c0_i32, %c0_i32_0, %c0_i32_1 : i32, i32, i32, i32
  }
  func.func @transform_4(%arg0: i32) -> (i32, i32) {
    %c0_i32 = arith.constant 0 : i32
    %c0_i32_0 = arith.constant 0 : i32
    %c0_i32_1 = arith.constant 0 : i32
    return %c0_i32, %c0_i32_0 : i32, i32
  }
  func.func @transform_5(%arg0: i32) -> (i32, i32) {
    %c0_i32 = arith.constant 0 : i32
    %c0_i32_0 = arith.constant 0 : i32
    %c0_i32_1 = arith.constant 0 : i32
    return %c0_i32, %c0_i32_0 : i32, i32
  }
  func.func @transform_6(%arg0: i32) -> (i32, i32) {
    %c0_i32 = arith.constant 0 : i32
    %c0_i32_0 = arith.constant 0 : i32
    %c0_i32_1 = arith.constant 0 : i32
    return %c0_i32, %c0_i32_0 : i32, i32
  }
  func.func @transform_7(%arg0: i32) -> (i32, i32, i32) {
    %c0_i32 = arith.constant 0 : i32
    %c0_i32_0 = arith.constant 0 : i32
    %c0_i32_1 = arith.constant 0 : i32
    %c0_i32_2 = arith.constant 0 : i32
    return %c0_i32, %c0_i32_0, %c0_i32_1 : i32, i32, i32
  }
  func.func @transform_8(%arg0: i32) -> (i32, i32) {
    %c0_i32 = arith.constant 0 : i32
    %c0_i32_0 = arith.constant 0 : i32
    %c0_i32_1 = arith.constant 0 : i32
    return %c0_i32, %c0_i32_0 : i32, i32
  }
  func.func @transform_9(%arg0: i32) -> (i32, i32) {
    %c0_i32 = arith.constant 0 : i32
    %c0_i32_0 = arith.constant 0 : i32
    %c0_i32_1 = arith.constant 0 : i32
    return %c0_i32, %c0_i32_0 : i32, i32
  }
  func.func @transform_10(%arg0: i32) -> (i32, i32, i32, i32) {
    %c0_i32 = arith.constant 0 : i32
    %c0_i32_0 = arith.constant 0 : i32
    %c0_i32_1 = arith.constant 0 : i32
    %c0_i32_2 = arith.constant 0 : i32
    return %arg0, %c0_i32, %c0_i32_0, %c0_i32_1 : i32, i32, i32, i32
  }
}

</mosaic_0001>

<bundles_post_ra>
// kernel: cnn_enhanced_forward.3
= control target key start
LH: loop header
LB: loop body
LE: loop exit
PB: predicated region body
PF: predicated region fallthrough
CT: control target
= control target key end

     0   :  { %v547_v28 = vlaneseq  ;;  %v3857_v36 = vmov 1966171168   ;;  %s4720_s0 = inlined_call_operand.vmem [shape: bf16[2,4096], index: 0, kind: input, shape index: {}]   ;;  %s4721_s1 = inlined_call_operand.vmem [shape: bf16[4096,128], index: 1, kind: input, shape index: {}]   ;;  %s4722_s2 = inlined_call_operand.vmem [shape: f32[1,128], index: 2, kind: input, shape index: {}]   ;;  %s4723_s3 = inlined_call_operand.hbm [shape: f32[2,128], index: 3, kind: output, shape index: {}]  }
   0x1   :  { %v3573_v0 = vld [vmem:[%s4721_s1 + $0x40] sm:$0xff]   ;;  %v3577_v4 = vld [vmem:[%s4721_s1 + $0x48] sm:$0xff]   ;;  %v3581_v8 = vld [vmem:[%s4721_s1 + $0x50] sm:$0xff]   ;;  %v545_v37 = vunpack.c.l.s4 %v3857_v36 }
   0x2   :  { %v3574_v1 = vld [vmem:[%s4721_s1 + $0xc0] sm:$0xff]   ;;  %3219 = vmatprep.subr.bf16.mxu0 %v3573_v0  ;;  %v3578_v5 = vld [vmem:[%s4721_s1 + $0xc8] sm:$0xff]   ;;  %v3582_v9 = vld [vmem:[%s4721_s1 + $0xd0] sm:$0xff]   ;;  %v548_v33 = vshrl.u32 %v547_v28, 7 }
   0x3   :  { %v3575_v2 = vld [vmem:[%s4721_s1] sm:$0xff]   ;;  %3241 = vmatprep.subr.bf16.mxu1 %v3574_v1  ;;  %v3579_v6 = vld [vmem:[%s4721_s1 + $0x8] sm:$0xff]   ;;  %v3583_v10 = vld [vmem:[%s4721_s1 + $0x10] sm:$0xff]   ;;  %v546_v40 = vunpack.c.0.s8 %v545_v37 }
   0x4   :  { %v3576_v3 = vld [vmem:[%s4721_s1 + $0x80] sm:$0xff]   ;;  %3220 = vmatpush3.bf16.msra.mxu0 %v3575_v2  ;;  %v3580_v7 = vld [vmem:[%s4721_s1 + $0x88] sm:$0xff]   ;;  %v3584_v11 = vld [vmem:[%s4721_s1 + $0x90] sm:$0xff]  }
   0x5   :  { %3242 = vmatpush3.bf16.msra.mxu1 %v3576_v3  ;;  %3221 = vmatprep.subr.bf16.mxu0 %v3577_v4  ;;  %v3585_v12 = vld [vmem:[%s4721_s1 + $0x58] sm:$0xff]   ;;  %v3589_v16 = vld [vmem:[%s4721_s1 + $0x60] sm:$0xff]   ;;  %v3593_v20 = vld [vmem:[%s4721_s1 + $0x68] sm:$0xff]   ;;  %v3984_v41 = vsub.s32 %v546_v40, %v548_v33 }
   0x6   :  { %3243 = vmatprep.subr.bf16.mxu1 %v3578_v5  ;;  %v3586_v13 = vld [vmem:[%s4721_s1 + $0xd8] sm:$0xff]   ;;  %v3590_v17 = vld [vmem:[%s4721_s1 + $0xe0] sm:$0xff]   ;;  %v3594_v21 = vld [vmem:[%s4721_s1 + $0xe8] sm:$0xff]  }
   0x7   :  { %v3587_v14 = vld [vmem:[%s4721_s1 + $0x18] sm:$0xff]   ;;  %v3591_v18 = vld [vmem:[%s4721_s1 + $0x20] sm:$0xff]   ;;  %v3595_v22 = vld [vmem:[%s4721_s1 + $0x28] sm:$0xff]  }
   0x8   :  { %3222 = vmatpush3.bf16.msra.mxu0 %v3579_v6  ;;  %v3588_v15 = vld [vmem:[%s4721_s1 + $0x98] sm:$0xff]   ;;  %v3592_v19 = vld [vmem:[%s4721_s1 + $0xa0] sm:$0xff]   ;;  %v3596_v23 = vld [vmem:[%s4721_s1 + $0xa8] sm:$0xff]  }
   0x9   :  { %3244 = vmatpush3.bf16.msra.mxu1 %v3580_v7  ;;  %3223 = vmatprep.subr.bf16.mxu0 %v3581_v8  ;;  %v3597_v24 = vld [vmem:[%s4721_s1 + $0x70] sm:$0xff]   ;;  %v3601_v29 = vld [vmem:[%s4721_s1 + $0x78] sm:$0xff]   ;;  %v16_v34 = vld [vmem:[%s4720_s0] sm:$0xff] }
   0xa   :  { %3245 = vmatprep.subr.bf16.mxu1 %v3582_v9  ;;  %v3598_v25 = vld [vmem:[%s4721_s1 + $0xf0] sm:$0xff]   ;;  %v3602_v30 = vld [vmem:[%s4721_s1 + $0xf8] sm:$0xff]   ;;  %v3606_v35 = vld [vmem:[%s4721_s1 + $0x140] sm:$0xff]   ;;  %v543_v39 = vcombine.high %v16_v34, %v16_v34  ;;  %v550_v42 = vrot.slane %v16_v34, %v3984_v41 }
   0xb   :  { %v3599_v26 = vld [vmem:[%s4721_s1 + $0x30] sm:$0xff]   ;;  %v3603_v31 = vld [vmem:[%s4721_s1 + $0x38] sm:$0xff]   ;;  %v3607_v38 = vld [vmem:[%s4721_s1 + $0x1c0] sm:$0xff]  }
   0xc   :  { %3224 = vmatpush3.bf16.msra.mxu0 %v3583_v10  ;;  %v3600_v27 = vld [vmem:[%s4721_s1 + $0xb0] sm:$0xff]   ;;  %v3604_v32 = vld [vmem:[%s4721_s1 + $0xb8] sm:$0xff]   ;;  %v3988_v43 = vrot.slane %v543_v39, %v3984_v41  ;;  %v558_v44 = vcombine.high %v550_v42, %v550_v42  ;;  %v566_v45 = vrot.slane %v550_v42, %v3984_v41  ;;  %v3608_v47 = vld [vmem:[%s4721_s1 + $0x100] sm:$0xff]  }
   0xd   :  { %3246 = vmatpush3.bf16.msra.mxu1 %v3584_v11  ;;  %3225 = vmatprep.subr.bf16.mxu0 %v3585_v12  ;;  %v3609_v49 = vld [vmem:[%s4721_s1 + $0x180] sm:$0xff]   ;;  %v3610_v52 = vld [vmem:[%s4721_s1 + $0x148] sm:$0xff]   ;;  %v3614_v58 = vld [vmem:[%s4721_s1 + $0x150] sm:$0xff]  }
   0xe   :  { %3247 = vmatprep.subr.bf16.mxu1 %v3586_v13  ;;  %v559_v46 = vcombine.high %v3988_v43, %v3988_v43  ;;  %v580_v48 = vrot.slane %v558_v44, %v3984_v41  ;;  %v588_v51 = vcombine.high %v566_v45, %v566_v45  ;;  %v3611_v54 = vld [vmem:[%s4721_s1 + $0x1c8] sm:$0xff]   ;;  %v3615_v59 = vld [vmem:[%s4721_s1 + $0x1d0] sm:$0xff]   ;;  %v3618_v62 = vld [vmem:[%s4721_s1 + $0x158] sm:$0xff]  }
   0xf   :  { %v3612_v55 = vld [vmem:[%s4721_s1 + $0x108] sm:$0xff]   ;;  %v3616_v60 = vld [vmem:[%s4721_s1 + $0x110] sm:$0xff]   ;;  %v3619_v63 = vld [vmem:[%s4721_s1 + $0x1d8] sm:$0xff]  }
  0x10   :  { %3226 = vmatpush3.bf16.msra.mxu0 %v3587_v14  ;;  %v587_v50 = vrot.slane %v559_v46, %v3984_v41  ;;  %2339 = vmatprep.mubr.bf16.mxu0 %v580_v48  ;;  %v590_v53 = vcombine.high %v580_v48, %v580_v48  ;;  %v3613_v57 = vld [vmem:[%s4721_s1 + $0x188] sm:$0xff]   ;;  %v3617_v61 = vld [vmem:[%s4721_s1 + $0x190] sm:$0xff]   ;;  %v3620_v0 = vld [vmem:[%s4721_s1 + $0x118] sm:$0xff]  }
  0x11   :  { %3248 = vmatpush3.bf16.msra.mxu1 %v3588_v15  ;;  %3227 = vmatprep.subr.bf16.mxu0 %v3589_v16  ;;  %v3621_v1 = vld [vmem:[%s4721_s1 + $0x198] sm:$0xff]   ;;  %v3622_v2 = vld [vmem:[%s4721_s1 + $0x160] sm:$0xff]   ;;  %v3626_v6 = vld [vmem:[%s4721_s1 + $0x168] sm:$0xff]  }
  0x12   :  { %3249 = vmatprep.subr.bf16.mxu1 %v3590_v17  ;;  %v591_v56 = vcombine.high %v587_v50, %v587_v50  ;;  %2379 = vmatprep.mubr.bf16.mxu1 %v590_v53  ;;  %v3623_v3 = vld [vmem:[%s4721_s1 + $0x1e0] sm:$0xff]   ;;  %v3627_v7 = vld [vmem:[%s4721_s1 + $0x1e8] sm:$0xff]   ;;  %v3630_v10 = vld [vmem:[%s4721_s1 + $0x170] sm:$0xff]  }
  0x13   :  { %v3624_v4 = vld [vmem:[%s4721_s1 + $0x120] sm:$0xff]   ;;  %v3628_v8 = vld [vmem:[%s4721_s1 + $0x128] sm:$0xff]   ;;  %v3631_v11 = vld [vmem:[%s4721_s1 + $0x1f0] sm:$0xff]  }
  0x14   :  { %3228 = vmatpush3.bf16.msra.mxu0 %v3591_v18  ;;  %v3625_v5 = vld [vmem:[%s4721_s1 + $0x1a0] sm:$0xff]   ;;  %v3629_v9 = vld [vmem:[%s4721_s1 + $0x1a8] sm:$0xff]   ;;  %v3632_v12 = vld [vmem:[%s4721_s1 + $0x130] sm:$0xff]   ;;  %v573_v18 = vrot.slane %v3988_v43, %v3984_v41 }
  0x15   :  { %3250 = vmatpush3.bf16.msra.mxu1 %v3592_v19  ;;  %3229 = vmatprep.subr.bf16.mxu0 %v3593_v20  ;;  %v3633_v13 = vld [vmem:[%s4721_s1 + $0x1b0] sm:$0xff]   ;;  %v3634_v14 = vld [vmem:[%s4721_s1 + $0x178] sm:$0xff]   ;;  %v3638_v19 = vld [vmem:[%s4721_s1 + $0x240] sm:$0xff]  }
  0x16   :  { %3251 = vmatprep.subr.bf16.mxu1 %v3594_v21  ;;  %v3635_v15 = vld [vmem:[%s4721_s1 + $0x1f8] sm:$0xff]   ;;  %v3639_v20 = vld [vmem:[%s4721_s1 + $0x2c0] sm:$0xff]   ;;  %v3646_v28 = vld [vmem:[%s4721_s1 + $0x250] sm:$0xff]  }
  0x17   :  { %v3636_v16 = vld [vmem:[%s4721_s1 + $0x138] sm:$0xff]   ;;  %v3640_v21 = vld [vmem:[%s4721_s1 + $0x200] sm:$0xff]   ;;  %v3658_v40 = vld [vmem:[%s4721_s1 + $0x268] sm:$0xff]  }
  0x18   :  { %3230 = vmatpush3.bf16.msra.mxu0 %v3595_v22  ;;  %v3637_v17 = vld [vmem:[%s4721_s1 + $0x1b8] sm:$0xff]   ;;  %v3641_v22 = vld [vmem:[%s4721_s1 + $0x280] sm:$0xff]   ;;  %v3659_v42 = vld [vmem:[%s4721_s1 + $0x2e8] sm:$0xff]  }
  0x19   :  { %3252 = vmatpush3.bf16.msra.mxu1 %v3596_v23  ;;  %3231 = vmatprep.subr.bf16.mxu0 %v3597_v24  ;;  %v589_v23 = vcombine.high %v573_v18, %v573_v18  ;;  %v3642_v24 = vld [vmem:[%s4721_s1 + $0x248] sm:$0xff]   ;;  %v3651_v33 = vld [vmem:[%s4721_s1 + $0x2d8] sm:$0xff]   ;;  %v3654_v36 = vld [vmem:[%s4721_s1 + $0x260] sm:$0xff]  }
  0x1a   :  { %3253 = vmatprep.subr.bf16.mxu1 %v3598_v25  ;;  %v3643_v25 = vld [vmem:[%s4721_s1 + $0x2c8] sm:$0xff]   ;;  %v3652_v34 = vld [vmem:[%s4721_s1 + $0x218] sm:$0xff]   ;;  %v3655_v37 = vld [vmem:[%s4721_s1 + $0x2e0] sm:$0xff]  }
  0x1b   :  { %v3657_v39 = vld [vmem:[%s4721_s1 + $0x2a0] sm:$0xff]   ;;  %v3660_v43 = vld [vmem:[%s4721_s1 + $0x228] sm:$0xff]  }
  0x1c   :  { %3232 = vmatpush3.bf16.msra.mxu0 %v3599_v26  ;;  %v3644_v26 = vld [vmem:[%s4721_s1 + $0x208] sm:$0xff]  }
  0x1d   :  { %3254 = vmatpush3.bf16.msra.mxu1 %v3600_v27  ;;  %3233 = vmatprep.subr.bf16.mxu0 %v3601_v29  ;;  %v3645_v27 = vld [vmem:[%s4721_s1 + $0x288] sm:$0xff]   ;;  %v3647_v29 = vld [vmem:[%s4721_s1 + $0x2d0] sm:$0xff]  }
  0x1e   :  { %3255 = vmatprep.subr.bf16.mxu1 %v3602_v30  ;;  %v3648_v30 = vld [vmem:[%s4721_s1 + $0x210] sm:$0xff]   ;;  %v3661_v44 = vld [vmem:[%s4721_s1 + $0x2a8] sm:$0xff]  }
  0x1f   :  { %v17_v46 = vld [vmem:[%s4720_s0 + $0x8] sm:$0xff] }
  0x20   :  { %3234 = vmatpush3.bf16.msra.mxu0 %v3603_v31  ;;  %v3649_v31 = vld [vmem:[%s4721_s1 + $0x290] sm:$0xff]   ;;  %v599_v48 = vrot.slane %v17_v46, %v3984_v41 }
  0x21   :  { %3256 = vmatpush3.bf16.msra.mxu1 %v3604_v32  ;;  %3263 = vmatprep.subr.bf16.mxu0 %v3606_v35  ;;  %v3650_v32 = vld [vmem:[%s4721_s1 + $0x258] sm:$0xff]  }
  0x22   :  { %3285 = vmatprep.subr.bf16.mxu1 %v3607_v38  ;;  %v3653_v35 = vld [vmem:[%s4721_s1 + $0x298] sm:$0xff]   ;;  %v3656_v38 = vld [vmem:[%s4721_s1 + $0x220] sm:$0xff]  }
  0x23   :  { %2340 = vmatmul.mubr.bf16.vlgmr.msra.gmra.mrb[0].mxu0 %v566_v45  ;;  %v3662_v45 = vld [vmem:[%s4721_s1 + $0x270] sm:$0xff]  }
  0x24   :  { %3264 = vmatpush3.bf16.msra.mxu0 %v3608_v47  ;;  %2380 = vmatmul.mubr.bf16.vlgmr.msra.gmra.mrb[0].mxu1 %v588_v51  ;;  %v3663_v47 = vld [vmem:[%s4721_s1 + $0x2f0] sm:$0xff]  }
  0x25   :  { %3265 = vmatprep.subr.bf16.mxu0 %v3610_v52  ;;  %3286 = vmatpush3.bf16.msra.mxu1 %v3609_v49  ;;  %v592_v49 = vcombine.high %v17_v46, %v17_v46  ;;  %v3665_v51 = vld [vmem:[%s4721_s1 + $0x2b0] sm:$0xff]   ;;  %v607_v52 = vcombine.high %v599_v48, %v599_v48 }
  0x26   :  { %2419 = vmatprep.mubr.bf16.mxu0 %v587_v50  ;;  %3287 = vmatprep.subr.bf16.mxu1 %v3611_v54  ;;  %v3664_v50 = vld [vmem:[%s4721_s1 + $0x230] sm:$0xff]   ;;  %v3666_v54 = vld [vmem:[%s4721_s1 + $0x278] sm:$0xff]  }
  0x27   :  { %2459 = vmatprep.mubr.bf16.mxu1 %v591_v56  ;;  %v4176_v53 = vrot.slane %v592_v49, %v3984_v41  ;;  %v629_v56 = vrot.slane %v607_v52, %v3984_v41  ;;  %v3713_v46 = vld [vmem:[%s4721_s1 + $0x410] sm:$0xff]   ;;  %v3716_v49 = vld [vmem:[%s4721_s1 + $0x4d8] sm:$0xff]   ;;  %v3719_v52 = vld [vmem:[%s4721_s1 + $0x460] sm:$0xff]  }
  0x28   :  { %3266 = vmatpush3.bf16.msra.mxu0 %v3612_v55  ;;  %v3667_v55 = vld [vmem:[%s4721_s1 + $0x2f8] sm:$0xff]  }
  0x29   :  { %3267 = vmatprep.subr.bf16.mxu0 %v3614_v58  ;;  %3288 = vmatpush3.bf16.msra.mxu1 %v3613_v57  ;;  %v608_v57 = vcombine.high %v4176_v53, %v4176_v53  ;;  %v3668_v58 = vld [vmem:[%s4721_s1 + $0x238] sm:$0xff]  }
  0x2a   :  { %3289 = vmatprep.subr.bf16.mxu1 %v3615_v59  ;;  %v3669_v59 = vld [vmem:[%s4721_s1 + $0x2b8] sm:$0xff]  }
  0x2c   :  { %3268 = vmatpush3.bf16.msra.mxu0 %v3616_v60  ;;  %v639_v60 = vcombine.high %v629_v56, %v629_v56 }
  0x2d   :  { %3269 = vmatprep.subr.bf16.mxu0 %v3618_v62  ;;  %3290 = vmatpush3.bf16.msra.mxu1 %v3617_v61  ;;  %v615_v61 = vrot.slane %v599_v48, %v3984_v41  ;;  %v3670_v62 = vld [vmem:[%s4721_s1 + $0x340] sm:$0xff]   ;;  %v3715_v48 = vld [vmem:[%s4721_s1 + $0x458] sm:$0xff]  }
  0x2e   :  { %3291 = vmatprep.subr.bf16.mxu1 %v3619_v63  ;;  %v3671_v63 = vld [vmem:[%s4721_s1 + $0x3c0] sm:$0xff]  }
  0x30   :  { %3270 = vmatpush3.bf16.msra.mxu0 %v3620_v0  ;;  %v636_v0 = vrot.slane %v608_v57, %v3984_v41  ;;  %v3724_v57 = vld [vmem:[%s4721_s1 + $0x4e8] sm:$0xff]  }
  0x31   :  { %3271 = vmatprep.subr.bf16.mxu0 %v3622_v2  ;;  %3292 = vmatpush3.bf16.msra.mxu1 %v3621_v1  ;;  %v3672_v1 = vld [vmem:[%s4721_s1 + $0x300] sm:$0xff]  }
  0x32   :  { %3293 = vmatprep.subr.bf16.mxu1 %v3623_v3  ;;  %v3673_v2 = vld [vmem:[%s4721_s1 + $0x380] sm:$0xff]   ;;  %v637_v3 = vcombine.high %v615_v61, %v615_v61 }
  0x34   :  { %3272 = vmatpush3.bf16.msra.mxu0 %v3624_v4  ;;  %v3674_v4 = vld [vmem:[%s4721_s1 + $0x348] sm:$0xff]  }
  0x35   :  { %3273 = vmatprep.subr.bf16.mxu0 %v3626_v6  ;;  %3294 = vmatpush3.bf16.msra.mxu1 %v3625_v5  ;;  %v3675_v5 = vld [vmem:[%s4721_s1 + $0x3c8] sm:$0xff]   ;;  %v640_v6 = vcombine.high %v636_v0, %v636_v0 }
  0x36   :  { %3295 = vmatprep.subr.bf16.mxu1 %v3627_v7  ;;  %v3676_v7 = vld [vmem:[%s4721_s1 + $0x308] sm:$0xff]  }
  0x38   :  { %3274 = vmatpush3.bf16.msra.mxu0 %v3628_v8  ;;  %v3677_v8 = vld [vmem:[%s4721_s1 + $0x388] sm:$0xff]  }
  0x39   :  { %3275 = vmatprep.subr.bf16.mxu0 %v3630_v10  ;;  %3296 = vmatpush3.bf16.msra.mxu1 %v3629_v9  ;;  %v3678_v9 = vld [vmem:[%s4721_s1 + $0x350] sm:$0xff]  }
  0x3a   :  { %3297 = vmatprep.subr.bf16.mxu1 %v3631_v11  ;;  %v3679_v10 = vld [vmem:[%s4721_s1 + $0x3d0] sm:$0xff]  }
  0x3b   :  { %v3680_v11 = vld [vmem:[%s4721_s1 + $0x310] sm:$0xff]  }
  0x3c   :  { %3276 = vmatpush3.bf16.msra.mxu0 %v3632_v12  ;;  %v3681_v12 = vld [vmem:[%s4721_s1 + $0x390] sm:$0xff]  }
  0x3d   :  { %3277 = vmatprep.subr.bf16.mxu0 %v3634_v14  ;;  %3298 = vmatpush3.bf16.msra.mxu1 %v3633_v13  ;;  %v3682_v13 = vld [vmem:[%s4721_s1 + $0x358] sm:$0xff]  }
  0x3e   :  { %3299 = vmatprep.subr.bf16.mxu1 %v3635_v15  ;;  %v3683_v14 = vld [vmem:[%s4721_s1 + $0x3d8] sm:$0xff]  }
  0x3f   :  { %v3684_v15 = vld [vmem:[%s4721_s1 + $0x318] sm:$0xff]  }
  0x40   :  { %3278 = vmatpush3.bf16.msra.mxu0 %v3636_v16  ;;  %v3685_v16 = vld [vmem:[%s4721_s1 + $0x398] sm:$0xff]  }
  0x41   :  { %3307 = vmatprep.subr.bf16.mxu0 %v3638_v19  ;;  %3300 = vmatpush3.bf16.msra.mxu1 %v3637_v17  ;;  %v3686_v17 = vld [vmem:[%s4721_s1 + $0x360] sm:$0xff]  }
  0x42   :  { %3329 = vmatprep.subr.bf16.mxu1 %v3639_v20  ;;  %v3688_v19 = vld [vmem:[%s4721_s1 + $0x320] sm:$0xff]  }
  0x43   :  { %2420 = vmatmul.mubr.bf16.vlgmr.msra.gmra.mrb[4].mxu0 %v573_v18  ;;  %v3687_v18 = vld [vmem:[%s4721_s1 + $0x3e0] sm:$0xff]  }
  0x44   :  { %3308 = vmatpush3.bf16.msra.mxu0 %v3640_v21  ;;  %2460 = vmatmul.mubr.bf16.vlgmr.msra.gmra.mrb[4].mxu1 %v589_v23  ;;  %v3689_v20 = vld [vmem:[%s4721_s1 + $0x3a0] sm:$0xff]   ;;  %v3690_v21 = vld [vmem:[%s4721_s1 + $0x368] sm:$0xff]  }
  0x45   :  { %3309 = vmatprep.subr.bf16.mxu0 %v3642_v24  ;;  %3330 = vmatpush3.bf16.msra.mxu1 %v3641_v22  ;;  %v3691_v22 = vld [vmem:[%s4721_s1 + $0x3e8] sm:$0xff]  }
  0x46   :  { %3331 = vmatprep.subr.bf16.mxu1 %v3643_v25  ;;  %2499 = vmatprep.mubr.bf16.mxu0 %v629_v56  ;;  %v3692_v23 = vld [vmem:[%s4721_s1 + $0x328] sm:$0xff]   ;;  %v3694_v25 = vld [vmem:[%s4721_s1 + $0x370] sm:$0xff]  }
  0x47   :  { %2539 = vmatprep.mubr.bf16.mxu1 %v639_v60  ;;  %v3693_v24 = vld [vmem:[%s4721_s1 + $0x3a8] sm:$0xff]   ;;  %v3727_v60 = vld [vmem:[%s4721_s1 + $0x470] sm:$0xff]  }
  0x48   :  { %3310 = vmatpush3.bf16.msra.mxu0 %v3644_v26  ;;  %v3695_v26 = vld [vmem:[%s4721_s1 + $0x3f0] sm:$0xff]   ;;  %v3723_v56 = vld [vmem:[%s4721_s1 + $0x468] sm:$0xff]  }
  0x49   :  { %3311 = vmatprep.subr.bf16.mxu0 %v3646_v28  ;;  %3332 = vmatpush3.bf16.msra.mxu1 %v3645_v27  ;;  %v3696_v27 = vld [vmem:[%s4721_s1 + $0x330] sm:$0xff]  }
  0x4a   :  { %3333 = vmatprep.subr.bf16.mxu1 %v3647_v29  ;;  %v3697_v28 = vld [vmem:[%s4721_s1 + $0x3b0] sm:$0xff]   ;;  %v3698_v29 = vld [vmem:[%s4721_s1 + $0x378] sm:$0xff]  }
  0x4c   :  { %3312 = vmatpush3.bf16.msra.mxu0 %v3648_v30  ;;  %v3699_v30 = vld [vmem:[%s4721_s1 + $0x3f8] sm:$0xff]  }
  0x4d   :  { %3313 = vmatprep.subr.bf16.mxu0 %v3650_v32  ;;  %3334 = vmatpush3.bf16.msra.mxu1 %v3649_v31  ;;  %v3700_v31 = vld [vmem:[%s4721_s1 + $0x338] sm:$0xff]  }
  0x4e   :  { %3335 = vmatprep.subr.bf16.mxu1 %v3651_v33  ;;  %v3701_v32 = vld [vmem:[%s4721_s1 + $0x3b8] sm:$0xff]   ;;  %v622_v33 = vrot.slane %v4176_v53, %v3984_v41  ;;  %v3720_v53 = vld [vmem:[%s4721_s1 + $0x4e0] sm:$0xff]  }
  0x50   :  { %3314 = vmatpush3.bf16.msra.mxu0 %v3652_v34  ;;  %v3703_v34 = vld [vmem:[%s4721_s1 + $0x440] sm:$0xff]  }
  0x51   :  { %3315 = vmatprep.subr.bf16.mxu0 %v3654_v36  ;;  %3336 = vmatpush3.bf16.msra.mxu1 %v3653_v35  ;;  %v3704_v35 = vld [vmem:[%s4721_s1 + $0x4c0] sm:$0xff]  }
  0x52   :  { %3337 = vmatprep.subr.bf16.mxu1 %v3655_v37  ;;  %v3705_v36 = vld [vmem:[%s4721_s1 + $0x400] sm:$0xff]  }
  0x53   :  { %v3706_v37 = vld [vmem:[%s4721_s1 + $0x480] sm:$0xff]  }
  0x54   :  { %3316 = vmatpush3.bf16.msra.mxu0 %v3656_v38  ;;  %v638_v38 = vcombine.high %v622_v33, %v622_v33 }
  0x55   :  { %3317 = vmatprep.subr.bf16.mxu0 %v3658_v40  ;;  %3338 = vmatpush3.bf16.msra.mxu1 %v3657_v39  ;;  %v3707_v39 = vld [vmem:[%s4721_s1 + $0x448] sm:$0xff]  }
  0x56   :  { %3339 = vmatprep.subr.bf16.mxu1 %v3659_v42  ;;  %v3708_v40 = vld [vmem:[%s4721_s1 + $0x4c8] sm:$0xff]  }
  0x57   :  { %v3709_v42 = vld [vmem:[%s4721_s1 + $0x408] sm:$0xff]  }
  0x58   :  { %3318 = vmatpush3.bf16.msra.mxu0 %v3660_v43  ;;  %v3710_v43 = vld [vmem:[%s4721_s1 + $0x488] sm:$0xff]  }
  0x59   :  { %3319 = vmatprep.subr.bf16.mxu0 %v3662_v45  ;;  %3340 = vmatpush3.bf16.msra.mxu1 %v3661_v44  ;;  %v3711_v44 = vld [vmem:[%s4721_s1 + $0x450] sm:$0xff]  }
  0x5a   :  { %3341 = vmatprep.subr.bf16.mxu1 %v3663_v47  ;;  %v3712_v45 = vld [vmem:[%s4721_s1 + $0x4d0] sm:$0xff]  }
  0x5b   :  { %v3714_v47 = vld [vmem:[%s4721_s1 + $0x490] sm:$0xff]  }
  0x5c   :  { %3320 = vmatpush3.bf16.msra.mxu0 %v3664_v50  ;;  %v3717_v50 = vld [vmem:[%s4721_s1 + $0x418] sm:$0xff]  }
  0x5d   :  { %3321 = vmatprep.subr.bf16.mxu0 %v3666_v54  ;;  %3342 = vmatpush3.bf16.msra.mxu1 %v3665_v51  ;;  %v3718_v51 = vld [vmem:[%s4721_s1 + $0x498] sm:$0xff]   ;;  %v3721_v54 = vld [vmem:[%s4721_s1 + $0x420] sm:$0xff]  }
  0x5e   :  { %3343 = vmatprep.subr.bf16.mxu1 %v3667_v55  ;;  %v3722_v55 = vld [vmem:[%s4721_s1 + $0x4a0] sm:$0xff]  }
  0x60   :  { %3322 = vmatpush3.bf16.msra.mxu0 %v3668_v58  ;;  %v3725_v58 = vld [vmem:[%s4721_s1 + $0x428] sm:$0xff]  }
  0x61   :  { %3351 = vmatprep.subr.bf16.mxu0 %v3670_v62  ;;  %3344 = vmatpush3.bf16.msra.mxu1 %v3669_v59  ;;  %v3726_v59 = vld [vmem:[%s4721_s1 + $0x4a8] sm:$0xff]   ;;  %v3728_v62 = vld [vmem:[%s4721_s1 + $0x4f0] sm:$0xff]  }
  0x62   :  { %3373 = vmatprep.subr.bf16.mxu1 %v3671_v63 }
  0x63   :  { %2500 = vmatmul.mubr.bf16.vlgmr.msra.gmra.mrb[8].mxu0 %v615_v61  ;;  %v18_v61 = vld [vmem:[%s4720_s0 + $0x10] sm:$0xff] }
  0x64   :  { %3352 = vmatpush3.bf16.msra.mxu0 %v3672_v1  ;;  %2579 = vmatprep.mubr.bf16.mxu0 %v636_v0  ;;  %v648_v63 = vrot.slane %v18_v61, %v3984_v41  ;;  %v641_v0 = vcombine.high %v18_v61, %v18_v61  ;;  %v3729_v1 = vld [vmem:[%s4721_s1 + $0x430] sm:$0xff]  }
  0x65   :  { %2540 = vmatmul.mubr.bf16.vlgmr.msra.gmra.mrb[8].mxu1 %v637_v3  ;;  %3353 = vmatprep.subr.bf16.mxu0 %v3674_v4  ;;  %v3778_v61 = vld [vmem:[%s4721_s1 + $0x610] sm:$0xff]  }
  0x66   :  { %3374 = vmatpush3.bf16.msra.mxu1 %v3673_v2  ;;  %2619 = vmatprep.mubr.bf16.mxu1 %v640_v6  ;;  %v3730_v2 = vld [vmem:[%s4721_s1 + $0x4b0] sm:$0xff]   ;;  %v656_v3 = vcombine.high %v648_v63, %v648_v63  ;;  %v4382_v4 = vrot.slane %v641_v0, %v3984_v41  ;;  %v3732_v6 = vld [vmem:[%s4721_s1 + $0x4f8] sm:$0xff]  }
  0x67   :  { %3375 = vmatprep.subr.bf16.mxu1 %v3675_v5  ;;  %v3731_v5 = vld [vmem:[%s4721_s1 + $0x478] sm:$0xff]  }
  0x68   :  { %3354 = vmatpush3.bf16.msra.mxu0 %v3676_v7  ;;  %v678_v7 = vrot.slane %v656_v3, %v3984_v41  ;;  %v3781_v0 = vld [vmem:[%s4721_s1 + $0x6d8] sm:$0xff]   ;;  %v3784_v3 = vld [vmem:[%s4721_s1 + $0x660] sm:$0xff]  }
  0x69   :  { %3355 = vmatprep.subr.bf16.mxu0 %v3678_v9  ;;  %v3733_v9 = vld [vmem:[%s4721_s1 + $0x438] sm:$0xff]  }
  0x6a   :  { %3376 = vmatpush3.bf16.msra.mxu1 %v3677_v8  ;;  %v657_v8 = vcombine.high %v4382_v4, %v4382_v4 }
  0x6b   :  { %3377 = vmatprep.subr.bf16.mxu1 %v3679_v10  ;;  %v3734_v10 = vld [vmem:[%s4721_s1 + $0x4b8] sm:$0xff]  }
  0x6c   :  { %3356 = vmatpush3.bf16.msra.mxu0 %v3680_v11  ;;  %v688_v11 = vcombine.high %v678_v7, %v678_v7 }
  0x6d   :  { %3357 = vmatprep.subr.bf16.mxu0 %v3682_v13  ;;  %v3735_v13 = vld [vmem:[%s4721_s1 + $0x540] sm:$0xff]  }
  0x6e   :  { %3378 = vmatpush3.bf16.msra.mxu1 %v3681_v12  ;;  %v664_v12 = vrot.slane %v648_v63, %v3984_v41  ;;  %v3780_v63 = vld [vmem:[%s4721_s1 + $0x658] sm:$0xff]  }
  0x6f   :  { %3379 = vmatprep.subr.bf16.mxu1 %v3683_v14  ;;  %v3736_v14 = vld [vmem:[%s4721_s1 + $0x5c0] sm:$0xff]  }
  0x70   :  { %3358 = vmatpush3.bf16.msra.mxu0 %v3684_v15  ;;  %v685_v15 = vrot.slane %v657_v8, %v3984_v41  ;;  %v3789_v8 = vld [vmem:[%s4721_s1 + $0x6e8] sm:$0xff]  }
  0x71   :  { %3359 = vmatprep.subr.bf16.mxu0 %v3686_v17  ;;  %v3738_v17 = vld [vmem:[%s4721_s1 + $0x580] sm:$0xff]  }
  0x72   :  { %3380 = vmatpush3.bf16.msra.mxu1 %v3685_v16  ;;  %v3737_v16 = vld [vmem:[%s4721_s1 + $0x500] sm:$0xff]  }
  0x73   :  { %3381 = vmatprep.subr.bf16.mxu1 %v3687_v18  ;;  %v686_v18 = vcombine.high %v664_v12, %v664_v12 }
  0x74   :  { %3360 = vmatpush3.bf16.msra.mxu0 %v3688_v19  ;;  %v3739_v19 = vld [vmem:[%s4721_s1 + $0x548] sm:$0xff]  }
  0x75   :  { %3361 = vmatprep.subr.bf16.mxu0 %v3690_v21  ;;  %v689_v21 = vcombine.high %v685_v15, %v685_v15 }
  0x76   :  { %3382 = vmatpush3.bf16.msra.mxu1 %v3689_v20  ;;  %v3740_v20 = vld [vmem:[%s4721_s1 + $0x5c8] sm:$0xff]  }
  0x77   :  { %3383 = vmatprep.subr.bf16.mxu1 %v3691_v22  ;;  %v3741_v22 = vld [vmem:[%s4721_s1 + $0x508] sm:$0xff]  }
  0x78   :  { %3362 = vmatpush3.bf16.msra.mxu0 %v3692_v23  ;;  %v3742_v23 = vld [vmem:[%s4721_s1 + $0x588] sm:$0xff]  }
  0x79   :  { %3363 = vmatprep.subr.bf16.mxu0 %v3694_v25  ;;  %v3744_v25 = vld [vmem:[%s4721_s1 + $0x5d0] sm:$0xff]  }
  0x7a   :  { %3384 = vmatpush3.bf16.msra.mxu1 %v3693_v24  ;;  %v3743_v24 = vld [vmem:[%s4721_s1 + $0x550] sm:$0xff]  }
  0x7b   :  { %3385 = vmatprep.subr.bf16.mxu1 %v3695_v26  ;;  %v3745_v26 = vld [vmem:[%s4721_s1 + $0x510] sm:$0xff]  }
  0x7c   :  { %3364 = vmatpush3.bf16.msra.mxu0 %v3696_v27  ;;  %v3746_v27 = vld [vmem:[%s4721_s1 + $0x590] sm:$0xff]  }
  0x7d   :  { %3365 = vmatprep.subr.bf16.mxu0 %v3698_v29  ;;  %v3748_v29 = vld [vmem:[%s4721_s1 + $0x5d8] sm:$0xff]  }
  0x7e   :  { %3386 = vmatpush3.bf16.msra.mxu1 %v3697_v28  ;;  %v3747_v28 = vld [vmem:[%s4721_s1 + $0x558] sm:$0xff]  }
  0x7f   :  { %3387 = vmatprep.subr.bf16.mxu1 %v3699_v30  ;;  %v3749_v30 = vld [vmem:[%s4721_s1 + $0x518] sm:$0xff]  }
  0x80   :  { %3366 = vmatpush3.bf16.msra.mxu0 %v3700_v31  ;;  %v3750_v31 = vld [vmem:[%s4721_s1 + $0x598] sm:$0xff]  }
  0x81   :  { %3395 = vmatprep.subr.bf16.mxu0 %v3703_v34  ;;  %v3753_v34 = vld [vmem:[%s4721_s1 + $0x520] sm:$0xff]  }
  0x82   :  { %3388 = vmatpush3.bf16.msra.mxu1 %v3701_v32  ;;  %v3751_v32 = vld [vmem:[%s4721_s1 + $0x560] sm:$0xff]  }
  0x83   :  { %2580 = vmatmul.mubr.bf16.vlgmr.msra.gmra.mrb[12].mxu0 %v622_v33  ;;  %3417 = vmatprep.subr.bf16.mxu1 %v3704_v35  ;;  %v3752_v33 = vld [vmem:[%s4721_s1 + $0x5e0] sm:$0xff]  }
  0x84   :  { %3396 = vmatpush3.bf16.msra.mxu0 %v3705_v36  ;;  %2659 = vmatprep.mubr.bf16.mxu0 %v678_v7  ;;  %v3754_v35 = vld [vmem:[%s4721_s1 + $0x5a0] sm:$0xff]   ;;  %v3755_v36 = vld [vmem:[%s4721_s1 + $0x568] sm:$0xff]  }
  0x85   :  { %2620 = vmatmul.mubr.bf16.vlgmr.msra.gmra.mrb[12].mxu1 %v638_v38  ;;  %3397 = vmatprep.subr.bf16.mxu0 %v3707_v39  ;;  %v3757_v38 = vld [vmem:[%s4721_s1 + $0x528] sm:$0xff]  }
  0x86   :  { %3418 = vmatpush3.bf16.msra.mxu1 %v3706_v37  ;;  %2699 = vmatprep.mubr.bf16.mxu1 %v688_v11  ;;  %v3756_v37 = vld [vmem:[%s4721_s1 + $0x5e8] sm:$0xff]   ;;  %v3792_v11 = vld [vmem:[%s4721_s1 + $0x670] sm:$0xff]  }
  0x87   :  { %3419 = vmatprep.subr.bf16.mxu1 %v3708_v40  ;;  %v3758_v39 = vld [vmem:[%s4721_s1 + $0x5a8] sm:$0xff]   ;;  %v3759_v40 = vld [vmem:[%s4721_s1 + $0x570] sm:$0xff]  }
  0x88   :  { %3398 = vmatpush3.bf16.msra.mxu0 %v3709_v42  ;;  %v3760_v42 = vld [vmem:[%s4721_s1 + $0x5f0] sm:$0xff]   ;;  %v3788_v7 = vld [vmem:[%s4721_s1 + $0x668] sm:$0xff]  }
  0x89   :  { %3399 = vmatprep.subr.bf16.mxu0 %v3711_v44  ;;  %v3762_v44 = vld [vmem:[%s4721_s1 + $0x5b0] sm:$0xff]  }
  0x8a   :  { %3420 = vmatpush3.bf16.msra.mxu1 %v3710_v43  ;;  %v3761_v43 = vld [vmem:[%s4721_s1 + $0x530] sm:$0xff]  }
  0x8b   :  { %3421 = vmatprep.subr.bf16.mxu1 %v3712_v45  ;;  %v3763_v45 = vld [vmem:[%s4721_s1 + $0x578] sm:$0xff]  }
  0x8c   :  { %3400 = vmatpush3.bf16.msra.mxu0 %v3713_v46  ;;  %v3764_v46 = vld [vmem:[%s4721_s1 + $0x5f8] sm:$0xff]  }
  0x8d   :  { %3401 = vmatprep.subr.bf16.mxu0 %v3715_v48  ;;  %v3766_v48 = vld [vmem:[%s4721_s1 + $0x5b8] sm:$0xff]  }
  0x8e   :  { %3422 = vmatpush3.bf16.msra.mxu1 %v3714_v47  ;;  %v3765_v47 = vld [vmem:[%s4721_s1 + $0x538] sm:$0xff]  }
  0x8f   :  { %3423 = vmatprep.subr.bf16.mxu1 %v3716_v49  ;;  %v671_v49 = vrot.slane %v4382_v4, %v3984_v41  ;;  %v3785_v4 = vld [vmem:[%s4721_s1 + $0x6e0] sm:$0xff]  }
  0x90   :  { %3402 = vmatpush3.bf16.msra.mxu0 %v3717_v50  ;;  %v3768_v50 = vld [vmem:[%s4721_s1 + $0x640] sm:$0xff]  }
  0x91   :  { %3403 = vmatprep.subr.bf16.mxu0 %v3719_v52  ;;  %v3770_v52 = vld [vmem:[%s4721_s1 + $0x600] sm:$0xff]  }
  0x92   :  { %3424 = vmatpush3.bf16.msra.mxu1 %v3718_v51  ;;  %v3769_v51 = vld [vmem:[%s4721_s1 + $0x6c0] sm:$0xff]  }
  0x93   :  { %3425 = vmatprep.subr.bf16.mxu1 %v3720_v53  ;;  %v3771_v53 = vld [vmem:[%s4721_s1 + $0x680] sm:$0xff]  }
  0x94   :  { %3404 = vmatpush3.bf16.msra.mxu0 %v3721_v54  ;;  %v687_v54 = vcombine.high %v671_v49, %v671_v49 }
  0x95   :  { %3405 = vmatprep.subr.bf16.mxu0 %v3723_v56  ;;  %v3773_v56 = vld [vmem:[%s4721_s1 + $0x6c8] sm:$0xff]  }
  0x96   :  { %3426 = vmatpush3.bf16.msra.mxu1 %v3722_v55  ;;  %v3772_v55 = vld [vmem:[%s4721_s1 + $0x648] sm:$0xff]  }
  0x97   :  { %3427 = vmatprep.subr.bf16.mxu1 %v3724_v57  ;;  %v3774_v57 = vld [vmem:[%s4721_s1 + $0x608] sm:$0xff]  }
  0x98   :  { %3406 = vmatpush3.bf16.msra.mxu0 %v3725_v58  ;;  %v3775_v58 = vld [vmem:[%s4721_s1 + $0x688] sm:$0xff]  }
  0x99   :  { %3407 = vmatprep.subr.bf16.mxu0 %v3727_v60  ;;  %v3777_v60 = vld [vmem:[%s4721_s1 + $0x6d0] sm:$0xff]  }
  0x9a   :  { %3428 = vmatpush3.bf16.msra.mxu1 %v3726_v59  ;;  %v3776_v59 = vld [vmem:[%s4721_s1 + $0x650] sm:$0xff]  }
  0x9b   :  { %3429 = vmatprep.subr.bf16.mxu1 %v3728_v62  ;;  %v3779_v62 = vld [vmem:[%s4721_s1 + $0x690] sm:$0xff]  }
  0x9c   :  { %3408 = vmatpush3.bf16.msra.mxu0 %v3729_v1  ;;  %v3782_v1 = vld [vmem:[%s4721_s1 + $0x618] sm:$0xff]  }
  0x9d   :  { %3409 = vmatprep.subr.bf16.mxu0 %v3731_v5  ;;  %v3786_v5 = vld [vmem:[%s4721_s1 + $0x620] sm:$0xff]  }
  0x9e   :  { %3430 = vmatpush3.bf16.msra.mxu1 %v3730_v2  ;;  %v3783_v2 = vld [vmem:[%s4721_s1 + $0x698] sm:$0xff]  }
  0x9f   :  { %3431 = vmatprep.subr.bf16.mxu1 %v3732_v6  ;;  %v3787_v6 = vld [vmem:[%s4721_s1 + $0x6a0] sm:$0xff]  }
  0xa0   :  { %3410 = vmatpush3.bf16.msra.mxu0 %v3733_v9  ;;  %v3790_v9 = vld [vmem:[%s4721_s1 + $0x628] sm:$0xff]  }
  0xa1   :  { %3439 = vmatprep.subr.bf16.mxu0 %v3735_v13  ;;  %v3793_v13 = vld [vmem:[%s4721_s1 + $0x6f0] sm:$0xff]  }
  0xa2   :  { %3432 = vmatpush3.bf16.msra.mxu1 %v3734_v10  ;;  %v3791_v10 = vld [vmem:[%s4721_s1 + $0x6a8] sm:$0xff]  }
  0xa3   :  { %2660 = vmatmul.mubr.bf16.vlgmr.msra.gmra.mrb[16].mxu0 %v664_v12  ;;  %3461 = vmatprep.subr.bf16.mxu1 %v3736_v14  ;;  %v19_v12 = vld [vmem:[%s4720_s0 + $0x18] sm:$0xff] }
  0xa4   :  { %3440 = vmatpush3.bf16.msra.mxu0 %v3737_v16  ;;  %2739 = vmatprep.mubr.bf16.mxu0 %v685_v15  ;;  %v697_v14 = vrot.slane %v19_v12, %v3984_v41  ;;  %v690_v15 = vcombine.high %v19_v12, %v19_v12  ;;  %v3794_v16 = vld [vmem:[%s4721_s1 + $0x630] sm:$0xff]  }
  0xa5   :  { %2700 = vmatmul.mubr.bf16.vlgmr.msra.gmra.mrb[16].mxu1 %v686_v18  ;;  %3441 = vmatprep.subr.bf16.mxu0 %v3739_v19 }
  0xa6   :  { %3462 = vmatpush3.bf16.msra.mxu1 %v3738_v17  ;;  %2779 = vmatprep.mubr.bf16.mxu1 %v689_v21  ;;  %v3796_v17 = vld [vmem:[%s4721_s1 + $0x678] sm:$0xff]   ;;  %v705_v18 = vcombine.high %v697_v14, %v697_v14  ;;  %v4588_v19 = vrot.slane %v690_v15, %v3984_v41 }
  0xa7   :  { %3463 = vmatprep.subr.bf16.mxu1 %v3740_v20  ;;  %v3795_v20 = vld [vmem:[%s4721_s1 + $0x6b0] sm:$0xff]   ;;  %v3797_v21 = vld [vmem:[%s4721_s1 + $0x6f8] sm:$0xff]  }
  0xa8   :  { %3442 = vmatpush3.bf16.msra.mxu0 %v3741_v22  ;;  %v727_v22 = vrot.slane %v705_v18, %v3984_v41 }
  0xa9   :  { %3443 = vmatprep.subr.bf16.mxu0 %v3743_v24  ;;  %v3798_v24 = vld [vmem:[%s4721_s1 + $0x638] sm:$0xff]  }
  0xaa   :  { %3464 = vmatpush3.bf16.msra.mxu1 %v3742_v23  ;;  %v706_v23 = vcombine.high %v4588_v19, %v4588_v19 }
  0xab   :  { %3465 = vmatprep.subr.bf16.mxu1 %v3744_v25  ;;  %v737_v25 = vcombine.high %v727_v22, %v727_v22 }
  0xac   :  { %3444 = vmatpush3.bf16.msra.mxu0 %v3745_v26  ;;  %v713_v26 = vrot.slane %v697_v14, %v3984_v41 }
  0xad   :  { %3445 = vmatprep.subr.bf16.mxu0 %v3747_v28  ;;  %v3799_v28 = vld [vmem:[%s4721_s1 + $0x6b8] sm:$0xff]  }
  0xae   :  { %3466 = vmatpush3.bf16.msra.mxu1 %v3746_v27  ;;  %v3800_v27 = vld [vmem:[%s4721_s1 + $0x740] sm:$0xff]  }
  0xaf   :  { %3467 = vmatprep.subr.bf16.mxu1 %v3748_v29  ;;  %v734_v29 = vrot.slane %v706_v23, %v3984_v41 }
  0xb0   :  { %3446 = vmatpush3.bf16.msra.mxu0 %v3749_v30  ;;  %v3801_v30 = vld [vmem:[%s4721_s1 + $0x7c0] sm:$0xff]  }
  0xb1   :  { %3447 = vmatprep.subr.bf16.mxu0 %v3751_v32  ;;  %v735_v32 = vcombine.high %v713_v26, %v713_v26 }
  0xb2   :  { %3468 = vmatpush3.bf16.msra.mxu1 %v3750_v31  ;;  %v3802_v31 = vld [vmem:[%s4721_s1 + $0x700] sm:$0xff]  }
  0xb3   :  { %3469 = vmatprep.subr.bf16.mxu1 %v3752_v33  ;;  %v3804_v33 = vld [vmem:[%s4721_s1 + $0x748] sm:$0xff]  }
  0xb4   :  { %3448 = vmatpush3.bf16.msra.mxu0 %v3753_v34  ;;  %v3803_v34 = vld [vmem:[%s4721_s1 + $0x780] sm:$0xff]  }
  0xb5   :  { %3449 = vmatprep.subr.bf16.mxu0 %v3755_v36  ;;  %v3805_v36 = vld [vmem:[%s4721_s1 + $0x7c8] sm:$0xff]  }
  0xb6   :  { %3470 = vmatpush3.bf16.msra.mxu1 %v3754_v35  ;;  %v738_v35 = vcombine.high %v734_v29, %v734_v29 }
  0xb7   :  { %3471 = vmatprep.subr.bf16.mxu1 %v3756_v37  ;;  %v3806_v37 = vld [vmem:[%s4721_s1 + $0x708] sm:$0xff]  }
  0xb8   :  { %3450 = vmatpush3.bf16.msra.mxu0 %v3757_v38  ;;  %v3808_v38 = vld [vmem:[%s4721_s1 + $0x750] sm:$0xff]  }
  0xb9   :  { %3451 = vmatprep.subr.bf16.mxu0 %v3759_v40  ;;  %v3809_v40 = vld [vmem:[%s4721_s1 + $0x7d0] sm:$0xff]  }
  0xba   :  { %3472 = vmatpush3.bf16.msra.mxu1 %v3758_v39  ;;  %v3807_v39 = vld [vmem:[%s4721_s1 + $0x788] sm:$0xff]  }
  0xbb   :  { %3473 = vmatprep.subr.bf16.mxu1 %v3760_v42  ;;  %v3810_v42 = vld [vmem:[%s4721_s1 + $0x710] sm:$0xff]  }
  0xbc   :  { %3452 = vmatpush3.bf16.msra.mxu0 %v3761_v43  ;;  %v3812_v43 = vld [vmem:[%s4721_s1 + $0x758] sm:$0xff]  }
  0xbd   :  { %3453 = vmatprep.subr.bf16.mxu0 %v3763_v45  ;;  %v3813_v45 = vld [vmem:[%s4721_s1 + $0x7d8] sm:$0xff]  }
  0xbe   :  { %3474 = vmatpush3.bf16.msra.mxu1 %v3762_v44  ;;  %v3811_v44 = vld [vmem:[%s4721_s1 + $0x790] sm:$0xff]  }
  0xbf   :  { %3475 = vmatprep.subr.bf16.mxu1 %v3764_v46  ;;  %v3814_v46 = vld [vmem:[%s4721_s1 + $0x718] sm:$0xff]  }
  0xc0   :  { %3454 = vmatpush3.bf16.msra.mxu0 %v3765_v47  ;;  %v3816_v47 = vld [vmem:[%s4721_s1 + $0x760] sm:$0xff]  }
  0xc1   :  { %3483 = vmatprep.subr.bf16.mxu0 %v3768_v50  ;;  %v3818_v50 = vld [vmem:[%s4721_s1 + $0x720] sm:$0xff]  }
  0xc2   :  { %3476 = vmatpush3.bf16.msra.mxu1 %v3766_v48  ;;  %v3815_v48 = vld [vmem:[%s4721_s1 + $0x798] sm:$0xff]  }
  0xc3   :  { %2740 = vmatmul.mubr.bf16.vlgmr.msra.gmra.mrb[20].mxu0 %v671_v49  ;;  %3505 = vmatprep.subr.bf16.mxu1 %v3769_v51  ;;  %v3817_v49 = vld [vmem:[%s4721_s1 + $0x7e0] sm:$0xff]   ;;  %v3820_v51 = vld [vmem:[%s4721_s1 + $0x768] sm:$0xff]  }
  0xc4   :  { %3484 = vmatpush3.bf16.msra.mxu0 %v3770_v52  ;;  %2819 = vmatprep.mubr.bf16.mxu0 %v727_v22  ;;  %v3819_v52 = vld [vmem:[%s4721_s1 + $0x7a0] sm:$0xff]  }
  0xc5   :  { %2780 = vmatmul.mubr.bf16.vlgmr.msra.gmra.mrb[20].mxu1 %v687_v54  ;;  %3485 = vmatprep.subr.bf16.mxu0 %v3772_v55  ;;  %v3822_v54 = vld [vmem:[%s4721_s1 + $0x728] sm:$0xff]   ;;  %v3824_v55 = vld [vmem:[%s4721_s1 + $0x770] sm:$0xff]  }
  0xc6   :  { %3506 = vmatpush3.bf16.msra.mxu1 %v3771_v53  ;;  %2859 = vmatprep.mubr.bf16.mxu1 %v737_v25  ;;  %v3821_v53 = vld [vmem:[%s4721_s1 + $0x7e8] sm:$0xff]  }
  0xc7   :  { %3507 = vmatprep.subr.bf16.mxu1 %v3773_v56 }
  0xc8   :  { %3486 = vmatpush3.bf16.msra.mxu0 %v3774_v57  ;;  %v3823_v57 = vld [vmem:[%s4721_s1 + $0x7a8] sm:$0xff]  }
  0xc9   :  { %3487 = vmatprep.subr.bf16.mxu0 %v3776_v59 }
  0xca   :  { %3508 = vmatpush3.bf16.msra.mxu1 %v3775_v58 }
  0xcb   :  { %3509 = vmatprep.subr.bf16.mxu1 %v3777_v60 }
  0xcc   :  { %3488 = vmatpush3.bf16.msra.mxu0 %v3778_v61 }
  0xcd   :  { %3489 = vmatprep.subr.bf16.mxu0 %v3780_v63 }
  0xce   :  { %3510 = vmatpush3.bf16.msra.mxu1 %v3779_v62 }
  0xcf   :  { %3511 = vmatprep.subr.bf16.mxu1 %v3781_v0 }
  0xd0   :  { %3490 = vmatpush3.bf16.msra.mxu0 %v3782_v1 }
  0xd1   :  { %3491 = vmatprep.subr.bf16.mxu0 %v3784_v3 }
  0xd2   :  { %3512 = vmatpush3.bf16.msra.mxu1 %v3783_v2 }
  0xd3   :  { %3513 = vmatprep.subr.bf16.mxu1 %v3785_v4 }
  0xd4   :  { %3492 = vmatpush3.bf16.msra.mxu0 %v3786_v5 }
  0xd5   :  { %3493 = vmatprep.subr.bf16.mxu0 %v3788_v7 }
  0xd6   :  { %3514 = vmatpush3.bf16.msra.mxu1 %v3787_v6 }
  0xd7   :  { %3515 = vmatprep.subr.bf16.mxu1 %v3789_v8 }
  0xd8   :  { %3494 = vmatpush3.bf16.msra.mxu0 %v3790_v9 }
  0xd9   :  { %3495 = vmatprep.subr.bf16.mxu0 %v3792_v11 }
  0xda   :  { %3516 = vmatpush3.bf16.msra.mxu1 %v3791_v10 }
  0xdb   :  { %3517 = vmatprep.subr.bf16.mxu1 %v3793_v13 }
  0xdc   :  { %3496 = vmatpush3.bf16.msra.mxu0 %v3794_v16 }
  0xdd   :  { %3497 = vmatprep.subr.bf16.mxu0 %v3796_v17 }
  0xde   :  { %3518 = vmatpush3.bf16.msra.mxu1 %v3795_v20 }
  0xdf   :  { %3519 = vmatprep.subr.bf16.mxu1 %v3797_v21 }
  0xe0   :  { %3498 = vmatpush3.bf16.msra.mxu0 %v3798_v24 }
  0xe1   :  { %3527 = vmatprep.subr.bf16.mxu0 %v3800_v27 }
  0xe2   :  { %3520 = vmatpush3.bf16.msra.mxu1 %v3799_v28 }
  0xe3   :  { %2820 = vmatmul.mubr.bf16.vlgmr.msra.gmra.mrb[24].mxu0 %v713_v26  ;;  %3549 = vmatprep.subr.bf16.mxu1 %v3801_v30 }
  0xe4   :  { %3528 = vmatpush3.bf16.msra.mxu0 %v3802_v31  ;;  %2899 = vmatprep.mubr.bf16.mxu0 %v734_v29 }
  0xe5   :  { %2860 = vmatmul.mubr.bf16.vlgmr.msra.gmra.mrb[24].mxu1 %v735_v32  ;;  %3529 = vmatprep.subr.bf16.mxu0 %v3804_v33 }
  0xe6   :  { %3550 = vmatpush3.bf16.msra.mxu1 %v3803_v34  ;;  %2939 = vmatprep.mubr.bf16.mxu1 %v738_v35 }
  0xe7   :  { %3551 = vmatprep.subr.bf16.mxu1 %v3805_v36 }
  0xe8   :  { %3530 = vmatpush3.bf16.msra.mxu0 %v3806_v37 }
  0xe9   :  { %3531 = vmatprep.subr.bf16.mxu0 %v3808_v38 }
  0xea   :  { %3552 = vmatpush3.bf16.msra.mxu1 %v3807_v39 }
  0xeb   :  { %3553 = vmatprep.subr.bf16.mxu1 %v3809_v40 }
  0xec   :  { %3532 = vmatpush3.bf16.msra.mxu0 %v3810_v42 }
  0xed   :  { %3533 = vmatprep.subr.bf16.mxu0 %v3812_v43 }
  0xee   :  { %3554 = vmatpush3.bf16.msra.mxu1 %v3811_v44 }
  0xef   :  { %3555 = vmatprep.subr.bf16.mxu1 %v3813_v45 }
  0xf0   :  { %3534 = vmatpush3.bf16.msra.mxu0 %v3814_v46 }
  0xf1   :  { %3535 = vmatprep.subr.bf16.mxu0 %v3816_v47 }
  0xf2   :  { %3556 = vmatpush3.bf16.msra.mxu1 %v3815_v48 }
  0xf3   :  { %3557 = vmatprep.subr.bf16.mxu1 %v3817_v49 }
  0xf4   :  { %3536 = vmatpush3.bf16.msra.mxu0 %v3818_v50 }
  0xf5   :  { %3537 = vmatprep.subr.bf16.mxu0 %v3820_v51 }
  0xf6   :  { %3558 = vmatpush3.bf16.msra.mxu1 %v3819_v52  ;;  %v3235_v56 = vpop.f32.mrb[0].mxu0 }
  0xf7   :  { %8 = vsyncpa [#allocation3], 0  ;;  %v2962_v58 = vld [vmem:[%s4722_s2] ss:$0 sm:$0xff]  ;;  %v3236_v59 = vpop.f32.mrb[1].mxu0  ;;  %3559 = vmatprep.subr.bf16.mxu1 %v3821_v53  ;;  %v3825_v60 = vld [vmem:[%s4721_s1 + $0x7f0] sm:$0xff]   ;;  %v720_v12 = vrot.slane %v4588_v19, %v3984_v41 }
  0xf8   :  { %v3257_v61 = vpop.f32.mrb[0].mxu1  ;;  %v3237_v62 = vadd.f32 %v3236_v59, %v3235_v56  ;;  %v3238_v63 = vpop.f32.mrb[2].mxu0  ;;  %3538 = vmatpush3.bf16.msra.mxu0 %v3822_v54  ;;  %v3826_v0 = vld [vmem:[%s4721_s1 + $0x730] sm:$0xff]   ;;  %v3828_v3 = vld [vmem:[%s4721_s1 + $0x778] sm:$0xff]  }
  0xf9   :  { %v3258_v1 = vpop.f32.mrb[1].mxu1  ;;  %v3239_v2 = vpop.f32.mrb[3].mxu0  ;;  %3539 = vmatprep.subr.bf16.mxu0 %v3824_v55  ;;  %v3827_v7 = vld [vmem:[%s4721_s1 + $0x7b0] sm:$0xff]   ;;  %v3829_v9 = vld [vmem:[%s4721_s1 + $0x7f8] sm:$0xff]   ;;  %v736_v14 = vcombine.high %v720_v12, %v720_v12 }
  0xfa   :  { %v2342_v4 = vadd.f32 %v3237_v62, %v2962_v58  ;;  %v3259_v5 = vadd.f32 %v3258_v1, %v3257_v61  ;;  %v3260_v6 = vpop.f32.mrb[2].mxu1  ;;  %3560 = vmatpush3.bf16.msra.mxu1 %v3823_v57  ;;  %v3830_v11 = vld [vmem:[%s4721_s1 + $0x738] sm:$0xff]  }
  0xfb   :  { %v3261_v8 = vpop.f32.mrb[3].mxu1  ;;  %3561 = vmatprep.subr.bf16.mxu1 %v3825_v60  ;;  %v3831_v13 = vld [vmem:[%s4721_s1 + $0x7b8] sm:$0xff]   ;;  %s3858_s1 = smov [#allocation2]  }
  0xfc   :  { %v2382_v10 = vadd.f32 %v3259_v5, %v2342_v4  ;;  %3540 = vmatpush3.bf16.msra.mxu0 %v3826_v0  ;;  %s2954_s17 = sshll.u32 %s3858_s1, 4  ;;  %s2955_s17 = int_to_ptr.vmem [resolvable:$true] %s2954_s17 }
  0xfd   :  { %3541 = vmatprep.subr.bf16.mxu0 %v3828_v3  ;;  %s3833_s18 = scalar_lea.vmem %s2955_s17, 32  ;;  %p3838_p1 = scmp.lt.s32.totalorder %s2955_s17, %s2955_s17 }
  0xfe   :  { %3562 = vmatpush3.bf16.msra.mxu1 %v3827_v7  ;;  %p3834_p0 = scmp.ne.s32.totalorder %s2955_s17, %s3833_s18  ;;  %p3839_p2 = scmp.lt.s32.totalorder %s3833_s18, %s3833_s18 }
  0xff   :  { %3563 = vmatprep.subr.bf16.mxu1 %v3829_v9 }
 0x100   :  { %3542 = vmatpush3.bf16.msra.mxu0 %v3830_v11  ;;  %p3840_p3 = por %p3839_p2, %p3838_p1 }
 0x102   :  { %3564 = vmatpush3.bf16.msra.mxu1 %v3831_v13  ;;  %p3841_p4 = pnand %p3840_p3, %p3834_p0 }
 0x103   :  { %2900 = vmatmul.mubr.bf16.vlgmr.msra.gmra.mrb[28].mxu0 %v720_v12 }
 0x105   :  { %2940 = vmatmul.mubr.bf16.vlgmr.msra.gmra.mrb[28].mxu1 %v736_v14 }
 0x116   :  { %v3279_v15 = vpop.f32.mrb[4].mxu0 }
 0x117   :  { %v3280_v16 = vpop.f32.mrb[5].mxu0  ;;  %v3301_v17 = vpop.f32.mrb[4].mxu1 }
 0x118   :  { %v3281_v18 = vadd.f32 %v3280_v16, %v3279_v15  ;;  %v3282_v20 = vpop.f32.mrb[6].mxu0  ;;  %v3302_v21 = vpop.f32.mrb[5].mxu1 }
 0x119   :  { %v3283_v22 = vpop.f32.mrb[7].mxu0  ;;  %v3303_v41 = vadd.f32 %v3302_v21, %v3301_v17  ;;  %v3304_v19 = vpop.f32.mrb[6].mxu1 }
 0x11a   :  { %v2422_v23 = vadd.f32 %v3281_v18, %v2382_v10  ;;  %v3305_v24 = vpop.f32.mrb[7].mxu1 }
 0x11c   :  { %v2462_v25 = vadd.f32 %v3303_v41, %v2422_v23 }
 0x136   :  { %v3323_v26 = vpop.f32.mrb[8].mxu0 }
 0x137   :  { %v3324_v27 = vpop.f32.mrb[9].mxu0 }
 0x138   :  { %v3345_v28 = vpop.f32.mrb[8].mxu1  ;;  %v3325_v29 = vadd.f32 %v3324_v27, %v3323_v26  ;;  %v3326_v30 = vpop.f32.mrb[10].mxu0 }
 0x139   :  { %v3346_v31 = vpop.f32.mrb[9].mxu1  ;;  %v3327_v32 = vpop.f32.mrb[11].mxu0 }
 0x13a   :  { %v2502_v33 = vadd.f32 %v3325_v29, %v2462_v25  ;;  %v3347_v34 = vadd.f32 %v3346_v31, %v3345_v28  ;;  %v3348_v35 = vpop.f32.mrb[10].mxu1 }
 0x13b   :  { %v3349_v36 = vpop.f32.mrb[11].mxu1 }
 0x13c   :  { %v2542_v37 = vadd.f32 %v3347_v34, %v2502_v33 }
 0x156   :  { %v3367_v38 = vpop.f32.mrb[12].mxu0 }
 0x157   :  { %v3368_v39 = vpop.f32.mrb[13].mxu0 }
 0x158   :  { %v3389_v40 = vpop.f32.mrb[12].mxu1  ;;  %v3369_v42 = vadd.f32 %v3368_v39, %v3367_v38  ;;  %v3370_v43 = vpop.f32.mrb[14].mxu0 }
 0x159   :  { %v3390_v44 = vpop.f32.mrb[13].mxu1  ;;  %v3371_v45 = vpop.f32.mrb[15].mxu0 }
 0x15a   :  { %v2582_v46 = vadd.f32 %v3369_v42, %v2542_v37  ;;  %v3391_v47 = vadd.f32 %v3390_v44, %v3389_v40  ;;  %v3392_v48 = vpop.f32.mrb[14].mxu1 }
 0x15b   :  { %v3393_v49 = vpop.f32.mrb[15].mxu1 }
 0x15c   :  { %v2622_v50 = vadd.f32 %v3391_v47, %v2582_v46 }
 0x176   :  { %v3411_v51 = vpop.f32.mrb[16].mxu0 }
 0x177   :  { %v3412_v52 = vpop.f32.mrb[17].mxu0 }
 0x178   :  { %v3433_v53 = vpop.f32.mrb[16].mxu1  ;;  %v3413_v54 = vadd.f32 %v3412_v52, %v3411_v51  ;;  %v3414_v55 = vpop.f32.mrb[18].mxu0 }
 0x179   :  { %v3434_v56 = vpop.f32.mrb[17].mxu1  ;;  %v3415_v57 = vpop.f32.mrb[19].mxu0 }
 0x17a   :  { %v2662_v58 = vadd.f32 %v3413_v54, %v2622_v50  ;;  %v3435_v59 = vadd.f32 %v3434_v56, %v3433_v53  ;;  %v3436_v60 = vpop.f32.mrb[18].mxu1 }
 0x17b   :  { %v3437_v61 = vpop.f32.mrb[19].mxu1 }
 0x17c   :  { %v2702_v62 = vadd.f32 %v3435_v59, %v2662_v58 }
 0x196   :  { %v3455_v63 = vpop.f32.mrb[20].mxu0 }
 0x197   :  { %v3456_v0 = vpop.f32.mrb[21].mxu0 }
 0x198   :  { %v3477_v1 = vpop.f32.mrb[20].mxu1  ;;  %v3457_v2 = vadd.f32 %v3456_v0, %v3455_v63  ;;  %v3458_v3 = vpop.f32.mrb[22].mxu0 }
 0x199   :  { %v3478_v4 = vpop.f32.mrb[21].mxu1  ;;  %v3459_v5 = vpop.f32.mrb[23].mxu0 }
 0x19a   :  { %v2742_v6 = vadd.f32 %v3457_v2, %v2702_v62  ;;  %v3479_v7 = vadd.f32 %v3478_v4, %v3477_v1  ;;  %v3480_v8 = vpop.f32.mrb[22].mxu1 }
 0x19b   :  { %v3481_v9 = vpop.f32.mrb[23].mxu1 }
 0x19c   :  { %v2782_v10 = vadd.f32 %v3479_v7, %v2742_v6 }
 0x1b6   :  { %v3499_v11 = vpop.f32.mrb[24].mxu0 }
 0x1b7   :  { %v3500_v12 = vpop.f32.mrb[25].mxu0 }
 0x1b8   :  { %v3521_v13 = vpop.f32.mrb[24].mxu1  ;;  %v3501_v14 = vadd.f32 %v3500_v12, %v3499_v11  ;;  %v3502_v15 = vpop.f32.mrb[26].mxu0 }
 0x1b9   :  { %v3522_v16 = vpop.f32.mrb[25].mxu1  ;;  %v3503_v17 = vpop.f32.mrb[27].mxu0 }
 0x1ba   :  { %v2822_v18 = vadd.f32 %v3501_v14, %v2782_v10  ;;  %v3523_v20 = vadd.f32 %v3522_v16, %v3521_v13  ;;  %v3524_v21 = vpop.f32.mrb[26].mxu1 }
 0x1bb   :  { %v3525_v22 = vpop.f32.mrb[27].mxu1 }
 0x1bc   :  { %v2862_v23 = vadd.f32 %v3523_v20, %v2822_v18 }
 0x1d6   :  { %v3543_v41 = vpop.f32.mrb[28].mxu0 }
 0x1d7   :  { %v3544_v19 = vpop.f32.mrb[29].mxu0 }
 0x1d8   :  { %v3565_v24 = vpop.f32.mrb[28].mxu1  ;;  %v3545_v25 = vadd.f32 %v3544_v19, %v3543_v41  ;;  %v3546_v26 = vpop.f32.mrb[30].mxu0 }
 0x1d9   :  { %v3566_v27 = vpop.f32.mrb[29].mxu1  ;;  %v3547_v28 = vpop.f32.mrb[31].mxu0 }
 0x1da   :  { %v2902_v29 = vadd.f32 %v3545_v25, %v2862_v23  ;;  %v3567_v30 = vadd.f32 %v3566_v27, %v3565_v24  ;;  %v3568_v31 = vpop.f32.mrb[30].mxu1 }
 0x1db   :  { %v3569_v32 = vpop.f32.mrb[31].mxu1 }
 0x1dc   :  { %v2942_v33 = vadd.f32 %v3567_v30, %v2902_v29 }
 0x1de   :  { %2947 = vst [vmem:[#allocation2] sm:$0x3] %v2942_v33 }
 0x1df   :  { %3844 = shalt.err (!%p3841_p4)
}
 0x1e0   :  { %s3845_s21 = scalar_lea.hbm %s4723_s3, 32 }
 0x1e1   :  { %p3846_p5 = scmp.ne.s32.totalorder %s4723_s3, %s3845_s21  ;;  %p3849_p6 = scmp.lt.u32.totalorder %s3845_s21, %s4723_s3 }
 0x1e3   :  { %p3851_p7 = pnand %p3849_p6, %p3846_p5 }
 0x1e5   :  { %3854 = shalt.err (!%p3851_p7)
}
 0x1e6   :  { %2957 = dma.vmem_to_hbm [thread:$0]  %s2955_s17, 32, %s4723_s3, [#allocation3]  }
 0x1e7   :  { %3855 = dma.done.wait [#allocation3], 32  }
 0x1e8   :  { %3856 = vsyncadd [#allocation3], 4294967264 }
 0x1e9   :  { %2961 = vsyncpa [#allocation3], 1 }

// kernel: cnn_enhanced_forward.2
= control target key start
LH: loop header
LB: loop body
LE: loop exit
PB: predicated region body
PF: predicated region fallthrough
CT: control target
= control target key end

     0   :  { %vm1332_vm0 = vcmask 1044480   ;;  %vm1333_vm1 = vcmask 1045504   ;;  %vm947_vm2 = vcmask 220160   ;;  %v8913_v1 = vmov 65535   ;;  %s8915_s24 = smov 64   ;;  %s8916_s26 = smov 32   ;;  %s13505_s4 = inlined_call_operand.vmem [shape: bf16[27,32], index: 4, kind: input, shape index: {}]   ;;  %s13506_s0 = inlined_call_operand.vmem [shape: bf16[2,32,8,27], index: 0, kind: input, shape index: {}]   ;;  %s13507_s1 = inlined_call_operand.vmem [shape: bf16[2,32,8,27], index: 1, kind: input, shape index: {}]   ;;  %s13508_s2 = inlined_call_operand.vmem [shape: bf16[2,32,8,27], index: 2, kind: input, shape index: {}]   ;;  %s13509_s3 = inlined_call_operand.vmem [shape: bf16[2,32,8,27], index: 3, kind: input, shape index: {}]   ;;  %s13510_s5 = inlined_call_operand.vmem [shape: f32[1,32], index: 5, kind: input, shape index: {}]   ;;  %s13511_s6 = inlined_call_operand.vmem [shape: f32[1,32], index: 6, kind: input, shape index: {}]   ;;  %s13512_s7 = inlined_call_operand.vmem [shape: bf16[3,96,64], index: 7, kind: input, shape index: {}]   ;;  %s13513_s8 = inlined_call_operand.vmem [shape: f32[1,64], index: 8, kind: input, shape index: {}]   ;;  %s13514_s9 = inlined_call_operand.vmem [shape: f32[1,64], index: 9, kind: input, shape index: {}]   ;;  %s13515_s10 = inlined_call_operand.vmem [shape: bf16[2,8,8,64], index: 10, kind: output, shape index: {}]  }
   0x1   :  { %v8759_v0 = vld [vmem:[%s13505_s4] sm:$0xff]   ;;  %v1334_v2 = vsel %vm1332_vm0, 4294967295, %v8913_v1  ;;  %v8760_v3 = vld [vmem:[%s13505_s4 + $0x8] sm:$0x3f]   ;;  %v8763_v8 = vld [vmem:[%s13506_s0 + $0x10] sm:$0xff]   ;;  %vm3725_vm3 = vcmask 1043456  }
   0x2   :  { %8135 = vmatprep.subr.bf16.mxu0 %v8759_v0  ;;  %v1335_v4 = vsel %vm1333_vm1, %v1334_v2, 0  ;;  %v8761_v5 = vld [vmem:[%s13506_s0] sm:$0xff]   ;;  %8623 = vmatprep.subr.bf16.mxu1 %v8759_v0  ;;  %v8762_v7 = vld [vmem:[%s13506_s0 + $0x8] sm:$0xff]   ;;  %v8764_v9 = vld [vmem:[%s13506_s0 + $0x18] sm:$0xff]   ;;  %vm3950_vm4 = vcmask 261120   ;;  %vm4045_vm5 = vcmask 523264  }
   0x3   :  { %8136 = vmatpush3.bf16.msra.mxu0 %v8759_v0  ;;  %v1337_v6 = vand.u32 %v8760_v3, %v1335_v4  ;;  %8625 = vmatpush3.bf16.msra.mxu1 %v8759_v0  ;;  %v8765_v10 = vld [vmem:[%s13506_s0 + $0x20] sm:$0xff]   ;;  %v8766_v11 = vld [vmem:[%s13506_s0 + $0x28] sm:$0xff]   ;;  %v8767_v12 = vld [vmem:[%s13506_s0 + $0x30] sm:$0xff]   ;;  %vm5799_vm6 = vcmask 785408   ;;  %vm3690_vm7 = vcmask 1040384   ;;  %vm7278_vm13 = vcmask 519168  }
   0x4   :  { %8139 = vmatprep.mubr.msk.bf16.mxu0 %vm947_vm2, %v8761_v5  ;;  %v8768_v13 = vld [vmem:[%s13506_s0 + $0x38] sm:$0xff]   ;;  %v8769_v14 = vld [vmem:[%s13506_s0 + $0x40] sm:$0xff]   ;;  %v8770_v15 = vld [vmem:[%s13506_s0 + $0x48] sm:$0xff]   ;;  %vm3691_vm8 = vsmask.f32 256 }
   0x5   :  { %8137 = vmatprep.subr.bf16.mxu0 %v1337_v6  ;;  %8624 = vmatprep.subr.bf16.mxu1 %v1337_v6  ;;  %v8771_v16 = vld [vmem:[%s13506_s0 + $0x50] sm:$0xff]   ;;  %v8772_v17 = vld [vmem:[%s13506_s0 + $0x58] sm:$0xff]   ;;  %v8773_v18 = vld [vmem:[%s13506_s0 + $0x60] sm:$0xff]   ;;  %vm4551_vm10 = vsmask.f32 3328 }
   0x6   :  { %v8774_v19 = vld [vmem:[%s13506_s0 + $0x68] sm:$0xff]   ;;  %v8775_v20 = vld [vmem:[%s13506_s0 + $0x70] sm:$0xff]   ;;  %v8776_v21 = vld [vmem:[%s13506_s0 + $0x78] sm:$0xff]   ;;  %vm4552_vm11 = vsmask.f32 7440 }
   0x7   :  { %8138 = vmatpush3.bf16.msra.mxu0 %v1337_v6  ;;  %8626 = vmatpush3.bf16.msra.mxu1 %v1337_v6  ;;  %v8777_v22 = vld [vmem:[%s13506_s0 + $0x80] sm:$0xff]   ;;  %v8778_v23 = vld [vmem:[%s13506_s0 + $0x88] sm:$0xff]   ;;  %v8779_v24 = vld [vmem:[%s13506_s0 + $0x90] sm:$0xff]  }
   0x8   :  { %v8780_v25 = vld [vmem:[%s13506_s0 + $0x98] sm:$0xff]   ;;  %v8781_v26 = vld [vmem:[%s13506_s0 + $0xa0] sm:$0xff]   ;;  %v8782_v27 = vld [vmem:[%s13506_s0 + $0xa8] sm:$0xff]  }
   0x9   :  { %v8783_v28 = vld [vmem:[%s13506_s0 + $0xb0] sm:$0xff]   ;;  %v8784_v29 = vld [vmem:[%s13506_s0 + $0xb8] sm:$0xff]   ;;  %v8785_v30 = vld [vmem:[%s13506_s0 + $0xc0] sm:$0xff]  }
   0xa   :  { %8140 = vmatmul.mubr.msk.bf16.vlgmr.msra.gmra.mrb[0].mxu0 %vm947_vm2, %v8762_v7  ;;  %v8786_v31 = vld [vmem:[%s13506_s0 + $0xc8] sm:$0xff]   ;;  %v8787_v32 = vld [vmem:[%s13506_s0 + $0xd0] sm:$0xff]   ;;  %v8788_v33 = vld [vmem:[%s13506_s0 + $0xd8] sm:$0xff]  }
   0xb   :  { %8143 = vmatprep.mubr.msk.bf16.mxu0 %vm947_vm2, %v8763_v8  ;;  %v8789_v34 = vld [vmem:[%s13506_s0 + $0xe0] sm:$0xff]   ;;  %v8790_v35 = vld [vmem:[%s13506_s0 + $0xe8] sm:$0xff]   ;;  %v8791_v36 = vld [vmem:[%s13506_s0 + $0xf0] sm:$0xff]  }
   0xc   :  { %v8792_v37 = vld [vmem:[%s13506_s0 + $0xf8] sm:$0xff]   ;;  %v8793_v38 = vld [vmem:[%s13507_s1] sm:$0xff]   ;;  %v8794_v39 = vld [vmem:[%s13507_s1 + $0x8] sm:$0xff]  }
   0xd   :  { %v8795_v40 = vld [vmem:[%s13507_s1 + $0x10] sm:$0xff]   ;;  %v8796_v41 = vld [vmem:[%s13507_s1 + $0x18] sm:$0xff]   ;;  %v8797_v42 = vld [vmem:[%s13507_s1 + $0x20] sm:$0xff]  }
   0xe   :  { %v8798_v43 = vld [vmem:[%s13507_s1 + $0x28] sm:$0xff]   ;;  %v8799_v44 = vld [vmem:[%s13507_s1 + $0x30] sm:$0xff]   ;;  %v8800_v45 = vld [vmem:[%s13507_s1 + $0x38] sm:$0xff]  }
   0xf   :  { %v8801_v46 = vld [vmem:[%s13507_s1 + $0x40] sm:$0xff]   ;;  %v8802_v47 = vld [vmem:[%s13507_s1 + $0x48] sm:$0xff]   ;;  %v8803_v48 = vld [vmem:[%s13507_s1 + $0x50] sm:$0xff]  }
  0x10   :  { %v8804_v49 = vld [vmem:[%s13507_s1 + $0x58] sm:$0xff]   ;;  %v8805_v50 = vld [vmem:[%s13507_s1 + $0x60] sm:$0xff]   ;;  %v8806_v51 = vld [vmem:[%s13507_s1 + $0x68] sm:$0xff]  }
  0x11   :  { %v8807_v52 = vld [vmem:[%s13507_s1 + $0x70] sm:$0xff]   ;;  %v8808_v53 = vld [vmem:[%s13507_s1 + $0x78] sm:$0xff]   ;;  %v8809_v54 = vld [vmem:[%s13507_s1 + $0x80] sm:$0xff]  }
  0x12   :  { %8144 = vmatmul.mubr.msk.bf16.gmra.mrb[4].mxu0 %vm947_vm2, %v8764_v9  ;;  %v8810_v55 = vld [vmem:[%s13507_s1 + $0x88] sm:$0xff]   ;;  %v8811_v56 = vld [vmem:[%s13507_s1 + $0x90] sm:$0xff]   ;;  %v8842_v57 = vld [vmem:[%s13509_s3 + $0x80] sm:$0xff]  }
  0x13   :  { %8147 = vmatprep.mubr.msk.bf16.mxu0 %vm947_vm2, %v8765_v10  ;;  %v8844_v58 = vld [vmem:[%s13509_s3 + $0x88] sm:$0xff]   ;;  %8363 = vmatprep.mubr.msk.bf16.mxu1 %vm947_vm2, %v8842_v57  ;;  %v8812_v59 = vld [vmem:[%s13507_s1 + $0x98] sm:$0xff]   ;;  %v8813_v60 = vld [vmem:[%s13507_s1 + $0xa0] sm:$0xff]  }
  0x14   :  { %8364 = vmatmul.mubr.msk.bf16.vlgmr.msra.gmra.mrb[0].mxu1 %vm947_vm2, %v8844_v58  ;;  %v8846_v61 = vld [vmem:[%s13509_s3 + $0x90] sm:$0xff]   ;;  %v8848_v62 = vld [vmem:[%s13509_s3 + $0x98] sm:$0xff]   ;;  %v8814_v63 = vld [vmem:[%s13507_s1 + $0xa8] sm:$0xff]  }
  0x15   :  { %8367 = vmatprep.mubr.msk.bf16.mxu1 %vm947_vm2, %v8846_v61  ;;  %v8815_v0 = vld [vmem:[%s13507_s1 + $0xb0] sm:$0xff]   ;;  %v8850_v1 = vld [vmem:[%s13509_s3 + $0xa0] sm:$0xff]   ;;  %v8852_v2 = vld [vmem:[%s13509_s3 + $0xa8] sm:$0xff]  }
  0x16   :  { %v8816_v5 = vld [vmem:[%s13507_s1 + $0xb8] sm:$0xff]   ;;  %v8817_v7 = vld [vmem:[%s13507_s1 + $0xc0] sm:$0xff]   ;;  %v8854_v8 = vld [vmem:[%s13509_s3 + $0xb0] sm:$0xff]  }
  0x17   :  { %v8856_v10 = vld [vmem:[%s13509_s3 + $0xb8] sm:$0xff]   ;;  %v8830_v58 = vld [vmem:[%s13508_s2 + $0x28] sm:$0xff]   ;;  %vm11262_vm9 = vmand %vm3690_vm7, %vm3691_vm8 }
  0x18   :  { %vm12289_vm12 = vmor %vm4551_vm10, %vm4552_vm11 }
  0x1a   :  { %8148 = vmatmul.mubr.msk.bf16.gmra.mrb[8].mxu0 %vm947_vm2, %v8766_v11 }
  0x1b   :  { %8151 = vmatprep.mubr.msk.bf16.mxu0 %vm947_vm2, %v8767_v12 }
  0x1c   :  { %8368 = vmatmul.mubr.msk.bf16.gmra.mrb[4].mxu1 %vm947_vm2, %v8848_v62 }
  0x1d   :  { %8371 = vmatprep.mubr.msk.bf16.mxu1 %vm947_vm2, %v8850_v1 }
  0x22   :  { %8152 = vmatmul.mubr.msk.bf16.gmra.mrb[12].mxu0 %vm947_vm2, %v8768_v13  ;;  %v8818_v13 = vld [vmem:[%s13507_s1 + $0xc8] sm:$0xff]  }
  0x23   :  { %8155 = vmatprep.mubr.msk.bf16.mxu0 %vm947_vm2, %v8769_v14 }
  0x24   :  { %8372 = vmatmul.mubr.msk.bf16.gmra.mrb[8].mxu1 %vm947_vm2, %v8852_v2  ;;  %v8833_v2 = vld [vmem:[%s13508_s2 + $0x40] sm:$0xff]  }
  0x25   :  { %8375 = vmatprep.mubr.msk.bf16.mxu1 %vm947_vm2, %v8854_v8 }
  0x2a   :  { %8156 = vmatmul.mubr.msk.bf16.gmra.mrb[16].mxu0 %vm947_vm2, %v8770_v15  ;;  %v8819_v15 = vld [vmem:[%s13507_s1 + $0xd0] sm:$0xff]  }
  0x2b   :  { %8159 = vmatprep.mubr.msk.bf16.mxu0 %vm947_vm2, %v8771_v16  ;;  %v8858_v16 = vld [vmem:[%s13509_s3 + $0xc0] sm:$0xff]  }
  0x2c   :  { %8376 = vmatmul.mubr.msk.bf16.gmra.mrb[12].mxu1 %vm947_vm2, %v8856_v10  ;;  %v8834_v10 = vld [vmem:[%s13508_s2 + $0x48] sm:$0xff]  }
  0x2d   :  { %8379 = vmatprep.mubr.msk.bf16.mxu1 %vm947_vm2, %v8858_v16 }
  0x32   :  { %8160 = vmatmul.mubr.msk.bf16.gmra.mrb[20].mxu0 %vm947_vm2, %v8772_v17 }
  0x33   :  { %8163 = vmatprep.mubr.msk.bf16.mxu0 %vm947_vm2, %v8773_v18  ;;  %v8860_v18 = vld [vmem:[%s13509_s3 + $0xc8] sm:$0xff]  }
  0x34   :  { %8380 = vmatmul.mubr.msk.bf16.gmra.mrb[16].mxu1 %vm947_vm2, %v8860_v18 }
  0x3a   :  { %8164 = vmatmul.mubr.msk.bf16.gmra.mrb[24].mxu0 %vm947_vm2, %v8774_v19  ;;  %v8914_v19 = vmov 0  }
  0x3b   :  { %8167 = vmatprep.mubr.msk.bf16.mxu0 %vm947_vm2, %v8775_v20  ;;  %3918 = vrot.lane.b32.xlu0 %v8914_v19, %s8915_s24 }
  0x42   :  { %8168 = vmatmul.mubr.msk.bf16.gmra.mrb[28].mxu0 %vm947_vm2, %v8776_v21 }
  0x43   :  { %8171 = vmatprep.mubr.msk.bf16.mxu0 %vm947_vm2, %v8777_v22  ;;  %v8820_v22 = vld [vmem:[%s13507_s1 + $0xd8] sm:$0xff]  }
  0x4a   :  { %8172 = vmatmul.mubr.msk.bf16.gmra.mrb[32].mxu0 %vm947_vm2, %v8778_v23 }
  0x4b   :  { %8175 = vmatprep.mubr.msk.bf16.mxu0 %vm947_vm2, %v8779_v24  ;;  %v8821_v24 = vld [vmem:[%s13507_s1 + $0xe0] sm:$0xff]  }
  0x52   :  { %8176 = vmatmul.mubr.msk.bf16.gmra.mrb[36].mxu0 %vm947_vm2, %v8780_v25  ;;  %v8862_v25 = vld [vmem:[%s13509_s3 + $0xd0] sm:$0xff]  }
  0x53   :  { %8179 = vmatprep.mubr.msk.bf16.mxu0 %vm947_vm2, %v8781_v26  ;;  %8383 = vmatprep.mubr.msk.bf16.mxu1 %vm947_vm2, %v8862_v25  ;;  %v8837_v25 = vld [vmem:[%s13508_s2 + $0x60] sm:$0xff]  }
  0x5a   :  { %8180 = vmatmul.mubr.msk.bf16.gmra.mrb[40].mxu0 %vm947_vm2, %v8782_v27  ;;  %v8864_v27 = vld [vmem:[%s13509_s3 + $0xd8] sm:$0xff]  }
  0x5b   :  { %8183 = vmatprep.mubr.msk.bf16.mxu0 %vm947_vm2, %v8783_v28  ;;  %8384 = vmatmul.mubr.msk.bf16.gmra.mrb[20].mxu1 %vm947_vm2, %v8864_v27 }
  0x62   :  { %8184 = vmatmul.mubr.msk.bf16.gmra.mrb[44].mxu0 %vm947_vm2, %v8784_v29 }
  0x63   :  { %8187 = vmatprep.mubr.msk.bf16.mxu0 %vm947_vm2, %v8785_v30  ;;  %v8822_v30 = vld [vmem:[%s13507_s1 + $0xe8] sm:$0xff]  }
  0x6a   :  { %8188 = vmatmul.mubr.msk.bf16.gmra.mrb[48].mxu0 %vm947_vm2, %v8786_v31 }
  0x6b   :  { %8191 = vmatprep.mubr.msk.bf16.mxu0 %vm947_vm2, %v8787_v32  ;;  %v8823_v32 = vld [vmem:[%s13507_s1 + $0xf0] sm:$0xff]  }
  0x72   :  { %8192 = vmatmul.mubr.msk.bf16.gmra.mrb[52].mxu0 %vm947_vm2, %v8788_v33  ;;  %v8866_v33 = vld [vmem:[%s13509_s3 + $0xe0] sm:$0xff]  }
  0x73   :  { %8195 = vmatprep.mubr.msk.bf16.mxu0 %vm947_vm2, %v8789_v34  ;;  %8387 = vmatprep.mubr.msk.bf16.mxu1 %vm947_vm2, %v8866_v33  ;;  %v8838_v33 = vld [vmem:[%s13508_s2 + $0x68] sm:$0xff]  }
  0x7a   :  { %8196 = vmatmul.mubr.msk.bf16.gmra.mrb[56].mxu0 %vm947_vm2, %v8790_v35  ;;  %v8868_v35 = vld [vmem:[%s13509_s3 + $0xe8] sm:$0xff]  }
  0x7b   :  { %8199 = vmatprep.mubr.msk.bf16.mxu0 %vm947_vm2, %v8791_v36  ;;  %8388 = vmatmul.mubr.msk.bf16.gmra.mrb[24].mxu1 %vm947_vm2, %v8868_v35 }
  0x82   :  { %8200 = vmatmul.mubr.msk.bf16.gmra.mrb[60].mxu0 %vm947_vm2, %v8792_v37 }
  0x83   :  { %8203 = vmatprep.mubr.msk.bf16.mxu0 %vm947_vm2, %v8793_v38  ;;  %v8824_v38 = vld [vmem:[%s13507_s1 + $0xf8] sm:$0xff]  }
  0x8a   :  { %8204 = vmatmul.mubr.msk.bf16.gmra.mrb[64].mxu0 %vm947_vm2, %v8794_v39 }
  0x8b   :  { %8207 = vmatprep.mubr.msk.bf16.mxu0 %vm947_vm2, %v8795_v40  ;;  %v8825_v40 = vld [vmem:[%s13508_s2] sm:$0xff]  }
  0x92   :  { %8208 = vmatmul.mubr.msk.bf16.gmra.mrb[68].mxu0 %vm947_vm2, %v8796_v41  ;;  %v8870_v41 = vld [vmem:[%s13509_s3 + $0xf0] sm:$0xff]  }
  0x93   :  { %8211 = vmatprep.mubr.msk.bf16.mxu0 %vm947_vm2, %v8797_v42  ;;  %8391 = vmatprep.mubr.msk.bf16.mxu1 %vm947_vm2, %v8870_v41 }
  0x9a   :  { %8212 = vmatmul.mubr.msk.bf16.gmra.mrb[72].mxu0 %vm947_vm2, %v8798_v43  ;;  %v8872_v43 = vld [vmem:[%s13509_s3 + $0xf8] sm:$0xff]  }
  0x9b   :  { %8215 = vmatprep.mubr.msk.bf16.mxu0 %vm947_vm2, %v8799_v44  ;;  %8392 = vmatmul.mubr.msk.bf16.gmra.mrb[28].mxu1 %vm947_vm2, %v8872_v43 }
  0xa2   :  { %8216 = vmatmul.mubr.msk.bf16.gmra.mrb[76].mxu0 %vm947_vm2, %v8800_v45 }
  0xa3   :  { %8219 = vmatprep.mubr.msk.bf16.mxu0 %vm947_vm2, %v8801_v46  ;;  %v8826_v46 = vld [vmem:[%s13508_s2 + $0x8] sm:$0xff]  }
  0xaa   :  { %8220 = vmatmul.mubr.msk.bf16.gmra.mrb[80].mxu0 %vm947_vm2, %v8802_v47 }
  0xab   :  { %8223 = vmatprep.mubr.msk.bf16.mxu0 %vm947_vm2, %v8803_v48  ;;  %v8827_v48 = vld [vmem:[%s13508_s2 + $0x10] sm:$0xff]  }
  0xb2   :  { %8224 = vmatmul.mubr.msk.bf16.gmra.mrb[84].mxu0 %vm947_vm2, %v8804_v49 }
  0xb3   :  { %8227 = vmatprep.mubr.msk.bf16.mxu0 %vm947_vm2, %v8805_v50 }
  0xba   :  { %8228 = vmatmul.mubr.msk.bf16.gmra.mrb[88].mxu0 %vm947_vm2, %v8806_v51 }
  0xbb   :  { %8231 = vmatprep.mubr.msk.bf16.mxu0 %vm947_vm2, %v8807_v52  ;;  %v8828_v52 = vld [vmem:[%s13508_s2 + $0x18] sm:$0xff]  }
  0xc2   :  { %8232 = vmatmul.mubr.msk.bf16.gmra.mrb[92].mxu0 %vm947_vm2, %v8808_v53 }
  0xc3   :  { %8235 = vmatprep.mubr.msk.bf16.mxu0 %vm947_vm2, %v8809_v54  ;;  %v8829_v54 = vld [vmem:[%s13508_s2 + $0x20] sm:$0xff]  }
  0xca   :  { %8236 = vmatmul.mubr.msk.bf16.gmra.mrb[96].mxu0 %vm947_vm2, %v8810_v55 }
  0xcb   :  { %8239 = vmatprep.mubr.msk.bf16.mxu0 %vm947_vm2, %v8811_v56 }
  0xd2   :  { %8240 = vmatmul.mubr.msk.bf16.gmra.mrb[100].mxu0 %vm947_vm2, %v8812_v59 }
  0xd3   :  { %8243 = vmatprep.mubr.msk.bf16.mxu0 %vm947_vm2, %v8813_v60  ;;  %v8831_v60 = vld [vmem:[%s13508_s2 + $0x30] sm:$0xff]  }
  0xda   :  { %8244 = vmatmul.mubr.msk.bf16.gmra.mrb[104].mxu0 %vm947_vm2, %v8814_v63 }
  0xdb   :  { %8247 = vmatprep.mubr.msk.bf16.mxu0 %vm947_vm2, %v8815_v0  ;;  %v8832_v0 = vld [vmem:[%s13508_s2 + $0x38] sm:$0xff]  }
  0xdd   :  { %v9222_v3 = vpop.f32.mrb[0].mxu0 }
  0xde   :  { %v9224_v4 = vpop.f32.mrb[1].mxu0 }
  0xdf   :  { %v9229_v6 = vpop.f32.mrb[2].mxu0 }
  0xe0   :  { %v9237_v9 = vpop.f32.mrb[3].mxu0 }
  0xe2   :  { %8248 = vmatmul.mubr.msk.bf16.gmra.mrb[108].mxu0 %vm947_vm2, %v8816_v5 }
  0xe3   :  { %8251 = vmatprep.mubr.msk.bf16.mxu0 %vm947_vm2, %v8817_v7 }
  0xe5   :  { %v9246_v11 = vpop.f32.mrb[4].mxu0 }
  0xe6   :  { %v9248_v12 = vpop.f32.mrb[5].mxu0 }
  0xe7   :  { %v9253_v14 = vpop.f32.mrb[6].mxu0 }
  0xe8   :  { %v9261_v17 = vpop.f32.mrb[7].mxu0 }
  0xea   :  { %8252 = vmatmul.mubr.msk.bf16.gmra.mrb[112].mxu0 %vm947_vm2, %v8818_v13 }
  0xeb   :  { %8255 = vmatprep.mubr.msk.bf16.mxu0 %vm947_vm2, %v8819_v15  ;;  %v8835_v15 = vld [vmem:[%s13508_s2 + $0x50] sm:$0xff]  }
  0xed   :  { %v9271_v20 = vpop.f32.mrb[8].mxu0 }
  0xee   :  { %v9273_v21 = vpop.f32.mrb[9].mxu0 }
  0xef   :  { %v9278_v23 = vpop.f32.mrb[10].mxu0 }
  0xf0   :  { %v9286_v26 = vpop.f32.mrb[11].mxu0 }
  0xf2   :  { %8256 = vmatmul.mubr.msk.bf16.gmra.mrb[116].mxu0 %vm947_vm2, %v8820_v22  ;;  %v8836_v22 = vld [vmem:[%s13508_s2 + $0x58] sm:$0xff]  }
  0xf3   :  { %8259 = vmatprep.mubr.msk.bf16.mxu0 %vm947_vm2, %v8821_v24 }
  0xf5   :  { %v9295_v28 = vpop.f32.mrb[12].mxu0 }
  0xf6   :  { %v9297_v29 = vpop.f32.mrb[13].mxu0 }
  0xf7   :  { %v9302_v31 = vpop.f32.mrb[14].mxu0 }
  0xf8   :  { %v9310_v34 = vpop.f32.mrb[15].mxu0 }
  0xfa   :  { %8260 = vmatmul.mubr.msk.bf16.gmra.mrb[120].mxu0 %vm947_vm2, %v8822_v30 }
  0xfb   :  { %8263 = vmatprep.mubr.msk.bf16.mxu0 %vm947_vm2, %v8823_v32 }
  0xfd   :  { %v9319_v36 = vpop.f32.mrb[16].mxu0 }
  0xfe   :  { %v9321_v37 = vpop.f32.mrb[17].mxu0 }
  0xff   :  { %v9326_v39 = vpop.f32.mrb[18].mxu0 }
 0x100   :  { %v9334_v42 = vpop.f32.mrb[19].mxu0 }
 0x102   :  { %8264 = vmatmul.mubr.msk.bf16.gmra.mrb[124].mxu0 %vm947_vm2, %v8824_v38  ;;  %v8839_v38 = vld [vmem:[%s13508_s2 + $0x70] sm:$0xff]  }
 0x103   :  { %8267 = vmatprep.mubr.msk.bf16.mxu0 %vm947_vm2, %v8825_v40 }
 0x105   :  { %v9343_v44 = vpop.f32.mrb[20].mxu0 }
 0x106   :  { %v9345_v45 = vpop.f32.mrb[21].mxu0 }
 0x107   :  { %v9350_v47 = vpop.f32.mrb[22].mxu0 }
 0x108   :  { %v9355_v49 = vpop.f32.mrb[23].mxu0 }
 0x10a   :  { %8268 = vmatmul.mubr.msk.bf16.gmra.mrb[128].mxu0 %vm947_vm2, %v8826_v46  ;;  %v8840_v46 = vld [vmem:[%s13508_s2 + $0x78] sm:$0xff]  }
 0x10b   :  { %8271 = vmatprep.mubr.msk.bf16.mxu0 %vm947_vm2, %v8827_v48 }
 0x10d   :  { %v9359_v50 = vpop.f32.mrb[24].mxu0 }
 0x10e   :  { %v9361_v51 = vpop.f32.mrb[25].mxu0 }
 0x10f   :  { %v9366_v53 = vpop.f32.mrb[26].mxu0 }
 0x110   :  { %v9371_v55 = vpop.f32.mrb[27].mxu0 }
 0x112   :  { %8272 = vmatmul.mubr.msk.bf16.gmra.mrb[132].mxu0 %vm947_vm2, %v8828_v52  ;;  %v8841_v52 = vld [vmem:[%s13508_s2 + $0x80] sm:$0xff]  }
 0x113   :  { %8275 = vmatprep.mubr.msk.bf16.mxu0 %vm947_vm2, %v8829_v54 }
 0x115   :  { %v9375_v56 = vpop.f32.mrb[28].mxu0 }
 0x116   :  { %v9377_v57 = vpop.f32.mrb[29].mxu0 }
 0x117   :  { %v9382_v59 = vpop.f32.mrb[30].mxu0 }
 0x118   :  { %v9387_v61 = vpop.f32.mrb[31].mxu0 }
 0x11a   :  { %8276 = vmatmul.mubr.msk.bf16.gmra.mrb[136].mxu0 %vm947_vm2, %v8830_v58 }
 0x11b   :  { %8279 = vmatprep.mubr.msk.bf16.mxu0 %vm947_vm2, %v8831_v60 }
 0x11d   :  { %v9391_v62 = vpop.f32.mrb[32].mxu0 }
 0x11e   :  { %v9393_v63 = vpop.f32.mrb[33].mxu0 }
 0x11f   :  { %v9398_v1 = vpop.f32.mrb[34].mxu0 }
 0x120   :  { %v9403_v5 = vpop.f32.mrb[35].mxu0 }
 0x122   :  { %8280 = vmatmul.mubr.msk.bf16.gmra.mrb[140].mxu0 %vm947_vm2, %v8832_v0  ;;  %v8843_v0 = vld [vmem:[%s13508_s2 + $0x88] sm:$0xff]  }
 0x123   :  { %8283 = vmatprep.mubr.msk.bf16.mxu0 %vm947_vm2, %v8833_v2 }
 0x125   :  { %v9407_v7 = vpop.f32.mrb[36].mxu0 }
 0x126   :  { %v9409_v8 = vpop.f32.mrb[37].mxu0 }
 0x127   :  { %v9414_v13 = vpop.f32.mrb[38].mxu0 }
 0x128   :  { %v9419_v16 = vpop.f32.mrb[39].mxu0 }
 0x12a   :  { %8284 = vmatmul.mubr.msk.bf16.gmra.mrb[144].mxu0 %vm947_vm2, %v8834_v10  ;;  %v8845_v10 = vld [vmem:[%s13508_s2 + $0x90] sm:$0xff]  }
 0x12b   :  { %8287 = vmatprep.mubr.msk.bf16.mxu0 %vm947_vm2, %v8835_v15  ;;  %v9486_v15 = vld [vmem:[%s13510_s5] ss:$0 sm:$0xff] }
 0x12d   :  { %v9423_v18 = vpop.f32.mrb[40].mxu0 }
 0x12e   :  { %v9425_v19 = vpop.f32.mrb[41].mxu0 }
 0x12f   :  { %v9430_v24 = vpop.f32.mrb[42].mxu0 }
 0x130   :  { %v9435_v27 = vpop.f32.mrb[43].mxu0 }
 0x132   :  { %8288 = vmatmul.mubr.msk.bf16.gmra.mrb[148].mxu0 %vm947_vm2, %v8836_v22 }
 0x133   :  { %8291 = vmatprep.mubr.msk.bf16.mxu0 %vm947_vm2, %v8837_v25  ;;  %v2405_v25 = vmul.f32 %v9222_v3, %v9486_v15  ;;  %v8847_v3 = vld [vmem:[%s13508_s2 + $0x98] sm:$0xff]  }
 0x135   :  { %v9439_v30 = vpop.f32.mrb[44].mxu0 }
 0x136   :  { %v9441_v32 = vpop.f32.mrb[45].mxu0 }
 0x137   :  { %13670 = vst [vmem:[#allocation2_spill] sm:$0xff] %v9441_v32  ;;  %v9446_v35 = vpop.f32.mrb[46].mxu0 }
 0x138   :  { %13671 = vst [vmem:[#allocation3_spill] sm:$0xff] %v9446_v35  ;;  %v9451_v40 = vpop.f32.mrb[47].mxu0 }
 0x139   :  { %13672 = vst [vmem:[#allocation4_spill] sm:$0xff] %v9451_v40 }
 0x13a   :  { %8292 = vmatmul.mubr.msk.bf16.gmra.mrb[152].mxu0 %vm947_vm2, %v8838_v33  ;;  %v9497_v33 = vld [vmem:[%s13511_s6] ss:$0 sm:$0xff] }
 0x13b   :  { %8295 = vmatprep.mubr.msk.bf16.mxu0 %vm947_vm2, %v8839_v38  ;;  %v2403_v38 = vmul.f32 %v9486_v15, %v9224_v4  ;;  %v8849_v4 = vld [vmem:[%s13508_s2 + $0xa0] sm:$0xff]  }
 0x13d   :  { %v9455_v41 = vpop.f32.mrb[48].mxu0 }
 0x13e   :  { %13673 = vst [vmem:[#allocation5_spill] sm:$0xff] %v9455_v41  ;;  %v9457_v43 = vpop.f32.mrb[49].mxu0 }
 0x13f   :  { %13674 = vst [vmem:[#allocation6_spill] sm:$0xff] %v9457_v43  ;;  %v9462_v48 = vpop.f32.mrb[50].mxu0 }
 0x140   :  { %13675 = vst [vmem:[#allocation7_spill] sm:$0xff] %v9462_v48  ;;  %v9467_v54 = vpop.f32.mrb[51].mxu0 }
 0x141   :  { %13676 = vst [vmem:[#allocation8_spill] sm:$0xff] %v9467_v54 }
 0x142   :  { %8296 = vmatmul.mubr.msk.bf16.gmra.mrb[156].mxu0 %vm947_vm2, %v8840_v46  ;;  %v2406_v46 = vmul.f32 %v9229_v6, %v9486_v15  ;;  %v9521_v6 = vadd.f32 %v9497_v33, %v2403_v38  ;;  %v2408_v38 = vmul.f32 %v9486_v15, %v9261_v17  ;;  %v2412_v17 = vmul.f32 %v9486_v15, %v9286_v26 }
 0x143   :  { %8299 = vmatprep.mubr.msk.bf16.mxu0 %vm947_vm2, %v8841_v52 }
 0x144   :  { %v9569_v26 = vadd.f32 %v9497_v33, %v2408_v38  ;;  %v2421_v38 = vmul.f32 %v9319_v36, %v9486_v15 }
 0x145   :  { %v9471_v58 = vpop.f32.mrb[52].mxu0 }
 0x146   :  { %13677 = vst [vmem:[#allocation9_spill] sm:$0xff] %v9471_v58  ;;  %v9473_v60 = vpop.f32.mrb[53].mxu0 }
 0x147   :  { %13678 = vst [vmem:[#allocation10_spill] sm:$0xff] %v9473_v60  ;;  %v9478_v2 = vpop.f32.mrb[54].mxu0  ;;  %v2410_v60 = vmul.f32 %v9253_v14, %v9486_v15  ;;  %v2414_v14 = vmul.f32 %v9278_v23, %v9486_v15 }
 0x148   :  { %13679 = vst [vmem:[#allocation11_spill] sm:$0xff] %v9478_v2  ;;  %v9488_v22 = vpop.f32.mrb[55].mxu0 }
 0x149   :  { %13680 = vst [vmem:[#allocation12_spill] sm:$0xff] %v9488_v22  ;;  %v9566_v23 = vadd.f32 %v9497_v33, %v2410_v60  ;;  %v2416_v60 = vmul.f32 %v9486_v15, %v9310_v34  ;;  %v2419_v34 = vmul.f32 %v9486_v15, %v9321_v37  ;;  %v2420_v37 = vmul.f32 %v9486_v15, %v9334_v42 }
 0x14a   :  { %8300 = vmatmul.mubr.msk.bf16.gmra.mrb[160].mxu0 %vm947_vm2, %v8843_v0  ;;  %v2404_v0 = vmul.f32 %v9486_v15, %v9237_v9  ;;  %v2409_v9 = vmul.f32 %v9246_v11, %v9486_v15 }
 0x14b   :  { %8303 = vmatprep.mubr.msk.bf16.mxu0 %vm947_vm2, %v8845_v10  ;;  %v9513_v10 = vadd.f32 %v9497_v33, %v2405_v25  ;;  %v2407_v25 = vmul.f32 %v9486_v15, %v9248_v12  ;;  %v9624_v36 = vadd.f32 %v9497_v33, %v2416_v60  ;;  %v9633_v42 = vadd.f32 %v9497_v33, %v2419_v34 }
 0x14c   :  { %v2426_v34 = vmul.f32 %v9350_v47, %v9486_v15  ;;  %v8857_v47 = vld [vmem:[%s13508_s2 + $0xc0] sm:$0xff]  }
 0x14d   :  { %v9503_v52 = vpop.f32.mrb[56].mxu0 }
 0x14e   :  { %13681 = vst [vmem:[#allocation13_spill] sm:$0xff] %v9503_v52  ;;  %v9507_v22 = vpop.f32.mrb[57].mxu0  ;;  %v9528_v52 = vadd.f32 %v9497_v33, %v2406_v46  ;;  %v2413_v46 = vmul.f32 %v9271_v20, %v9486_v15  ;;  %v9556_v20 = vadd.f32 %v9497_v33, %v2407_v25  ;;  %v2418_v25 = vmul.f32 %v9302_v31, %v9486_v15  ;;  %v8853_v31 = vld [vmem:[%s13508_s2 + $0xb0] sm:$0xff]  }
 0x14f   :  { %13682 = vst [vmem:[#allocation14_spill] sm:$0xff] %v9507_v22  ;;  %v9515_v2 = vpop.f32.mrb[58].mxu0 }
 0x150   :  { %13683 = vst [vmem:[#allocation15_spill] sm:$0xff] %v9515_v2  ;;  %v9525_v22 = vpop.f32.mrb[59].mxu0  ;;  %v9533_v2 = vadd.f32 %v9497_v33, %v2404_v0  ;;  %v9548_v0 = vadd.f32 %v9497_v33, %v2409_v9  ;;  %v9616_v54 = vadd.f32 %v9497_v33, %v2418_v25  ;;  %v2424_v25 = vmul.f32 %v9486_v15, %v9355_v49 }
 0x151   :  { %13684 = vst [vmem:[#allocation16_spill] sm:$0xff] %v9525_v22  ;;  %v2411_v22 = vmul.f32 %v9486_v15, %v9273_v21  ;;  %v2417_v21 = vmul.f32 %v9295_v28, %v9486_v15  ;;  %v8851_v28 = vld [vmem:[%s13508_s2 + $0xa8] sm:$0xff]  }
 0x152   :  { %8304 = vmatmul.mubr.msk.bf16.gmra.mrb[164].mxu0 %vm947_vm2, %v8847_v3 }
 0x153   :  { %8307 = vmatprep.mubr.msk.bf16.mxu0 %vm947_vm2, %v8849_v4  ;;  %v2415_v4 = vmul.f32 %v9486_v15, %v9297_v29  ;;  %v9579_v29 = vadd.f32 %v9497_v33, %v2413_v46  ;;  %v9582_v9 = vadd.f32 %v9497_v33, %v2411_v22  ;;  %v9595_v46 = vadd.f32 %v9497_v33, %v2414_v14 }
 0x154   :  { %v9598_v22 = vadd.f32 %v9497_v33, %v2412_v17  ;;  %v2422_v14 = vmul.f32 %v9326_v39, %v9486_v15  ;;  %v9627_v39 = vadd.f32 %v9497_v33, %v2421_v38  ;;  %v2423_v38 = vmul.f32 %v9486_v15, %v9345_v45 }
 0x155   :  { %v9562_v12 = vpop.f32.mrb[60].mxu0  ;;  %v9609_v58 = vadd.f32 %v9497_v33, %v2415_v4  ;;  %v9646_v17 = vadd.f32 %v9497_v33, %v2420_v37 }
 0x156   :  { %13685 = vst [vmem:[#allocation17_spill] sm:$0xff] %v9562_v12  ;;  %v9573_v3 = vpop.f32.mrb[61].mxu0  ;;  %v9670_v49 = vadd.f32 %v9497_v33, %v2423_v38  ;;  %v9684_v38 = vadd.f32 %v9497_v33, %v2424_v25  ;;  %v8859_v25 = vld [vmem:[%s13508_s2 + $0xc8] sm:$0xff]  }
 0x157   :  { %13686 = vst [vmem:[#allocation18_spill] sm:$0xff] %v9573_v3  ;;  %v9588_v11 = vpop.f32.mrb[62].mxu0 }
 0x158   :  { %13687 = vst [vmem:[#allocation19_spill] sm:$0xff] %v9588_v11  ;;  %v9602_v12 = vpop.f32.mrb[63].mxu0  ;;  %v9606_v11 = vadd.f32 %v9497_v33, %v2417_v21  ;;  %v9640_v21 = vadd.f32 %v9497_v33, %v2422_v14  ;;  %v8855_v14 = vld [vmem:[%s13508_s2 + $0xb8] sm:$0xff]  }
 0x159   :  { %13688 = vst [vmem:[#allocation20_spill] sm:$0xff] %v9602_v12 }
 0x15a   :  { %8308 = vmatmul.mubr.msk.bf16.gmra.mrb[168].mxu0 %vm947_vm2, %v8851_v28  ;;  %v2425_v28 = vmul.f32 %v9343_v44, %v9486_v15 }
 0x15b   :  { %8311 = vmatprep.mubr.msk.bf16.mxu0 %vm947_vm2, %v8853_v31 }
 0x15c   :  { %v9664_v12 = vadd.f32 %v9497_v33, %v2425_v28  ;;  %v8889_v28 = vld [vmem:[%s13512_s7 + $0x30] sm:$0xff]  }
 0x15d   :  { %v8205_v31 = vpop.f32.mrb[64].mxu0  ;;  %8395 = vmatprep.subr.bf16.mxu1 %v8889_v28 }
 0x15e   :  { %v2469_v44 = vmul.f32 %v8205_v31, %v9486_v15  ;;  %v1629_v4 = vpop.f32.mrb[65].mxu0  ;;  %8396 = vmatpush3.bf16.msra.mxu1 %v8889_v28  ;;  %v2430_v28 = vmul.f32 %v9366_v53, %v9486_v15 }
 0x15f   :  { %v2467_v37 = vmul.f32 %v9486_v15, %v1629_v4  ;;  %v8206_v3 = vpop.f32.mrb[66].mxu0 }
 0x160   :  { %v2732_v48 = vadd.f32 %v9497_v33, %v2469_v44  ;;  %v2470_v60 = vmul.f32 %v8206_v3, %v9486_v15  ;;  %v1632_v45 = vpop.f32.mrb[67].mxu0  ;;  %v9679_v44 = vadd.f32 %v9497_v33, %v2426_v34 }
 0x161   :  { %v2730_v4 = vadd.f32 %v9497_v33, %v2467_v37  ;;  %v2468_v41 = vmul.f32 %v9486_v15, %v1632_v45  ;;  %v2429_v45 = vmul.f32 %v9359_v50, %v9486_v15  ;;  %v13692_v50 = vmax.f32 %v9533_v2, 0.0 }
 0x162   :  { %v2988_v3 = vmax.f32 %v2732_v48, 0.0  ;;  %v2733_v43 = vadd.f32 %v9497_v33, %v2470_v60  ;;  %8312 = vmatmul.mubr.msk.bf16.gmra.mrb[172].mxu0 %vm947_vm2, %v8855_v14  ;;  %v2427_v48 = vmul.f32 %v9486_v15, %v9361_v51  ;;  %v13689_v60 = vmax.f32 %v9513_v10, 0.0  ;;  %v8861_v51 = vld [vmem:[%s13508_s2 + $0xd0] sm:$0xff]  }
 0x163   :  { %v2986_v37 = vmax.f32 %v2730_v4, 0.0  ;;  %v2731_v40 = vadd.f32 %v9497_v33, %v2468_v41  ;;  %8315 = vmatprep.mubr.msk.bf16.mxu0 %vm947_vm2, %v8857_v47  ;;  %v13690_v41 = vmax.f32 %v9521_v6, 0.0 }
 0x164   :  { %v3180_v14 = vmax.f32 %v13689_v60, %v2988_v3  ;;  %v2989_v31 = vmax.f32 %v2733_v43, 0.0  ;;  %v8890_v43 = vld [vmem:[%s13512_s7 + $0x38] sm:$0xff]   ;;  %v13691_v3 = vmax.f32 %v9528_v52, 0.0  ;;  %v9721_v53 = vadd.f32 %v9497_v33, %v2427_v48 }
 0x165   :  { %v3178_v47 = vmax.f32 %v13690_v41, %v2986_v37  ;;  %v2987_v4 = vmax.f32 %v2731_v40, 0.0  ;;  %v8209_v35 = vpop.f32.mrb[68].mxu0  ;;  %v9715_v41 = vadd.f32 %v9497_v33, %v2429_v45  ;;  %8397 = vmatprep.subr.bf16.mxu1 %v8890_v43  ;;  %v2428_v45 = vmul.f32 %v9486_v15, %v9371_v55 }
 0x166   :  { %v3181_v60 = vmax.f32 %v13691_v3, %v2989_v31  ;;  %v2473_v6 = vmul.f32 %v8209_v35, %v9486_v15  ;;  %v1645_v40 = vpop.f32.mrb[69].mxu0  ;;  %8398 = vmatpush3.bf16.msra.mxu1 %v8890_v43 }
 0x167   :  { %v3179_v34 = vmax.f32 %v13692_v50, %v2987_v4  ;;  %v2471_v32 = vmul.f32 %v9486_v15, %v1645_v40  ;;  %v8210_v10 = vpop.f32.mrb[70].mxu0  ;;  %v9730_v40 = vadd.f32 %v9497_v33, %v2430_v28  ;;  %v2948_v55 = vmax.f32 %v9715_v41, 0.0 }
 0x168   :  { %v2736_v52 = vadd.f32 %v9497_v33, %v2473_v6  ;;  %v2474_v35 = vmul.f32 %v8210_v10, %v9486_v15  ;;  %v1648_v31 = vpop.f32.mrb[71].mxu0  ;;  %v3307_v3 = vmax.f32 %v3180_v14, %v3181_v60  ;;  %v8891_v14 = vld [vmem:[%s13512_s7 + $0x40] sm:$0xff]   ;;  %v8863_v6 = vld [vmem:[%s13508_s2 + $0xd8] sm:$0xff]  }
 0x169   :  { %v2734_v2 = vadd.f32 %v9497_v33, %v2471_v32  ;;  %v2472_v50 = vmul.f32 %v9486_v15, %v1648_v31  ;;  %v3306_v4 = vmax.f32 %v3178_v47, %v3179_v34  ;;  %v2433_v32 = vmul.f32 %v9375_v56, %v9486_v15  ;;  %8399 = vmatprep.subr.bf16.mxu1 %v8891_v14 }
 0x16a   :  { %v2992_v48 = vmax.f32 %v2736_v52, 0.0  ;;  %v2737_v37 = vadd.f32 %v9497_v33, %v2474_v35  ;;  %8316 = vmatmul.mubr.msk.bf16.gmra.mrb[176].mxu0 %vm947_vm2, %v8859_v25  ;;  %v3339_v10 = vpack.c.bf16 %v3307_v3, %v3307_v3  ;;  %v13693_v47 = vmax.f32 %v9548_v0, 0.0  ;;  %8400 = vmatpush3.bf16.msra.mxu1 %v8891_v14 }
 0x16b   :  { %v2990_v43 = vmax.f32 %v2734_v2, 0.0  ;;  %v2735_v34 = vadd.f32 %v9497_v33, %v2472_v50  ;;  %8319 = vmatprep.mubr.msk.bf16.mxu0 %vm947_vm2, %v8861_v51  ;;  %v2946_v52 = vmax.f32 %v9721_v53, 0.0  ;;  %v9752_v56 = vadd.f32 %v9497_v33, %v2428_v45 }
 0x16c   :  { %v3184_v28 = vmax.f32 %v13693_v47, %v2992_v48  ;;  %v2993_v60 = vmax.f32 %v2737_v37, 0.0  ;;  %v9745_v25 = vsel %vm3725_vm3, %v3339_v10, 0  ;;  %v13694_v35 = vmax.f32 %v9556_v20, 0.0  ;;  %v8865_v37 = vld [vmem:[%s13508_s2 + $0xe0] sm:$0xff]  }
 0x16d   :  { %v2991_v31 = vmax.f32 %v2735_v34, 0.0  ;;  %4143 = vrot.lane.b32.xlu0 %v9745_v25, %s8916_s26  ;;  %v8213_v0 = vpop.f32.mrb[72].mxu0  ;;  %v2949_v3 = vmax.f32 %v9730_v40, 0.0  ;;  %v2431_v45 = vmul.f32 %v9486_v15, %v9377_v57  ;;  %v13695_v2 = vmax.f32 %v9566_v23, 0.0  ;;  %v8892_v57 = vld [vmem:[%s13512_s7 + $0x48] sm:$0xff]  }
 0x16e   :  { %v3182_v51 = vmax.f32 %v13694_v35, %v2990_v43  ;;  %v2477_v50 = vmul.f32 %v8213_v0, %v9486_v15  ;;  %v1661_v48 = vpop.f32.mrb[73].mxu0  ;;  %v9768_v10 = vadd.f32 %v9497_v33, %v2433_v32  ;;  %v13696_v43 = vmax.f32 %v9569_v26, 0.0  ;;  %8401 = vmatprep.subr.bf16.mxu1 %v8892_v57 }
 0x16f   :  { %v3185_v20 = vmax.f32 %v13695_v2, %v2993_v60  ;;  %v2475_v47 = vmul.f32 %v9486_v15, %v1661_v48  ;;  %v8214_v14 = vpop.f32.mrb[74].mxu0  ;;  %v3338_v35 = vpack.c.bf16 %v3306_v4, %v3306_v4  ;;  %v2434_v23 = vmul.f32 %v9382_v59, %v9486_v15  ;;  %8402 = vmatpush3.bf16.msra.mxu1 %v8892_v57 }
 0x170   :  { %v3183_v34 = vmax.f32 %v13696_v43, %v2991_v31  ;;  %v2740_v60 = vadd.f32 %v9497_v33, %v2477_v50  ;;  %v2478_v0 = vmul.f32 %v8214_v14, %v9486_v15  ;;  %v1664_v32 = vpop.f32.mrb[75].mxu0  ;;  %v2432_v48 = vmul.f32 %v9486_v15, %v9387_v61 }
 0x171   :  { %v3309_v2 = vmax.f32 %v3184_v28, %v3185_v20  ;;  %v2738_v26 = vadd.f32 %v9497_v33, %v2475_v47  ;;  %v2476_v31 = vmul.f32 %v9486_v15, %v1664_v32  ;;  %4205 = vrot.lane.b32.xlu0 %v9745_v25, %s8915_s24  ;;  %v2947_v28 = vmax.f32 %v9752_v56, 0.0 }
 0x172   :  { %v3308_v4 = vmax.f32 %v3182_v51, %v3183_v34  ;;  %v2996_v43 = vmax.f32 %v2740_v60, 0.0  ;;  %v2741_v59 = vadd.f32 %v9497_v33, %v2478_v0  ;;  %8320 = vmatmul.mubr.msk.bf16.gmra.mrb[180].mxu0 %vm947_vm2, %v8863_v6  ;;  %v9791_v14 = vsel %vm3725_vm3, %v3338_v35, 0 }
 0x173   :  { %v3341_v50 = vpack.c.bf16 %v3309_v2, %v3309_v2  ;;  %v2994_v20 = vmax.f32 %v2738_v26, 0.0  ;;  %v2739_v47 = vadd.f32 %v9497_v33, %v2476_v31  ;;  %8323 = vmatprep.mubr.msk.bf16.mxu0 %vm947_vm2, %v8865_v37  ;;  %v13697_v51 = vmax.f32 %v9579_v29, 0.0 }
 0x174   :  { %v2997_v34 = vmax.f32 %v2741_v59, 0.0  ;;  %v3340_v6 = vpack.c.bf16 %v3308_v4, %v3308_v4  ;;  %v2952_v57 = vmax.f32 %v9768_v10, 0.0  ;;  %v9801_v0 = vadd.f32 %v9497_v33, %v2431_v45  ;;  %v8893_v59 = vld [vmem:[%s13512_s7 + $0x50] sm:$0xff]  }
 0x175   :  { %v3188_v61 = vmax.f32 %v13697_v51, %v2996_v43  ;;  %v9797_v60 = vsel %vm3725_vm3, %v3341_v50, 0  ;;  %v13698_v32 = vmax.f32 %v9582_v9, 0.0  ;;  %v2995_v35 = vmax.f32 %v2739_v47, 0.0  ;;  %4141 = vrot.lane.b32.xlu0 %v9791_v14, %s8916_s26  ;;  %v8217_v29 = vpop.f32.mrb[76].mxu0  ;;  %v8867_v43 = vld [vmem:[%s13508_s2 + $0xe8] sm:$0xff]   ;;  %v8869_v51 = vld [vmem:[%s13508_s2 + $0xf0] sm:$0xff]   ;;  %8403 = vmatprep.subr.bf16.mxu1 %v8893_v59 }
 0x176   :  { %4147 = vrot.lane.b32.xlu1 %v9797_v60, %s8916_s26  ;;  %v9810_v37 = vadd.f32 %v9497_v33, %v2434_v23  ;;  %v9813_v26 = vadd.f32 %v9497_v33, %v2432_v48  ;;  %v13699_v45 = vmax.f32 %v9595_v46, 0.0  ;;  %v2481_v9 = vmul.f32 %v8217_v29, %v9486_v15  ;;  %v1677_v4 = vpop.f32.mrb[77].mxu0  ;;  %8404 = vmatpush3.bf16.msra.mxu1 %v8893_v59 }
 0x177   :  { %v3186_v2 = vmax.f32 %v13698_v32, %v2994_v20  ;;  %v2437_v23 = vmul.f32 %v9391_v62, %v9486_v15  ;;  %v2435_v48 = vmul.f32 %v9486_v15, %v9393_v63  ;;  %v13700_v46 = vmax.f32 %v9598_v22, 0.0  ;;  %v8218_v47 = vpop.f32.mrb[78].mxu0 }
 0x178   :  { %v3189_v31 = vmax.f32 %v13699_v45, %v2997_v34  ;;  %v2479_v20 = vmul.f32 %v9486_v15, %v1677_v4  ;;  %v2744_v34 = vadd.f32 %v9497_v33, %v2481_v9  ;;  %v2482_v32 = vmul.f32 %v8218_v47, %v9486_v15  ;;  %v1680_v29 = vpop.f32.mrb[79].mxu0 }
 0x179   :  { %v3187_v50 = vmax.f32 %v13700_v46, %v2995_v35  ;;  %v9837_v62 = vsel %vm3725_vm3, %v3340_v6, 0  ;;  %v2950_v63 = vmax.f32 %v9801_v0, 0.0  ;;  %v2480_v35 = vmul.f32 %v9486_v15, %v1680_v29  ;;  %4209 = vrot.lane.b32.xlu0 %v9797_v60, %s8915_s24  ;;  %v8894_v46 = vld [vmem:[%s13512_s7 + $0x58] sm:$0xff]  }
 0x17a   :  { %v3311_v45 = vmax.f32 %v3188_v61, %v3189_v31  ;;  %v2742_v22 = vadd.f32 %v9497_v33, %v2479_v20  ;;  %4145 = vrot.lane.b32.xlu1 %v9837_v62, %s8916_s26  ;;  %v2438_v4 = vmul.f32 %v9398_v1, %v9486_v15  ;;  %v3000_v6 = vmax.f32 %v2744_v34, 0.0  ;;  %8324 = vmatmul.mubr.msk.bf16.gmra.mrb[184].mxu0 %vm947_vm2, %v8867_v43 }
 0x17b   :  { %v3310_v9 = vmax.f32 %v3186_v2, %v3187_v50  ;;  %v2745_v61 = vadd.f32 %v9497_v33, %v2482_v32  ;;  %v2953_v20 = vmax.f32 %v9810_v37, 0.0  ;;  %v2436_v47 = vmul.f32 %v9486_v15, %v9403_v5  ;;  %8327 = vmatprep.mubr.msk.bf16.mxu0 %vm947_vm2, %v8869_v51  ;;  %8405 = vmatprep.subr.bf16.mxu1 %v8894_v46 }
 0x17c   :  { %v3343_v31 = vpack.c.bf16 %v3311_v45, %v3311_v45  ;;  %v2998_v2 = vmax.f32 %v2742_v22, 0.0  ;;  %v2743_v50 = vadd.f32 %v9497_v33, %v2480_v35  ;;  %v13701_v1 = vmax.f32 %v9606_v11, 0.0  ;;  %8406 = vmatpush3.bf16.msra.mxu1 %v8894_v46 }
 0x17d   :  { %v3001_v43 = vmax.f32 %v2745_v61, 0.0  ;;  %v3342_v32 = vpack.c.bf16 %v3310_v9, %v3310_v9  ;;  %v2951_v29 = vmax.f32 %v9813_v26, 0.0  ;;  %v9865_v45 = vadd.f32 %v9497_v33, %v2437_v23  ;;  %v8221_v11 = vpop.f32.mrb[80].mxu0 }
 0x17e   :  { %v3192_v34 = vmax.f32 %v13701_v1, %v3000_v6  ;;  %v9861_v59 = vsel %vm3725_vm3, %v3343_v31, 0  ;;  %v13702_v5 = vmax.f32 %v9609_v58, 0.0  ;;  %v2999_v35 = vmax.f32 %v2743_v50, 0.0  ;;  %4207 = vrot.lane.b32.xlu1 %v9837_v62, %s8915_s24  ;;  %v1693_v61 = vpop.f32.mrb[81].mxu0  ;;  %v8871_v31 = vld [vmem:[%s13508_s2 + $0xf8] sm:$0xff]  }
 0x17f   :  { %4213 = vrot.lane.b32.xlu0 %v9861_v59, %s8915_s24  ;;  %v9874_v51 = vadd.f32 %v9497_v33, %v2435_v48  ;;  %v9877_v9 = vadd.f32 %v9497_v33, %v2438_v4  ;;  %v13703_v23 = vmax.f32 %v9616_v54, 0.0  ;;  %v2485_v58 = vmul.f32 %v8221_v11, %v9486_v15  ;;  %v8222_v1 = vpop.f32.mrb[82].mxu0 }
 0x180   :  { %v3190_v22 = vmax.f32 %v13702_v5, %v2998_v2  ;;  %v9886_v2 = vadd.f32 %v9497_v33, %v2436_v47  ;;  %v2441_v48 = vmul.f32 %v9407_v7, %v9486_v15  ;;  %v13704_v4 = vmax.f32 %v9624_v36, 0.0  ;;  %v1696_v11 = vpop.f32.mrb[83].mxu0 }
 0x181   :  { %v3193_v6 = vmax.f32 %v13703_v23, %v3001_v43  ;;  %v2483_v54 = vmul.f32 %v9486_v15, %v1693_v61  ;;  %v8873_v43 = vld [vmem:[%s13509_s3] sm:$0xff]   ;;  %v2748_v5 = vadd.f32 %v9497_v33, %v2485_v58  ;;  %v2486_v46 = vmul.f32 %v8222_v1, %v9486_v15 }
 0x182   :  { %v3191_v50 = vmax.f32 %v13704_v4, %v2999_v35  ;;  %v9899_v47 = vsel %vm3725_vm3, %v3342_v32, 0  ;;  %v2956_v7 = vmax.f32 %v9865_v45, 0.0  ;;  %v2484_v35 = vmul.f32 %v9486_v15, %v1696_v11  ;;  %4151 = vrot.lane.b32.xlu1 %v9861_v59, %s8916_s26  ;;  %8328 = vmatmul.mubr.msk.bf16.gmra.mrb[188].mxu0 %vm947_vm2, %v8871_v31  ;;  %v10165_v45 = vld [vmem:[%s13511_s6] ss:$0 sm:$0xff] }
 0x183   :  { %v3313_v23 = vmax.f32 %v3192_v34, %v3193_v6  ;;  %v2746_v36 = vadd.f32 %v9497_v33, %v2483_v54  ;;  %4149 = vrot.lane.b32.xlu0 %v9899_v47, %s8916_s26  ;;  %v2439_v61 = vmul.f32 %v9486_v15, %v9409_v8  ;;  %v3004_v4 = vmax.f32 %v2748_v5, 0.0  ;;  %8331 = vmatprep.mubr.msk.bf16.mxu0 %vm947_vm2, %v8873_v43 }
 0x184   :  { %v3312_v58 = vmax.f32 %v3190_v22, %v3191_v50  ;;  %v2749_v32 = vadd.f32 %v9497_v33, %v2486_v46  ;;  %v2442_v54 = vmul.f32 %v9414_v13, %v9486_v15  ;;  %v2747_v11 = vadd.f32 %v9497_v33, %v2484_v35 }
 0x185   :  { %v3345_v34 = vpack.c.bf16 %v3313_v23, %v3313_v23  ;;  %v3002_v1 = vmax.f32 %v2746_v36, 0.0  ;;  %v13705_v22 = vmax.f32 %v9627_v39, 0.0  ;;  %v2957_v31 = vmax.f32 %v9877_v9, 0.0  ;;  %v8225_v39 = vpop.f32.mrb[84].mxu0  ;;  %v13721_v9 = vld [vmem:[#allocation9_spill] sm:$0xff] }
 0x186   :  { %v3005_v8 = vmax.f32 %v2749_v32, 0.0  ;;  %v3344_v46 = vpack.c.bf16 %v3312_v58, %v3312_v58  ;;  %v9924_v23 = vadd.f32 %v9497_v33, %v2441_v48  ;;  %v13706_v13 = vmax.f32 %v9633_v42, 0.0  ;;  %4211 = vrot.lane.b32.xlu1 %v9899_v47, %s8915_s24  ;;  %v1709_v42 = vpop.f32.mrb[85].mxu0  ;;  %v8874_v32 = vld [vmem:[%s13509_s3 + $0x8] sm:$0xff]  }
 0x187   :  { %v3196_v50 = vmax.f32 %v13705_v22, %v3004_v4  ;;  %v9920_v5 = vsel %vm3725_vm3, %v3345_v34, 0  ;;  %v3003_v6 = vmax.f32 %v2747_v11, 0.0  ;;  %v9934_v35 = vadd.f32 %v9497_v33, %v2439_v61 }
 0x188   :  { %v3194_v36 = vmax.f32 %v13706_v13, %v3002_v1  ;;  %4217 = vrot.lane.b32.xlu0 %v9920_v5, %s8915_s24  ;;  %v13707_v58 = vmax.f32 %v9640_v21, 0.0  ;;  %v2489_v4 = vmul.f32 %v8225_v39, %v9486_v15  ;;  %v9943_v34 = vadd.f32 %v9497_v33, %v2442_v54  ;;  %v8226_v21 = vpop.f32.mrb[86].mxu0 }
 0x189   :  { %v2440_v1 = vmul.f32 %v9486_v15, %v9419_v16  ;;  %v13708_v11 = vmax.f32 %v9646_v17, 0.0  ;;  %v2487_v22 = vmul.f32 %v9486_v15, %v1709_v42  ;;  %v2490_v39 = vmul.f32 %v8226_v21, %v9486_v15 }
 0x18a   :  { %v3197_v48 = vmax.f32 %v13707_v58, %v3005_v8  ;;  %v8875_v8 = vld [vmem:[%s13509_s3 + $0x10] sm:$0xff]   ;;  %v2752_v13 = vadd.f32 %v9497_v33, %v2489_v4  ;;  %v1712_v58 = vpop.f32.mrb[87].mxu0  ;;  %v9956_v54 = vsel %vm3725_vm3, %v3344_v46, 0  ;;  %v2960_v16 = vmax.f32 %v9924_v23, 0.0  ;;  %4155 = vrot.lane.b32.xlu1 %v9920_v5, %s8916_s26  ;;  %8332 = vmatmul.mubr.msk.bf16.gmra.mrb[192].mxu0 %vm947_vm2, %v8874_v32 }
 0x18b   :  { %v3195_v61 = vmax.f32 %v13708_v11, %v3003_v6  ;;  %v2750_v17 = vadd.f32 %v9497_v33, %v2487_v22  ;;  %v2488_v6 = vmul.f32 %v9486_v15, %v1712_v58  ;;  %v2445_v42 = vmul.f32 %v9423_v18, %v9486_v15  ;;  %8335 = vmatprep.mubr.msk.bf16.mxu0 %vm947_vm2, %v8875_v8 }
 0x18c   :  { %v3315_v43 = vmax.f32 %v3196_v50, %v3197_v48  ;;  %4153 = vrot.lane.b32.xlu0 %v9956_v54, %s8916_s26  ;;  %v3008_v11 = vmax.f32 %v2752_v13, 0.0  ;;  %v2753_v46 = vadd.f32 %v9497_v33, %v2490_v39  ;;  %v2443_v22 = vmul.f32 %v9486_v15, %v9425_v19 }
 0x18d   :  { %v3314_v4 = vmax.f32 %v3194_v36, %v3195_v61  ;;  %v3006_v21 = vmax.f32 %v2750_v17, 0.0  ;;  %v2751_v58 = vadd.f32 %v9497_v33, %v2488_v6  ;;  %v13709_v36 = vmax.f32 %v9664_v12, 0.0  ;;  %v8229_v12 = vpop.f32.mrb[88].mxu0 }
 0x18e   :  { %v3347_v50 = vpack.c.bf16 %v3315_v43, %v3315_v43  ;;  %v3009_v18 = vmax.f32 %v2753_v46, 0.0  ;;  %v2961_v43 = vmax.f32 %v9943_v34, 0.0  ;;  %v9981_v32 = vadd.f32 %v9497_v33, %v2440_v1  ;;  %4215 = vrot.lane.b32.xlu1 %v9956_v54, %s8915_s24  ;;  %v8876_v46 = vld [vmem:[%s13509_s3 + $0x18] sm:$0xff]  }
 0x18f   :  { %v3200_v61 = vmax.f32 %v13709_v36, %v3008_v11  ;;  %v3346_v39 = vpack.c.bf16 %v3314_v4, %v3314_v4  ;;  %v13710_v19 = vmax.f32 %v9670_v49, 0.0  ;;  %v3007_v48 = vmax.f32 %v2751_v58, 0.0  ;;  %v1725_v11 = vpop.f32.mrb[89].mxu0  ;;  %v8877_v36 = vld [vmem:[%s13509_s3 + $0x20] sm:$0xff]  }
 0x190   :  { %v9977_v13 = vsel %vm3725_vm3, %v3347_v50, 0  ;;  %v9990_v8 = vadd.f32 %v9497_v33, %v2445_v42  ;;  %v2446_v6 = vmul.f32 %v9430_v24, %v9486_v15  ;;  %v13711_v1 = vmax.f32 %v9679_v44, 0.0  ;;  %v8230_v44 = vpop.f32.mrb[90].mxu0 }
 0x191   :  { %v3198_v17 = vmax.f32 %v13710_v19, %v3006_v21  ;;  %4221 = vrot.lane.b32.xlu0 %v9977_v13, %s8915_s24  ;;  %v2493_v49 = vmul.f32 %v8229_v12, %v9486_v15  ;;  %v10001_v50 = vadd.f32 %v9497_v33, %v2443_v22  ;;  %v2444_v42 = vmul.f32 %v9486_v15, %v9435_v27  ;;  %v1728_v12 = vpop.f32.mrb[91].mxu0 }
 0x192   :  { %v3201_v4 = vmax.f32 %v13711_v1, %v3009_v18  ;;  %v13712_v21 = vmax.f32 %v9684_v38, 0.0  ;;  %v2491_v24 = vmul.f32 %v9486_v15, %v1725_v11  ;;  %v2494_v19 = vmul.f32 %v8230_v44, %v9486_v15  ;;  %4159 = vrot.lane.b32.xlu1 %v9977_v13, %s8916_s26  ;;  %8336 = vmatmul.mubr.msk.bf16.gmra.mrb[196].mxu0 %vm947_vm2, %v8876_v46 }
 0x193   :  { %v2756_v18 = vadd.f32 %v9497_v33, %v2493_v49  ;;  %v10014_v22 = vsel %vm3725_vm3, %v3346_v39, 0  ;;  %v2959_v27 = vmax.f32 %v9981_v32, 0.0  ;;  %v10024_v11 = vadd.f32 %v9497_v33, %v2446_v6  ;;  %8339 = vmatprep.mubr.msk.bf16.mxu0 %vm947_vm2, %v8877_v36  ;;  %v13713_v36 = vld [vmem:[#allocation2_spill] sm:$0xff] }
 0x194   :  { %v3199_v58 = vmax.f32 %v13712_v21, %v3007_v48  ;;  %v3317_v1 = vmax.f32 %v3200_v61, %v3201_v4  ;;  %v2754_v38 = vadd.f32 %v9497_v33, %v2491_v24  ;;  %v2492_v48 = vmul.f32 %v9486_v15, %v1728_v12 }
 0x195   :  { %4157 = vrot.lane.b32.xlu0 %v10014_v22, %s8916_s26  ;;  %v3012_v21 = vmax.f32 %v2756_v18, 0.0  ;;  %v2757_v39 = vadd.f32 %v9497_v33, %v2494_v19  ;;  %v2964_v4 = vmax.f32 %v9990_v8, 0.0  ;;  %v2449_v24 = vmul.f32 %v9439_v30, %v9486_v15  ;;  %v8233_v41 = vpop.f32.mrb[92].mxu0 }
 0x196   :  { %v3316_v49 = vmax.f32 %v3198_v17, %v3199_v58  ;;  %v3349_v61 = vpack.c.bf16 %v3317_v1, %v3317_v1  ;;  %v3010_v44 = vmax.f32 %v2754_v38, 0.0  ;;  %v2755_v12 = vadd.f32 %v9497_v33, %v2492_v48  ;;  %4219 = vrot.lane.b32.xlu1 %v10014_v22, %s8915_s24  ;;  %v1741_v53 = vpop.f32.mrb[93].mxu0 }
 0x197   :  { %v3204_v17 = vmax.f32 %v2948_v55, %v3012_v21  ;;  %v3013_v6 = vmax.f32 %v2757_v39, 0.0  ;;  %v2962_v46 = vmax.f32 %v10001_v50, 0.0  ;;  %v10040_v19 = vadd.f32 %v9497_v33, %v2444_v42  ;;  %v13714_v21 = vld [vmem:[#allocation3_spill] sm:$0xff]  ;;  %v8234_v40 = vpop.f32.mrb[94].mxu0 }
 0x198   :  { %v10036_v58 = vsel %vm3725_vm3, %v3349_v61, 0  ;;  %v3348_v18 = vpack.c.bf16 %v3316_v49, %v3316_v49  ;;  %v3202_v30 = vmax.f32 %v2946_v52, %v3010_v44  ;;  %v3011_v1 = vmax.f32 %v2755_v12, 0.0  ;;  %v8878_v52 = vld [vmem:[%s13509_s3 + $0x28] sm:$0xff]  }
 0x199   :  { %4225 = vrot.lane.b32.xlu0 %v10036_v58, %s8915_s24  ;;  %v2447_v38 = vmul.f32 %v9486_v15, %v13713_v36  ;;  %v3205_v42 = vmax.f32 %v2949_v3, %v3013_v6  ;;  %v2497_v48 = vmul.f32 %v8233_v41, %v9486_v15  ;;  %v10058_v49 = vadd.f32 %v9497_v33, %v2449_v24  ;;  %v8879_v3 = vld [vmem:[%s13509_s3 + $0x30] sm:$0xff]   ;;  %v1744_v41 = vpop.f32.mrb[95].mxu0 }
 0x19a   :  { %v2450_v39 = vmul.f32 %v13714_v21, %v9486_v15  ;;  %v3203_v61 = vmax.f32 %v2947_v28, %v3011_v1  ;;  %v2495_v44 = vmul.f32 %v9486_v15, %v1741_v53  ;;  %v2498_v6 = vmul.f32 %v8234_v40, %v9486_v15  ;;  %4163 = vrot.lane.b32.xlu1 %v10036_v58, %s8916_s26  ;;  %v13716_v40 = vld [vmem:[#allocation5_spill] sm:$0xff] }
 0x19b   :  { %v2760_v12 = vadd.f32 %v9497_v33, %v2497_v48  ;;  %v10071_v24 = vsel %vm3725_vm3, %v3348_v18, 0  ;;  %v3319_v36 = vmax.f32 %v3204_v17, %v3205_v42  ;;  %v2496_v28 = vmul.f32 %v9486_v15, %v1744_v41  ;;  %8340 = vmatmul.mubr.msk.bf16.gmra.mrb[200].mxu0 %vm947_vm2, %v8878_v52  ;;  %v13715_v42 = vld [vmem:[#allocation4_spill] sm:$0xff] }
 0x19c   :  { %v2758_v56 = vadd.f32 %v9497_v33, %v2495_v44  ;;  %v3318_v1 = vmax.f32 %v3202_v30, %v3203_v61  ;;  %v10081_v48 = vadd.f32 %v9497_v33, %v2447_v38  ;;  %v2761_v18 = vadd.f32 %v9497_v33, %v2498_v6  ;;  %8343 = vmatprep.mubr.msk.bf16.mxu0 %vm947_vm2, %v8879_v3  ;;  %v13717_v3 = vld [vmem:[#allocation6_spill] sm:$0xff] }
 0x19d   :  { %4161 = vrot.lane.b32.xlu0 %v10071_v24, %s8916_s26  ;;  %v3016_v53 = vmax.f32 %v2760_v12, 0.0  ;;  %v3351_v17 = vpack.c.bf16 %v3319_v36, %v3319_v36  ;;  %v2448_v44 = vmul.f32 %v9486_v15, %v13715_v42  ;;  %v2453_v41 = vmul.f32 %v13716_v40, %v9486_v15  ;;  %v8237_v10 = vpop.f32.mrb[96].mxu0 }
 0x19e   :  { %v3014_v21 = vmax.f32 %v2758_v56, 0.0  ;;  %v2759_v55 = vadd.f32 %v9497_v33, %v2496_v28  ;;  %v3017_v38 = vmax.f32 %v2761_v18, 0.0  ;;  %v3350_v52 = vpack.c.bf16 %v3318_v1, %v3318_v1  ;;  %4223 = vrot.lane.b32.xlu1 %v10071_v24, %s8915_s24  ;;  %v1757_v0 = vpop.f32.mrb[97].mxu0 }
 0x19f   :  { %v3208_v30 = vmax.f32 %v2952_v57, %v3016_v53  ;;  %v10094_v61 = vsel %vm3725_vm3, %v3351_v17, 0  ;;  %v10098_v6 = vadd.f32 %v9497_v33, %v2450_v39  ;;  %v2451_v28 = vmul.f32 %v9486_v15, %v13717_v3  ;;  %v8238_v37 = vpop.f32.mrb[98].mxu0 }
 0x1a0   :  { %v3206_v36 = vmax.f32 %v2950_v63, %v3014_v21  ;;  %v3015_v56 = vmax.f32 %v2759_v55, 0.0  ;;  %v3209_v39 = vmax.f32 %v2953_v20, %v3017_v38  ;;  %v2501_v1 = vmul.f32 %v8237_v10, %v9486_v15  ;;  %v8880_v63 = vld [vmem:[%s13509_s3 + $0x38] sm:$0xff]   ;;  %v8881_v20 = vld [vmem:[%s13509_s3 + $0x40] sm:$0xff]   ;;  %v1760_v40 = vpop.f32.mrb[99].mxu0 }
 0x1a1   :  { %4229 = vrot.lane.b32.xlu0 %v10094_v61, %s8915_s24  ;;  %v10116_v55 = vadd.f32 %v9497_v33, %v2448_v44  ;;  %v10119_v21 = vadd.f32 %v9497_v33, %v2453_v41  ;;  %v2499_v18 = vmul.f32 %v9486_v15, %v1757_v0  ;;  %v2502_v42 = vmul.f32 %v8238_v37, %v9486_v15 }
 0x1a2   :  { %v3207_v53 = vmax.f32 %v2951_v29, %v3015_v56  ;;  %v2764_v17 = vadd.f32 %v9497_v33, %v2501_v1  ;;  %v10130_v44 = vsel %vm3725_vm3, %v3350_v52, 0  ;;  %v3321_v41 = vmax.f32 %v3208_v30, %v3209_v39  ;;  %4167 = vrot.lane.b32.xlu1 %v10094_v61, %s8916_s26  ;;  %v13718_v52 = vld [vmem:[#allocation7_spill] sm:$0xff]  ;;  %v13719_v1 = vld [vmem:[#allocation8_spill] sm:$0xff] }
 0x1a3   :  { %v2762_v26 = vadd.f32 %v9497_v33, %v2499_v18  ;;  %v2500_v29 = vmul.f32 %v9486_v15, %v1760_v40  ;;  %v10140_v10 = vadd.f32 %v9497_v33, %v2451_v28  ;;  %v2454_v3 = vmul.f32 %v13718_v52, %v9486_v15  ;;  %8344 = vmatmul.mubr.msk.bf16.gmra.mrb[204].mxu0 %vm947_vm2, %v8880_v63 }
 0x1a4   :  { %v3320_v56 = vmax.f32 %v3206_v36, %v3207_v53  ;;  %v3020_v30 = vmax.f32 %v2764_v17, 0.0  ;;  %v2765_v39 = vadd.f32 %v9497_v33, %v2502_v42  ;;  %v2452_v0 = vmul.f32 %v9486_v15, %v13719_v1  ;;  %8347 = vmatprep.mubr.msk.bf16.mxu0 %vm947_vm2, %v8881_v20  ;;  %v10197_v20 = vpop.f32.mrb[0].mxu1 }
 0x1a5   :  { %4165 = vrot.lane.b32.xlu0 %v10130_v44, %s8916_s26  ;;  %v3018_v18 = vmax.f32 %v2762_v26, 0.0  ;;  %v2763_v37 = vadd.f32 %v9497_v33, %v2500_v29  ;;  %v3353_v17 = vpack.c.bf16 %v3321_v41, %v3321_v41  ;;  %v13720_v63 = vmax.f32 %v9874_v51, 0.0  ;;  %v8241_v15 = vpop.f32.mrb[100].mxu0  ;;  %v10175_v41 = vld [vmem:[%s13510_s5] ss:$0 sm:$0xff]  ;;  %v10204_v42 = vpop.f32.mrb[1].mxu1 }
 0x1a6   :  { %v3352_v40 = vpack.c.bf16 %v3320_v56, %v3320_v56  ;;  %v3212_v28 = vmax.f32 %v2956_v7, %v3020_v30  ;;  %v3021_v53 = vmax.f32 %v2765_v39, 0.0  ;;  %4227 = vrot.lane.b32.xlu1 %v10130_v44, %s8915_s24  ;;  %v10168_v7 = vadd.f32 %v10165_v45, %v2454_v3  ;;  %v1773_v29 = vpop.f32.mrb[101].mxu0  ;;  %v8882_v56 = vld [vmem:[%s13509_s3 + $0x48] sm:$0xff]  }
 0x1a7   :  { %v3210_v52 = vmax.f32 %v13720_v63, %v3018_v18  ;;  %v3019_v38 = vmax.f32 %v2763_v37, 0.0  ;;  %v2505_v26 = vmul.f32 %v10175_v41, %v8241_v15  ;;  %v10184_v3 = vadd.f32 %v10165_v45, %v2452_v0  ;;  %v8242_v18 = vpop.f32.mrb[102].mxu0  ;;  %v8883_v37 = vld [vmem:[%s13509_s3 + $0x50] sm:$0xff]  }
 0x1a8   :  { %v10159_v33 = vsel %vm3725_vm3, %v3352_v40, 0  ;;  %v3213_v51 = vmax.f32 %v2957_v31, %v3021_v53  ;;  %v2457_v31 = vmul.f32 %v10175_v41, %v13721_v9  ;;  %v13722_v30 = vmax.f32 %v9886_v2, 0.0  ;;  %v1776_v63 = vpop.f32.mrb[103].mxu0  ;;  %v13723_v9 = vld [vmem:[#allocation10_spill] sm:$0xff] }
 0x1a9   :  { %4169 = vrot.lane.b32.xlu0 %v10159_v33, %s8916_s26  ;;  %v2503_v1 = vmul.f32 %v10175_v41, %v1773_v29  ;;  %v2768_v40 = vadd.f32 %v10165_v45, %v2505_v26  ;;  %v2506_v53 = vmul.f32 %v10175_v41, %v8242_v18  ;;  %v3758_v0 = vsel %vm3725_vm3, %v3353_v17, 0  ;;  %v13724_v26 = vld [vmem:[#allocation11_spill] sm:$0xff] }
 0x1aa   :  { %v3211_v39 = vmax.f32 %v13722_v30, %v3019_v38  ;;  %v3323_v15 = vmax.f32 %v3212_v28, %v3213_v51  ;;  %v2455_v2 = vmul.f32 %v10175_v41, %v13723_v9  ;;  %v2504_v29 = vmul.f32 %v10175_v41, %v1776_v63  ;;  %4171 = vrot.lane.b32.xlu1 %v3758_v0, %s8916_s26  ;;  %v10210_v51 = vpop.f32.mrb[2].mxu1  ;;  %v13725_v9 = vld [vmem:[#allocation12_spill] sm:$0xff] }
 0x1ab   :  { %v2766_v38 = vadd.f32 %v10165_v45, %v2503_v1  ;;  %v2458_v18 = vmul.f32 %v10175_v41, %v13724_v26  ;;  %v3024_v36 = vmax.f32 %v2768_v40, 0.0  ;;  %v2769_v28 = vadd.f32 %v10165_v45, %v2506_v53  ;;  %8348 = vmatmul.mubr.msk.bf16.gmra.mrb[208].mxu0 %vm947_vm2, %v8882_v56 }
 0x1ac   :  { %v3322_v30 = vmax.f32 %v3210_v52, %v3211_v39  ;;  %v3355_v17 = vpack.c.bf16 %v3323_v15, %v3323_v15  ;;  %v2456_v63 = vmul.f32 %v10175_v41, %v13725_v9  ;;  %v2767_v52 = vadd.f32 %v10165_v45, %v2504_v29  ;;  %8351 = vmatprep.mubr.msk.bf16.mxu0 %vm947_vm2, %v8883_v37  ;;  %v10222_v15 = vpop.f32.mrb[3].mxu1 }
 0x1ad   :  { %v3022_v57 = vmax.f32 %v2766_v38, 0.0  ;;  %v3216_v39 = vmax.f32 %v2960_v16, %v3024_v36  ;;  %v3025_v40 = vmax.f32 %v2769_v28, 0.0  ;;  %v10226_v1 = vadd.f32 %v10165_v45, %v2457_v31  ;;  %v8245_v23 = vpop.f32.mrb[104].mxu0 }
 0x1ae   :  { %v10220_v53 = vsel %vm3725_vm3, %v3355_v17, 0  ;;  %v3354_v56 = vpack.c.bf16 %v3322_v30, %v3322_v30  ;;  %v13727_v38 = vmax.f32 %v9934_v35, 0.0  ;;  %v3023_v9 = vmax.f32 %v2767_v52, 0.0  ;;  %4233 = vrot.lane.b32.xlu1 %v3758_v0, %s8915_s24  ;;  %v1789_v35 = vpop.f32.mrb[105].mxu0  ;;  %v13728_v30 = vld [vmem:[#allocation13_spill] sm:$0xff] }
 0x1af   :  { %13726 = vst [vmem:[#allocation2_spill] sm:$0xff] %v10220_v53  ;;  %4235 = vrot.lane.b32.xlu0 %v10220_v53, %s8915_s24  ;;  %v10234_v16 = vadd.f32 %v10165_v45, %v2455_v2  ;;  %v10237_v36 = vadd.f32 %v10165_v45, %v2458_v18  ;;  %v3217_v31 = vmax.f32 %v2961_v43, %v3025_v40  ;;  %v8246_v34 = vpop.f32.mrb[106].mxu0  ;;  %v8885_v43 = vld [vmem:[%s13509_s3 + $0x60] sm:$0xff]  }
 0x1b0   :  { %v3214_v29 = vmax.f32 %v13727_v38, %v3022_v57  ;;  %v2509_v37 = vmul.f32 %v10175_v41, %v8245_v23  ;;  %v8884_v57 = vld [vmem:[%s13509_s3 + $0x58] sm:$0xff]   ;;  %v10246_v0 = vadd.f32 %v10165_v45, %v2456_v63  ;;  %v2461_v2 = vmul.f32 %v10175_v41, %v13728_v30  ;;  %v1792_v40 = vpop.f32.mrb[107].mxu0 }
 0x1b1   :  { %v3215_v18 = vmax.f32 %v2959_v27, %v3023_v9  ;;  %v2507_v28 = vmul.f32 %v10175_v41, %v1789_v35  ;;  %v2510_v52 = vmul.f32 %v10175_v41, %v8246_v34  ;;  %v10259_v63 = vsel %vm3725_vm3, %v3354_v56, 0 }
 0x1b2   :  { %v2772_v17 = vadd.f32 %v10165_v45, %v2509_v37  ;;  %13729 = vst [vmem:[#allocation3_spill] sm:$0xff] %v10259_v63  ;;  %v3325_v38 = vmax.f32 %v3216_v39, %v3217_v31  ;;  %v2508_v27 = vmul.f32 %v10175_v41, %v1792_v40  ;;  %4231 = vrot.lane.b32.xlu1 %v10159_v33, %s8915_s24  ;;  %v13730_v37 = vld [vmem:[#allocation14_spill] sm:$0xff] }
 0x1b3   :  { %v2770_v32 = vadd.f32 %v10165_v45, %v2507_v28  ;;  %4173 = vrot.lane.b32.xlu0 %v10259_v63, %s8916_s26  ;;  %v3324_v9 = vmax.f32 %v3214_v29, %v3215_v18  ;;  %v2459_v35 = vmul.f32 %v10175_v41, %v13730_v37  ;;  %v2773_v56 = vadd.f32 %v10165_v45, %v2510_v52  ;;  %v13731_v28 = vld [vmem:[#allocation15_spill] sm:$0xff]  ;;  %v10277_v29 = vpop.f32.mrb[4].mxu1 }
 0x1b4   :  { %v3028_v30 = vmax.f32 %v2772_v17, 0.0  ;;  %8352 = vmatmul.mubr.msk.bf16.gmra.mrb[212].mxu0 %vm947_vm2, %v8884_v57  ;;  %v3357_v39 = vpack.c.bf16 %v3325_v38, %v3325_v38  ;;  %v2462_v34 = vmul.f32 %v10175_v41, %v13731_v28  ;;  %v2771_v23 = vadd.f32 %v10165_v45, %v2508_v27 }
 0x1b5   :  { %v3026_v40 = vmax.f32 %v2770_v32, 0.0  ;;  %8355 = vmatprep.mubr.msk.bf16.mxu0 %vm947_vm2, %v8885_v43  ;;  %v3029_v17 = vmax.f32 %v2773_v56, 0.0  ;;  %v3356_v57 = vpack.c.bf16 %v3324_v9, %v3324_v9  ;;  %v10286_v37 = vadd.f32 %v10165_v45, %v2461_v2  ;;  %v8249_v8 = vpop.f32.mrb[108].mxu0 }
 0x1b6   :  { %v3220_v18 = vmax.f32 %v2964_v4, %v3028_v30  ;;  %v10282_v52 = vsel %vm3725_vm3, %v3357_v39, 0  ;;  %v3027_v27 = vmax.f32 %v2771_v23, 0.0  ;;  %4175 = vrot.lane.b32.xlu1 %v10220_v53, %s8916_s26  ;;  %v10296_v43 = vadd.f32 %v10165_v45, %v2459_v35  ;;  %v1805_v50 = vpop.f32.mrb[109].mxu0  ;;  %v10304_v23 = vpop.f32.mrb[5].mxu1  ;;  %v13734_v39 = vld [vmem:[#allocation16_spill] sm:$0xff] }
 0x1b7   :  { %13732 = vst [vmem:[#allocation4_spill] sm:$0xff] %v10282_v52  ;;  %v3218_v32 = vmax.f32 %v2962_v46, %v3026_v40  ;;  %4239 = vrot.lane.b32.xlu0 %v10282_v52, %s8915_s24  ;;  %v13733_v9 = vmax.f32 %v10024_v11, 0.0  ;;  %v2513_v30 = vmul.f32 %v10175_v41, %v8249_v8  ;;  %v8886_v46 = vld [vmem:[%s13509_s3 + $0x68] sm:$0xff]   ;;  %v10307_v56 = vadd.f32 %v10165_v45, %v2462_v34  ;;  %v8887_v8 = vld [vmem:[%s13509_s3 + $0x70] sm:$0xff]  }
 0x1b8   :  { %v2460_v28 = vmul.f32 %v10175_v41, %v13734_v39  ;;  %v13735_v35 = vmax.f32 %v10040_v19, 0.0  ;;  %v2511_v11 = vmul.f32 %v10175_v41, %v1805_v50  ;;  %v10322_v31 = vsel %vm3725_vm3, %v3356_v57, 0 }
 0x1b9   :  { %v3221_v2 = vmax.f32 %v13733_v9, %v3029_v17  ;;  %v8250_v17 = vpop.f32.mrb[110].mxu0  ;;  %v10317_v9 = vpop.f32.mrb[6].mxu1  ;;  %v2776_v4 = vadd.f32 %v10165_v45, %v2513_v30  ;;  %13736 = vst [vmem:[#allocation5_spill] sm:$0xff] %v10322_v31 }
 0x1ba   :  { %v3219_v40 = vmax.f32 %v13735_v35, %v3027_v27  ;;  %v2514_v34 = vmul.f32 %v10175_v41, %v8250_v17  ;;  %v1808_v38 = vpop.f32.mrb[111].mxu0  ;;  %v2774_v27 = vadd.f32 %v10165_v45, %v2511_v11  ;;  %4179 = vrot.lane.b32.xlu1 %v10282_v52, %s8916_s26  ;;  %v10331_v35 = vpop.f32.mrb[7].mxu1  ;;  %v13737_v17 = vld [vmem:[#allocation17_spill] sm:$0xff]  ;;  %v13738_v11 = vld [vmem:[#allocation18_spill] sm:$0xff] }
 0x1bb   :  { %v3327_v39 = vmax.f32 %v3220_v18, %v3221_v2  ;;  %v2512_v50 = vmul.f32 %v10175_v41, %v1808_v38  ;;  %4177 = vrot.lane.b32.xlu0 %v10322_v31, %s8916_s26  ;;  %v2465_v57 = vmul.f32 %v10175_v41, %v13737_v17  ;;  %v3032_v26 = vmax.f32 %v2776_v4, 0.0 }
 0x1bc   :  { %v3326_v30 = vmax.f32 %v3218_v32, %v3219_v40  ;;  %v2777_v18 = vadd.f32 %v10165_v45, %v2514_v34  ;;  %8356 = vmatmul.mubr.msk.bf16.gmra.mrb[216].mxu0 %vm947_vm2, %v8886_v46  ;;  %v2463_v19 = vmul.f32 %v10175_v41, %v13738_v11  ;;  %v3030_v12 = vmax.f32 %v2774_v27, 0.0 }
 0x1bd   :  { %v3359_v2 = vpack.c.bf16 %v3327_v39, %v3327_v39  ;;  %v2775_v52 = vadd.f32 %v10165_v45, %v2512_v50  ;;  %8359 = vmatprep.mubr.msk.bf16.mxu0 %vm947_vm2, %v8887_v8  ;;  %v13739_v32 = vmax.f32 %v10058_v49, 0.0  ;;  %v10349_v39 = vadd.f32 %v10165_v45, %v2460_v28  ;;  %v8253_v49 = vpop.f32.mrb[112].mxu0  ;;  %v13741_v8 = vld [vmem:[#allocation19_spill] sm:$0xff] }
 0x1be   :  { %v3033_v17 = vmax.f32 %v2777_v18, 0.0  ;;  %v3358_v34 = vpack.c.bf16 %v3326_v30, %v3326_v30  ;;  %v13740_v11 = vmax.f32 %v10081_v48, 0.0  ;;  %4237 = vrot.lane.b32.xlu1 %v10322_v31, %s8915_s24  ;;  %v2466_v50 = vmul.f32 %v10175_v41, %v13741_v8  ;;  %v10368_v18 = vpop.f32.mrb[8].mxu1 }
 0x1bf   :  { %v3224_v40 = vmax.f32 %v13739_v32, %v3032_v26  ;;  %v10345_v4 = vsel %vm3725_vm3, %v3359_v2, 0  ;;  %v3031_v38 = vmax.f32 %v2775_v52, 0.0  ;;  %v10358_v26 = vadd.f32 %v10165_v45, %v2465_v57  ;;  %v8888_v52 = vld [vmem:[%s13509_s3 + $0x78] sm:$0xff]   ;;  %v13743_v57 = vld [vmem:[#allocation20_spill] sm:$0xff] }
 0x1c0   :  { %v3222_v27 = vmax.f32 %v13740_v11, %v3030_v12  ;;  %4243 = vrot.lane.b32.xlu0 %v10345_v4, %s8915_s24  ;;  %v13742_v28 = vmax.f32 %v10098_v6, 0.0  ;;  %v2517_v48 = vmul.f32 %v10175_v41, %v8253_v49  ;;  %v1821_v12 = vpop.f32.mrb[113].mxu0  ;;  %v10371_v2 = vadd.f32 %v10165_v45, %v2463_v19  ;;  %v10378_v49 = vpop.f32.mrb[9].mxu1 }
 0x1c1   :  { %v2464_v32 = vmul.f32 %v10175_v41, %v13743_v57  ;;  %v13744_v11 = vmax.f32 %v10116_v55, 0.0  ;;  %v2515_v6 = vmul.f32 %v10175_v41, %v1821_v12  ;;  %v10383_v63 = vsel %vm3725_vm3, %v3358_v34, 0  ;;  %v10385_v53 = vpop.f32.mrb[10].mxu1 }
 0x1c2   :  { %v3225_v30 = vmax.f32 %v13742_v28, %v3033_v17  ;;  %v8254_v17 = vpop.f32.mrb[114].mxu0  ;;  %v2780_v28 = vadd.f32 %v10165_v45, %v2517_v48  ;;  %4183 = vrot.lane.b32.xlu1 %v10345_v4, %s8916_s26  ;;  %v13745_v57 = vmax.f32 %v10119_v21, 0.0 }
 0x1c3   :  { %v3223_v8 = vmax.f32 %v13744_v11, %v3031_v38  ;;  %v2518_v46 = vmul.f32 %v10175_v41, %v8254_v17  ;;  %v1824_v31 = vpop.f32.mrb[115].mxu0  ;;  %v2778_v55 = vadd.f32 %v10165_v45, %v2515_v6  ;;  %v2627_v17 = vmul.f32 %v10175_v41, %v10204_v42 }
 0x1c4   :  { %v3329_v19 = vmax.f32 %v3224_v40, %v3225_v30  ;;  %v2516_v38 = vmul.f32 %v10175_v41, %v1824_v31  ;;  %4181 = vrot.lane.b32.xlu0 %v10383_v63, %s8916_s26  ;;  %v3036_v12 = vmax.f32 %v2780_v28, 0.0  ;;  %8360 = vmatmul.mubr.msk.bf16.gmra.mrb[220].mxu0 %vm947_vm2, %v8888_v52  ;;  %v2629_v30 = vmul.f32 %v10175_v41, %v10197_v20  ;;  %v10407_v28 = vpop.f32.mrb[11].mxu1 }
 0x1c5   :  { %v3328_v48 = vmax.f32 %v3222_v27, %v3223_v8  ;;  %v2781_v34 = vadd.f32 %v10165_v45, %v2518_v46  ;;  %v3034_v6 = vmax.f32 %v2778_v55, 0.0  ;;  %v13747_v55 = vmax.f32 %v10140_v10, 0.0  ;;  %v8257_v21 = vpop.f32.mrb[116].mxu0 }
 0x1c6   :  { %v3361_v40 = vpack.c.bf16 %v3329_v19, %v3329_v19  ;;  %v2779_v31 = vadd.f32 %v10165_v45, %v2516_v38  ;;  %v3228_v27 = vmax.f32 %v13745_v57, %v3036_v12  ;;  %v10411_v19 = vadd.f32 %v10165_v45, %v2466_v50  ;;  %4241 = vrot.lane.b32.xlu1 %v10383_v63, %s8915_s24  ;;  %v1837_v12 = vpop.f32.mrb[117].mxu0 }
 0x1c7   :  { %v3037_v8 = vmax.f32 %v2781_v34, 0.0  ;;  %v3360_v52 = vpack.c.bf16 %v3328_v48, %v3328_v48  ;;  %v3226_v38 = vmax.f32 %v13747_v55, %v3034_v6  ;;  %v10420_v42 = vadd.f32 %v10165_v45, %v2464_v32 }
 0x1c8   :  { %v10405_v46 = vsel %vm3725_vm3, %v3361_v40, 0  ;;  %v3035_v11 = vmax.f32 %v2779_v31, 0.0  ;;  %v13748_v57 = vmax.f32 %v10168_v7, 0.0  ;;  %v2521_v50 = vmul.f32 %v10175_v41, %v8257_v21  ;;  %v8258_v31 = vpop.f32.mrb[118].mxu0 }
 0x1c9   :  { %13746 = vst [vmem:[#allocation6_spill] sm:$0xff] %v10405_v46  ;;  %4247 = vrot.lane.b32.xlu0 %v10405_v46, %s8915_s24  ;;  %v10426_v10 = vadd.f32 %v10165_v45, %v2629_v30  ;;  %v13749_v34 = vmax.f32 %v10184_v3, 0.0  ;;  %v2519_v6 = vmul.f32 %v10175_v41, %v1837_v12  ;;  %v10432_v55 = vadd.f32 %v10165_v45, %v2627_v17  ;;  %v1840_v21 = vpop.f32.mrb[119].mxu0 }
 0x1ca   :  { %v3229_v48 = vmax.f32 %v13748_v57, %v3037_v8  ;;  %v2630_v32 = vmul.f32 %v10175_v41, %v10210_v51  ;;  %v2784_v7 = vadd.f32 %v10165_v45, %v2521_v50  ;;  %v2522_v8 = vmul.f32 %v10175_v41, %v8258_v31  ;;  %4187 = vrot.lane.b32.xlu1 %v10405_v46, %s8916_s26 }
 0x1cb   :  { %v3227_v40 = vmax.f32 %v13749_v34, %v3035_v11  ;;  %v10439_v30 = vsel %vm3725_vm3, %v3360_v52, 0  ;;  %v2782_v11 = vadd.f32 %v10165_v45, %v2519_v6  ;;  %v2520_v12 = vmul.f32 %v10175_v41, %v1840_v21 }
 0x1cc   :  { %13750 = vst [vmem:[#allocation7_spill] sm:$0xff] %v10439_v30  ;;  %v3331_v57 = vmax.f32 %v3228_v27, %v3229_v48  ;;  %v3040_v17 = vmax.f32 %v2784_v7, 0.0  ;;  %v2785_v50 = vadd.f32 %v10165_v45, %v2522_v8  ;;  %v2628_v27 = vmul.f32 %v10175_v41, %v10222_v15 }
 0x1cd   :  { %4185 = vrot.lane.b32.xlu0 %v10439_v30, %s8916_s26  ;;  %v3330_v51 = vmax.f32 %v3226_v38, %v3227_v40  ;;  %v3038_v48 = vmax.f32 %v2782_v11, 0.0  ;;  %v2783_v6 = vadd.f32 %v10165_v45, %v2520_v12  ;;  %v2633_v31 = vmul.f32 %v10175_v41, %v10277_v29 }
 0x1ce   :  { %v3363_v34 = vpack.c.bf16 %v3331_v57, %v3331_v57  ;;  %v13751_v21 = vmax.f32 %v10226_v1, 0.0  ;;  %v3041_v20 = vmax.f32 %v2785_v50, 0.0  ;;  %v13753_v7 = vmax.f32 %v10234_v16, 0.0  ;;  %4245 = vrot.lane.b32.xlu1 %v10439_v30, %s8915_s24  ;;  %v8261_v57 = vpop.f32.mrb[120].mxu0 }
 0x1cf   :  { %v3362_v40 = vpack.c.bf16 %v3330_v51, %v3330_v51  ;;  %v3039_v15 = vmax.f32 %v2783_v6, 0.0  ;;  %v10468_v1 = vadd.f32 %v10165_v45, %v2630_v32  ;;  %v13754_v11 = vmax.f32 %v10237_v36, 0.0  ;;  %v1853_v16 = vpop.f32.mrb[121].mxu0 }
 0x1d0   :  { %v3232_v3 = vmax.f32 %v13751_v21, %v3040_v17  ;;  %v10458_v38 = vsel %vm3725_vm3, %v3363_v34, 0  ;;  %v3230_v8 = vmax.f32 %v13753_v7, %v3038_v48  ;;  %v2525_v51 = vmul.f32 %v10175_v41, %v8261_v57  ;;  %v8262_v21 = vpop.f32.mrb[122].mxu0 }
 0x1d1   :  { %13752 = vst [vmem:[#allocation8_spill] sm:$0xff] %v10458_v38  ;;  %4251 = vrot.lane.b32.xlu0 %v10458_v38, %s8915_s24  ;;  %v3233_v12 = vmax.f32 %v13754_v11, %v3041_v20  ;;  %v10475_v50 = vadd.f32 %v10165_v45, %v2628_v27  ;;  %v13755_v34 = vmax.f32 %v10246_v0, 0.0  ;;  %v2523_v6 = vmul.f32 %v10175_v41, %v1853_v16  ;;  %v10485_v20 = vpop.f32.mrb[12].mxu1  ;;  %v1856_v27 = vpop.f32.mrb[123].mxu0 }
 0x1d2   :  { %v10481_v32 = vadd.f32 %v10165_v45, %v2633_v31  ;;  %v2631_v36 = vmul.f32 %v10175_v41, %v10304_v23  ;;  %v2788_v7 = vadd.f32 %v10165_v45, %v2525_v51  ;;  %v2526_v57 = vmul.f32 %v10175_v41, %v8262_v21  ;;  %4191 = vrot.lane.b32.xlu1 %v10458_v38, %s8916_s26 }
 0x1d3   :  { %v3231_v48 = vmax.f32 %v13755_v34, %v3039_v15  ;;  %v10490_v11 = vsel %vm3725_vm3, %v3362_v40, 0  ;;  %v3333_v0 = vmax.f32 %v3232_v3, %v3233_v12  ;;  %v10492_v15 = vpop.f32.mrb[13].mxu1  ;;  %v2786_v16 = vadd.f32 %v10165_v45, %v2523_v6 }
 0x1d4   :  { %13756 = vst [vmem:[#allocation9_spill] sm:$0xff] %v10490_v11  ;;  %v2524_v31 = vmul.f32 %v10175_v41, %v1856_v27  ;;  %v10501_v34 = vpop.f32.mrb[14].mxu1  ;;  %v3044_v40 = vmax.f32 %v2788_v7, 0.0  ;;  %v2789_v3 = vadd.f32 %v10165_v45, %v2526_v57  ;;  %v2634_v6 = vmul.f32 %v10175_v41, %v10317_v9 }
 0x1d5   :  { %4189 = vrot.lane.b32.xlu0 %v10490_v11, %s8916_s26  ;;  %v3332_v23 = vmax.f32 %v3230_v8, %v3231_v48  ;;  %v3365_v12 = vpack.c.bf16 %v3333_v0, %v3333_v0  ;;  %v3042_v21 = vmax.f32 %v2786_v16, 0.0  ;;  %v2632_v29 = vmul.f32 %v10175_v41, %v10331_v35  ;;  %v8265_v16 = vpop.f32.mrb[124].mxu0 }
 0x1d6   :  { %v2787_v27 = vadd.f32 %v10165_v45, %v2524_v31  ;;  %v13757_v8 = vmax.f32 %v10286_v37, 0.0  ;;  %v3045_v51 = vmax.f32 %v2789_v3, 0.0  ;;  %v13759_v0 = vmax.f32 %v10296_v43, 0.0  ;;  %4249 = vrot.lane.b32.xlu1 %v10490_v11, %s8915_s24  ;;  %v1869_v43 = vpop.f32.mrb[125].mxu0 }
 0x1d7   :  { %v10513_v7 = vsel %vm3725_vm3, %v3365_v12, 0  ;;  %v3364_v57 = vpack.c.bf16 %v3332_v23, %v3332_v23  ;;  %v10523_v37 = vadd.f32 %v10165_v45, %v2631_v36  ;;  %v13760_v31 = vmax.f32 %v10307_v56, 0.0 }
 0x1d8   :  { %v3236_v48 = vmax.f32 %v13757_v8, %v3044_v40  ;;  %13758 = vst [vmem:[#allocation10_spill] sm:$0xff] %v10513_v7  ;;  %v3234_v52 = vmax.f32 %v13759_v0, %v3042_v21  ;;  %v3043_v9 = vmax.f32 %v2787_v27, 0.0  ;;  %v2529_v23 = vmul.f32 %v10175_v41, %v8265_v16  ;;  %v8266_v0 = vpop.f32.mrb[126].mxu0 }
 0x1d9   :  { %4255 = vrot.lane.b32.xlu0 %v10513_v7, %s8915_s24  ;;  %v3237_v40 = vmax.f32 %v13760_v31, %v3045_v51  ;;  %v10529_v3 = vadd.f32 %v10165_v45, %v2634_v6  ;;  %v2637_v12 = vmul.f32 %v10175_v41, %v10368_v18  ;;  %v13761_v21 = vmax.f32 %v10349_v39, 0.0  ;;  %v1872_v16 = vpop.f32.mrb[127].mxu0 }
 0x1da   :  { %v2527_v8 = vmul.f32 %v10175_v41, %v1869_v43  ;;  %v10537_v36 = vadd.f32 %v10165_v45, %v2632_v29  ;;  %v2635_v56 = vmul.f32 %v10175_v41, %v10378_v49  ;;  %v2792_v51 = vadd.f32 %v10165_v45, %v2529_v23  ;;  %4195 = vrot.lane.b32.xlu1 %v10513_v7, %s8916_s26  ;;  %v10552_v49 = vpop.permute.xlu0 %3918 }
 0x1db   :  { %v3235_v27 = vmax.f32 %v13761_v21, %v3043_v9  ;;  %v2530_v6 = vmul.f32 %v10175_v41, %v8266_v0  ;;  %v10544_v31 = vsel %vm3725_vm3, %v3364_v57, 0  ;;  %v3335_v18 = vmax.f32 %v3236_v48, %v3237_v40  ;;  %13763 = vst [vmem:[#allocation12_spill] sm:$0xff] %v10552_v49 }
 0x1dc   :  { %13762 = vst [vmem:[#allocation11_spill] sm:$0xff] %v10544_v31  ;;  %v2790_v39 = vadd.f32 %v10165_v45, %v2527_v8  ;;  %v2528_v9 = vmul.f32 %v10175_v41, %v1872_v16  ;;  %v3048_v43 = vmax.f32 %v2792_v51, 0.0  ;;  %v2638_v48 = vmul.f32 %v10175_v41, %v10385_v53 }
 0x1dd   :  { %4193 = vrot.lane.b32.xlu0 %v10544_v31, %s8916_s26  ;;  %v3334_v29 = vmax.f32 %v3234_v52, %v3235_v27  ;;  %v2793_v57 = vadd.f32 %v10165_v45, %v2530_v6  ;;  %v3367_v21 = vpack.c.bf16 %v3335_v18, %v3335_v18  ;;  %v2636_v0 = vmul.f32 %v10175_v41, %v10407_v28  ;;  %v2320_v52 = vpop.f32.mrb[15].mxu1  ;;  %v8269_v28 = vpop.f32.mrb[128].mxu0 }
 0x1de   :  { %v3046_v40 = vmax.f32 %v2790_v39, 0.0  ;;  %v2791_v8 = vadd.f32 %v10165_v45, %v2528_v9  ;;  %v2641_v16 = vmul.f32 %v10175_v41, %v10485_v20  ;;  %v13764_v27 = vmax.f32 %v10358_v26, 0.0  ;;  %4253 = vrot.lane.b32.xlu1 %v10544_v31, %s8915_s24 }
 0x1df   :  { %v3049_v23 = vmax.f32 %v2793_v57, 0.0  ;;  %v10566_v6 = vsel %vm3725_vm3, %v3367_v21, 0  ;;  %v3366_v18 = vpack.c.bf16 %v3334_v29, %v3334_v29  ;;  %v13766_v53 = vmax.f32 %v10371_v2, 0.0  ;;  %v1885_v2 = vpop.f32.mrb[129].mxu0  ;;  %v4144_v35 = vpop.permute.xlu0 %4143 }
 0x1e0   :  { %v3240_v51 = vmax.f32 %v13764_v27, %v3048_v43  ;;  %13765 = vst [vmem:[#allocation13_spill] sm:$0xff] %v10566_v6  ;;  %v3047_v9 = vmax.f32 %v2791_v8, 0.0  ;;  %v10575_v20 = vadd.f32 %v10165_v45, %v2637_v12  ;;  %v2639_v26 = vmul.f32 %v10175_v41, %v10492_v15  ;;  %v8381_v43 = vpop.f32.mrb[16].mxu1  ;;  %v8270_v15 = vpop.f32.mrb[130].mxu0 }
 0x1e1   :  { %v3238_v39 = vmax.f32 %v13766_v53, %v3046_v40  ;;  %4259 = vrot.lane.b32.xlu0 %v10566_v6, %s8915_s24  ;;  %v13767_v29 = vmax.f32 %v10411_v19, 0.0  ;;  %v10583_v40 = vadd.f32 %v10165_v45, %v2635_v56  ;;  %v2642_v8 = vmul.f32 %v10175_v41, %v10501_v34  ;;  %v2333_v27 = vpop.f32.mrb[17].mxu1 }
 0x1e2   :  { %v13768_v12 = vmax.f32 %v10420_v42, 0.0  ;;  %v10591_v19 = vadd.f32 %v10165_v45, %v2638_v48  ;;  %v10595_v56 = vsel %vm3725_vm3, %v3366_v18, 0  ;;  %v10598_v34 = vadd.f32 %v10165_v45, %v2636_v0  ;;  %4199 = vrot.lane.b32.xlu1 %v10566_v6, %s8916_s26 }
 0x1e3   :  { %v3241_v57 = vmax.f32 %v13767_v29, %v3049_v23  ;;  %v2640_v23 = vmul.f32 %v10175_v41, %v2320_v52  ;;  %v1888_v29 = vpop.f32.mrb[131].mxu0  ;;  %13769 = vst [vmem:[#allocation14_spill] sm:$0xff] %v10595_v56  ;;  %v10601_v42 = vadd.f32 %v10165_v45, %v2641_v16  ;;  %v2531_v0 = vmul.f32 %v10175_v41, %v1885_v2  ;;  %v4206_v6 = vpop.permute.xlu0 %4205 }
 0x1e4   :  { %v3239_v53 = vmax.f32 %v13768_v12, %v3047_v9  ;;  %v8382_v9 = vpop.f32.mrb[18].mxu1  ;;  %v2533_v12 = vmul.f32 %v10175_v41, %v8269_v28  ;;  %v2534_v28 = vmul.f32 %v10175_v41, %v8270_v15  ;;  %v2532_v17 = vmul.f32 %v10175_v41, %v1888_v29 }
 0x1e5   :  { %v3337_v21 = vmax.f32 %v3240_v51, %v3241_v57  ;;  %4197 = vrot.lane.b32.xlu0 %v10595_v56, %s8916_s26  ;;  %v10610_v51 = vadd.f32 %v10165_v45, %v2639_v26  ;;  %v10615_v57 = vadd.f32 %v10165_v45, %v2642_v8  ;;  %v8273_v15 = vpop.f32.mrb[132].mxu0  ;;  %v2646_v2 = vmul.f32 %v10175_v41, %v8382_v9 }
 0x1e6   :  { %v3336_v48 = vmax.f32 %v3238_v39, %v3239_v53  ;;  %v10620_v39 = vadd.f32 %v10165_v45, %v2640_v23  ;;  %v2645_v53 = vmul.f32 %v10175_v41, %v8381_v43  ;;  %v10627_v8 = vadd.f32 %v10165_v45, %v2533_v12  ;;  %4257 = vrot.lane.b32.xlu1 %v10595_v56, %s8915_s24  ;;  %v1901_v12 = vpop.f32.mrb[133].mxu0 }
 0x1e7   :  { %v3369_v18 = vpack.c.bf16 %v3337_v21, %v3337_v21  ;;  %v2643_v21 = vmul.f32 %v10175_v41, %v2333_v27  ;;  %v4268_v27 = vsel %vm3950_vm4, %v9791_v14, %v4144_v35  ;;  %v10643_v16 = vadd.f32 %v10165_v45, %v2534_v28  ;;  %v4142_v43 = vpop.permute.xlu0 %4141 }
 0x1e8   :  { %13770 = vst [vmem:[#allocation15_spill] sm:$0xff] %v10620_v39  ;;  %v3368_v52 = vpack.c.bf16 %v3336_v48, %v3336_v48  ;;  %13771 = vst [vmem:[#allocation16_spill] sm:$0xff] %v10627_v8  ;;  %v10636_v48 = vadd.f32 %v10165_v45, %v2531_v0  ;;  %v10646_v23 = vadd.f32 %v10165_v45, %v2532_v17  ;;  %v4148_v56 = vpop.permute.xlu1 %4147  ;;  %v4266_v35 = vsel %vm3950_vm4, 0, %v4142_v43  ;;  %v2336_v17 = vpop.f32.mrb[19].mxu1 }
 0x1e9   :  { %v3790_v26 = vsel %vm3725_vm3, %v3369_v18, 0  ;;  %13773 = vst [vmem:[#allocation18_spill] sm:$0xff] %v10643_v16  ;;  %v10650_v0 = vadd.f32 %v10165_v45, %v2645_v53  ;;  %v2537_v14 = vmul.f32 %v10175_v41, %v8273_v15  ;;  %v8274_v18 = vpop.f32.mrb[134].mxu0  ;;  %v10658_v28 = vadd.f32 %v10165_v45, %v2643_v21 }
 0x1ea   :  { %4263 = vrot.lane.b32.xlu0 %v3790_v26, %s8915_s24  ;;  %13772 = vst [vmem:[#allocation17_spill] sm:$0xff] %v10636_v48  ;;  %13774 = vst [vmem:[#allocation19_spill] sm:$0xff] %v10646_v23  ;;  %v10655_v9 = vsel %vm3725_vm3, %v3368_v52, 0  ;;  %v2535_v31 = vmul.f32 %v10175_v41, %v1901_v12  ;;  %v10663_v29 = vsel %vm4045_vm5, %v4266_v35, %v4206_v6  ;;  %v1904_v15 = vpop.f32.mrb[135].mxu0  ;;  %4203 = vrot.lane.b32.xlu1 %v3790_v26, %s8916_s26  ;;  %v8385_v6 = vpop.f32.mrb[20].mxu1 }
 0x1eb   :  { %13775 = vst [vmem:[#allocation20_spill] sm:$0xff] %v10650_v0  ;;  %13776 = vst [vmem:[#allocation21_spill] sm:$0xff] %v10655_v9  ;;  %v2538_v53 = vmul.f32 %v10175_v41, %v8274_v18  ;;  %v7623_v21 = vcombine.low %v10663_v29, %v10663_v29  ;;  %v7624_v43 = vcombine.high %v10663_v29, %v10663_v29  ;;  %v4210_v7 = vpop.permute.xlu0 %4209  ;;  %v10685_v46 = vpop.f32.mrb[21].mxu1 }
 0x1ec   :  { %13777 = vst [vmem:[#allocation22_spill] sm:$0xff] %v10658_v28  ;;  %v10675_v12 = vadd.f32 %v10165_v45, %v2646_v2  ;;  %v2536_v26 = vmul.f32 %v10175_v41, %v1904_v15  ;;  %v4146_v8 = vpop.permute.xlu1 %4145  ;;  %v10682_v48 = vadd.f32 %v10165_v45, %v2537_v14  ;;  %13780 = vst [vmem:[#allocation25_spill] sm:$0xff] %v10685_v46 }
 0x1ed   :  { %v5163_v38 = vshrl.u32 %v7623_v21, 16  ;;  %v5166_v11 = vshll.u32 %v7623_v21, 16  ;;  %v10688_v18 = vadd.f32 %v10165_v45, %v2535_v31  ;;  %v10692_v15 = vsel %vm3950_vm4, %v9837_v62, %v4148_v56  ;;  %v8277_v21 = vpop.f32.mrb[136].mxu0  ;;  %v10706_v56 = vpop.f32.mrb[22].mxu1 }
 0x1ee   :  { %4201 = vrot.lane.b32.xlu0 %v10655_v9, %s8916_s26  ;;  %13778 = vst [vmem:[#allocation23_spill] sm:$0xff] %v10675_v12  ;;  %13779 = vst [vmem:[#allocation24_spill] sm:$0xff] %v10682_v48  ;;  %v10695_v35 = vadd.f32 %v10165_v45, %v2538_v53  ;;  %v4270_v14 = vsel %vm3950_vm4, %v9745_v25, %v4146_v8  ;;  %4261 = vrot.lane.b32.xlu1 %v10655_v9, %s8915_s24  ;;  %v10701_v2 = vshll.u32 %v7624_v43, 16  ;;  %v1917_v52 = vpop.f32.mrb[137].mxu0 }
 0x1ef   :  { %13781 = vst [vmem:[#allocation26_spill] sm:$0xff] %v10688_v18  ;;  %v2644_v23 = vmul.f32 %v10175_v41, %v2336_v17  ;;  %v2649_v62 = vmul.f32 %v10175_v41, %v8385_v6  ;;  %13784 = vst [vmem:[#allocation29_spill] sm:$0xff] %v10706_v56  ;;  %v5165_v53 = vrot.slane %v5163_v38, 4  ;;  %v5168_v16 = vrot.slane %v5166_v11, 5  ;;  %v8278_v56 = vpop.f32.mrb[138].mxu0 }
 0x1f0   :  { %13782 = vst [vmem:[#allocation27_spill] sm:$0xff] %v10695_v35  ;;  %13783 = vst [vmem:[#allocation28_spill] sm:$0xff] %v10701_v2  ;;  %v10709_v46 = vadd.f32 %v10165_v45, %v2536_v26  ;;  %v10712_v25 = vsel %vm4045_vm5, %v4270_v14, %v4210_v7  ;;  %v4208_v8 = vpop.permute.xlu1 %4207  ;;  %v2541_v31 = vmul.f32 %v10175_v41, %v8277_v21  ;;  %v1920_v14 = vpop.f32.mrb[139].mxu0 }
 0x1f1   :  { %v4214_v43 = vpop.permute.xlu0 %4213  ;;  %v7627_v9 = vcombine.low %v10712_v25, %v10712_v25  ;;  %v2539_v17 = vmul.f32 %v10175_v41, %v1917_v52  ;;  %v4332_v6 = vsel %vm4045_vm5, %v4268_v27, %v4208_v8  ;;  %v10723_v28 = vadd.f32 %v10165_v45, %v2644_v23 }
 0x1f2   :  { %13785 = vst [vmem:[#allocation30_spill] sm:$0xff] %v10709_v46  ;;  %v7625_v7 = vcombine.low %v4332_v6, %v4332_v6  ;;  %v10726_v21 = vadd.f32 %v10165_v45, %v2649_v62  ;;  %v5169_v52 = vor.u32 %v5168_v16, %v5165_v53  ;;  %v7628_v27 = vcombine.high %v10712_v25, %v10712_v25 }
 0x1f3   :  { %v5191_v12 = vshrl.u32 %v7627_v9, 16  ;;  %v5194_v30 = vshll.u32 %v7627_v9, 16  ;;  %v10733_v9 = vadd.f32 %v10165_v45, %v2541_v31  ;;  %v10736_v23 = vadd.f32 %v10165_v45, %v2539_v17 }
 0x1f4   :  { %13786 = vst [vmem:[#allocation31_spill] sm:$0xff] %v10726_v21  ;;  %v5177_v8 = vshrl.u32 %v7625_v7, 16  ;;  %v5180_v38 = vshll.u32 %v7625_v7, 16  ;;  %v4152_v48 = vpop.permute.xlu1 %4151  ;;  %v7626_v16 = vcombine.high %v4332_v6, %v4332_v6  ;;  %v10739_v53 = vcombine.low %v10663_v29, %v4332_v6 }
 0x1f5   :  { %v4150_v11 = vpop.permute.xlu0 %4149  ;;  %13787 = vst [vmem:[#allocation32_spill] sm:$0xff] %v10733_v9  ;;  %13788 = vst [vmem:[#allocation33_spill] sm:$0xff] %v10736_v23  ;;  %v5193_v62 = vrot.slane %v5191_v12, 4  ;;  %v5196_v18 = vrot.slane %v5194_v30, 5  ;;  %v8281_v21 = vpop.f32.mrb[140].mxu0  ;;  %v2542_v39 = vmul.f32 %v10175_v41, %v8278_v56  ;;  %v2540_v26 = vmul.f32 %v10175_v41, %v1920_v14 }
 0x1f6   :  { %13789 = vst [vmem:[#allocation34_spill] sm:$0xff] %v10739_v53  ;;  %v5179_v7 = vrot.slane %v5177_v8, 4  ;;  %v5182_v0 = vrot.slane %v5180_v38, 5  ;;  %v1933_v35 = vpop.f32.mrb[141].mxu0  ;;  %v10743_v2 = vrot.slane %v5169_v52, 4  ;;  %v10745_v31 = vshll.u32 %v7628_v27, 16  ;;  %8407 = vmatprep.mubr.msk.bf16.mxu1 %vm5799_vm6, %v10739_v53 }
 0x1f7   :  { %v4274_v30 = vsel %vm3950_vm4, %v9797_v60, %v4150_v11  ;;  %v2545_v38 = vmul.f32 %v10175_v41, %v8281_v21  ;;  %v2543_v14 = vmul.f32 %v10175_v41, %v1933_v35  ;;  %v8282_v52 = vpop.f32.mrb[142].mxu0  ;;  %v10758_v27 = vpop.f32.mrb[23].mxu1  ;;  %v5197_v8 = vor.u32 %v5196_v18, %v5193_v62 }
 0x1f8   :  { %13790 = vst [vmem:[#allocation35_spill] sm:$0xff] %v10743_v2  ;;  %13791 = vst [vmem:[#allocation36_spill] sm:$0xff] %v10745_v31  ;;  %v4212_v29 = vpop.permute.xlu1 %4211  ;;  %v10754_v56 = vsel %vm4045_vm5, %v4274_v30, %v4214_v43  ;;  %v10761_v60 = vshll.u32 %v7626_v16, 16  ;;  %v1936_v17 = vpop.f32.mrb[143].mxu0  ;;  %v5183_v6 = vor.u32 %v5182_v0, %v5179_v7  ;;  %v10766_v43 = vadd.f32 %v10165_v45, %v2542_v39 }
 0x1f9   :  { %13792 = vst [vmem:[#allocation37_spill] sm:$0xff] %v10758_v27  ;;  %v7631_v11 = vcombine.low %v10754_v56, %v10754_v56  ;;  %v10769_v21 = vadd.f32 %v10165_v45, %v2540_v26  ;;  %v4336_v35 = vsel %vm4045_vm5, %v10692_v15, %v4212_v29  ;;  %v7632_v18 = vcombine.high %v10754_v56, %v10754_v56  ;;  %v10784_v7 = vpop.f32.mrb[24].mxu1  ;;  %v10822_v29 = vld [vmem:[%s13510_s5] ss:$0 sm:$0xff] }
 0x1fa   :  { %v4218_v12 = vpop.permute.xlu0 %4217  ;;  %13793 = vst [vmem:[#allocation38_spill] sm:$0xff] %v10761_v60  ;;  %13794 = vst [vmem:[#allocation39_spill] sm:$0xff] %v10766_v43  ;;  %v7629_v30 = vcombine.low %v4336_v35, %v4336_v35  ;;  %v10776_v23 = vadd.f32 %v10165_v45, %v2545_v38  ;;  %v10779_v39 = vadd.f32 %v10165_v45, %v2543_v14  ;;  %v10788_v27 = vrot.slane %v5197_v8, 4 }
 0x1fb   :  { %13795 = vst [vmem:[#allocation40_spill] sm:$0xff] %v10769_v21  ;;  %v5219_v62 = vshrl.u32 %v7631_v11, 16  ;;  %v5222_v16 = vshll.u32 %v7631_v11, 16  ;;  %v7630_v0 = vcombine.high %v4336_v35, %v4336_v35  ;;  %v10782_v26 = vcombine.low %v10712_v25, %v4336_v35  ;;  %13799 = vst [vmem:[#allocation44_spill] sm:$0xff] %v10784_v7 }
 0x1fc   :  { %v4156_v53 = vpop.permute.xlu1 %4155  ;;  %13796 = vst [vmem:[#allocation41_spill] sm:$0xff] %v10776_v23  ;;  %13797 = vst [vmem:[#allocation42_spill] sm:$0xff] %v10779_v39  ;;  %v4276_v38 = vsel %vm3950_vm4, %v9899_v47, %v4152_v48  ;;  %v5205_v45 = vshrl.u32 %v7629_v30, 16  ;;  %v5208_v14 = vshll.u32 %v7629_v30, 16  ;;  %v10794_v35 = vrot.slane %v5183_v6, 4 }
 0x1fd   :  { %13798 = vst [vmem:[#allocation43_spill] sm:$0xff] %v10782_v26  ;;  %v5221_v11 = vrot.slane %v5219_v62, 4  ;;  %v5224_v9 = vrot.slane %v5222_v16, 5  ;;  %v8285_v46 = vpop.f32.mrb[144].mxu0  ;;  %13800 = vst [vmem:[#allocation45_spill] sm:$0xff] %v10788_v27  ;;  %8408 = vmatmul.mubr.msk.bf16.vlgmr.msra.gmra.mrb[32].mxu1 %vm5799_vm6, %v10782_v26  ;;  %v10796_v7 = vshll.u32 %v7632_v18, 16  ;;  %v2544_v27 = vmul.f32 %v10175_v41, %v1936_v17 }
 0x1fe   :  { %v4154_v2 = vpop.permute.xlu0 %4153  ;;  %v1949_v25 = vpop.f32.mrb[145].mxu0  ;;  %13801 = vst [vmem:[#allocation46_spill] sm:$0xff] %v10794_v35  ;;  %v10798_v15 = vshll.u32 %v7630_v0, 16  ;;  %v2546_v0 = vmul.f32 %v10175_v41, %v8282_v52  ;;  %v5207_v47 = vrot.slane %v5205_v45, 4  ;;  %v5210_v48 = vrot.slane %v5208_v14, 5 }
 0x1ff   :  { %13802 = vst [vmem:[#allocation47_spill] sm:$0xff] %v10796_v7  ;;  %v4278_v62 = vsel %vm3950_vm4, %v9861_v59, %v4154_v2  ;;  %v8286_v6 = vpop.f32.mrb[146].mxu0  ;;  %v10808_v26 = vpop.f32.mrb[25].mxu1  ;;  %v5225_v18 = vor.u32 %v5224_v9, %v5221_v11  ;;  %v2549_v9 = vmul.f32 %v10822_v29, %v8285_v46  ;;  %v4280_v17 = vsel %vm3950_vm4, %v9956_v54, %v4156_v53  ;;  %v10840_v41 = vld [vmem:[%s13511_s6] ss:$0 sm:$0xff] }
 0x200   :  { %13803 = vst [vmem:[#allocation48_spill] sm:$0xff] %v10798_v15  ;;  %v4216_v8 = vpop.permute.xlu1 %4215  ;;  %v10813_v59 = vsel %vm4045_vm5, %v4278_v62, %v4218_v12  ;;  %v1952_v2 = vpop.f32.mrb[147].mxu0  ;;  %v2547_v60 = vmul.f32 %v10822_v29, %v1949_v25  ;;  %v10843_v12 = vadd.f32 %v10840_v41, %v2546_v0  ;;  %v10846_v54 = vadd.f32 %v10840_v41, %v2544_v27 }
 0x201   :  { %v10815_v31 = vpop.f32.mrb[26].mxu1  ;;  %v7635_v30 = vcombine.low %v10813_v59, %v10813_v59  ;;  %v4340_v11 = vsel %vm4045_vm5, %v4276_v38, %v4216_v8  ;;  %v10835_v46 = vrot.slane %v5225_v18, 4  ;;  %v7636_v53 = vcombine.high %v10813_v59, %v10813_v59 }
 0x202   :  { %13804 = vst [vmem:[#allocation49_spill] sm:$0xff] %v10815_v31  ;;  %v10825_v52 = vpop.f32.mrb[27].mxu1  ;;  %v7633_v39 = vcombine.low %v4340_v11, %v4340_v11  ;;  %13807 = vst [vmem:[#allocation52_spill] sm:$0xff] %v10843_v12  ;;  %v5211_v8 = vor.u32 %v5210_v48, %v5207_v47  ;;  %v10851_v25 = vadd.f32 %v10840_v41, %v2549_v9 }
 0x203   :  { %v10802_v16 = vpop.permute.xlu0 %4221  ;;  %13805 = vst [vmem:[#allocation50_spill] sm:$0xff] %v10825_v52  ;;  %v5247_v62 = vshrl.u32 %v7635_v30, 16  ;;  %v5250_v35 = vshll.u32 %v7635_v30, 16  ;;  %13806 = vst [vmem:[#allocation51_spill] sm:$0xff] %v10835_v46  ;;  %v10853_v7 = vpop.f32.mrb[28].mxu1  ;;  %v7634_v0 = vcombine.high %v4340_v11, %v4340_v11  ;;  %v10856_v21 = vcombine.low %v10754_v56, %v4340_v11 }
 0x204   :  { %v10832_v45 = vpop.permute.xlu1 %4159  ;;  %13808 = vst [vmem:[#allocation53_spill] sm:$0xff] %v10846_v54  ;;  %13809 = vst [vmem:[#allocation54_spill] sm:$0xff] %v10851_v25  ;;  %v5233_v30 = vshrl.u32 %v7633_v39, 16  ;;  %v5236_v18 = vshll.u32 %v7633_v39, 16  ;;  %v10861_v52 = vadd.f32 %v10840_v41, %v2547_v60  ;;  %v2550_v9 = vmul.f32 %v10822_v29, %v8286_v6  ;;  %v10864_v31 = vpop.f32.mrb[29].mxu1 }
 0x205   :  { %v8289_v38 = vpop.f32.mrb[148].mxu0  ;;  %13810 = vst [vmem:[#allocation55_spill] sm:$0xff] %v10853_v7  ;;  %v5249_v15 = vrot.slane %v5247_v62, 4  ;;  %v5252_v23 = vrot.slane %v5250_v35, 5  ;;  %13811 = vst [vmem:[#allocation56_spill] sm:$0xff] %v10856_v21  ;;  %v10868_v7 = vshll.u32 %v7636_v53, 16  ;;  %8411 = vmatprep.mubr.msk.bf16.mxu1 %vm5799_vm6, %v10856_v21 }
 0x206   :  { %v1965_v46 = vpop.f32.mrb[149].mxu0  ;;  %13812 = vst [vmem:[#allocation57_spill] sm:$0xff] %v10861_v52  ;;  %v5235_v47 = vrot.slane %v5233_v30, 4  ;;  %v5238_v48 = vrot.slane %v5236_v18, 5  ;;  %v10874_v11 = vpop.f32.mrb[30].mxu1  ;;  %v10876_v30 = vrot.slane %v5211_v8, 4  ;;  %v2548_v18 = vmul.f32 %v10822_v29, %v1952_v2 }
 0x207   :  { %v4158_v14 = vpop.permute.xlu0 %4157  ;;  %v8290_v39 = vpop.f32.mrb[150].mxu0  ;;  %13813 = vst [vmem:[#allocation58_spill] sm:$0xff] %v10868_v7  ;;  %v5253_v53 = vor.u32 %v5252_v23, %v5249_v15  ;;  %v10884_v62 = vshll.u32 %v7634_v0, 16  ;;  %v10892_v6 = vadd.f32 %v10840_v41, %v2550_v9  ;;  %v2553_v25 = vmul.f32 %v10822_v29, %v8289_v38 }
 0x208   :  { %v4220_v27 = vpop.permute.xlu1 %4219  ;;  %v4282_v56 = vsel %vm3950_vm4, %v9920_v5, %v4158_v14  ;;  %v1968_v60 = vpop.f32.mrb[151].mxu0  ;;  %13814 = vst [vmem:[#allocation59_spill] sm:$0xff] %v10876_v30  ;;  %v5239_v30 = vor.u32 %v5238_v48, %v5235_v47  ;;  %v10900_v12 = vadd.f32 %v10840_v41, %v2548_v18  ;;  %v2551_v47 = vmul.f32 %v10822_v29, %v1965_v46 }
 0x209   :  { %v10882_v35 = vsel %vm4045_vm5, %v4282_v56, %v10802_v16  ;;  %13815 = vst [vmem:[#allocation60_spill] sm:$0xff] %v10884_v62  ;;  %13816 = vst [vmem:[#allocation61_spill] sm:$0xff] %v10892_v6  ;;  %v4344_v2 = vsel %vm4045_vm5, %v4280_v17, %v4220_v27  ;;  %v10895_v56 = vpop.f32.mrb[31].mxu1  ;;  %v10906_v27 = vrot.slane %v5253_v53, 4  ;;  %v10920_v8 = vadd.f32 %v10840_v41, %v2553_v25 }
 0x20a   :  { %v7639_v21 = vcombine.low %v10882_v35, %v10882_v35  ;;  %v7640_v5 = vcombine.high %v10882_v35, %v10882_v35  ;;  %13817 = vst [vmem:[#allocation62_spill] sm:$0xff] %v10900_v12  ;;  %v7637_v48 = vcombine.low %v4344_v2, %v4344_v2  ;;  %v10904_v9 = vcombine.low %v10813_v59, %v4344_v2 }
 0x20b   :  { %v10858_v43 = vpop.permute.xlu0 %4225  ;;  %13819 = vst [vmem:[#allocation64_spill] sm:$0xff] %v10906_v27  ;;  %v10914_v18 = vrot.slane %v5239_v30, 4  ;;  %13822 = vst [vmem:[#allocation67_spill] sm:$0xff] %v10920_v8  ;;  %v7638_v62 = vcombine.high %v4344_v2, %v4344_v2  ;;  %v10924_v30 = vadd.f32 %v10840_v41, %v2551_v47 }
 0x20c   :  { %v4164_v14 = vpop.permute.xlu1 %4163  ;;  %v5275_v15 = vshrl.u32 %v7639_v21, 16  ;;  %v5278_v0 = vshll.u32 %v7639_v21, 16  ;;  %13818 = vst [vmem:[#allocation63_spill] sm:$0xff] %v10904_v9  ;;  %v4284_v21 = vsel %vm3950_vm4, %v10014_v22, %v10832_v45  ;;  %v10912_v38 = vshll.u32 %v7640_v5, 16  ;;  %8412 = vmatmul.mubr.msk.bf16.gmra.mrb[36].mxu1 %vm5799_vm6, %v10904_v9 }
 0x20d   :  { %v8293_v54 = vpop.f32.mrb[152].mxu0  ;;  %13821 = vst [vmem:[#allocation66_spill] sm:$0xff] %v10914_v18  ;;  %v5261_v7 = vshrl.u32 %v7637_v48, 16  ;;  %v5264_v52 = vshll.u32 %v7637_v48, 16  ;;  %13823 = vst [vmem:[#allocation68_spill] sm:$0xff] %v10924_v30  ;;  %v2554_v5 = vmul.f32 %v10822_v29, %v8290_v39  ;;  %v10943_v9 = vshll.u32 %v7638_v62, 16 }
 0x20e   :  { %v1981_v17 = vpop.f32.mrb[153].mxu0  ;;  %13820 = vst [vmem:[#allocation65_spill] sm:$0xff] %v10912_v38  ;;  %v5277_v53 = vrot.slane %v5275_v15, 4  ;;  %v5280_v27 = vrot.slane %v5278_v0, 5  ;;  %v2552_v0 = vmul.f32 %v10822_v29, %v1968_v60  ;;  %v4288_v62 = vsel %vm3950_vm4, %v10071_v24, %v4164_v14 }
 0x20f   :  { %v4162_v16 = vpop.permute.xlu0 %4161  ;;  %v8294_v59 = vpop.f32.mrb[154].mxu0  ;;  %v5263_v15 = vrot.slane %v5261_v7, 4  ;;  %v5266_v45 = vrot.slane %v5264_v52, 5  ;;  %13824 = vst [vmem:[#allocation69_spill] sm:$0xff] %v10943_v9  ;;  %v2555_v18 = vmul.f32 %v10822_v29, %v1981_v17 }
 0x210   :  { %v4224_v23 = vpop.permute.xlu1 %4223  ;;  %v1984_v22 = vpop.f32.mrb[155].mxu0  ;;  %v4286_v48 = vsel %vm3950_vm4, %v9977_v13, %v4162_v16  ;;  %v2557_v13 = vmul.f32 %v10822_v29, %v8293_v54  ;;  %v5281_v16 = vor.u32 %v5280_v27, %v5277_v53  ;;  %v10952_v54 = vadd.f32 %v10840_v41, %v2552_v0 }
 0x211   :  { %v10933_v25 = vsel %vm4045_vm5, %v4286_v48, %v10858_v43  ;;  %v4348_v60 = vsel %vm4045_vm5, %v4284_v21, %v4224_v23  ;;  %v10947_v48 = vadd.f32 %v10840_v41, %v2554_v5  ;;  %v5267_v21 = vor.u32 %v5266_v45, %v5263_v15 }
 0x212   :  { %v7643_v47 = vcombine.low %v10933_v25, %v10933_v25  ;;  %v7644_v39 = vcombine.high %v10933_v25, %v10933_v25  ;;  %13825 = vst [vmem:[#allocation70_spill] sm:$0xff] %v10952_v54  ;;  %v7641_v27 = vcombine.low %v4348_v60, %v4348_v60  ;;  %v10964_v17 = vcombine.low %v10882_v35, %v4348_v60 }
 0x213   :  { %v4230_v46 = vpop.permute.xlu0 %4229  ;;  %v10968_v0 = vrot.slane %v5281_v16, 4  ;;  %v2558_v16 = vmul.f32 %v10822_v29, %v8294_v59 }
 0x214   :  { %v10935_v2 = vpop.permute.xlu1 %4167  ;;  %v5303_v52 = vshrl.u32 %v7643_v47, 16  ;;  %v5306_v38 = vshll.u32 %v7643_v47, 16  ;;  %v10958_v5 = vshll.u32 %v7644_v39, 16  ;;  %v10961_v47 = vadd.f32 %v10840_v41, %v2557_v13  ;;  %13828 = vst [vmem:[#allocation73_spill] sm:$0xff] %v10964_v17  ;;  %8415 = vmatprep.mubr.msk.bf16.mxu1 %vm5799_vm6, %v10964_v17 }
 0x215   :  { %v8297_v43 = vpop.f32.mrb[156].mxu0  ;;  %13829 = vst [vmem:[#allocation74_spill] sm:$0xff] %v10968_v0  ;;  %v5289_v14 = vshrl.u32 %v7641_v27, 16  ;;  %v5292_v30 = vshll.u32 %v7641_v27, 16  ;;  %v10973_v39 = vadd.f32 %v10840_v41, %v2555_v18  ;;  %v7642_v13 = vcombine.high %v4348_v60, %v4348_v60 }
 0x216   :  { %v1997_v12 = vpop.f32.mrb[157].mxu0  ;;  %13826 = vst [vmem:[#allocation71_spill] sm:$0xff] %v10958_v5  ;;  %13827 = vst [vmem:[#allocation72_spill] sm:$0xff] %v10961_v47  ;;  %v5305_v45 = vrot.slane %v5303_v52, 4  ;;  %v5308_v15 = vrot.slane %v5306_v38, 5  ;;  %v10981_v27 = vrot.slane %v5267_v21, 4  ;;  %v2556_v18 = vmul.f32 %v10822_v29, %v1984_v22 }
 0x217   :  { %v10956_v23 = vpop.f32.mrb[158].mxu0  ;;  %v4166_v6 = vpop.permute.xlu0 %4165  ;;  %13830 = vst [vmem:[#allocation75_spill] sm:$0xff] %v10973_v39  ;;  %v5291_v8 = vrot.slane %v5289_v14, 4  ;;  %v5294_v9 = vrot.slane %v5292_v30, 5  ;;  %v2561_v60 = vmul.f32 %v10822_v29, %v8297_v43  ;;  %v2559_v21 = vmul.f32 %v10822_v29, %v1997_v12 }
 0x218   :  { %v4228_v53 = vpop.permute.xlu1 %4227  ;;  %v10966_v7 = vpop.f32.mrb[159].mxu0  ;;  %v4290_v24 = vsel %vm3950_vm4, %v10036_v58, %v4166_v6  ;;  %13831 = vst [vmem:[#allocation76_spill] sm:$0xff] %v10981_v27  ;;  %v5309_v35 = vor.u32 %v5308_v15, %v5305_v45  ;;  %v10994_v38 = vshll.u32 %v7642_v13, 16  ;;  %v10997_v22 = vadd.f32 %v10840_v41, %v2558_v16 }
 0x219   :  { %v10987_v17 = vsel %vm4045_vm5, %v4290_v24, %v4230_v46  ;;  %v4352_v30 = vsel %vm4045_vm5, %v4288_v62, %v4228_v53  ;;  %v11003_v43 = vadd.f32 %v10840_v41, %v2556_v18  ;;  %v5295_v12 = vor.u32 %v5294_v9, %v5291_v8 }
 0x21a   :  { %v7647_v6 = vcombine.low %v10987_v17, %v10987_v17  ;;  %13832 = vst [vmem:[#allocation77_spill] sm:$0xff] %v10994_v38  ;;  %13833 = vst [vmem:[#allocation78_spill] sm:$0xff] %v10997_v22  ;;  %v7648_v46 = vcombine.high %v10987_v17, %v10987_v17  ;;  %v7645_v45 = vcombine.low %v4352_v30, %v4352_v30  ;;  %v11019_v8 = vrot.slane %v5309_v35, 4 }
 0x21b   :  { %13834 = vst [vmem:[#allocation79_spill] sm:$0xff] %v11003_v43  ;;  %v4170_v15 = vpop.permute.xlu0 %4169  ;;  %v11006_v13 = vadd.f32 %v10840_v41, %v2561_v60  ;;  %v7646_v5 = vcombine.high %v4352_v30, %v4352_v30  ;;  %v11009_v16 = vcombine.low %v10933_v25, %v4352_v30  ;;  %v11014_v62 = vsel %vm3950_vm4, %v10130_v44, %v10935_v2 }
 0x21c   :  { %v4172_v0 = vpop.permute.xlu1 %4171  ;;  %v5331_v24 = vshrl.u32 %v7647_v6, 16  ;;  %v5334_v14 = vshll.u32 %v7647_v6, 16  ;;  %v11017_v6 = vadd.f32 %v10840_v41, %v2559_v21  ;;  %13838 = vst [vmem:[#allocation83_spill] sm:$0xff] %v11019_v8  ;;  %v11023_v25 = vshll.u32 %v7648_v46, 16 }
 0x21d   :  { %v8301_v59 = vpop.f32.mrb[160].mxu0  ;;  %13835 = vst [vmem:[#allocation80_spill] sm:$0xff] %v11006_v13  ;;  %13836 = vst [vmem:[#allocation81_spill] sm:$0xff] %v11009_v16  ;;  %8416 = vmatmul.mubr.msk.bf16.gmra.mrb[40].mxu1 %vm5799_vm6, %v11009_v16  ;;  %v5317_v30 = vshrl.u32 %v7645_v45, 16  ;;  %v5320_v47 = vshll.u32 %v7645_v45, 16  ;;  %v11027_v44 = vshll.u32 %v7646_v5, 16  ;;  %v4296_v2 = vsel %vm3950_vm4, %v10159_v33, %v4172_v0 }
 0x21e   :  { %v2013_v52 = vpop.f32.mrb[161].mxu0  ;;  %v5333_v53 = vrot.slane %v5331_v24, 4  ;;  %v5336_v18 = vrot.slane %v5334_v14, 5  ;;  %13837 = vst [vmem:[#allocation82_spill] sm:$0xff] %v11017_v6  ;;  %13839 = vst [vmem:[#allocation84_spill] sm:$0xff] %v11023_v25  ;;  %v11033_v35 = vrot.slane %v5295_v12, 4  ;;  %v11039_v46 = vsel %vm4045_vm5, %v4296_v2, %v10552_v49 }
 0x21f   :  { %v8302_v58 = vpop.f32.mrb[162].mxu0  ;;  %13840 = vst [vmem:[#allocation85_spill] sm:$0xff] %v11027_v44  ;;  %v2562_v45 = vmul.f32 %v10822_v29, %v10956_v23  ;;  %v7653_v33 = vcombine.low %v11039_v46, %v11039_v46  ;;  %v2560_v14 = vmul.f32 %v10822_v29, %v10966_v7  ;;  %v2565_v2 = vmul.f32 %v10822_v29, %v8301_v59 }
 0x220   :  { %v4234_v27 = vpop.permute.xlu1 %4233  ;;  %v2016_v39 = vpop.f32.mrb[163].mxu0  ;;  %13841 = vst [vmem:[#allocation86_spill] sm:$0xff] %v11033_v35  ;;  %v5337_v60 = vor.u32 %v5336_v18, %v5333_v53  ;;  %v2563_v24 = vmul.f32 %v10822_v29, %v2013_v52  ;;  %v11053_v18 = vrot.slane %v5317_v30, 4  ;;  %v11055_v5 = vrot.slane %v5320_v47, 5 }
 0x221   :  { %v11031_v21 = vpop.permute.xlu0 %4235  ;;  %v4294_v16 = vsel %vm3950_vm4, %v10094_v61, %v4170_v15  ;;  %v5373_v12 = vshrl.u32 %v7653_v33, 16  ;;  %v2828_v25 = vadd.f32 %v10840_v41, %v2565_v2  ;;  %v11070_v47 = vadd.f32 %v10840_v41, %v2562_v45 }
 0x222   :  { %v2826_v7 = vadd.f32 %v10840_v41, %v2563_v24  ;;  %v4358_v59 = vsel %vm4045_vm5, %v4294_v16, %v4234_v27  ;;  %v11067_v30 = vrot.slane %v5337_v60, 4  ;;  %v5376_v23 = vshll.u32 %v7653_v33, 16 }
 0x223   :  { %13843 = vst [vmem:[#allocation88_spill] sm:$0xff] %v11070_v47  ;;  %v7651_v44 = vcombine.low %v4358_v59, %v4358_v59  ;;  %v11073_v61 = vadd.f32 %v10840_v41, %v2560_v14  ;;  %v7654_v15 = vcombine.high %v11039_v46, %v11039_v46  ;;  %v3084_v2 = vmax.f32 %v2828_v25, 0.0 }
 0x224   :  { %v4232_v53 = vpop.permute.xlu1 %4231  ;;  %13842 = vst [vmem:[#allocation87_spill] sm:$0xff] %v11067_v30  ;;  %v3082_v24 = vmax.f32 %v2826_v7, 0.0  ;;  %v5323_v27 = vor.u32 %v11055_v5, %v11053_v18  ;;  %v2566_v30 = vmul.f32 %v10822_v29, %v8302_v58  ;;  %v5375_v45 = vrot.slane %v5373_v12, 4 }
 0x225   :  { %v8305_v9 = vpop.f32.mrb[164].mxu0  ;;  %v4174_v35 = vpop.permute.xlu0 %4173  ;;  %13844 = vst [vmem:[#allocation89_spill] sm:$0xff] %v11073_v61  ;;  %v5359_v16 = vshrl.u32 %v7651_v44, 16  ;;  %v5362_v60 = vshll.u32 %v7651_v44, 16  ;;  %v13845_v33 = vmax.f32 %v10426_v10, 0.0  ;;  %v13846_v6 = vmax.f32 %v10432_v55, 0.0 }
 0x226   :  { %v11046_v0 = vpop.f32.mrb[165].mxu0  ;;  %v2564_v13 = vmul.f32 %v10822_v29, %v2016_v39  ;;  %v5378_v7 = vrot.slane %v5376_v23, 5  ;;  %v7652_v22 = vcombine.high %v4358_v59, %v4358_v59  ;;  %v2829_v44 = vadd.f32 %v10840_v41, %v2566_v30 }
 0x227   :  { %v11060_v8 = vpop.f32.mrb[166].mxu0  ;;  %v3276_v38 = vmax.f32 %v3084_v2, %v13845_v33  ;;  %v3274_v14 = vmax.f32 %v3082_v24, %v13846_v6  ;;  %v5361_v5 = vrot.slane %v5359_v16, 4  ;;  %v5364_v58 = vrot.slane %v5362_v60, 5 }
 0x228   :  { %v11065_v52 = vpop.f32.mrb[167].mxu0  ;;  %v11085_v43 = vpop.permute.xlu1 %4175  ;;  %v2827_v12 = vadd.f32 %v10840_v41, %v2564_v13  ;;  %v4356_v10 = vsel %vm4045_vm5, %v11014_v62, %v4232_v53  ;;  %v4298_v55 = vsel %vm3950_vm4, 0, %v4174_v35  ;;  %v11095_v6 = vshll.u32 %v7654_v15, 16 }
 0x229   :  { %v3085_v2 = vmax.f32 %v2829_v44, 0.0  ;;  %v7649_v24 = vcombine.low %v4356_v10, %v4356_v10  ;;  %v4240_v23 = vpop.permute.xlu0 %4239  ;;  %v11100_v30 = vcombine.low %v10987_v17, %v4356_v10  ;;  %v11104_v13 = vsel %vm4045_vm5, %v4298_v55, %v11031_v21 }
 0x22a   :  { %13847 = vst [vmem:[#allocation90_spill] sm:$0xff] %v11095_v6  ;;  %v3083_v16 = vmax.f32 %v2827_v12, 0.0  ;;  %v2569_v62 = vmul.f32 %v10822_v29, %v8305_v9  ;;  %v5379_v53 = vor.u32 %v5378_v7, %v5375_v45  ;;  %v11109_v15 = vshll.u32 %v7652_v22, 16  ;;  %v13858_v45 = vld [vmem:[#allocation2_spill] sm:$0xff] }
 0x22b   :  { %13848 = vst [vmem:[#allocation91_spill] sm:$0xff] %v11100_v30  ;;  %v11112_v60 = vcombine.low %v4358_v59, %v11039_v46  ;;  %v13851_v44 = vmax.f32 %v10468_v1, 0.0  ;;  %v5365_v39 = vor.u32 %v5364_v58, %v5361_v5  ;;  %v13852_v17 = vmax.f32 %v10475_v50, 0.0  ;;  %8419 = vmatprep.mubr.msk.bf16.mxu1 %vm5799_vm6, %v11100_v30 }
 0x22c   :  { %13849 = vst [vmem:[#allocation92_spill] sm:$0xff] %v11109_v15  ;;  %v7650_v54 = vcombine.high %v4356_v10, %v4356_v10  ;;  %v7655_v21 = vcombine.low %v11104_v13, %v11104_v13  ;;  %v11122_v9 = vpop.permute.xlu1 %4179  ;;  %v5345_v46 = vshrl.u32 %v7649_v24, 16  ;;  %v5348_v59 = vshll.u32 %v7649_v24, 16 }
 0x22d   :  { %v11087_v25 = vpop.f32.mrb[168].mxu0  ;;  %13850 = vst [vmem:[#allocation93_spill] sm:$0xff] %v11112_v60  ;;  %v3277_v12 = vmax.f32 %v3085_v2, %v13851_v44  ;;  %v3275_v47 = vmax.f32 %v3083_v16, %v13852_v17  ;;  %v2832_v1 = vadd.f32 %v10840_v41, %v2569_v62  ;;  %8420 = vmatmul.mubr.msk.bf16.gmra.mrb[44].mxu1 %vm5799_vm6, %v11112_v60  ;;  %v11129_v50 = vrot.slane %v5323_v27, 4  ;;  %v4178_v24 = vpop.permute.xlu0 %4177 }
 0x22e   :  { %v2045_v18 = vpop.f32.mrb[169].mxu0  ;;  %v5387_v5 = vshrl.u32 %v7655_v21, 16  ;;  %v11136_v10 = vrot.slane %v5379_v53, 4  ;;  %v5390_v55 = vshll.u32 %v7655_v21, 16  ;;  %v11141_v62 = vrot.slane %v5365_v39, 4 }
 0x22f   :  { %v11097_v33 = vpop.f32.mrb[170].mxu0  ;;  %v11124_v22 = vmax.f32 %v3276_v38, %v3277_v12  ;;  %13853 = vst [vmem:[#allocation94_spill] sm:$0xff] %v11129_v50  ;;  %v11132_v7 = vmax.f32 %v3274_v14, %v3275_v47  ;;  %v3088_v2 = vmax.f32 %v2832_v1, 0.0  ;;  %v11144_v44 = vshll.u32 %v7650_v54, 16 }
 0x230   :  { %v11107_v35 = vpop.f32.mrb[171].mxu0  ;;  %13854 = vst [vmem:[#allocation95_spill] sm:$0xff] %v11136_v10  ;;  %13855 = vst [vmem:[#allocation96_spill] sm:$0xff] %v11141_v62  ;;  %v2567_v47 = vmul.f32 %v10822_v29, %v11046_v0  ;;  %v5347_v14 = vrot.slane %v5345_v46, 4  ;;  %v5350_v12 = vrot.slane %v5348_v59, 5  ;;  %v7656_v53 = vcombine.high %v11104_v13, %v11104_v13  ;;  %v4238_v0 = vpop.permute.xlu1 %4237 }
 0x231   :  { %13856 = vst [vmem:[#allocation97_spill] sm:$0xff] %v11144_v44  ;;  %v13857_v17 = vmax.f32 %v10481_v32, 0.0  ;;  %v5389_v38 = vrot.slane %v5387_v5, 4  ;;  %v2570_v54 = vmul.f32 %v10822_v29, %v11060_v8  ;;  %v2568_v27 = vmul.f32 %v10822_v29, %v11065_v52 }
 0x232   :  { %v2830_v39 = vadd.f32 %v10840_v41, %v2567_v47  ;;  %v5392_v59 = vrot.slane %v5390_v55, 5  ;;  %v4302_v60 = vsel %vm3950_vm4, %v13858_v45, %v4178_v24  ;;  %v2573_v32 = vmul.f32 %v10822_v29, %v11087_v25  ;;  %v13859_v47 = vld [vmem:[#allocation3_spill] sm:$0xff] }
 0x233   :  { %v3280_v21 = vmax.f32 %v3088_v2, %v13857_v17  ;;  %v2571_v5 = vmul.f32 %v10822_v29, %v2045_v18  ;;  %v4300_v8 = vsel %vm3950_vm4, %v13859_v47, %v11085_v43  ;;  %v2833_v17 = vadd.f32 %v10840_v41, %v2570_v54  ;;  %v4244_v18 = vpop.permute.xlu0 %4243 }
 0x234   :  { %v3086_v2 = vmax.f32 %v2830_v39, 0.0  ;;  %v2831_v52 = vadd.f32 %v10840_v41, %v2568_v27  ;;  %v11172_v30 = vsel %vm4045_vm5, %v4302_v60, %v4240_v23  ;;  %v2836_v55 = vadd.f32 %v10840_v41, %v2573_v32 }
 0x235   :  { %v11134_v58 = vpop.f32.mrb[172].mxu0  ;;  %v2834_v45 = vadd.f32 %v10840_v41, %v2571_v5  ;;  %v11177_v25 = vsel %vm4045_vm5, %v4300_v8, %v4238_v0  ;;  %v13860_v24 = vmax.f32 %v10523_v37, 0.0  ;;  %v3089_v10 = vmax.f32 %v2833_v17, 0.0 }
 0x236   :  { %v11139_v16 = vpop.f32.mrb[173].mxu0  ;;  %v3087_v43 = vmax.f32 %v2831_v52, 0.0  ;;  %v7659_v54 = vcombine.low %v11172_v30, %v11172_v30  ;;  %v5351_v23 = vor.u32 %v5350_v12, %v5347_v14  ;;  %v7660_v60 = vcombine.high %v11172_v30, %v11172_v30 }
 0x237   :  { %v11152_v1 = vpop.f32.mrb[174].mxu0  ;;  %v3278_v39 = vmax.f32 %v3086_v2, %v13860_v24  ;;  %v3092_v32 = vmax.f32 %v2836_v55, 0.0  ;;  %v3090_v5 = vmax.f32 %v2834_v45, 0.0  ;;  %v11189_v47 = vshll.u32 %v7656_v53, 16 }
 0x238   :  { %v11159_v46 = vpop.f32.mrb[175].mxu0  ;;  %v13862_v37 = vmax.f32 %v10529_v3, 0.0  ;;  %v13863_v8 = vmax.f32 %v10537_v36, 0.0  ;;  %v7657_v14 = vcombine.low %v11177_v25, %v11177_v25  ;;  %v5393_v52 = vor.u32 %v5392_v59, %v5389_v38  ;;  %v4182_v59 = vpop.permute.xlu0 %4181 }
 0x239   :  { %13861 = vst [vmem:[#allocation2_spill] sm:$0xff] %v11189_v47  ;;  %v13864_v55 = vmax.f32 %v10575_v20, 0.0  ;;  %v13865_v24 = vmax.f32 %v10583_v40, 0.0  ;;  %v5415_v36 = vshrl.u32 %v7659_v54, 16  ;;  %v11214_v20 = vpack.c.bf16 %v11132_v7, %v11132_v7 }
 0x23a   :  { %v3281_v2 = vmax.f32 %v3089_v10, %v13862_v37  ;;  %v3279_v17 = vmax.f32 %v3087_v43, %v13863_v8  ;;  %v5418_v10 = vshll.u32 %v7659_v54, 16  ;;  %v3419_v37 = vpack.c.bf16 %v11124_v22, %v11124_v22  ;;  %v13870_v22 = vld [vmem:[#allocation5_spill] sm:$0xff] }
 0x23b   :  { %v3284_v45 = vmax.f32 %v3092_v32, %v13864_v55  ;;  %v3282_v6 = vmax.f32 %v3090_v5, %v13865_v24  ;;  %v11216_v38 = vrot.slane %v5351_v23, 4  ;;  %v11218_v40 = vshll.u32 %v7660_v60, 16 }
 0x23c   :  { %v11204_v62 = vmax.f32 %v3280_v21, %v3281_v2  ;;  %v11206_v3 = vmax.f32 %v3278_v39, %v3279_v17  ;;  %v5401_v39 = vshrl.u32 %v7657_v14, 16  ;;  %v5404_v32 = vshll.u32 %v7657_v14, 16  ;;  %v11234_v2 = vpop.permute.xlu1 %4183  ;;  %v13871_v14 = vld [vmem:[#allocation4_spill] sm:$0xff] }
 0x23d   :  { %v11183_v27 = vpop.f32.mrb[176].mxu0  ;;  %13866 = vst [vmem:[#allocation3_spill] sm:$0xff] %v11216_v38  ;;  %13867 = vst [vmem:[#allocation98_spill] sm:$0xff] %v11218_v40  ;;  %v11223_v54 = vcombine.low %v11104_v13, %v11177_v25  ;;  %v11225_v5 = vrot.slane %v5393_v52, 4  ;;  %v4304_v7 = vsel %vm3950_vm4, %v13870_v22, %v11122_v9  ;;  %v7658_v23 = vcombine.high %v11177_v25, %v11177_v25 }
 0x23e   :  { %v11187_v0 = vpop.f32.mrb[177].mxu0  ;;  %v2574_v60 = vmul.f32 %v10822_v29, %v11097_v33  ;;  %v5417_v8 = vrot.slane %v5415_v36, 4  ;;  %v5420_v17 = vrot.slane %v5418_v10, 5  ;;  %v2572_v13 = vmul.f32 %v10822_v29, %v11107_v35 }
 0x23f   :  { %v11202_v53 = vpop.f32.mrb[178].mxu0  ;;  %13868 = vst [vmem:[#allocation99_spill] sm:$0xff] %v11223_v54  ;;  %13869 = vst [vmem:[#allocation100_spill] sm:$0xff] %v11225_v5  ;;  %8423 = vmatprep.mubr.msk.bf16.mxu1 %vm5799_vm6, %v11223_v54  ;;  %v4306_v52 = vsel %vm3950_vm4, %v13871_v14, %v4182_v59  ;;  %v3554_v24 = vshrl.u32 %v3419_v37, 16  ;;  %v5403_v10 = vrot.slane %v5401_v39, 4  ;;  %v5406_v35 = vrot.slane %v5404_v32, 5 }
 0x240   :  { %v11208_v43 = vpop.f32.mrb[179].mxu0  ;;  %v2837_v55 = vadd.f32 %v10840_v41, %v2574_v60  ;;  %v11247_v33 = vsel %vm4045_vm5, %v4306_v52, %v4244_v18  ;;  %v2835_v22 = vadd.f32 %v10840_v41, %v2572_v13  ;;  %v3557_v12 = vshll.u32 %v3419_v37, 16  ;;  %v4248_v13 = vpop.permute.xlu0 %4247  ;;  %v12642_v32 = vld [vmem:[%s13512_s7 + $0x60] sm:$0xff]  }
 0x241   :  { %v7663_v21 = vcombine.low %v11247_v33, %v11247_v33  ;;  %v3556_v14 = vrot.slane %v3554_v24, 7  ;;  %v2577_v25 = vmul.f32 %v10822_v29, %v11134_v58  ;;  %v7664_v52 = vcombine.high %v11247_v33, %v11247_v33  ;;  %v4242_v5 = vpop.permute.xlu1 %4241 }
 0x242   :  { %v3093_v59 = vmax.f32 %v2837_v55, 0.0  ;;  %v3091_v18 = vmax.f32 %v2835_v22, 0.0  ;;  %v13874_v37 = vmax.f32 %v10591_v19, 0.0  ;;  %v2575_v40 = vmul.f32 %v10822_v29, %v11139_v16 }
 0x243   :  { %v5443_v54 = vshrl.u32 %v7663_v21, 16  ;;  %v5446_v39 = vshll.u32 %v7663_v21, 16  ;;  %v3559_v24 = vor.u32 %v3557_v12, %v3556_v14  ;;  %v2840_v22 = vadd.f32 %v10840_v41, %v2577_v25 }
 0x244   :  { %v3285_v58 = vmax.f32 %v3093_v59, %v13874_v37  ;;  %v5421_v21 = vor.u32 %v5420_v17, %v5417_v8  ;;  %v5407_v47 = vor.u32 %v5406_v35, %v5403_v10  ;;  %v11273_v15 = vshll.u32 %v7658_v23, 16  ;;  %v4186_v10 = vpop.permute.xlu0 %4185 }
 0x245   :  { %v11242_v9 = vpop.f32.mrb[180].mxu0  ;;  %v13876_v38 = vmax.f32 %v10598_v34, 0.0  ;;  %v11279_v61 = vsel %vm11262_vm9, 0, %v3559_v24  ;;  %v3096_v19 = vmax.f32 %v2840_v22, 0.0  ;;  %v2838_v12 = vadd.f32 %v10840_v41, %v2575_v40 }
 0x246   :  { %v11249_v36 = vpop.f32.mrb[181].mxu0  ;;  %13875 = vst [vmem:[#allocation5_spill] sm:$0xff] %v11273_v15  ;;  %v3391_v50 = vmax.f32 %v3284_v45, %v3285_v58  ;;  %13877 = vst [vmem:[#allocation4_spill] sm:$0xff] %v11279_v61  ;;  %v11282_v59 = vshll.u32 %v7664_v52, 16  ;;  %3920 = vrot.lane.b32.xlu0 %v11279_v61, %s8915_s24  ;;  %3857 = vrot.lane.b32.xlu1 %v11279_v61, %s8916_s26  ;;  %v11289_v34 = vsel %vm4045_vm5, %v4304_v7, %v4242_v5 }
 0x247   :  { %v11256_v60 = vpop.f32.mrb[182].mxu0  ;;  %v3283_v44 = vmax.f32 %v3091_v18, %v13876_v38  ;;  %v3547_v16 = vshrl.u32 %v11214_v20, 16  ;;  %v11294_v38 = vrot.slane %v5443_v54, 4  ;;  %v11296_v23 = vrot.slane %v5446_v39, 5 }
 0x248   :  { %v11266_v55 = vpop.f32.mrb[183].mxu0  ;;  %13878 = vst [vmem:[#allocation101_spill] sm:$0xff] %v11282_v59  ;;  %v3094_v40 = vmax.f32 %v2838_v12, 0.0  ;;  %v3421_v17 = vpack.c.bf16 %v11204_v62, %v11204_v62  ;;  %v11306_v5 = vpack.c.bf16 %v11206_v3, %v11206_v3  ;;  %v11311_v54 = vcombine.low %v11172_v30, %v11289_v34  ;;  %v13894_v59 = vld [vmem:[#allocation22_spill] sm:$0xff] }
 0x249   :  { %v3390_v25 = vmax.f32 %v3282_v6, %v3283_v44  ;;  %v13879_v6 = vmax.f32 %v10601_v42, 0.0  ;;  %v11313_v35 = vrot.slane %v5421_v21, 4  ;;  %v13882_v42 = vmax.f32 %v10610_v51, 0.0  ;;  %v4188_v21 = vpop.permute.xlu1 %4187 }
 0x24a   :  { %13880 = vst [vmem:[#allocation102_spill] sm:$0xff] %v11311_v54  ;;  %v7661_v18 = vcombine.low %v11289_v34, %v11289_v34  ;;  %v3549_v62 = vrot.slane %v3547_v16, 7  ;;  %v4308_v3 = vsel %vm3950_vm4, %v10383_v63, %v11234_v2  ;;  %v3550_v39 = vshll.u32 %v11214_v20, 16  ;;  %8424 = vmatmul.mubr.msk.bf16.gmra.mrb[48].mxu1 %vm5799_vm6, %v11311_v54 }
 0x24b   :  { %v3288_v44 = vmax.f32 %v3096_v19, %v13879_v6  ;;  %13881 = vst [vmem:[#allocation103_spill] sm:$0xff] %v11313_v35  ;;  %v3286_v14 = vmax.f32 %v3094_v40, %v13882_v42  ;;  %v2578_v30 = vmul.f32 %v10822_v29, %v11152_v1  ;;  %v2576_v37 = vmul.f32 %v10822_v29, %v11159_v46 }
 0x24c   :  { %v11333_v58 = vrot.slane %v5407_v47, 4  ;;  %v5449_v24 = vor.u32 %v11296_v23, %v11294_v38  ;;  %v4310_v20 = vsel %vm3950_vm4, %v10345_v4, %v4186_v10  ;;  %v11340_v2 = vpack.c.bf16 %v3391_v50, %v3391_v50 }
 0x24d   :  { %v11292_v45 = vpop.f32.mrb[184].mxu0  ;;  %v3552_v1 = vor.u32 %v3550_v39, %v3549_v62  ;;  %v2841_v46 = vadd.f32 %v10840_v41, %v2578_v30  ;;  %v2839_v22 = vadd.f32 %v10840_v41, %v2576_v37  ;;  %v5429_v19 = vshrl.u32 %v7661_v18, 16  ;;  %v13886_v30 = vld [vmem:[#allocation15_spill] sm:$0xff] }
 0x24e   :  { %v11300_v8 = vpop.f32.mrb[185].mxu0  ;;  %13883 = vst [vmem:[#allocation104_spill] sm:$0xff] %v11333_v58  ;;  %v5432_v12 = vshll.u32 %v7661_v18, 16  ;;  %v11345_v47 = vsel %vm4045_vm5, %v4310_v20, %v4248_v13  ;;  %v3568_v16 = vshrl.u32 %v3421_v17, 16  ;;  %v7662_v40 = vcombine.high %v11289_v34, %v11289_v34 }
 0x24f   :  { %v11319_v52 = vpop.f32.mrb[186].mxu0  ;;  %v11349_v38 = vsel %vm11262_vm9, 0, %v3552_v1  ;;  %v3097_v23 = vmax.f32 %v2841_v46, 0.0  ;;  %v3095_v4 = vmax.f32 %v2839_v22, 0.0  ;;  %v7667_v50 = vcombine.low %v11345_v47, %v11345_v47  ;;  %v4252_v22 = vpop.permute.xlu0 %4251 }
 0x250   :  { %v11331_v51 = vpop.f32.mrb[187].mxu0  ;;  %13884 = vst [vmem:[#allocation105_spill] sm:$0xff] %v11349_v38  ;;  %3855 = vrot.lane.b32.xlu0 %v11349_v38, %s8916_s26  ;;  %v3570_v13 = vrot.slane %v3568_v16, 7  ;;  %v3571_v10 = vshll.u32 %v3421_v17, 16  ;;  %v2581_v42 = vmul.f32 %v10822_v29, %v11183_v27  ;;  %v13885_v62 = vmax.f32 %v10615_v57, 0.0 }
 0x251   :  { %v13887_v37 = vmax.f32 %v13886_v30, 0.0  ;;  %v5471_v1 = vshrl.u32 %v7667_v50, 16  ;;  %v5474_v46 = vshll.u32 %v7667_v50, 16  ;;  %v11367_v34 = vpack.c.bf16 %v3390_v25, %v3390_v25 }
 0x252   :  { %v3289_v39 = vmax.f32 %v3097_v23, %v13885_v62  ;;  %v3573_v63 = vor.u32 %v3571_v10, %v3570_v13  ;;  %v2844_v16 = vadd.f32 %v10840_v41, %v2581_v42  ;;  %v2579_v17 = vmul.f32 %v10822_v29, %v11187_v0  ;;  %v4246_v62 = vpop.permute.xlu1 %4245 }
 0x253   :  { %v3287_v20 = vmax.f32 %v3095_v4, %v13887_v37  ;;  %v5431_v7 = vrot.slane %v5429_v19, 4  ;;  %v5434_v54 = vrot.slane %v5432_v12, 5  ;;  %v11376_v4 = vshll.u32 %v7662_v40, 16 }
 0x254   :  { %v3393_v57 = vmax.f32 %v3288_v44, %v3289_v39  ;;  %v11380_v25 = vsel %vm11262_vm9, 0, %v3573_v63  ;;  %v3100_v50 = vmax.f32 %v2844_v16, 0.0  ;;  %v2842_v13 = vadd.f32 %v10840_v41, %v2579_v17  ;;  %v13891_v63 = vld [vmem:[#allocation20_spill] sm:$0xff]  ;;  %v4190_v16 = vpop.permute.xlu0 %4189 }
 0x255   :  { %v11353_v6 = vpop.f32.mrb[188].mxu0  ;;  %v3392_v23 = vmax.f32 %v3286_v14, %v3287_v20  ;;  %13888 = vst [vmem:[#allocation15_spill] sm:$0xff] %v11376_v4  ;;  %13889 = vst [vmem:[#allocation106_spill] sm:$0xff] %v11380_v25  ;;  %v7668_v0 = vcombine.high %v11345_v47, %v11345_v47  ;;  %v5473_v10 = vrot.slane %v5471_v1, 4  ;;  %v5476_v19 = vrot.slane %v5474_v46, 5  ;;  %3924 = vrot.lane.b32.xlu0 %v11380_v25, %s8915_s24 }
 0x256   :  { %v11361_v18 = vpop.f32.mrb[189].mxu0  ;;  %3861 = vrot.lane.b32.xlu1 %v11380_v25, %s8916_s26  ;;  %v3561_v44 = vshrl.u32 %v11306_v5, 16  ;;  %v11390_v14 = vrot.slane %v5449_v24, 4  ;;  %v13892_v12 = vmax.f32 %v13891_v63, 0.0  ;;  %v3098_v42 = vmax.f32 %v2842_v13, 0.0 }
 0x257   :  { %v11372_v27 = vpop.f32.mrb[190].mxu0  ;;  %v4371_v39 = vsel %vm4045_vm5, %v4308_v3, %v4246_v62  ;;  %v5435_v37 = vor.u32 %v5434_v54, %v5431_v7  ;;  %v3564_v46 = vshll.u32 %v11306_v5, 16  ;;  %v13895_v35 = vmax.f32 %v13894_v59, 0.0  ;;  %v13896_v54 = vld [vmem:[#allocation7_spill] sm:$0xff] }
 0x258   :  { %v11374_v30 = vpop.f32.mrb[191].mxu0  ;;  %13890 = vst [vmem:[#allocation107_spill] sm:$0xff] %v11390_v14  ;;  %v3292_v40 = vmax.f32 %v3100_v50, %v13892_v12  ;;  %v7665_v20 = vcombine.low %v4371_v39, %v4371_v39  ;;  %v11396_v1 = vcombine.low %v11247_v33, %v4371_v39  ;;  %v3563_v14 = vrot.slane %v3561_v44, 7  ;;  %v13898_v44 = vld [vmem:[#allocation6_spill] sm:$0xff] }
 0x259   :  { %v3290_v24 = vmax.f32 %v3098_v42, %v13895_v35  ;;  %v2582_v50 = vmul.f32 %v10822_v29, %v11202_v53  ;;  %v2580_v3 = vmul.f32 %v10822_v29, %v11208_v43  ;;  %v4312_v5 = vsel %vm3950_vm4, %v13896_v54, %v4188_v21 }
 0x25a   :  { %13893 = vst [vmem:[#allocation20_spill] sm:$0xff] %v11396_v1  ;;  %v5477_v62 = vor.u32 %v5476_v19, %v5473_v10  ;;  %v11412_v13 = vshll.u32 %v7668_v0, 16  ;;  %8427 = vmatprep.mubr.msk.bf16.mxu1 %vm5799_vm6, %v11396_v1  ;;  %v3566_v35 = vor.u32 %v3564_v46, %v3563_v14  ;;  %v4314_v63 = vsel %vm3950_vm4, %v13898_v44, %v4190_v16  ;;  %v4192_v10 = vpop.permute.xlu1 %4191 }
 0x25b   :  { %v2845_v53 = vadd.f32 %v10840_v41, %v2582_v50  ;;  %v2843_v43 = vadd.f32 %v10840_v41, %v2580_v3  ;;  %v11424_v42 = vrot.slane %v5435_v37, 4  ;;  %v7666_v21 = vcombine.high %v4371_v39, %v4371_v39 }
 0x25c   :  { %13897 = vst [vmem:[#allocation22_spill] sm:$0xff] %v11412_v13  ;;  %v5457_v0 = vshrl.u32 %v7665_v20, 16  ;;  %v11427_v19 = vsel %vm4045_vm5, %v4314_v63, %v4252_v22  ;;  %v5460_v54 = vshll.u32 %v7665_v20, 16  ;;  %v11431_v14 = vsel %vm11262_vm9, 0, %v3566_v35  ;;  %v13902_v20 = vld [vmem:[#allocation23_spill] sm:$0xff] }
 0x25d   :  { %v11399_v17 = vpop.f32.mrb[192].mxu0  ;;  %13899 = vst [vmem:[#allocation7_spill] sm:$0xff] %v11424_v42  ;;  %13900 = vst [vmem:[#allocation6_spill] sm:$0xff] %v11431_v14  ;;  %v3101_v46 = vmax.f32 %v2845_v53, 0.0  ;;  %v3099_v50 = vmax.f32 %v2843_v43, 0.0  ;;  %v11433_v3 = vpack.c.bf16 %v3393_v57, %v3393_v57  ;;  %v11435_v16 = vpack.c.bf16 %v3392_v23, %v3392_v23  ;;  %3922 = vrot.lane.b32.xlu1 %v11431_v14, %s8915_s24 }
 0x25e   :  { %v11407_v7 = vpop.f32.mrb[193].mxu0  ;;  %3859 = vrot.lane.b32.xlu0 %v11431_v14, %s8916_s26  ;;  %v3582_v22 = vshrl.u32 %v11340_v2, 16  ;;  %v11443_v39 = vrot.slane %v5477_v62, 4  ;;  %v13903_v35 = vmax.f32 %v13902_v20, 0.0  ;;  %v13904_v57 = vmax.f32 %v10723_v28, 0.0 }
 0x25f   :  { %v11416_v59 = vpop.f32.mrb[194].mxu0  ;;  %v7671_v23 = vcombine.low %v11427_v19, %v11427_v19  ;;  %v11451_v44 = vshll.u32 %v7666_v21, 16  ;;  %v3585_v37 = vshll.u32 %v11340_v2, 16  ;;  %v2585_v33 = vmul.f32 %v10822_v29, %v11242_v9  ;;  %v4250_v29 = vpop.permute.xlu1 %4249 }
 0x260   :  { %v11422_v12 = vpop.f32.mrb[195].mxu0  ;;  %13901 = vst [vmem:[#allocation108_spill] sm:$0xff] %v11443_v39  ;;  %v3293_v53 = vmax.f32 %v3101_v46, %v13903_v35  ;;  %v3291_v43 = vmax.f32 %v3099_v50, %v13904_v57  ;;  %v3584_v63 = vrot.slane %v3582_v22, 7  ;;  %v5459_v62 = vrot.slane %v5457_v0, 4  ;;  %v13906_v50 = vld [vmem:[#allocation9_spill] sm:$0xff]  ;;  %v13907_v35 = vld [vmem:[#allocation31_spill] sm:$0xff] }
 0x261   :  { %13905 = vst [vmem:[#allocation23_spill] sm:$0xff] %v11451_v44  ;;  %v5462_v39 = vrot.slane %v5460_v54, 5  ;;  %v11466_v21 = vsel %vm3950_vm4, %v13906_v50, %v4192_v10  ;;  %v2848_v2 = vadd.f32 %v10840_v41, %v2585_v33  ;;  %v3168_v57 = vmax.f32 %v13907_v35, 0.0  ;;  %v11477_v54 = vld [vmem:[%s13510_s5] ss:$0 sm:$0xff] }
 0x262   :  { %v11458_v20 = vmax.f32 %v3292_v40, %v3293_v53  ;;  %v11460_v46 = vmax.f32 %v3290_v24, %v3291_v43  ;;  %v3587_v22 = vor.u32 %v3585_v37, %v3584_v63  ;;  %v7672_v40 = vcombine.high %v11427_v19, %v11427_v19  ;;  %v4256_v37 = vpop.permute.xlu0 %4255  ;;  %v13909_v43 = vld [vmem:[#allocation25_spill] sm:$0xff] }
 0x263   :  { %v5499_v0 = vshrl.u32 %v7671_v23, 16  ;;  %v5502_v24 = vshll.u32 %v7671_v23, 16  ;;  %v2583_v10 = vmul.f32 %v11477_v54, %v11249_v36  ;;  %v3104_v53 = vmax.f32 %v2848_v2, 0.0  ;;  %v13910_v23 = vld [vmem:[#allocation29_spill] sm:$0xff]  ;;  %v11498_v36 = vld [vmem:[%s13511_s6] ss:$0 sm:$0xff] }
 0x264   :  { %v11485_v33 = vsel %vm11262_vm9, 0, %v3587_v22  ;;  %v2647_v63 = vmul.f32 %v11477_v54, %v13909_v43  ;;  %v2650_v50 = vmul.f32 %v11477_v54, %v13910_v23  ;;  %v5463_v35 = vor.u32 %v5462_v39, %v5459_v62 }
 0x265   :  { %v11456_v1 = vpop.f32.mrb[196].mxu0  ;;  %13908 = vst [vmem:[#allocation9_spill] sm:$0xff] %v11485_v33  ;;  %3928 = vrot.lane.b32.xlu0 %v11485_v33, %s8915_s24  ;;  %3865 = vrot.lane.b32.xlu1 %v11485_v33, %s8916_s26  ;;  %v2846_v22 = vadd.f32 %v11498_v36, %v2583_v10  ;;  %v4375_v2 = vsel %vm4045_vm5, %v4312_v5, %v4250_v29  ;;  %v3575_v43 = vshrl.u32 %v11367_v34, 16  ;;  %v5501_v15 = vrot.slane %v5499_v0, 4 }
 0x266   :  { %v11462_v28 = vpop.f32.mrb[197].mxu0  ;;  %v3296_v13 = vmax.f32 %v3104_v53, %v3168_v57  ;;  %v2910_v39 = vadd.f32 %v11498_v36, %v2647_v63  ;;  %v2913_v62 = vadd.f32 %v11498_v36, %v2650_v50  ;;  %v7669_v23 = vcombine.low %v4375_v2, %v4375_v2 }
 0x267   :  { %v11470_v9 = vpop.f32.mrb[198].mxu0  ;;  %v3102_v33 = vmax.f32 %v2846_v22, 0.0  ;;  %v11507_v4 = vcombine.low %v11345_v47, %v4375_v2  ;;  %v3577_v58 = vrot.slane %v3575_v43, 7  ;;  %v5504_v25 = vrot.slane %v5502_v24, 5  ;;  %v4194_v47 = vpop.permute.xlu0 %4193  ;;  %v13914_v43 = vld [vmem:[#allocation37_spill] sm:$0xff] }
 0x268   :  { %v11481_v41 = vpop.f32.mrb[199].mxu0  ;;  %v11509_v10 = vshll.u32 %v7672_v40, 16  ;;  %v3166_v5 = vmax.f32 %v2910_v39, 0.0  ;;  %v11513_v57 = vrot.slane %v5463_v35, 4  ;;  %v3578_v53 = vshll.u32 %v11367_v34, 16 }
 0x269   :  { %13911 = vst [vmem:[#allocation31_spill] sm:$0xff] %v11507_v4  ;;  %v2586_v63 = vmul.f32 %v11477_v54, %v11256_v60  ;;  %v2584_v50 = vmul.f32 %v11477_v54, %v11266_v55  ;;  %8428 = vmatmul.mubr.msk.bf16.gmra.mrb[52].mxu1 %vm5799_vm6, %v11507_v4  ;;  %v3169_v24 = vmax.f32 %v2913_v62, 0.0  ;;  %v5485_v22 = vshrl.u32 %v7669_v23, 16  ;;  %v13915_v62 = vld [vmem:[#allocation8_spill] sm:$0xff] }
 0x26a   :  { %13912 = vst [vmem:[#allocation25_spill] sm:$0xff] %v11509_v10  ;;  %13913 = vst [vmem:[#allocation29_spill] sm:$0xff] %v11513_v57  ;;  %v3294_v40 = vmax.f32 %v3102_v33, %v3166_v5  ;;  %v2648_v35 = vmul.f32 %v11477_v54, %v13914_v43  ;;  %v5488_v34 = vshll.u32 %v7669_v23, 16  ;;  %v3580_v42 = vor.u32 %v3578_v53, %v3577_v58 }
 0x26b   :  { %v2849_v60 = vadd.f32 %v11498_v36, %v2586_v63  ;;  %v2847_v55 = vadd.f32 %v11498_v36, %v2584_v50  ;;  %v5505_v4 = vor.u32 %v5504_v25, %v5501_v15  ;;  %v4318_v5 = vsel %vm3950_vm4, %v13915_v62, %v4194_v47  ;;  %v11549_v25 = vpop.permute.xlu1 %4195 }
 0x26c   :  { %v2911_v33 = vadd.f32 %v11498_v36, %v2648_v35  ;;  %v11538_v43 = vsel %vm11262_vm9, 0, %v3580_v42  ;;  %v11541_v53 = vsel %vm4045_vm5, %v4318_v5, %v4256_v37  ;;  %v7670_v63 = vcombine.high %v4375_v2, %v4375_v2 }
 0x26d   :  { %13916 = vst [vmem:[#allocation37_spill] sm:$0xff] %v11538_v43  ;;  %v3105_v23 = vmax.f32 %v2849_v60, 0.0  ;;  %v3103_v58 = vmax.f32 %v2847_v55, 0.0  ;;  %v11543_v50 = vrot.slane %v5485_v22, 4  ;;  %3863 = vrot.lane.b32.xlu0 %v11538_v43, %s8916_s26  ;;  %3926 = vrot.lane.b32.xlu1 %v11538_v43, %s8915_s24  ;;  %v7675_v42 = vcombine.low %v11541_v53, %v11541_v53 }
 0x26e   :  { %v11511_v29 = vpop.f32.mrb[200].mxu0  ;;  %v3167_v15 = vmax.f32 %v2911_v33, 0.0  ;;  %v11553_v47 = vrot.slane %v5488_v34, 5  ;;  %v3596_v37 = vshrl.u32 %v11433_v3, 16  ;;  %v3589_v2 = vshrl.u32 %v11435_v16, 16 }
 0x26f   :  { %v11522_v0 = vpop.f32.mrb[201].mxu0  ;;  %v3297_v35 = vmax.f32 %v3105_v23, %v3169_v24  ;;  %v11559_v22 = vpack.c.bf16 %v11458_v20, %v11458_v20  ;;  %v11563_v60 = vpack.c.bf16 %v11460_v46, %v11460_v46  ;;  %v3599_v33 = vshll.u32 %v11433_v3, 16 }
 0x270   :  { %v11526_v39 = vpop.f32.mrb[202].mxu0  ;;  %v3295_v55 = vmax.f32 %v3103_v58, %v3167_v15  ;;  %v3598_v24 = vrot.slane %v3596_v37, 7  ;;  %v3591_v5 = vrot.slane %v3589_v2, 7  ;;  %v3592_v23 = vshll.u32 %v11435_v16, 16  ;;  %v13921_v37 = vld [vmem:[#allocation44_spill] sm:$0xff] }
 0x271   :  { %v11530_v57 = vpop.f32.mrb[203].mxu0  ;;  %13917 = vst [vmem:[#allocation8_spill] sm:$0xff] %v11559_v22  ;;  %13918 = vst [vmem:[#allocation109_spill] sm:$0xff] %v11563_v60  ;;  %v11568_v34 = vmax.f32 %v3296_v13, %v3297_v35  ;;  %v11573_v10 = vrot.slane %v5505_v4, 4  ;;  %v11575_v20 = vshll.u32 %v7670_v63, 16  ;;  %v5527_v46 = vshrl.u32 %v7675_v42, 16 }
 0x272   :  { %v11577_v43 = vmax.f32 %v3294_v40, %v3295_v55  ;;  %v5491_v3 = vor.u32 %v11553_v47, %v11543_v50  ;;  %v3601_v13 = vor.u32 %v3599_v33, %v3598_v24  ;;  %v3594_v15 = vor.u32 %v3592_v23, %v3591_v5  ;;  %v4254_v55 = vpop.permute.xlu1 %4253  ;;  %v13924_v5 = vld [vmem:[#allocation49_spill] sm:$0xff] }
 0x273   :  { %13919 = vst [vmem:[#allocation110_spill] sm:$0xff] %v11573_v10  ;;  %13920 = vst [vmem:[#allocation111_spill] sm:$0xff] %v11575_v20  ;;  %v2589_v35 = vmul.f32 %v11477_v54, %v11292_v45  ;;  %v7676_v4 = vcombine.high %v11541_v53, %v11541_v53  ;;  %v5530_v63 = vshll.u32 %v7675_v42, 16  ;;  %v2653_v40 = vmul.f32 %v11477_v54, %v13921_v37  ;;  %v4260_v10 = vpop.permute.xlu0 %4259 }
 0x274   :  { %v2587_v2 = vmul.f32 %v11477_v54, %v11300_v8  ;;  %v11595_v50 = vsel %vm11262_vm9, 0, %v3601_v13  ;;  %v11599_v45 = vsel %vm11262_vm9, 0, %v3594_v15  ;;  %v2651_v42 = vmul.f32 %v11477_v54, %v10808_v26 }
 0x275   :  { %13922 = vst [vmem:[#allocation44_spill] sm:$0xff] %v11595_v50  ;;  %13923 = vst [vmem:[#allocation112_spill] sm:$0xff] %v11599_v45  ;;  %v2852_v47 = vadd.f32 %v11498_v36, %v2589_v35  ;;  %v5529_v33 = vrot.slane %v5527_v46, 4  ;;  %3869 = vrot.lane.b32.xlu1 %v11595_v50, %s8916_s26  ;;  %3867 = vrot.lane.b32.xlu0 %v11599_v45, %s8916_s26  ;;  %v2916_v8 = vadd.f32 %v11498_v36, %v2653_v40 }
 0x276   :  { %v11566_v62 = vpop.f32.mrb[204].mxu0  ;;  %v2850_v24 = vadd.f32 %v11498_v36, %v2587_v2  ;;  %v2654_v23 = vmul.f32 %v11477_v54, %v13924_v5  ;;  %v2914_v15 = vadd.f32 %v11498_v36, %v2651_v42  ;;  %v4379_v26 = vsel %vm4045_vm5, %v11466_v21, %v4254_v55 }
 0x277   :  { %v11571_v44 = vpop.f32.mrb[205].mxu0  ;;  %v3108_v13 = vmax.f32 %v2852_v47, 0.0  ;;  %v2590_v46 = vmul.f32 %v11477_v54, %v11319_v52  ;;  %v5532_v35 = vrot.slane %v5530_v63, 5  ;;  %v3172_v37 = vmax.f32 %v2916_v8, 0.0  ;;  %v4198_v8 = vpop.permute.xlu0 %4197 }
 0x278   :  { %v11579_v58 = vpop.f32.mrb[206].mxu0  ;;  %v3106_v50 = vmax.f32 %v2850_v24, 0.0  ;;  %v2917_v22 = vadd.f32 %v11498_v36, %v2654_v23  ;;  %v3170_v2 = vmax.f32 %v2914_v15, 0.0  ;;  %v7673_v14 = vcombine.low %v4379_v26, %v4379_v26  ;;  %v13927_v23 = vld [vmem:[#allocation11_spill] sm:$0xff] }
 0x279   :  { %v11585_v16 = vpop.f32.mrb[207].mxu0  ;;  %v11621_v5 = vcombine.low %v11427_v19, %v4379_v26  ;;  %v2853_v47 = vadd.f32 %v11498_v36, %v2590_v46  ;;  %v11627_v55 = vshll.u32 %v7676_v4, 16  ;;  %v3300_v52 = vmax.f32 %v3108_v13, %v3172_v37  ;;  %3930 = vrot.lane.b32.xlu1 %v11599_v45, %s8915_s24  ;;  %v4200_v4 = vpop.permute.xlu1 %4199  ;;  %v13929_v45 = vld [vmem:[#allocation50_spill] sm:$0xff] }
 0x27a   :  { %v3173_v63 = vmax.f32 %v2917_v22, 0.0  ;;  %v4320_v19 = vsel %vm3950_vm4, %v13927_v23, %v11549_v25  ;;  %v3298_v15 = vmax.f32 %v3106_v50, %v3170_v2  ;;  %v2588_v61 = vmul.f32 %v11477_v54, %v11331_v51  ;;  %v13930_v2 = vld [vmem:[#allocation10_spill] sm:$0xff] }
 0x27b   :  { %13925 = vst [vmem:[#allocation49_spill] sm:$0xff] %v11621_v5  ;;  %13926 = vst [vmem:[#allocation113_spill] sm:$0xff] %v11627_v55  ;;  %v3109_v46 = vmax.f32 %v2853_v47, 0.0  ;;  %8431 = vmatprep.mubr.msk.bf16.mxu1 %vm5799_vm6, %v11621_v5  ;;  %v11642_v13 = vrot.slane %v5491_v3, 4  ;;  %v5533_v37 = vor.u32 %v5532_v35, %v5529_v33  ;;  %v7674_v21 = vcombine.high %v4379_v26, %v4379_v26 }
 0x27c   :  { %v2652_v20 = vmul.f32 %v11477_v54, %v13929_v45  ;;  %v5513_v60 = vshrl.u32 %v7673_v14, 16  ;;  %v2851_v50 = vadd.f32 %v11498_v36, %v2588_v61  ;;  %v4322_v51 = vsel %vm3950_vm4, %v13930_v2, %v4198_v8  ;;  %v13932_v8 = vld [vmem:[#allocation55_spill] sm:$0xff] }
 0x27d   :  { %13928 = vst [vmem:[#allocation11_spill] sm:$0xff] %v11642_v13  ;;  %v3301_v25 = vmax.f32 %v3109_v46, %v3173_v63  ;;  %v11652_v5 = vsel %vm4045_vm5, %v4322_v51, %v4260_v10  ;;  %v2593_v3 = vmul.f32 %v11477_v54, %v11353_v6  ;;  %v5516_v33 = vshll.u32 %v7673_v14, 16 }
 0x27e   :  { %v11618_v40 = vpop.f32.mrb[208].mxu0  ;;  %v2915_v23 = vadd.f32 %v11498_v36, %v2652_v20  ;;  %v3107_v45 = vmax.f32 %v2851_v50, 0.0  ;;  %v7679_v61 = vcombine.low %v11652_v5, %v11652_v5  ;;  %v11662_v35 = vpack.c.bf16 %v11568_v34, %v11568_v34  ;;  %v4258_v34 = vpop.permute.xlu1 %4257 }
 0x27f   :  { %v11624_v42 = vpop.f32.mrb[209].mxu0  ;;  %v11656_v26 = vmax.f32 %v3300_v52, %v3301_v25  ;;  %v2856_v20 = vadd.f32 %v11498_v36, %v2593_v3  ;;  %v2657_v10 = vmul.f32 %v11477_v54, %v13932_v8  ;;  %v11671_v6 = vpack.c.bf16 %v11577_v43, %v11577_v43 }
 0x280   :  { %v11631_v24 = vpop.f32.mrb[210].mxu0  ;;  %13931 = vst [vmem:[#allocation50_spill] sm:$0xff] %v11662_v35  ;;  %v3171_v63 = vmax.f32 %v2915_v23, 0.0  ;;  %v11673_v14 = vrot.slane %v5533_v37, 4  ;;  %v11675_v52 = vrot.slane %v5513_v60, 4  ;;  %v11677_v25 = vshll.u32 %v7674_v21, 16 }
 0x281   :  { %v11640_v22 = vpop.f32.mrb[211].mxu0  ;;  %13933 = vst [vmem:[#allocation10_spill] sm:$0xff] %v11671_v6  ;;  %v3112_v51 = vmax.f32 %v2856_v20, 0.0  ;;  %v2920_v23 = vadd.f32 %v11498_v36, %v2657_v10  ;;  %v2591_v3 = vmul.f32 %v11477_v54, %v11361_v18  ;;  %v11686_v43 = vrot.slane %v5516_v33, 5  ;;  %v13936_v37 = vld [vmem:[#allocation14_spill] sm:$0xff]  ;;  %v4264_v33 = vpop.permute.xlu0 %4263 }
 0x282   :  { %13934 = vst [vmem:[#allocation55_spill] sm:$0xff] %v11673_v14  ;;  %13935 = vst [vmem:[#allocation114_spill] sm:$0xff] %v11677_v25  ;;  %v3299_v2 = vmax.f32 %v3107_v45, %v3171_v63  ;;  %v11690_v60 = vsel %vm3950_vm4, %v13936_v37, %v4200_v4  ;;  %v5555_v21 = vshrl.u32 %v7679_v61, 16  ;;  %v2655_v47 = vmul.f32 %v11477_v54, %v10864_v31 }
 0x283   :  { %v3176_v63 = vmax.f32 %v2920_v23, 0.0  ;;  %v2854_v20 = vadd.f32 %v11498_v36, %v2591_v3  ;;  %v2658_v18 = vmul.f32 %v11477_v54, %v10874_v11  ;;  %v5558_v10 = vshll.u32 %v7679_v61, 16  ;;  %v4204_v61 = vpop.permute.xlu1 %4203 }
 0x284   :  { %v11696_v45 = vmax.f32 %v3298_v15, %v3299_v2  ;;  %v2918_v55 = vadd.f32 %v11498_v36, %v2655_v47  ;;  %v4383_v4 = vsel %vm4045_vm5, %v4320_v19, %v4258_v34  ;;  %v2594_v37 = vmul.f32 %v11477_v54, %v11372_v27 }
 0x285   :  { %v3304_v13 = vmax.f32 %v3112_v51, %v3176_v63  ;;  %v3110_v15 = vmax.f32 %v2854_v20, 0.0  ;;  %v2921_v2 = vadd.f32 %v11498_v36, %v2658_v18  ;;  %v7680_v23 = vcombine.high %v11652_v5, %v11652_v5 }
 0x286   :  { %v5557_v3 = vrot.slane %v5555_v21, 4  ;;  %v3174_v11 = vmax.f32 %v2918_v55, 0.0  ;;  %v7677_v35 = vcombine.low %v4383_v4, %v4383_v4  ;;  %v11710_v47 = vcombine.low %v11541_v53, %v4383_v4  ;;  %v8895_v55 = vld [vmem:[%s13512_s7] sm:$0xff]  }
 0x287   :  { %v11667_v46 = vpop.f32.mrb[212].mxu0  ;;  %v3177_v6 = vmax.f32 %v2921_v2, 0.0  ;;  %v2857_v19 = vadd.f32 %v11498_v36, %v2594_v37  ;;  %v2592_v27 = vmul.f32 %v11477_v54, %v11374_v30  ;;  %v5560_v51 = vrot.slane %v5558_v10, 5  ;;  %v13940_v30 = vld [vmem:[#allocation21_spill] sm:$0xff]  ;;  %8471 = vmatprep.subr.bf16.mxu1 %v8895_v55 }
 0x288   :  { %v11679_v50 = vpop.f32.mrb[213].mxu0  ;;  %13937 = vst [vmem:[#allocation14_spill] sm:$0xff] %v11710_v47  ;;  %v3302_v63 = vmax.f32 %v3110_v15, %v3174_v11  ;;  %v5541_v20 = vshrl.u32 %v7677_v35, 16  ;;  %v5544_v18 = vshll.u32 %v7677_v35, 16  ;;  %v2656_v37 = vmul.f32 %v11477_v54, %v10895_v56  ;;  %8432 = vmatmul.mubr.msk.bf16.gmra.mrb[56].mxu1 %vm5799_vm6, %v11710_v47  ;;  %v4202_v15 = vpop.permute.xlu0 %4201 }
 0x289   :  { %v11684_v8 = vpop.f32.mrb[214].mxu0  ;;  %v3113_v21 = vmax.f32 %v2857_v19, 0.0  ;;  %v2855_v53 = vadd.f32 %v11498_v36, %v2592_v27  ;;  %v4328_v10 = vsel %vm3950_vm4, %v13940_v30, %v4204_v61  ;;  %v5519_v2 = vor.u32 %v11686_v43, %v11675_v52  ;;  %8472 = vmatpush3.bf16.msra.mxu1 %v8895_v55 }
 0x28a   :  { %v11694_v14 = vpop.f32.mrb[215].mxu0  ;;  %v11733_v11 = vshll.u32 %v7680_v23, 16  ;;  %v7678_v19 = vcombine.high %v4383_v4, %v4383_v4  ;;  %v4390_v27 = vsel %vm4045_vm5, %v4328_v10, %v10552_v49  ;;  %v2919_v38 = vadd.f32 %v11498_v36, %v2656_v37 }
 0x28b   :  { %v3305_v56 = vmax.f32 %v3113_v21, %v3177_v6  ;;  %v3111_v47 = vmax.f32 %v2855_v53, 0.0  ;;  %v7685_v61 = vcombine.low %v4390_v27, %v4390_v27  ;;  %v5543_v30 = vrot.slane %v5541_v20, 4 }
 0x28c   :  { %v2597_v43 = vmul.f32 %v11477_v54, %v11399_v17  ;;  %v5561_v4 = vor.u32 %v5560_v51, %v5557_v3  ;;  %v3175_v10 = vmax.f32 %v2919_v38, 0.0  ;;  %v7686_v49 = vcombine.high %v4390_v27, %v4390_v27  ;;  %v4262_v17 = vpop.permute.xlu1 %4261 }
 0x28d   :  { %v3401_v23 = vmax.f32 %v3304_v13, %v3305_v56  ;;  %v11746_v53 = vrot.slane %v5519_v2, 4  ;;  %v11750_v20 = vpack.c.bf16 %v11656_v26, %v11656_v26  ;;  %v11758_v38 = vpack.c.bf16 %v11696_v45, %v11696_v45 }
 0x28e   :  { %v2860_v21 = vadd.f32 %v11498_v36, %v2597_v43 }
 0x28f   :  { %v11715_v34 = vpop.f32.mrb[216].mxu0 }
 0x290   :  { %13938 = vst [vmem:[#allocation115_spill] sm:$0xff] %v11715_v34  ;;  %v11717_v31 = vpop.f32.mrb[217].mxu0  ;;  %v5600_v34 = vshll.u32 %v7685_v61, 16  ;;  %v3116_v26 = vmax.f32 %v2860_v21, 0.0 }
 0x291   :  { %13939 = vst [vmem:[#allocation116_spill] sm:$0xff] %v11717_v31  ;;  %v11729_v35 = vpop.f32.mrb[218].mxu0  ;;  %v13943_v31 = vld [vmem:[#allocation13_spill] sm:$0xff] }
 0x292   :  { %13941 = vst [vmem:[#allocation21_spill] sm:$0xff] %v11729_v35  ;;  %v11737_v25 = vpop.f32.mrb[219].mxu0  ;;  %v5546_v35 = vrot.slane %v5544_v18, 5  ;;  %v4326_v52 = vsel %vm3950_vm4, %v13943_v31, %v4202_v15  ;;  %v11752_v31 = vshll.u32 %v7678_v19, 16  ;;  %v3303_v18 = vmax.f32 %v3111_v47, %v3175_v10 }
 0x293   :  { %13942 = vst [vmem:[#allocation117_spill] sm:$0xff] %v11737_v25  ;;  %v5597_v25 = vshrl.u32 %v7685_v61, 16  ;;  %v4389_v6 = vsel %vm4045_vm5, %v4326_v52, %v4264_v33  ;;  %v11763_v15 = vshll.u32 %v7686_v49, 16  ;;  %v2595_v47 = vmul.f32 %v11477_v54, %v11407_v7 }
 0x294   :  { %v5547_v33 = vor.u32 %v5546_v35, %v5543_v30  ;;  %v7683_v51 = vcombine.low %v4389_v6, %v4389_v6  ;;  %v3400_v37 = vmax.f32 %v3302_v63, %v3303_v18  ;;  %v11769_v19 = vrot.slane %v5561_v4, 4  ;;  %v13945_v30 = vld [vmem:[#allocation16_spill] sm:$0xff] }
 0x295   :  { %13944 = vst [vmem:[#allocation13_spill] sm:$0xff] %v11763_v15  ;;  %v11771_v56 = vrot.slane %v5597_v25, 4  ;;  %v11773_v45 = vrot.slane %v5600_v34, 5  ;;  %v11777_v35 = vsel %vm4045_vm5, %v11690_v60, %v4262_v17  ;;  %v7684_v63 = vcombine.high %v4389_v6, %v4389_v6 }
 0x296   :  { %v13946_v52 = vmax.f32 %v13945_v30, 0.0  ;;  %v2858_v43 = vadd.f32 %v11498_v36, %v2595_v47  ;;  %v11785_v4 = vrot.slane %v5547_v33, 4  ;;  %v11787_v25 = vpack.c.bf16 %v3401_v23, %v3401_v23  ;;  %v13949_v30 = vld [vmem:[#allocation17_spill] sm:$0xff] }
 0x297   :  { %v11754_v3 = vpop.f32.mrb[220].mxu0  ;;  %v5583_v34 = vshrl.u32 %v7683_v51, 16  ;;  %v5586_v10 = vshll.u32 %v7683_v51, 16  ;;  %v11792_v18 = vcombine.low %v11652_v5, %v11777_v35  ;;  %v2598_v17 = vmul.f32 %v11477_v54, %v11416_v59 }
 0x298   :  { %v11761_v55 = vpop.f32.mrb[221].mxu0  ;;  %v3244_v7 = vmax.f32 %v13946_v52, %v3116_v26  ;;  %v3114_v60 = vmax.f32 %v2858_v43, 0.0  ;;  %v11798_v47 = vcombine.low %v4389_v6, %v4390_v27  ;;  %v11802_v23 = vcombine.low %v11777_v35, %v11777_v35 }
 0x299   :  { %v11767_v2 = vpop.f32.mrb[222].mxu0  ;;  %13947 = vst [vmem:[#allocation16_spill] sm:$0xff] %v11792_v18  ;;  %v2596_v33 = vmul.f32 %v11477_v54, %v11422_v12  ;;  %v11806_v51 = vshll.u32 %v7684_v63, 16  ;;  %v13950_v5 = vmax.f32 %v13949_v30, 0.0  ;;  %v2861_v43 = vadd.f32 %v11498_v36, %v2598_v17  ;;  %8435 = vmatprep.mubr.msk.bf16.mxu1 %vm5799_vm6, %v11792_v18  ;;  %v13951_v30 = vld [vmem:[#allocation18_spill] sm:$0xff]  ;;  %v13953_v63 = vld [vmem:[#allocation19_spill] sm:$0xff] }
 0x29a   :  { %v11779_v61 = vpop.f32.mrb[223].mxu0  ;;  %13948 = vst [vmem:[#allocation118_spill] sm:$0xff] %v11798_v47  ;;  %v2601_v59 = vmul.f32 %v11477_v54, %v11456_v1  ;;  %v11815_v27 = vpack.c.bf16 %v3400_v37, %v3400_v37  ;;  %v11817_v6 = vrot.slane %v5583_v34, 4  ;;  %v11819_v21 = vrot.slane %v5586_v10, 5  ;;  %8436 = vmatmul.mubr.msk.bf16.gmra.mrb[60].mxu1 %vm5799_vm6, %v11798_v47 }
 0x29b   :  { %v3242_v52 = vmax.f32 %v13950_v5, %v3114_v60  ;;  %v2859_v12 = vadd.f32 %v11498_v36, %v2596_v33  ;;  %v3117_v60 = vmax.f32 %v2861_v43, 0.0  ;;  %v2599_v1 = vmul.f32 %v11477_v54, %v11462_v28 }
 0x29c   :  { %v2864_v17 = vadd.f32 %v11498_v36, %v2601_v59  ;;  %v2602_v10 = vmul.f32 %v11477_v54, %v11470_v9  ;;  %v2600_v33 = vmul.f32 %v11477_v54, %v11481_v41  ;;  %v13952_v5 = vmax.f32 %v13951_v30, 0.0  ;;  %v13955_v41 = vld [vmem:[#allocation24_spill] sm:$0xff] }
 0x29d   :  { %v3115_v34 = vmax.f32 %v2859_v12, 0.0  ;;  %v2862_v43 = vadd.f32 %v11498_v36, %v2599_v1  ;;  %v2605_v59 = vmul.f32 %v11477_v54, %v11511_v29  ;;  %v13954_v26 = vmax.f32 %v13953_v63, 0.0  ;;  %v13957_v63 = vld [vmem:[#allocation26_spill] sm:$0xff] }
 0x29e   :  { %v3245_v13 = vmax.f32 %v13952_v5, %v3117_v60  ;;  %v3120_v49 = vmax.f32 %v2864_v17, 0.0  ;;  %v2865_v37 = vadd.f32 %v11498_v36, %v2602_v10  ;;  %v2863_v9 = vadd.f32 %v11498_v36, %v2600_v33  ;;  %v13959_v33 = vld [vmem:[#allocation27_spill] sm:$0xff] }
 0x29f   :  { %v3243_v12 = vmax.f32 %v13954_v26, %v3115_v34  ;;  %v13956_v18 = vmax.f32 %v13955_v41, 0.0  ;;  %v3118_v60 = vmax.f32 %v2862_v43, 0.0  ;;  %v2868_v17 = vadd.f32 %v11498_v36, %v2605_v59  ;;  %v13961_v43 = vld [vmem:[#allocation30_spill] sm:$0xff] }
 0x2a0   :  { %v3371_v47 = vmax.f32 %v3244_v7, %v3245_v13  ;;  %v3121_v5 = vmax.f32 %v2865_v37, 0.0  ;;  %v3119_v15 = vmax.f32 %v2863_v9, 0.0  ;;  %v2603_v29 = vmul.f32 %v11477_v54, %v11522_v0 }
 0x2a1   :  { %v3248_v30 = vmax.f32 %v13956_v18, %v3120_v49  ;;  %v3370_v1 = vmax.f32 %v3242_v52, %v3243_v12  ;;  %v13958_v26 = vmax.f32 %v13957_v63, 0.0  ;;  %v3124_v10 = vmax.f32 %v2868_v17, 0.0  ;;  %v13963_v12 = vld [vmem:[#allocation32_spill] sm:$0xff] }
 0x2a2   :  { %v3403_v28 = vpack.c.bf16 %v3371_v47, %v3371_v47  ;;  %v2606_v13 = vmul.f32 %v11477_v54, %v11526_v39  ;;  %v13960_v49 = vmax.f32 %v13959_v33, 0.0  ;;  %v13962_v59 = vmax.f32 %v13961_v43, 0.0 }
 0x2a3   :  { %v3246_v34 = vmax.f32 %v13958_v26, %v3118_v60  ;;  %v3402_v7 = vpack.c.bf16 %v3370_v1, %v3370_v1  ;;  %v2866_v37 = vadd.f32 %v11498_v36, %v2603_v29  ;;  %v13964_v9 = vmax.f32 %v13963_v12, 0.0 }
 0x2a4   :  { %v3249_v18 = vmax.f32 %v13960_v49, %v3121_v5  ;;  %v3247_v52 = vmax.f32 %v13962_v59, %v3119_v15  ;;  %v2869_v47 = vadd.f32 %v11498_v36, %v2606_v13  ;;  %v2604_v41 = vmul.f32 %v11477_v54, %v11530_v57  ;;  %v13967_v59 = vld [vmem:[#allocation39_spill] sm:$0xff] }
 0x2a5   :  { %v3252_v0 = vmax.f32 %v13964_v9, %v3124_v10  ;;  %v3442_v60 = vshrl.u32 %v3403_v28, 16  ;;  %v3122_v1 = vmax.f32 %v2866_v37, 0.0  ;;  %v3445_v63 = vshll.u32 %v3403_v28, 16  ;;  %v13965_v10 = vld [vmem:[#allocation33_spill] sm:$0xff] }
 0x2a6   :  { %v3373_v17 = vmax.f32 %v3248_v30, %v3249_v18  ;;  %v3372_v39 = vmax.f32 %v3246_v34, %v3247_v52  ;;  %v3125_v26 = vmax.f32 %v2869_v47, 0.0  ;;  %v2867_v5 = vadd.f32 %v11498_v36, %v2604_v41  ;;  %v13969_v41 = vld [vmem:[#allocation40_spill] sm:$0xff] }
 0x2a7   :  { %v3444_v33 = vrot.slane %v3442_v60, 7  ;;  %v2609_v15 = vmul.f32 %v11477_v54, %v11566_v62  ;;  %v13966_v43 = vmax.f32 %v13965_v10, 0.0  ;;  %v2607_v57 = vmul.f32 %v11477_v54, %v11571_v44 }
 0x2a8   :  { %v3405_v29 = vpack.c.bf16 %v3373_v17, %v3373_v17  ;;  %v3404_v49 = vpack.c.bf16 %v3372_v39, %v3372_v39  ;;  %v13968_v30 = vmax.f32 %v13967_v59, 0.0  ;;  %v3123_v18 = vmax.f32 %v2867_v5, 0.0  ;;  %v13971_v5 = vld [vmem:[#allocation41_spill] sm:$0xff] }
 0x2a9   :  { %v3250_v13 = vmax.f32 %v13966_v43, %v3122_v1  ;;  %v3447_v28 = vor.u32 %v3445_v63, %v3444_v33  ;;  %v2872_v52 = vadd.f32 %v11498_v36, %v2609_v15  ;;  %v2870_v37 = vadd.f32 %v11498_v36, %v2607_v57  ;;  %v13973_v43 = vld [vmem:[#allocation42_spill] sm:$0xff] }
 0x2aa   :  { %v3253_v34 = vmax.f32 %v13968_v30, %v3125_v26  ;;  %v3435_v12 = vshrl.u32 %v3402_v7, 16  ;;  %v3438_v9 = vshll.u32 %v3402_v7, 16  ;;  %v2610_v62 = vmul.f32 %v11477_v54, %v11579_v58 }
 0x2ab   :  { %v13970_v60 = vmax.f32 %v13969_v41, 0.0  ;;  %v11880_v44 = vsel %vm11262_vm9, 0, %v3447_v28  ;;  %v3128_v39 = vmax.f32 %v2872_v52, 0.0  ;;  %v3126_v1 = vmax.f32 %v2870_v37, 0.0 }
 0x2ac   :  { %v3375_v47 = vmax.f32 %v3252_v0, %v3253_v34  ;;  %3888 = vrot.lane.b32.xlu0 %v11880_v44, %s8915_s24  ;;  %3825 = vrot.lane.b32.xlu1 %v11880_v44, %s8916_s26  ;;  %v3437_v7 = vrot.slane %v3435_v12, 7  ;;  %v2873_v63 = vadd.f32 %v11498_v36, %v2610_v62  ;;  %v2608_v58 = vmul.f32 %v11477_v54, %v11585_v16  ;;  %v13975_v12 = vld [vmem:[#allocation52_spill] sm:$0xff] }
 0x2ad   :  { %v3251_v17 = vmax.f32 %v13970_v60, %v3123_v18  ;;  %v13972_v33 = vmax.f32 %v13971_v5, 0.0  ;;  %v3456_v10 = vshrl.u32 %v3405_v29, 16  ;;  %v13974_v57 = vmax.f32 %v13973_v43, 0.0 }
 0x2ae   :  { %v3407_v0 = vpack.c.bf16 %v3375_v47, %v3375_v47  ;;  %v3440_v30 = vor.u32 %v3438_v9, %v3437_v7  ;;  %v3129_v34 = vmax.f32 %v2873_v63, 0.0  ;;  %v2871_v18 = vadd.f32 %v11498_v36, %v2608_v58 }
 0x2af   :  { %v3374_v26 = vmax.f32 %v3250_v13, %v3251_v17  ;;  %v3256_v15 = vmax.f32 %v13972_v33, %v3128_v39  ;;  %v3254_v59 = vmax.f32 %v13974_v57, %v3126_v1  ;;  %v3458_v52 = vrot.slane %v3456_v10, 7  ;;  %v13977_v1 = vld [vmem:[#allocation53_spill] sm:$0xff] }
 0x2b0   :  { %v3459_v37 = vshll.u32 %v3405_v29, 16  ;;  %v2613_v16 = vmul.f32 %v11477_v54, %v11618_v40  ;;  %v11900_v13 = vsel %vm11262_vm9, 0, %v3440_v30  ;;  %v13976_v62 = vmax.f32 %v13975_v12, 0.0 }
 0x2b1   :  { %v11894_v28 = vpack.c.bf16 %v3374_v26, %v3374_v26  ;;  %v3127_v41 = vmax.f32 %v2871_v18, 0.0  ;;  %v2611_v9 = vmul.f32 %v11477_v54, %v11624_v42  ;;  %3823 = vrot.lane.b32.xlu0 %v11900_v13, %s8916_s26  ;;  %v3449_v17 = vshrl.u32 %v3404_v49, 16 }
 0x2b2   :  { %v3257_v47 = vmax.f32 %v13976_v62, %v3129_v34  ;;  %v3461_v60 = vor.u32 %v3459_v37, %v3458_v52  ;;  %v2876_v29 = vadd.f32 %v11498_v36, %v2613_v16  ;;  %v3452_v39 = vshll.u32 %v3404_v49, 16  ;;  %v13981_v16 = vld [vmem:[#allocation57_spill] sm:$0xff] }
 0x2b3   :  { %v13978_v7 = vmax.f32 %v13977_v1, 0.0  ;;  %v2874_v58 = vadd.f32 %v11498_v36, %v2611_v9  ;;  %v2614_v26 = vmul.f32 %v11477_v54, %v11631_v24  ;;  %v3451_v33 = vrot.slane %v3449_v17, 7  ;;  %v13979_v24 = vld [vmem:[#allocation54_spill] sm:$0xff]  ;;  %v13983_v17 = vld [vmem:[#allocation61_spill] sm:$0xff] }
 0x2b4   :  { %v3377_v40 = vmax.f32 %v3256_v15, %v3257_v47  ;;  %v11916_v42 = vsel %vm11262_vm9, 0, %v3461_v60  ;;  %v3132_v5 = vmax.f32 %v2876_v29, 0.0  ;;  %v2612_v10 = vmul.f32 %v11477_v54, %v11640_v22 }
 0x2b5   :  { %v3255_v63 = vmax.f32 %v13978_v7, %v3127_v41  ;;  %3829 = vrot.lane.b32.xlu1 %v11916_v42, %s8916_s26  ;;  %v3130_v15 = vmax.f32 %v2874_v58, 0.0  ;;  %v2877_v57 = vadd.f32 %v11498_v36, %v2614_v26  ;;  %3892 = vrot.lane.b32.xlu0 %v11916_v42, %s8915_s24  ;;  %v13980_v30 = vmax.f32 %v13979_v24, 0.0 }
 0x2b6   :  { %v11920_v43 = vpack.c.bf16 %v3377_v40, %v3377_v40  ;;  %v3454_v18 = vor.u32 %v3452_v39, %v3451_v33  ;;  %v2875_v52 = vadd.f32 %v11498_v36, %v2612_v10  ;;  %v3470_v37 = vshrl.u32 %v3407_v0, 16 }
 0x2b7   :  { %v3376_v49 = vmax.f32 %v3254_v59, %v3255_v63  ;;  %v3260_v34 = vmax.f32 %v13980_v30, %v3132_v5  ;;  %v13982_v59 = vmax.f32 %v13981_v16, 0.0  ;;  %v3133_v62 = vmax.f32 %v2877_v57, 0.0  ;;  %v8896_v63 = vld [vmem:[%s13512_s7 + $0x8] sm:$0xff]  }
 0x2b8   :  { %v3473_v47 = vshll.u32 %v3407_v0, 16  ;;  %v11936_v41 = vsel %vm11262_vm9, 0, %v3454_v18  ;;  %v3131_v9 = vmax.f32 %v2875_v52, 0.0  ;;  %v3472_v60 = vrot.slane %v3470_v37, 7  ;;  %8473 = vmatprep.subr.bf16.mxu1 %v8896_v63 }
 0x2b9   :  { %v11930_v22 = vpack.c.bf16 %v3376_v49, %v3376_v49  ;;  %v3258_v12 = vmax.f32 %v13982_v59, %v3130_v15  ;;  %v2617_v29 = vmul.f32 %v11477_v54, %v11667_v46  ;;  %3890 = vrot.lane.b32.xlu1 %v11936_v41, %s8915_s24  ;;  %v13984_v39 = vmax.f32 %v13983_v17, 0.0  ;;  %3827 = vrot.lane.b32.xlu0 %v11936_v41, %s8916_s26  ;;  %v13985_v46 = vld [vmem:[#allocation62_spill] sm:$0xff] }
 0x2ba   :  { %v2615_v1 = vmul.f32 %v11477_v54, %v11679_v50  ;;  %v3463_v0 = vshrl.u32 %v11894_v28, 16  ;;  %v3466_v7 = vshll.u32 %v11894_v28, 16  ;;  %v13986_v58 = vmax.f32 %v13985_v46, 0.0  ;;  %8474 = vmatpush3.bf16.msra.mxu1 %v8896_v63  ;;  %v13992_v63 = vld [vmem:[#allocation115_spill] sm:$0xff] }
 0x2bb   :  { %v3261_v40 = vmax.f32 %v13984_v39, %v3133_v62  ;;  %v3475_v5 = vor.u32 %v3473_v47, %v3472_v60  ;;  %v2880_v33 = vadd.f32 %v11498_v36, %v2617_v29  ;;  %v2618_v50 = vmul.f32 %v11477_v54, %v11684_v8 }
 0x2bc   :  { %v3259_v26 = vmax.f32 %v13986_v58, %v3131_v9  ;;  %v2878_v49 = vadd.f32 %v11498_v36, %v2615_v1  ;;  %v3465_v28 = vrot.slane %v3463_v0, 7  ;;  %v2616_v15 = vmul.f32 %v11477_v54, %v11694_v14  ;;  %v13987_v14 = vld [vmem:[#allocation67_spill] sm:$0xff]  ;;  %v13989_v9 = vld [vmem:[#allocation68_spill] sm:$0xff] }
 0x2bd   :  { %v3379_v10 = vmax.f32 %v3260_v34, %v3261_v40  ;;  %v11963_v24 = vsel %vm11262_vm9, 0, %v3475_v5  ;;  %v3136_v30 = vmax.f32 %v2880_v33, 0.0  ;;  %v2881_v18 = vadd.f32 %v11498_v36, %v2618_v50  ;;  %v13993_v58 = vld [vmem:[#allocation116_spill] sm:$0xff]  ;;  %v13994_v5 = vld [vmem:[#allocation70_spill] sm:$0xff] }
 0x2be   :  { %v3378_v57 = vmax.f32 %v3258_v12, %v3259_v26  ;;  %3896 = vrot.lane.b32.xlu1 %v11963_v24, %s8915_s24  ;;  %v3134_v8 = vmax.f32 %v2878_v49, 0.0  ;;  %v3468_v34 = vor.u32 %v3466_v7, %v3465_v28  ;;  %v2879_v37 = vadd.f32 %v11498_v36, %v2616_v15  ;;  %3833 = vrot.lane.b32.xlu0 %v11963_v24, %s8916_s26  ;;  %v13996_v49 = vld [vmem:[#allocation21_spill] sm:$0xff] }
 0x2bf   :  { %v3411_v52 = vpack.c.bf16 %v3379_v10, %v3379_v10  ;;  %v13988_v59 = vmax.f32 %v13987_v14, 0.0  ;;  %v3137_v62 = vmax.f32 %v2881_v18, 0.0  ;;  %v3484_v47 = vshrl.u32 %v11920_v43, 16 }
 0x2c0   :  { %v11969_v16 = vpack.c.bf16 %v3378_v57, %v3378_v57  ;;  %v13990_v60 = vmax.f32 %v13989_v9, 0.0  ;;  %v11980_v17 = vsel %vm11262_vm9, 0, %v3468_v34  ;;  %v3135_v39 = vmax.f32 %v2879_v37, 0.0  ;;  %v13997_v37 = vld [vmem:[#allocation117_spill] sm:$0xff] }
 0x2c1   :  { %v3264_v12 = vmax.f32 %v13988_v59, %v3136_v30  ;;  %v3487_v40 = vshll.u32 %v11920_v43, 16  ;;  %v13991_v1 = vmax.f32 %v10947_v48, 0.0  ;;  %v3486_v7 = vrot.slane %v3484_v47, 7 }
 0x2c2   :  { %v3262_v29 = vmax.f32 %v13990_v60, %v3134_v8  ;;  %v2621_v46 = vmul.f32 %v11477_v54, %v13992_v63  ;;  %v2619_v26 = vmul.f32 %v11477_v54, %v13993_v58  ;;  %3894 = vrot.lane.b32.xlu1 %v11980_v17, %s8915_s24  ;;  %v13995_v33 = vmax.f32 %v13994_v5, 0.0 }
 0x2c3   :  { %v3265_v0 = vmax.f32 %v13991_v1, %v3137_v62  ;;  %v3477_v10 = vshrl.u32 %v11930_v22, 16  ;;  %v3480_v43 = vshll.u32 %v11930_v22, 16  ;;  %v2622_v48 = vmul.f32 %v11477_v54, %v13996_v49 }
 0x2c4   :  { %v3263_v50 = vmax.f32 %v13995_v33, %v3135_v39  ;;  %v3489_v15 = vor.u32 %v3487_v40, %v3486_v7  ;;  %v2884_v57 = vadd.f32 %v11498_v36, %v2621_v46  ;;  %v2882_v30 = vadd.f32 %v11498_v36, %v2619_v26  ;;  %v13998_v39 = vld [vmem:[#allocation72_spill] sm:$0xff]  ;;  %v12019_v26 = vpop.permute.xlu0 %3920  ;;  %v14002_v33 = vld [vmem:[#allocation78_spill] sm:$0xff] }
 0x2c5   :  { %v3381_v28 = vmax.f32 %v3264_v12, %v3265_v0  ;;  %v3479_v8 = vrot.slane %v3477_v10, 7  ;;  %v2885_v34 = vadd.f32 %v11498_v36, %v2622_v48  ;;  %v2620_v14 = vmul.f32 %v11477_v54, %v13997_v37  ;;  %v14000_v0 = vld [vmem:[#allocation75_spill] sm:$0xff] }
 0x2c6   :  { %v3380_v18 = vmax.f32 %v3262_v29, %v3263_v50  ;;  %v12006_v22 = vsel %vm11262_vm9, 0, %v3489_v15  ;;  %v3140_v62 = vmax.f32 %v2884_v57, 0.0  ;;  %v3138_v12 = vmax.f32 %v2882_v30, 0.0  ;;  %3831 = vrot.lane.b32.xlu1 %v11980_v17, %s8916_s26  ;;  %v14004_v30 = vld [vmem:[#allocation79_spill] sm:$0xff] }
 0x2c7   :  { %v12002_v59 = vpack.c.bf16 %v3381_v28, %v3381_v28  ;;  %3837 = vrot.lane.b32.xlu0 %v12006_v22, %s8916_s26  ;;  %v3482_v9 = vor.u32 %v3480_v43, %v3479_v8  ;;  %v3141_v60 = vmax.f32 %v2885_v34, 0.0  ;;  %v2883_v29 = vadd.f32 %v11498_v36, %v2620_v14 }
 0x2c8   :  { %v12008_v47 = vpack.c.bf16 %v3380_v18, %v3380_v18  ;;  %v13999_v40 = vmax.f32 %v13998_v39, 0.0  ;;  %v14001_v7 = vmax.f32 %v14000_v0, 0.0  ;;  %v3498_v46 = vshrl.u32 %v3411_v52, 16 }
 0x2c9   :  { %v3501_v58 = vshll.u32 %v3411_v52, 16  ;;  %v12023_v5 = vsel %vm11262_vm9, 0, %v3482_v9  ;;  %v14003_v50 = vmax.f32 %v14002_v33, 0.0  ;;  %v3139_v43 = vmax.f32 %v2883_v29, 0.0 }
 0x2ca   :  { %v3268_v1 = vmax.f32 %v13999_v40, %v3140_v62  ;;  %v3266_v63 = vmax.f32 %v14001_v7, %v3138_v12  ;;  %v2625_v49 = vmul.f32 %v11477_v54, %v11754_v3  ;;  %v3500_v48 = vrot.slane %v3498_v46, 7  ;;  %3900 = vrot.lane.b32.xlu1 %v12006_v22, %s8915_s24  ;;  %v3858_v62 = vpop.permute.xlu1 %3857  ;;  %v8897_v12 = vld [vmem:[%s13512_s7 + $0x10] sm:$0xff]  }
 0x2cb   :  { %v3269_v10 = vmax.f32 %v14003_v50, %v3141_v60  ;;  %v2623_v28 = vmul.f32 %v11477_v54, %v11761_v55  ;;  %v3491_v15 = vshrl.u32 %v11969_v16, 16  ;;  %v3494_v52 = vshll.u32 %v11969_v16, 16  ;;  %3898 = vrot.lane.b32.xlu0 %v12023_v5, %s8915_s24  ;;  %8475 = vmatprep.subr.bf16.mxu1 %v8897_v12 }
 0x2cc   :  { %v14005_v18 = vmax.f32 %v14004_v30, 0.0  ;;  %v2888_v3 = vadd.f32 %v11498_v36, %v2625_v49  ;;  %v3512_v34 = vshrl.u32 %v12002_v59, 16  ;;  %v3503_v37 = vor.u32 %v3501_v58, %v3500_v48  ;;  %8476 = vmatpush3.bf16.msra.mxu1 %v8897_v12 }
 0x2cd   :  { %v3383_v57 = vmax.f32 %v3268_v1, %v3269_v10  ;;  %v2886_v55 = vadd.f32 %v11498_v36, %v2623_v28  ;;  %v3493_v14 = vrot.slane %v3491_v15, 7  ;;  %v2626_v16 = vmul.f32 %v11477_v54, %v11767_v2  ;;  %v3856_v2 = vpop.permute.xlu0 %3855  ;;  %v14008_v10 = vld [vmem:[#allocation82_spill] sm:$0xff] }
 0x2ce   :  { %v3267_v8 = vmax.f32 %v14005_v18, %v3139_v43  ;;  %v3144_v29 = vmax.f32 %v2888_v3, 0.0  ;;  %v2624_v39 = vmul.f32 %v11477_v54, %v11779_v61  ;;  %v12051_v40 = vsel %vm11262_vm9, 0, %v3503_v37  ;;  %3835 = vrot.lane.b32.xlu1 %v12023_v5, %s8916_s26  ;;  %v14006_v54 = vld [vmem:[#allocation80_spill] sm:$0xff] }
 0x2cf   :  { %v3415_v9 = vpack.c.bf16 %v3383_v57, %v3383_v57  ;;  %v3142_v1 = vmax.f32 %v2886_v55, 0.0  ;;  %v3496_v0 = vor.u32 %v3494_v52, %v3493_v14  ;;  %v2889_v7 = vadd.f32 %v11498_v36, %v2626_v16  ;;  %3841 = vrot.lane.b32.xlu0 %v12051_v40, %s8916_s26  ;;  %v14012_v3 = vld [vmem:[#allocation88_spill] sm:$0xff]  ;;  %v14014_v55 = vld [vmem:[#allocation89_spill] sm:$0xff] }
 0x2d0   :  { %v3382_v60 = vmax.f32 %v3266_v63, %v3267_v8  ;;  %v5589_v46 = vor.u32 %v11819_v21, %v11817_v6  ;;  %v14007_v61 = vmax.f32 %v14006_v54, 0.0  ;;  %v2887_v58 = vadd.f32 %v11498_v36, %v2624_v39  ;;  %v12066_v21 = vpop.permute.xlu1 %3861 }
 0x2d1   :  { %v3514_v33 = vrot.slane %v3512_v34, 7  ;;  %v14009_v43 = vmax.f32 %v14008_v10, 0.0  ;;  %v3145_v48 = vmax.f32 %v2889_v7, 0.0  ;;  %v3515_v28 = vshll.u32 %v12002_v59, 16  ;;  %v3925_v7 = vpop.permute.xlu0 %3924 }
 0x2d2   :  { %v3272_v63 = vmax.f32 %v14007_v61, %v3144_v29  ;;  %v3414_v50 = vpack.c.bf16 %v3382_v60, %v3382_v60  ;;  %v14010_v6 = vshrl.u32 %v11802_v23, 16  ;;  %v3143_v52 = vmax.f32 %v2887_v58, 0.0  ;;  %3904 = vrot.lane.b32.xlu1 %v12051_v40, %s8915_s24 }
 0x2d3   :  { %v3270_v49 = vmax.f32 %v14009_v43, %v3142_v1  ;;  %v3505_v57 = vshrl.u32 %v12008_v47, 16  ;;  %v3526_v30 = vshrl.u32 %v3415_v9, 16  ;;  %v14011_v36 = vshll.u32 %v11802_v23, 16 }
 0x2d4   :  { %v12070_v15 = vrot.slane %v14010_v6, 4  ;;  %v12077_v8 = vsel %vm11262_vm9, 0, %v3496_v0  ;;  %v14013_v59 = vmax.f32 %v14012_v3, 0.0  ;;  %v3517_v37 = vor.u32 %v3515_v28, %v3514_v33  ;;  %v3923_v28 = vpop.permute.xlu1 %3922 }
 0x2d5   :  { %v5574_v18 = vrot.slane %v14011_v36, 5  ;;  %3902 = vrot.lane.b32.xlu0 %v12077_v8, %s8915_s24  ;;  %v14015_v14 = vmax.f32 %v14014_v55, 0.0  ;;  %v3507_v12 = vrot.slane %v3505_v57, 7  ;;  %v3508_v23 = vshll.u32 %v12008_v47, 16 }
 0x2d6   :  { %v3273_v34 = vmax.f32 %v14013_v59, %v3145_v48  ;;  %v3528_v60 = vrot.slane %v3526_v30, 7  ;;  %v12090_v39 = vsel %vm11262_vm9, 0, %v3517_v37  ;;  %v3519_v1 = vshrl.u32 %v3414_v50, 16  ;;  %3839 = vrot.lane.b32.xlu1 %v12077_v8, %s8916_s26  ;;  %v3860_v59 = vpop.permute.xlu0 %3859 }
 0x2d7   :  { %v3271_v16 = vmax.f32 %v14015_v14, %v3143_v52  ;;  %v3999_v0 = vsel %vm3950_vm4, 0, %v3856_v2  ;;  %v14016_v54 = vor.u32 %v11773_v45, %v11771_v56  ;;  %v14017_v47 = vcombine.high %v11777_v35, %v11777_v35  ;;  %v14019_v35 = vld [vmem:[#allocation105_spill] sm:$0xff] }
 0x2d8   :  { %v3385_v29 = vmax.f32 %v3272_v63, %v3273_v34  ;;  %v3510_v43 = vor.u32 %v3508_v23, %v3507_v12  ;;  %v3529_v48 = vshll.u32 %v3415_v9, 16  ;;  %v12106_v2 = vsel %vm4045_vm5, %v3999_v0, %v12019_v26  ;;  %v14021_v34 = vld [vmem:[#allocation109_spill] sm:$0xff] }
 0x2d9   :  { %v12096_v61 = vrot.slane %v14016_v54, 4  ;;  %v12102_v33 = vshll.u32 %v14017_v47, 16  ;;  %v3384_v63 = vmax.f32 %v3270_v49, %v3271_v16  ;;  %14018 = vst [vmem:[#allocation17_spill] sm:$0xff] %v12106_v2  ;;  %v12108_v6 = vrot.slane %v5589_v46, 4  ;;  %3845 = vrot.lane.b32.xlu0 %v12090_v39, %s8916_s26  ;;  %v14030_v16 = vld [vmem:[#allocation50_spill] sm:$0xff] }
 0x2da   :  { %v3417_v10 = vpack.c.bf16 %v3385_v29, %v3385_v29  ;;  %v5575_v56 = vor.u32 %v5574_v18, %v12070_v15  ;;  %v4002_v49 = vsel %vm3950_vm4, %v14019_v35, %v3858_v62  ;;  %v3531_v9 = vor.u32 %v3529_v48, %v3528_v60  ;;  %3908 = vrot.lane.b32.xlu1 %v12090_v39, %s8915_s24 }
 0x2db   :  { %v3416_v45 = vpack.c.bf16 %v3384_v63, %v3384_v63  ;;  %v3521_v52 = vrot.slane %v3519_v1, 7  ;;  %v7591_v26 = vcombine.low %v12106_v2, %v12106_v2  ;;  %v3522_v46 = vshll.u32 %v3414_v50, 16 }
 0x2dc   :  { %v3540_v57 = vshrl.u32 %v3417_v10, 16  ;;  %v7592_v15 = vcombine.high %v12106_v2, %v12106_v2  ;;  %v12122_v36 = vsel %vm4045_vm5, %v4002_v49, %v3923_v28  ;;  %v12126_v18 = vsel %vm11262_vm9, 0, %v3510_v43  ;;  %v14023_v28 = vld [vmem:[#allocation4_spill] sm:$0xff] }
 0x2dd   :  { %v3533_v30 = vshrl.u32 %v3416_v45, 16  ;;  %14020 = vst [vmem:[#allocation18_spill] sm:$0xff] %v12122_v36  ;;  %v4779_v3 = vshrl.u32 %v7591_v26, 16  ;;  %v4782_v62 = vshll.u32 %v7591_v26, 16  ;;  %v3603_v37 = vshrl.u32 %v14021_v34, 16  ;;  %3906 = vrot.lane.b32.xlu0 %v12126_v18, %s8915_s24  ;;  %v8898_v26 = vld [vmem:[%s13512_s7 + $0x18] sm:$0xff]  }
 0x2de   :  { %v3542_v50 = vrot.slane %v3540_v57, 7  ;;  %v7593_v14 = vcombine.low %v12122_v36, %v12122_v36  ;;  %v12139_v12 = vsel %vm11262_vm9, 0, %v3531_v9  ;;  %v3524_v23 = vor.u32 %v3522_v46, %v3521_v52  ;;  %3843 = vrot.lane.b32.xlu1 %v12126_v18, %s8916_s26  ;;  %8477 = vmatprep.subr.bf16.mxu1 %v8898_v26 }
 0x2df   :  { %v3535_v55 = vrot.slane %v3533_v30, 7  ;;  %14022 = vst [vmem:[#allocation19_spill] sm:$0xff] %v12139_v12  ;;  %v3543_v60 = vshll.u32 %v3417_v10, 16  ;;  %v7594_v29 = vcombine.high %v12122_v36, %v12122_v36  ;;  %v12143_v1 = vshll.u32 %v7592_v15, 16  ;;  %v3929_v30 = vpop.permute.xlu0 %3928  ;;  %8478 = vmatpush3.bf16.msra.mxu1 %v8898_v26 }
 0x2e0   :  { %v3536_v0 = vshll.u32 %v3416_v45, 16  ;;  %v4793_v54 = vshrl.u32 %v7593_v14, 16  ;;  %v4796_v47 = vshll.u32 %v7593_v14, 16  ;;  %v12146_v43 = vrot.slane %v4779_v3, 4  ;;  %v14024_v45 = vld [vmem:[#allocation6_spill] sm:$0xff]  ;;  %v3866_v3 = vpop.permute.xlu1 %3865 }
 0x2e1   :  { %v12148_v48 = vrot.slane %v4782_v62, 5  ;;  %v4005_v35 = vsel %vm3950_vm4, %v14023_v28, %v3860_v59  ;;  %v12152_v49 = vrot.slane %v5575_v56, 4  ;;  %3849 = vrot.lane.b32.xlu0 %v12139_v12, %s8916_s26  ;;  %v3545_v10 = vor.u32 %v3543_v60, %v3542_v50  ;;  %v14027_v14 = vld [vmem:[#allocation10_spill] sm:$0xff] }
 0x2e2   :  { %v4008_v9 = vsel %vm3950_vm4, %v14024_v45, %v12066_v21  ;;  %v3538_v52 = vor.u32 %v3536_v0, %v3535_v55  ;;  %v12164_v57 = vrot.slane %v4793_v54, 4  ;;  %v12166_v56 = vrot.slane %v4796_v47, 5  ;;  %3912 = vrot.lane.b32.xlu1 %v12139_v12, %s8915_s24 }
 0x2e3   :  { %v12168_v46 = vshll.u32 %v7594_v29, 16  ;;  %v12171_v15 = vsel %vm4045_vm5, %v4005_v35, %v3925_v7  ;;  %v12175_v62 = vsel %vm11262_vm9, 0, %v3524_v23  ;;  %v3605_v50 = vrot.slane %v3603_v37, 7  ;;  %v14028_v29 = vld [vmem:[#allocation8_spill] sm:$0xff]  ;;  %v14029_v35 = vld [vmem:[#allocation37_spill] sm:$0xff] }
 0x2e4   :  { %14025 = vst [vmem:[#allocation24_spill] sm:$0xff] %v12171_v15  ;;  %14026 = vst [vmem:[#allocation26_spill] sm:$0xff] %v12175_v62  ;;  %v7595_v59 = vcombine.low %v12171_v15, %v12171_v15  ;;  %v4785_v55 = vor.u32 %v12148_v48, %v12146_v43  ;;  %v7596_v7 = vcombine.high %v12171_v15, %v12171_v15  ;;  %v3617_v60 = vshrl.u32 %v14027_v14, 16  ;;  %v3927_v21 = vpop.permute.xlu1 %3926 }
 0x2e5   :  { %v3610_v0 = vshrl.u32 %v14028_v29, 16  ;;  %3910 = vrot.lane.b32.xlu0 %v12175_v62, %s8915_s24  ;;  %v3708_v37 = vsel %vm11262_vm9, 0, %v3545_v10  ;;  %v3606_v47 = vshll.u32 %v14021_v34, 16  ;;  %v12195_v43 = vsel %vm11262_vm9, 0, %v3538_v52  ;;  %v3864_v52 = vpop.permute.xlu0 %3863 }
 0x2e6   :  { %v4807_v23 = vshrl.u32 %v7595_v59, 16  ;;  %v4810_v54 = vshll.u32 %v7595_v59, 16  ;;  %v4799_v48 = vor.u32 %v12166_v56, %v12164_v57  ;;  %v12202_v45 = vsel %vm3950_vm4, %v14029_v35, %v3866_v3  ;;  %3847 = vrot.lane.b32.xlu1 %v12175_v62, %s8916_s26  ;;  %v14031_v3 = vld [vmem:[#allocation106_spill] sm:$0xff] }
 0x2e7   :  { %v3608_v26 = vor.u32 %v3606_v47, %v3605_v50  ;;  %v3620_v10 = vshll.u32 %v14027_v14, 16  ;;  %v3613_v59 = vshll.u32 %v14028_v29, 16  ;;  %v3624_v34 = vshrl.u32 %v14030_v16, 16 }
 0x2e8   :  { %v4809_v58 = vrot.slane %v4807_v23, 4  ;;  %v12207_v63 = vshll.u32 %v7596_v7, 16  ;;  %v3619_v36 = vrot.slane %v3617_v60, 7  ;;  %v3612_v57 = vrot.slane %v3610_v0, 7 }
 0x2e9   :  { %3853 = vrot.lane.b32.xlu0 %v3708_v37, %s8916_s26  ;;  %v4812_v56 = vrot.slane %v4810_v54, 5  ;;  %v4011_v50 = vsel %vm3950_vm4, %v14031_v3, %v3864_v52  ;;  %v12215_v14 = vsel %vm4045_vm5, %v4008_v9, %v3927_v21  ;;  %v3631_v29 = vshrl.u32 %v11758_v38, 16 }
 0x2ea   :  { %14032 = vst [vmem:[#allocation27_spill] sm:$0xff] %v12215_v14  ;;  %v12219_v7 = vsel %vm4045_vm5, %v4011_v50, %v3929_v30  ;;  %v7597_v60 = vcombine.low %v12215_v14, %v12215_v14  ;;  %v7598_v0 = vcombine.high %v12215_v14, %v12215_v14  ;;  %v3626_v21 = vrot.slane %v3624_v34, 7  ;;  %3916 = vrot.lane.b32.xlu1 %v3708_v37, %s8915_s24 }
 0x2eb   :  { %14033 = vst [vmem:[#allocation30_spill] sm:$0xff] %v12219_v7  ;;  %v7599_v54 = vcombine.low %v12219_v7, %v12219_v7  ;;  %v7600_v9 = vcombine.high %v12219_v7, %v12219_v7  ;;  %v3627_v47 = vshll.u32 %v14030_v16, 16  ;;  %v3622_v52 = vor.u32 %v3620_v10, %v3619_v36  ;;  %v14065_v7 = vld [vmem:[#allocation64_spill] sm:$0xff] }
 0x2ec   :  { %v4821_v30 = vshrl.u32 %v7597_v60, 16  ;;  %v4824_v35 = vshll.u32 %v7597_v60, 16  ;;  %v3615_v3 = vor.u32 %v3613_v59, %v3612_v57  ;;  %v4813_v50 = vor.u32 %v4812_v56, %v4809_v58  ;;  %v12244_v58 = vpop.permute.xlu1 %3869  ;;  %v14034_v56 = vld [vmem:[#allocation44_spill] sm:$0xff] }
 0x2ed   :  { %3914 = vrot.lane.b32.xlu0 %v12195_v43, %s8915_s24  ;;  %v4835_v23 = vshrl.u32 %v7599_v54, 16  ;;  %v4838_v28 = vshll.u32 %v7599_v54, 16  ;;  %v3634_v14 = vshll.u32 %v11758_v38, 16  ;;  %v12236_v12 = vshll.u32 %v7598_v0, 16 }
 0x2ee   :  { %v4823_v15 = vrot.slane %v4821_v30, 4  ;;  %v4826_v2 = vrot.slane %v4824_v35, 5  ;;  %v3633_v34 = vrot.slane %v3631_v29, 7  ;;  %v12238_v60 = vshll.u32 %v7600_v9, 16  ;;  %3851 = vrot.lane.b32.xlu1 %v12195_v43, %s8916_s26 }
 0x2ef   :  { %v4837_v16 = vrot.slane %v4835_v23, 4  ;;  %v4840_v62 = vrot.slane %v4838_v28, 5  ;;  %v3629_v36 = vor.u32 %v3627_v47, %v3626_v21  ;;  %v12240_v10 = vrot.slane %v4785_v55, 4 }
 0x2f0   :  { %v12242_v37 = vrot.slane %v4799_v48, 4  ;;  %v4827_v59 = vor.u32 %v4826_v2, %v4823_v15  ;;  %v3645_v57 = vshrl.u32 %v11815_v27, 16  ;;  %v12254_v28 = vsel %vm11262_vm9, 0, %v3608_v26 }
 0x2f1   :  { %3932 = vrot.lane.b32.xlu0 %v14034_v56, %s8915_s24  ;;  %14035 = vst [vmem:[#allocation32_spill] sm:$0xff] %v12254_v28  ;;  %v3636_v55 = vor.u32 %v3634_v14, %v3633_v34  ;;  %v3638_v48 = vshrl.u32 %v11750_v20, 16  ;;  %v12257_v2 = vrot.slane %v4813_v50, 4  ;;  %v4841_v15 = vor.u32 %v4840_v62, %v4837_v16  ;;  %v3931_v62 = vpop.permute.xlu1 %3930  ;;  %v14077_v56 = vld [vmem:[#allocation86_spill] sm:$0xff] }
 0x2f2   :  { %v12261_v29 = vsel %vm11262_vm9, 0, %v3622_v52  ;;  %v12265_v0 = vsel %vm11262_vm9, 0, %v3615_v3  ;;  %v12271_v26 = vsel %vm11262_vm9, 0, %v3629_v36  ;;  %v3648_v14 = vshll.u32 %v11815_v27, 16  ;;  %3934 = vrot.lane.b32.xlu1 %v12254_v28, %s8915_s24 }
 0x2f3   :  { %v12274_v9 = vrot.slane %v4827_v59, 4  ;;  %v3647_v21 = vrot.slane %v3645_v57, 7  ;;  %v12282_v47 = vsel %vm4045_vm5, %v12202_v45, %v3931_v62  ;;  %v12286_v30 = vsel %vm11262_vm9, 0, %v3636_v55  ;;  %v14041_v57 = vld [vmem:[#allocation35_spill] sm:$0xff]  ;;  %v14045_v62 = vld [vmem:[#allocation46_spill] sm:$0xff] }
 0x2f4   :  { %14036 = vst [vmem:[#allocation33_spill] sm:$0xff] %v12282_v47  ;;  %v3640_v27 = vrot.slane %v3638_v48, 7  ;;  %v3641_v35 = vshll.u32 %v11750_v20, 16  ;;  %v12293_v3 = vrot.slane %v4841_v15, 4  ;;  %v7601_v50 = vcombine.low %v12282_v47, %v12282_v47  ;;  %v14039_v20 = vld [vmem:[#allocation28_spill] sm:$0xff]  ;;  %v14043_v48 = vld [vmem:[#allocation38_spill] sm:$0xff] }
 0x2f5   :  { %3871 = vrot.lane.b32.xlu0 %v12254_v28, %s8916_s26  ;;  %v7602_v45 = vcombine.high %v12282_v47, %v12282_v47  ;;  %v3652_v16 = vshrl.u32 %v11787_v25, 16  ;;  %v14040_v59 = vrot.slane %v14039_v20, 5  ;;  %v14044_v15 = vrot.slane %v14043_v48, 5  ;;  %v14049_v47 = vld [vmem:[#allocation45_spill] sm:$0xff]  ;;  %v14073_v28 = vld [vmem:[#allocation74_spill] sm:$0xff] }
 0x2f6   :  { %v4849_v54 = vshrl.u32 %v7601_v50, 16  ;;  %v4852_v34 = vshll.u32 %v7601_v50, 16  ;;  %v3650_v38 = vor.u32 %v3648_v14, %v3647_v21  ;;  %3873 = vrot.lane.b32.xlu1 %v12265_v0, %s8916_s26  ;;  %v14051_v14 = vld [vmem:[#allocation48_spill] sm:$0xff]  ;;  %v14053_v50 = vld [vmem:[#allocation59_spill] sm:$0xff] }
 0x2f7   :  { %v12308_v55 = vsel %vm12289_vm12, %v14041_v57, %v14040_v59  ;;  %v12315_v23 = vsel %vm12289_vm12, %v14045_v62, %v14044_v15  ;;  %v4858_v20 = vshll.u32 %v7602_v45, 16  ;;  %v12323_v59 = vor.u32 %v3641_v35, %v3640_v27  ;;  %v14047_v57 = vld [vmem:[#allocation36_spill] sm:$0xff]  ;;  %v14055_v45 = vld [vmem:[#allocation47_spill] sm:$0xff] }
 0x2f8   :  { %14042 = vst [vmem:[#allocation39_spill] sm:$0xff] %v12308_v55  ;;  %14046 = vst [vmem:[#allocation40_spill] sm:$0xff] %v12315_v23  ;;  %v14048_v48 = vrot.slane %v14047_v57, 5  ;;  %v14052_v21 = vrot.slane %v14051_v14, 5  ;;  %v4851_v36 = vrot.slane %v4849_v54, 4  ;;  %v4854_v23 = vrot.slane %v4852_v34, 5 }
 0x2f9   :  { %3875 = vrot.lane.b32.xlu0 %v12261_v29, %s8916_s26  ;;  %v8899_v27 = vld [vmem:[%s13512_s7 + $0x20] sm:$0xff]   ;;  %v14056_v57 = vrot.slane %v14055_v45, 5  ;;  %v14063_v34 = vld [vmem:[#allocation58_spill] sm:$0xff]  ;;  %v14067_v45 = vld [vmem:[#allocation69_spill] sm:$0xff] }
 0x2fa   :  { %v12330_v15 = vsel %vm12289_vm12, %v14049_v47, %v14048_v48  ;;  %v12337_v62 = vsel %vm12289_vm12, %v14053_v50, %v14052_v21  ;;  %v14057_v47 = vld [vmem:[#allocation51_spill] sm:$0xff]  ;;  %v14059_v14 = vld [vmem:[#allocation60_spill] sm:$0xff]  ;;  %v14061_v21 = vld [vmem:[#allocation66_spill] sm:$0xff]  ;;  %v14064_v50 = vrot.slane %v14063_v34, 5  ;;  %8479 = vmatprep.subr.bf16.mxu1 %v8899_v27  ;;  %3877 = vrot.lane.b32.xlu1 %v12271_v26, %s8916_s26 }
 0x2fb   :  { %14050 = vst [vmem:[#allocation41_spill] sm:$0xff] %v12330_v15  ;;  %14054 = vst [vmem:[#allocation42_spill] sm:$0xff] %v12337_v62  ;;  %v12349_v48 = vsel %vm12289_vm12, %v14057_v47, %v14056_v57  ;;  %v14060_v55 = vrot.slane %v14059_v14, 5  ;;  %v14068_v62 = vrot.slane %v14067_v45, 5  ;;  %v14069_v15 = vld [vmem:[#allocation76_spill] sm:$0xff]  ;;  %v14071_v47 = vld [vmem:[#allocation65_spill] sm:$0xff]  ;;  %8480 = vmatpush3.bf16.msra.mxu1 %v8899_v27 }
 0x2fc   :  { %14058 = vst [vmem:[#allocation52_spill] sm:$0xff] %v12349_v48  ;;  %v12363_v35 = vsel %vm12289_vm12, %v14065_v7, %v14064_v50  ;;  %v14072_v14 = vrot.slane %v14071_v47, 5  ;;  %v14075_v50 = vld [vmem:[#allocation77_spill] sm:$0xff]  ;;  %v14081_v47 = vld [vmem:[#allocation83_spill] sm:$0xff]  ;;  %v4860_v7 = vrot.slane %v4858_v20, 5 }
 0x2fd   :  { %v12356_v54 = vsel %vm12289_vm12, %v14061_v21, %v14060_v55  ;;  %14066 = vst [vmem:[#allocation54_spill] sm:$0xff] %v12363_v35  ;;  %v12370_v57 = vsel %vm12289_vm12, %v14069_v15, %v14068_v62  ;;  %v4855_v21 = vor.u32 %v4854_v23, %v4851_v36  ;;  %v14076_v45 = vrot.slane %v14075_v50, 5  ;;  %3936 = vrot.lane.b32.xlu0 %v12265_v0, %s8915_s24  ;;  %v14079_v36 = vld [vmem:[#allocation71_spill] sm:$0xff]  ;;  %v14083_v50 = vld [vmem:[#allocation85_spill] sm:$0xff] }
 0x2fe   :  { %14062 = vst [vmem:[#allocation53_spill] sm:$0xff] %v12356_v54  ;;  %14070 = vst [vmem:[#allocation57_spill] sm:$0xff] %v12370_v57  ;;  %v12377_v55 = vsel %vm12289_vm12, %v14073_v28, %v14072_v14  ;;  %v3654_v28 = vrot.slane %v3652_v16, 7  ;;  %v14080_v62 = vrot.slane %v14079_v36, 5  ;;  %v14087_v16 = vrot.slane %v12143_v1, 5  ;;  %v14091_v27 = vld [vmem:[#allocation87_spill] sm:$0xff]  ;;  %3938 = vrot.lane.b32.xlu1 %v12261_v29, %s8915_s24 }
 0x2ff   :  { %14074 = vst [vmem:[#allocation61_spill] sm:$0xff] %v12377_v55  ;;  %v12388_v15 = vsel %vm12289_vm12, %v14077_v56, %v14076_v45  ;;  %v14084_v56 = vrot.slane %v14083_v50, 5  ;;  %v14085_v45 = vld [vmem:[#allocation94_spill] sm:$0xff]  ;;  %v14088_v23 = vrot.slane %v12168_v46, 5 }
 0x300   :  { %14078 = vst [vmem:[#allocation62_spill] sm:$0xff] %v12388_v15  ;;  %v12401_v14 = vsel %vm12289_vm12, %v14081_v47, %v14080_v62  ;;  %v4791_v36 = vsel %vm12289_vm12, %v12240_v10, %v14087_v16  ;;  %v14095_v16 = vld [vmem:[#allocation3_spill] sm:$0xff]  ;;  %v14099_v15 = vld [vmem:[#allocation96_spill] sm:$0xff]  ;;  %v14105_v47 = vld [vmem:[#allocation2_spill] sm:$0xff] }
 0x301   :  { %14082 = vst [vmem:[#allocation67_spill] sm:$0xff] %v12401_v14  ;;  %v12408_v34 = vsel %vm12289_vm12, %v14085_v45, %v14084_v56  ;;  %v4805_v62 = vsel %vm12289_vm12, %v12242_v37, %v14088_v23  ;;  %v14089_v56 = vld [vmem:[#allocation84_spill] sm:$0xff]  ;;  %v14093_v45 = vld [vmem:[#allocation97_spill] sm:$0xff]  ;;  %3940 = vrot.lane.b32.xlu0 %v12271_v26, %s8915_s24 }
 0x302   :  { %14086 = vst [vmem:[#allocation68_spill] sm:$0xff] %v12408_v34  ;;  %v12422_v50 = vcombine.low %v4791_v36, %v4805_v62  ;;  %v14090_v20 = vrot.slane %v14089_v56, 5  ;;  %v14094_v10 = vrot.slane %v14093_v45, 5  ;;  %v14097_v37 = vld [vmem:[#allocation92_spill] sm:$0xff]  ;;  %v14101_v56 = vld [vmem:[#allocation90_spill] sm:$0xff]  ;;  %v14109_v34 = vld [vmem:[#allocation5_spill] sm:$0xff]  ;;  %3942 = vrot.lane.b32.xlu1 %v12286_v30, %s8915_s24 }
 0x303   :  { %v14098_v23 = vrot.slane %v14097_v37, 5 }
 0x304   :  { %v12429_v1 = vsel %vm12289_vm12, %v14091_v27, %v14090_v20  ;;  %v12436_v46 = vsel %vm12289_vm12, %v14095_v16, %v14094_v10  ;;  %v14102_v20 = vrot.slane %v14101_v56, 5  ;;  %v14103_v27 = vld [vmem:[#allocation95_spill] sm:$0xff]  ;;  %v14106_v10 = vrot.slane %v14105_v47, 5  ;;  %v14107_v16 = vld [vmem:[#allocation100_spill] sm:$0xff] }
 0x305   :  { %14092 = vst [vmem:[#allocation115_spill] sm:$0xff] %v12429_v1  ;;  %14096 = vst [vmem:[#allocation116_spill] sm:$0xff] %v12436_v46  ;;  %v12443_v36 = vsel %vm12289_vm12, %v14099_v15, %v14098_v23  ;;  %v14110_v15 = vrot.slane %v14109_v34, 5  ;;  %v14111_v23 = vld [vmem:[#allocation104_spill] sm:$0xff]  ;;  %v4856_v56 = vrot.slane %v4855_v21, 4  ;;  %v14117_v21 = vld [vmem:[#allocation15_spill] sm:$0xff]  ;;  %3879 = vrot.lane.b32.xlu0 %v12286_v30, %s8916_s26 }
 0x306   :  { %14100 = vst [vmem:[#allocation70_spill] sm:$0xff] %v12443_v36  ;;  %v12452_v45 = vsel %vm12289_vm12, %v14103_v27, %v14102_v20  ;;  %v12459_v37 = vsel %vm12289_vm12, %v14107_v16, %v14106_v10  ;;  %v14113_v27 = vld [vmem:[#allocation98_spill] sm:$0xff]  ;;  %v14115_v10 = vld [vmem:[#allocation103_spill] sm:$0xff]  ;;  %v14121_v1 = vld [vmem:[#allocation101_spill] sm:$0xff] }
 0x307   :  { %14104 = vst [vmem:[#allocation21_spill] sm:$0xff] %v12452_v45  ;;  %14108 = vst [vmem:[#allocation117_spill] sm:$0xff] %v12459_v37  ;;  %v12466_v62 = vsel %vm12289_vm12, %v14111_v23, %v14110_v15  ;;  %v14114_v34 = vrot.slane %v14113_v27, 5  ;;  %v14118_v15 = vrot.slane %v14117_v21, 5  ;;  %v14119_v23 = vld [vmem:[#allocation7_spill] sm:$0xff]  ;;  %v14122_v14 = vrot.slane %v14121_v1, 5 }
 0x308   :  { %14112 = vst [vmem:[#allocation72_spill] sm:$0xff] %v12466_v62  ;;  %v14123_v47 = vld [vmem:[#allocation107_spill] sm:$0xff]  ;;  %v14127_v37 = vld [vmem:[#allocation29_spill] sm:$0xff]  ;;  %v14131_v45 = vld [vmem:[#allocation108_spill] sm:$0xff] }
 0x309   :  { %v12481_v16 = vsel %vm12289_vm12, %v14115_v10, %v14114_v34  ;;  %v12488_v46 = vsel %vm12289_vm12, %v14119_v23, %v14118_v15  ;;  %v12495_v20 = vsel %vm12289_vm12, %v14123_v47, %v14122_v14  ;;  %v14125_v27 = vld [vmem:[#allocation23_spill] sm:$0xff]  ;;  %v14129_v10 = vld [vmem:[#allocation22_spill] sm:$0xff] }
 0x30a   :  { %14116 = vst [vmem:[#allocation75_spill] sm:$0xff] %v12481_v16  ;;  %14120 = vst [vmem:[#allocation78_spill] sm:$0xff] %v12488_v46  ;;  %v14126_v62 = vrot.slane %v14125_v27, 5  ;;  %v14130_v21 = vrot.slane %v14129_v10, 5  ;;  %v14133_v47 = vld [vmem:[#allocation111_spill] sm:$0xff]  ;;  %v14139_v36 = vld [vmem:[#allocation110_spill] sm:$0xff] }
 0x30b   :  { %14124 = vst [vmem:[#allocation79_spill] sm:$0xff] %v12495_v20  ;;  %v14134_v23 = vrot.slane %v14133_v47, 5  ;;  %v14135_v27 = vld [vmem:[#allocation11_spill] sm:$0xff]  ;;  %v14142_v47 = vrot.slane %v12236_v12, 5  ;;  %v12554_v12 = vsel %vm11262_vm9, 0, %v3650_v38 }
 0x30c   :  { %v12502_v34 = vsel %vm12289_vm12, %v14127_v37, %v14126_v62  ;;  %v12509_v15 = vsel %vm12289_vm12, %v14131_v45, %v14130_v21  ;;  %v14137_v37 = vld [vmem:[#allocation25_spill] sm:$0xff]  ;;  %v14141_v21 = vrot.slane %v12207_v63, 5  ;;  %v14150_v38 = vld [vmem:[#allocation55_spill] sm:$0xff]  ;;  %3883 = vrot.lane.b32.xlu0 %v12554_v12, %s8916_s26 }
 0x30d   :  { %14128 = vst [vmem:[#allocation80_spill] sm:$0xff] %v12502_v34  ;;  %14132 = vst [vmem:[#allocation82_spill] sm:$0xff] %v12509_v15  ;;  %v12520_v62 = vsel %vm12289_vm12, %v14135_v27, %v14134_v23  ;;  %v14138_v10 = vrot.slane %v14137_v37, 5  ;;  %v4833_v23 = vsel %vm12289_vm12, %v12274_v9, %v14142_v47  ;;  %v14143_v37 = vld [vmem:[#allocation114_spill] sm:$0xff] }
 0x30e   :  { %14136 = vst [vmem:[#allocation88_spill] sm:$0xff] %v12520_v62  ;;  %v4819_v14 = vsel %vm12289_vm12, %v12257_v2, %v14141_v21  ;;  %v14144_v1 = vrot.slane %v14143_v37, 5  ;;  %v14146_v2 = vrot.slane %v12238_v60, 5  ;;  %v14148_v21 = vld [vmem:[#allocation113_spill] sm:$0xff]  ;;  %v14152_v60 = vrot.slane %v11752_v31, 5 }
 0x30f   :  { %v12527_v45 = vsel %vm12289_vm12, %v14139_v36, %v14138_v10  ;;  %v12556_v63 = vcombine.low %v4819_v14, %v4833_v23  ;;  %v14149_v47 = vrot.slane %v14148_v21, 5  ;;  %v14156_v37 = vrot.slane %v12102_v33, 5 }
 0x310   :  { %14140 = vst [vmem:[#allocation89_spill] sm:$0xff] %v12527_v45  ;;  %v12546_v36 = vsel %vm12289_vm12, %v11746_v53, %v14144_v1  ;;  %v4847_v9 = vsel %vm12289_vm12, %v12293_v3, %v14146_v2  ;;  %v4861_v53 = vsel %vm12289_vm12, %v4856_v56, %v4860_v7  ;;  %v12581_v3 = vsel %vm12289_vm12, %v11785_v4, %v14152_v60 }
 0x311   :  { %14145 = vst [vmem:[#allocation105_spill] sm:$0xff] %v12546_v36  ;;  %v12565_v1 = vcombine.low %v4847_v9, %v4861_v53  ;;  %v12574_v14 = vsel %vm12289_vm12, %v14150_v38, %v14149_v47  ;;  %14153 = vst [vmem:[#allocation6_spill] sm:$0xff] %v12581_v3  ;;  %v14154_v56 = vrot.slane %v11733_v11, 5  ;;  %v12597_v31 = vsel %vm12289_vm12, %v12152_v49, %v14156_v37  ;;  %v14161_v49 = vld [vmem:[#allocation13_spill] sm:$0xff] }
 0x312   :  { %14151 = vst [vmem:[#allocation4_spill] sm:$0xff] %v12574_v14  ;;  %14157 = vst [vmem:[#allocation8_spill] sm:$0xff] %v12597_v31  ;;  %v14158_v4 = vrot.slane %v11806_v51, 5  ;;  %v12609_v11 = vsel %vm11262_vm9, 0, %v12323_v59  ;;  %v14162_v53 = vrot.slane %v14161_v49, 5  ;;  %v12644_v59 = vpop.permute.xlu0 %3867 }
 0x313   :  { %14147 = vst [vmem:[#allocation109_spill] sm:$0xff] %v12565_v1  ;;  %v12590_v23 = vsel %vm12289_vm12, %v11769_v19, %v14154_v56  ;;  %v14160_v19 = vshll.u32 %v11787_v25, 16  ;;  %3881 = vrot.lane.b32.xlu1 %v12609_v11, %s8916_s26  ;;  %3944 = vrot.lane.b32.xlu0 %v12609_v11, %s8915_s24 }
 0x314   :  { %14155 = vst [vmem:[#allocation10_spill] sm:$0xff] %v12590_v23  ;;  %v12604_v2 = vsel %vm12289_vm12, %v12108_v6, %v14158_v4  ;;  %v12620_v51 = vsel %vm12289_vm12, %v12096_v61, %v14162_v53  ;;  %v8900_v61 = vld [vmem:[%s13512_s7 + $0x28] sm:$0xff]  }
 0x315   :  { %14159 = vst [vmem:[#allocation37_spill] sm:$0xff] %v12604_v2  ;;  %v3657_v33 = vor.u32 %v14160_v19, %v3654_v28  ;;  %14163 = vst [vmem:[#allocation50_spill] sm:$0xff] %v12620_v51  ;;  %8481 = vmatprep.subr.bf16.mxu1 %v8900_v61 }
 0x316   :  { %8482 = vmatpush3.bf16.msra.mxu1 %v8900_v61 }
 0x317   :  { %v3724_v6 = vsel %vm11262_vm9, 0, %v3657_v33  ;;  %8547 = vmatprep.subr.bf16.mxu1 %v12642_v32 }
 0x318   :  { %3885 = vrot.lane.b32.xlu1 %v3724_v6, %s8916_s26  ;;  %3948 = vrot.lane.b32.xlu0 %v3724_v6, %s8915_s24 }
 0x31c   :  { %3946 = vrot.lane.b32.xlu1 %v12554_v12, %s8915_s24 }
 0x31e   :  { %v3889_v28 = vpop.permute.xlu0 %3888  ;;  %v3826_v21 = vpop.permute.xlu1 %3825 }
 0x31f   :  { %v3955_v49 = vsel %vm3950_vm4, %v11900_v13, %v3826_v21 }
 0x323   :  { %v3824_v47 = vpop.permute.xlu0 %3823 }
 0x324   :  { %v3952_v38 = vsel %vm3950_vm4, 0, %v3824_v47 }
 0x325   :  { %v12649_v60 = vsel %vm4045_vm5, %v3952_v38, %v3889_v28 }
 0x326   :  { %v7559_v56 = vcombine.low %v12649_v60, %v12649_v60  ;;  %v7560_v25 = vcombine.high %v12649_v60, %v12649_v60 }
 0x327   :  { %v3830_v37 = vpop.permute.xlu1 %3829  ;;  %v3893_v4 = vpop.permute.xlu0 %3892 }
 0x328   :  { %v4555_v19 = vshrl.u32 %v7559_v56, 16  ;;  %v4558_v33 = vshll.u32 %v7559_v56, 16  ;;  %v4564_v10 = vshll.u32 %v7560_v25, 16 }
 0x32a   :  { %v4557_v53 = vrot.slane %v4555_v19, 4  ;;  %v4560_v6 = vrot.slane %v4558_v33, 5  ;;  %v4566_v56 = vrot.slane %v4564_v10, 5 }
 0x32b   :  { %v3891_v61 = vpop.permute.xlu1 %3890  ;;  %v3828_v28 = vpop.permute.xlu0 %3827 }
 0x32c   :  { %v12658_v47 = vsel %vm4045_vm5, %v3955_v49, %v3891_v61  ;;  %v4561_v13 = vor.u32 %v4560_v6, %v4557_v53  ;;  %v3958_v21 = vsel %vm3950_vm4, %v11880_v44, %v3828_v28  ;;  %v3961_v44 = vsel %vm3950_vm4, %v11936_v41, %v3830_v37 }
 0x32d   :  { %v7561_v38 = vcombine.low %v12658_v47, %v12658_v47  ;;  %v7562_v9 = vcombine.high %v12658_v47, %v12658_v47  ;;  %v12669_v61 = vsel %vm4045_vm5, %v3958_v21, %v3893_v4 }
 0x32e   :  { %v7563_v2 = vcombine.low %v12669_v61, %v12669_v61  ;;  %v4562_v31 = vrot.slane %v4561_v13, 4  ;;  %v7564_v53 = vcombine.high %v12669_v61, %v12669_v61 }
 0x32f   :  { %v4569_v19 = vshrl.u32 %v7561_v38, 16  ;;  %v4572_v33 = vshll.u32 %v7561_v38, 16  ;;  %v4578_v49 = vshll.u32 %v7562_v9, 16 }
 0x330   :  { %v3897_v7 = vpop.permute.xlu1 %3896  ;;  %v4583_v28 = vshrl.u32 %v7563_v2, 16  ;;  %v4586_v38 = vshll.u32 %v7563_v2, 16  ;;  %v3834_v25 = vpop.permute.xlu0 %3833  ;;  %v4592_v3 = vshll.u32 %v7564_v53, 16  ;;  %v4567_v10 = vsel %vm12289_vm12, %v4562_v31, %v4566_v56 }
 0x331   :  { %v4571_v27 = vrot.slane %v4569_v19, 4  ;;  %v4574_v51 = vrot.slane %v4572_v33, 5  ;;  %v4580_v4 = vrot.slane %v4578_v49, 5 }
 0x332   :  { %v4585_v33 = vrot.slane %v4583_v28, 4  ;;  %v4588_v23 = vrot.slane %v4586_v38, 5  ;;  %v4594_v56 = vrot.slane %v4592_v3, 5 }
 0x333   :  { %v4575_v6 = vor.u32 %v4574_v51, %v4571_v27 }
 0x334   :  { %v3895_v9 = vpop.permute.xlu1 %3894  ;;  %v4589_v2 = vor.u32 %v4588_v23, %v4585_v33 }
 0x335   :  { %v12678_v21 = vsel %vm4045_vm5, %v3961_v44, %v3895_v9  ;;  %v4576_v19 = vrot.slane %v4575_v6, 4 }
 0x336   :  { %v7565_v13 = vcombine.low %v12678_v21, %v12678_v21  ;;  %v7566_v41 = vcombine.high %v12678_v21, %v12678_v21  ;;  %v4590_v31 = vrot.slane %v4589_v2, 4 }
 0x337   :  { %v4581_v6 = vsel %vm12289_vm12, %v4576_v19, %v4580_v4  ;;  %v3967_v4 = vsel %vm3950_vm4, %v11980_v17, %v3834_v25 }
 0x338   :  { %v4597_v51 = vshrl.u32 %v7565_v13, 16  ;;  %v4600_v37 = vshll.u32 %v7565_v13, 16  ;;  %v3832_v49 = vpop.permute.xlu1 %3831  ;;  %v4606_v28 = vshll.u32 %v7566_v41, 16  ;;  %v12692_v38 = vcombine.low %v4567_v10, %v4581_v6 }
 0x339   :  { %v3838_v44 = vpop.permute.xlu0 %3837  ;;  %v3964_v53 = vsel %vm3950_vm4, %v11916_v42, %v3832_v49  ;;  %v4595_v49 = vsel %vm12289_vm12, %v4590_v31, %v4594_v56 }
 0x33a   :  { %v4599_v9 = vrot.slane %v4597_v51, 4  ;;  %v4602_v14 = vrot.slane %v4600_v37, 5  ;;  %v12695_v27 = vsel %vm4045_vm5, %v3964_v53, %v3897_v7  ;;  %8439 = vmatprep.mubr.msk.bf16.mxu1 %vm5799_vm6, %v12692_v38  ;;  %v4608_v41 = vrot.slane %v4606_v28, 5 }
 0x33b   :  { %v7567_v23 = vcombine.low %v12695_v27, %v12695_v27  ;;  %v7568_v42 = vcombine.high %v12695_v27, %v12695_v27 }
 0x33c   :  { %v4603_v19 = vor.u32 %v4602_v14, %v4599_v9  ;;  %v3901_v33 = vpop.permute.xlu1 %3900 }
 0x33d   :  { %v3899_v13 = vpop.permute.xlu0 %3898  ;;  %v4611_v7 = vshrl.u32 %v7567_v23, 16  ;;  %v4614_v10 = vshll.u32 %v7567_v23, 16  ;;  %v4620_v6 = vshll.u32 %v7568_v42, 16 }
 0x33e   :  { %v12706_v2 = vsel %vm4045_vm5, %v3967_v4, %v3899_v13  ;;  %v4604_v51 = vrot.slane %v4603_v19, 4 }
 0x33f   :  { %v7569_v37 = vcombine.low %v12706_v2, %v12706_v2  ;;  %v7570_v3 = vcombine.high %v12706_v2, %v12706_v2  ;;  %v4613_v14 = vrot.slane %v4611_v7, 4  ;;  %v4616_v25 = vrot.slane %v4614_v10, 5 }
 0x340   :  { %v3836_v9 = vpop.permute.xlu1 %3835  ;;  %v4609_v4 = vsel %vm12289_vm12, %v4604_v51, %v4608_v41  ;;  %v4622_v41 = vrot.slane %v4620_v6, 5  ;;  %v14178_v52 = vcombine.low %v12695_v27, %v12706_v2  ;;  %v8906_v27 = vld [vmem:[%s13512_s7 + $0x88] sm:$0xff]  }
 0x341   :  { %v4625_v28 = vshrl.u32 %v7569_v37, 16  ;;  %v4628_v53 = vshll.u32 %v7569_v37, 16  ;;  %v3842_v23 = vpop.permute.xlu0 %3841  ;;  %v4617_v19 = vor.u32 %v4616_v25, %v4613_v14  ;;  %v4634_v13 = vshll.u32 %v7570_v3, 16 }
 0x342   :  { %v3970_v36 = vsel %vm3950_vm4, %v11963_v24, %v3836_v9  ;;  %v12720_v45 = vcombine.low %v4595_v49, %v4609_v4  ;;  %v3973_v24 = vsel %vm3950_vm4, %v12023_v5, %v3838_v44 }
 0x343   :  { %v4627_v7 = vrot.slane %v4625_v28, 4  ;;  %v4630_v10 = vrot.slane %v4628_v53, 5  ;;  %v12723_v17 = vsel %vm4045_vm5, %v3970_v36, %v3901_v33  ;;  %v4618_v31 = vrot.slane %v4617_v19, 4 }
 0x344   :  { %v7571_v56 = vcombine.low %v12723_v17, %v12723_v17  ;;  %v7572_v42 = vcombine.high %v12723_v17, %v12723_v17  ;;  %8440 = vmatmul.mubr.msk.bf16.gmra.mrb[64].mxu1 %vm5799_vm6, %v12720_v45  ;;  %v3905_v37 = vpop.permute.xlu1 %3904  ;;  %v4636_v14 = vrot.slane %v4634_v13, 5 }
 0x345   :  { %v4631_v51 = vor.u32 %v4630_v10, %v4627_v7  ;;  %v4623_v4 = vsel %vm12289_vm12, %v4618_v31, %v4622_v41  ;;  %v3979_v31 = vsel %vm3950_vm4, %v12077_v8, %v3842_v23 }
 0x346   :  { %v4639_v36 = vshrl.u32 %v7571_v56, 16  ;;  %v4642_v33 = vshll.u32 %v7571_v56, 16  ;;  %v4648_v9 = vshll.u32 %v7572_v42, 16 }
 0x347   :  { %v3903_v3 = vpop.permute.xlu0 %3902  ;;  %v4632_v49 = vrot.slane %v4631_v51, 4 }
 0x348   :  { %v12734_v25 = vsel %vm4045_vm5, %v3973_v24, %v3903_v3  ;;  %v4641_v5 = vrot.slane %v4639_v36, 4  ;;  %v4644_v44 = vrot.slane %v4642_v33, 5  ;;  %v3840_v10 = vpop.permute.xlu1 %3839 }
 0x349   :  { %v7573_v28 = vcombine.low %v12734_v25, %v12734_v25  ;;  %v7574_v53 = vcombine.high %v12734_v25, %v12734_v25  ;;  %v4637_v24 = vsel %vm12289_vm12, %v4632_v49, %v4636_v14  ;;  %v3976_v3 = vsel %vm3950_vm4, %v12006_v22, %v3840_v10 }
 0x34a   :  { %v4645_v51 = vor.u32 %v4644_v44, %v4641_v5  ;;  %v12748_v62 = vcombine.low %v4623_v4, %v4637_v24  ;;  %v12751_v42 = vsel %vm4045_vm5, %v3976_v3, %v3905_v37  ;;  %v4650_v49 = vrot.slane %v4648_v9, 5 }
 0x34b   :  { %v4653_v19 = vshrl.u32 %v7573_v28, 16  ;;  %v4656_v13 = vshll.u32 %v7573_v28, 16  ;;  %v4662_v7 = vshll.u32 %v7574_v53, 16  ;;  %v3846_v56 = vpop.permute.xlu0 %3845  ;;  %v7575_v41 = vcombine.low %v12751_v42, %v12751_v42 }
 0x34c   :  { %8443 = vmatprep.mubr.msk.bf16.mxu1 %vm5799_vm6, %v12748_v62  ;;  %v4646_v14 = vrot.slane %v4645_v51, 4  ;;  %v3909_v53 = vpop.permute.xlu1 %3908  ;;  %v7576_v44 = vcombine.high %v12751_v42, %v12751_v42 }
 0x34d   :  { %v4655_v36 = vrot.slane %v4653_v19, 4  ;;  %v4658_v33 = vrot.slane %v4656_v13, 5  ;;  %v4664_v22 = vrot.slane %v4662_v7, 5  ;;  %v4667_v37 = vshrl.u32 %v7575_v41, 16 }
 0x34e   :  { %v4670_v4 = vshll.u32 %v7575_v41, 16 }
 0x34f   :  { %v4659_v28 = vor.u32 %v4658_v33, %v4655_v36  ;;  %v3907_v5 = vpop.permute.xlu0 %3906  ;;  %v4669_v7 = vrot.slane %v4667_v37, 4  ;;  %v4651_v33 = vsel %vm12289_vm12, %v4646_v14, %v4650_v49  ;;  %v3985_v49 = vsel %vm3950_vm4, %v12126_v18, %v3846_v56 }
 0x350   :  { %v12762_v19 = vsel %vm4045_vm5, %v3979_v31, %v3907_v5  ;;  %v4672_v10 = vrot.slane %v4670_v4, 5  ;;  %v3844_v3 = vpop.permute.xlu1 %3843 }
 0x351   :  { %v4660_v8 = vrot.slane %v4659_v28, 4  ;;  %v7577_v23 = vcombine.low %v12762_v19, %v12762_v19  ;;  %v7578_v13 = vcombine.high %v12762_v19, %v12762_v19  ;;  %v4676_v28 = vshll.u32 %v7576_v44, 16 }
 0x352   :  { %v4673_v41 = vor.u32 %v4672_v10, %v4669_v7  ;;  %v3982_v5 = vsel %vm3950_vm4, %v12051_v40, %v3844_v3 }
 0x353   :  { %v4681_v24 = vshrl.u32 %v7577_v23, 16  ;;  %v4684_v51 = vshll.u32 %v7577_v23, 16  ;;  %v3850_v36 = vpop.permute.xlu0 %3849  ;;  %v4665_v31 = vsel %vm12289_vm12, %v4660_v8, %v4664_v22  ;;  %v4690_v4 = vshll.u32 %v7578_v13, 16 }
 0x354   :  { %v12776_v6 = vcombine.low %v4651_v33, %v4665_v31  ;;  %v12779_v23 = vsel %vm4045_vm5, %v3982_v5, %v3909_v53  ;;  %v4674_v14 = vrot.slane %v4673_v41, 4  ;;  %v3913_v40 = vpop.permute.xlu1 %3912  ;;  %v4678_v8 = vrot.slane %v4676_v28, 5 }
 0x355   :  { %v4683_v9 = vrot.slane %v4681_v24, 4  ;;  %v4686_v37 = vrot.slane %v4684_v51, 5  ;;  %v7579_v15 = vcombine.low %v12779_v23, %v12779_v23  ;;  %v4692_v53 = vrot.slane %v4690_v4, 5 }
 0x356   :  { %14164 = vst [vmem:[#allocation106_spill] sm:$0xff] %v12776_v6  ;;  %8444 = vmatmul.mubr.msk.bf16.gmra.mrb[68].mxu1 %vm5799_vm6, %v12776_v6  ;;  %v7580_v51 = vcombine.high %v12779_v23, %v12779_v23  ;;  %v4679_v41 = vsel %vm12289_vm12, %v4674_v14, %v4678_v8  ;;  %v14167_v8 = vld [vmem:[#allocation12_spill] sm:$0xff] }
 0x357   :  { %v4687_v22 = vor.u32 %v4686_v37, %v4683_v9  ;;  %v3911_v44 = vpop.permute.xlu0 %3910  ;;  %v4695_v3 = vshrl.u32 %v7579_v15, 16  ;;  %v4698_v18 = vshll.u32 %v7579_v15, 16 }
 0x358   :  { %v12788_v7 = vsel %vm4045_vm5, %v3985_v49, %v3911_v44  ;;  %v3848_v33 = vpop.permute.xlu1 %3847  ;;  %v14166_v49 = vld [vmem:[#allocation26_spill] sm:$0xff] }
 0x359   :  { %v4688_v13 = vrot.slane %v4687_v22, 4  ;;  %v7581_v10 = vcombine.low %v12788_v7, %v12788_v7  ;;  %v3988_v5 = vsel %vm3950_vm4, %v12090_v39, %v3848_v33  ;;  %v3991_v15 = vsel %vm3950_vm4, %v14166_v49, %v3850_v36 }
 0x35a   :  { %v12809_v22 = vsel %vm4045_vm5, %v3988_v5, %v3913_v40  ;;  %v4697_v44 = vrot.slane %v4695_v3, 4  ;;  %v4700_v39 = vrot.slane %v4698_v18, 5  ;;  %v14169_v5 = vld [vmem:[#allocation9_spill] sm:$0xff]  ;;  %v14181_v2 = vcombine.low %v12779_v23, %v12788_v7  ;;  %v14187_v23 = vld [vmem:[#allocation24_spill] sm:$0xff] }
 0x35b   :  { %v4709_v56 = vshrl.u32 %v7581_v10, 16  ;;  %v4712_v9 = vshll.u32 %v7581_v10, 16  ;;  %v3854_v31 = vpop.permute.xlu0 %3853  ;;  %v4693_v28 = vsel %vm12289_vm12, %v4688_v13, %v4692_v53  ;;  %v4704_v10 = vshll.u32 %v7580_v51, 16 }
 0x35c   :  { %v3997_v37 = vsel %vm3950_vm4, %v12195_v43, %v3854_v31  ;;  %v12804_v4 = vcombine.low %v4679_v41, %v4693_v28  ;;  %v7583_v14 = vcombine.low %v12809_v22, %v12809_v22  ;;  %v3917_v40 = vpop.permute.xlu1 %3916  ;;  %v14168_v41 = vld [vmem:[#allocation112_spill] sm:$0xff]  ;;  %v4017_v18 = vsel %vm3950_vm4, %v14169_v5, %v12644_v59 }
 0x35d   :  { %v12815_v13 = vsel %vm4045_vm5, %v3997_v37, %v14167_v8  ;;  %v4711_v43 = vrot.slane %v4709_v56, 4  ;;  %v4714_v53 = vrot.slane %v4712_v9, 5  ;;  %v4020_v28 = vsel %vm3950_vm4, %v14168_v41, %v12244_v58 }
 0x35e   :  { %14165 = vst [vmem:[#allocation28_spill] sm:$0xff] %v12804_v4  ;;  %8447 = vmatprep.mubr.msk.bf16.mxu1 %vm5799_vm6, %v12804_v4  ;;  %v7589_v36 = vcombine.low %v12815_v13, %v12815_v13  ;;  %v4723_v3 = vshrl.u32 %v7583_v14, 16  ;;  %v4726_v51 = vshll.u32 %v7583_v14, 16  ;;  %v7582_v56 = vcombine.high %v12788_v7, %v12788_v7  ;;  %v14188_v7 = vld [vmem:[#allocation27_spill] sm:$0xff] }
 0x35f   :  { %v3915_v33 = vpop.permute.xlu0 %3914  ;;  %v4706_v9 = vrot.slane %v4704_v10, 5  ;;  %v4701_v24 = vor.u32 %v4700_v39, %v4697_v44  ;;  %v14170_v44 = vld [vmem:[#allocation19_spill] sm:$0xff] }
 0x360   :  { %v12822_v31 = vsel %vm4045_vm5, %v3991_v15, %v3915_v33  ;;  %v4725_v37 = vrot.slane %v4723_v3, 4  ;;  %v4728_v49 = vrot.slane %v4726_v51, 5  ;;  %v4715_v15 = vor.u32 %v4714_v53, %v4711_v43  ;;  %v3852_v41 = vpop.permute.xlu1 %3851 }
 0x361   :  { %v7585_v14 = vcombine.low %v12822_v31, %v12822_v31  ;;  %v7584_v33 = vcombine.high %v12809_v22, %v12809_v22  ;;  %v4765_v34 = vshrl.u32 %v7589_v36, 16  ;;  %v4768_v20 = vshll.u32 %v7589_v36, 16 }
 0x362   :  { %v4718_v10 = vshll.u32 %v7582_v56, 16  ;;  %v7586_v3 = vcombine.high %v12822_v31, %v12822_v31  ;;  %v3994_v39 = vsel %vm3950_vm4, %v14170_v44, %v3852_v41  ;;  %v4729_v43 = vor.u32 %v4728_v49, %v4725_v37 }
 0x363   :  { %v3933_v58 = vpop.permute.xlu0 %3932  ;;  %v4737_v46 = vshrl.u32 %v7585_v14, 16  ;;  %v4740_v59 = vshll.u32 %v7585_v14, 16  ;;  %v4702_v14 = vrot.slane %v4701_v24, 4  ;;  %v4716_v55 = vrot.slane %v4715_v15, 4 }
 0x364   :  { %v12841_v51 = vsel %vm4045_vm5, %v4017_v18, %v3933_v58  ;;  %v4732_v57 = vshll.u32 %v7584_v33, 16  ;;  %v12848_v56 = vsel %vm4045_vm5, %v3994_v39, %v3917_v40  ;;  %v3935_v35 = vpop.permute.xlu1 %3934  ;;  %v4767_v54 = vrot.slane %v4765_v34, 4 }
 0x365   :  { %v4739_v53 = vrot.slane %v4737_v46, 4  ;;  %v4742_v16 = vrot.slane %v4740_v59, 5  ;;  %v7603_v36 = vcombine.low %v12841_v51, %v12841_v51  ;;  %v4770_v18 = vrot.slane %v4768_v20, 5 }
 0x366   :  { %v7587_v41 = vcombine.low %v12848_v56, %v12848_v56  ;;  %v4720_v37 = vrot.slane %v4718_v10, 5  ;;  %v7590_v46 = vcombine.high %v12815_v13, %v12815_v13  ;;  %v4746_v49 = vshll.u32 %v7586_v3, 16 }
 0x367   :  { %v3872_v5 = vpop.permute.xlu0 %3871  ;;  %v4743_v58 = vor.u32 %v4742_v16, %v4739_v53  ;;  %v4730_v15 = vrot.slane %v4729_v43, 4  ;;  %v4863_v33 = vshrl.u32 %v7603_v36, 16  ;;  %v4866_v40 = vshll.u32 %v7603_v36, 16 }
 0x368   :  { %v4751_v59 = vshrl.u32 %v7587_v41, 16  ;;  %v4754_v39 = vshll.u32 %v7587_v41, 16  ;;  %v4707_v20 = vsel %vm12289_vm12, %v4702_v14, %v4706_v9  ;;  %v4721_v16 = vsel %vm12289_vm12, %v4716_v55, %v4720_v37  ;;  %v3874_v10 = vpop.permute.xlu1 %3873 }
 0x369   :  { %v4744_v44 = vrot.slane %v4743_v58, 4  ;;  %v4734_v53 = vrot.slane %v4732_v57, 5  ;;  %v4771_v48 = vor.u32 %v4770_v18, %v4767_v54  ;;  %v12860_v4 = vcombine.low %v4707_v20, %v4721_v16  ;;  %v14172_v18 = vld [vmem:[#allocation44_spill] sm:$0xff] }
 0x36a   :  { %v4753_v3 = vrot.slane %v4751_v59, 4  ;;  %v4748_v24 = vrot.slane %v4746_v49, 5  ;;  %v7588_v43 = vcombine.high %v12848_v56, %v12848_v56  ;;  %v4756_v36 = vrot.slane %v4754_v39, 5 }
 0x36b   :  { %v3876_v34 = vpop.permute.xlu0 %3875  ;;  %14171 = vst [vmem:[#allocation35_spill] sm:$0xff] %v12860_v4  ;;  %v12865_v58 = vsel %vm4045_vm5, %v4020_v28, %v3935_v35  ;;  %v7604_v9 = vcombine.high %v12841_v51, %v12841_v51  ;;  %v4865_v14 = vrot.slane %v4863_v33, 4  ;;  %8448 = vmatmul.mubr.msk.bf16.gmra.mrb[72].mxu1 %vm5799_vm6, %v12860_v4  ;;  %v4868_v55 = vrot.slane %v4866_v40, 5 }
 0x36c   :  { %v7605_v54 = vcombine.low %v12865_v58, %v12865_v58  ;;  %v4023_v41 = vsel %vm3950_vm4, %v14172_v18, %v3872_v5  ;;  %v4735_v35 = vsel %vm12289_vm12, %v4730_v15, %v4734_v53  ;;  %v4749_v28 = vsel %vm12289_vm12, %v4744_v44, %v4748_v24  ;;  %v3878_v49 = vpop.permute.xlu1 %3877  ;;  %v14174_v18 = vld [vmem:[#allocation32_spill] sm:$0xff] }
 0x36d   :  { %v4757_v33 = vor.u32 %v4756_v36, %v4753_v3  ;;  %v12881_v20 = vcombine.low %v4735_v35, %v4749_v28  ;;  %v4760_v16 = vshll.u32 %v7588_v43, 16  ;;  %v4772_v24 = vrot.slane %v4771_v48, 4 }
 0x36e   :  { %v4877_v59 = vshrl.u32 %v7605_v54, 16  ;;  %v4880_v39 = vshll.u32 %v7605_v54, 16  ;;  %v4774_v15 = vshll.u32 %v7590_v46, 16  ;;  %v4872_v44 = vshll.u32 %v7604_v9, 16 }
 0x36f   :  { %v3937_v37 = vpop.permute.xlu0 %3936  ;;  %14173 = vst [vmem:[#allocation38_spill] sm:$0xff] %v12881_v20  ;;  %8451 = vmatprep.mubr.msk.bf16.mxu1 %vm5799_vm6, %v12881_v20  ;;  %v4029_v53 = vsel %vm3950_vm4, %v12265_v0, %v3876_v34  ;;  %v4869_v43 = vor.u32 %v4868_v55, %v4865_v14  ;;  %v4758_v54 = vrot.slane %v4757_v33, 4  ;;  %v4762_v28 = vrot.slane %v4760_v16, 5 }
 0x370   :  { %v12884_v57 = vsel %vm4045_vm5, %v4023_v41, %v3937_v37  ;;  %v4879_v40 = vrot.slane %v4877_v59, 4  ;;  %v4882_v4 = vrot.slane %v4880_v39, 5  ;;  %v3939_v36 = vpop.permute.xlu1 %3938  ;;  %v4026_v41 = vsel %vm3950_vm4, %v14174_v18, %v3874_v10 }
 0x371   :  { %v7607_v5 = vcombine.low %v12884_v57, %v12884_v57  ;;  %v7606_v37 = vcombine.high %v12865_v58, %v12865_v58  ;;  %v7608_v48 = vcombine.high %v12884_v57, %v12884_v57  ;;  %v12902_v46 = vsel %vm4045_vm5, %v4026_v41, %v3939_v36 }
 0x372   :  { %v4883_v0 = vor.u32 %v4882_v4, %v4879_v40  ;;  %v7609_v14 = vcombine.low %v12902_v46, %v12902_v46  ;;  %v4776_v10 = vrot.slane %v4774_v15, 5  ;;  %v4874_v55 = vrot.slane %v4872_v44, 5 }
 0x373   :  { %v3941_v3 = vpop.permute.xlu0 %3940  ;;  %v4891_v34 = vshrl.u32 %v7607_v5, 16  ;;  %v4894_v9 = vshll.u32 %v7607_v5, 16  ;;  %v4870_v16 = vrot.slane %v4869_v43, 4  ;;  %v4763_v36 = vsel %vm12289_vm12, %v4758_v54, %v4762_v28 }
 0x374   :  { %v12895_v35 = vsel %vm4045_vm5, %v4029_v53, %v3941_v3  ;;  %v3943_v39 = vpop.permute.xlu1 %3942  ;;  %v4905_v53 = vshrl.u32 %v7609_v14, 16  ;;  %v4908_v3 = vshll.u32 %v7609_v14, 16  ;;  %v4886_v18 = vshll.u32 %v7606_v37, 16 }
 0x375   :  { %v7611_v33 = vcombine.low %v12895_v35, %v12895_v35  ;;  %v4032_v4 = vsel %vm3950_vm4, %v12261_v29, %v3878_v49  ;;  %v4777_v5 = vsel %vm12289_vm12, %v4772_v24, %v4776_v10  ;;  %v4884_v15 = vrot.slane %v4883_v0, 4 }
 0x376   :  { %v4893_v44 = vrot.slane %v4891_v34, 4  ;;  %v4896_v41 = vrot.slane %v4894_v9, 5  ;;  %v12916_v20 = vshll.u32 %v7608_v48, 16  ;;  %v12918_v6 = vcombine.low %v4763_v36, %v4777_v5 }
 0x377   :  { %v3880_v59 = vpop.permute.xlu0 %3879  ;;  %v4919_v43 = vshrl.u32 %v7611_v33, 16  ;;  %v4922_v14 = vshll.u32 %v7611_v33, 16  ;;  %v12921_v54 = vsel %vm4045_vm5, %v4032_v4, %v3943_v39  ;;  %v7610_v49 = vcombine.high %v12902_v46, %v12902_v46 }
 0x378   :  { %14175 = vst [vmem:[#allocation46_spill] sm:$0xff] %v12918_v6  ;;  %v4907_v37 = vrot.slane %v4905_v53, 4  ;;  %v4910_v40 = vrot.slane %v4908_v3, 5  ;;  %v7613_v24 = vcombine.low %v12921_v54, %v12921_v54  ;;  %v4888_v0 = vrot.slane %v4886_v18, 5  ;;  %8452 = vmatmul.mubr.msk.bf16.gmra.mrb[76].mxu1 %vm5799_vm6, %v12918_v6 }
 0x379   :  { %v7612_v48 = vcombine.high %v12895_v35, %v12895_v35  ;;  %v4875_v9 = vsel %vm12289_vm12, %v4870_v16, %v4874_v55  ;;  %v4897_v10 = vor.u32 %v4896_v41, %v4893_v44  ;;  %v4902_v33 = vrot.slane %v12916_v20, 5  ;;  %8455 = vmatprep.mubr.msk.bf16.mxu1 %vm5799_vm6, %v12422_v50 }
 0x37a   :  { %v4933_v39 = vshrl.u32 %v7613_v24, 16  ;;  %v4936_v53 = vshll.u32 %v7613_v24, 16  ;;  %v4921_v3 = vrot.slane %v4919_v43, 4  ;;  %v4924_v36 = vrot.slane %v4922_v14, 5 }
 0x37b   :  { %v4035_v18 = vsel %vm3950_vm4, %v12271_v26, %v3880_v59  ;;  %v4889_v34 = vsel %vm12289_vm12, %v4884_v15, %v4888_v0  ;;  %v4911_v6 = vor.u32 %v4910_v40, %v4907_v37  ;;  %v4914_v55 = vshll.u32 %v7610_v49, 16 }
 0x37c   :  { %v4935_v16 = vrot.slane %v4933_v39, 4  ;;  %v4938_v44 = vrot.slane %v4936_v53, 5  ;;  %v12949_v14 = vcombine.low %v4875_v9, %v4889_v34  ;;  %v4898_v26 = vrot.slane %v4897_v10, 4 }
 0x37d   :  { %v7614_v59 = vcombine.high %v12921_v54, %v12921_v54  ;;  %v4928_v9 = vshll.u32 %v7612_v48, 16  ;;  %v4912_v10 = vrot.slane %v4911_v6, 4 }
 0x37e   :  { %v3884_v28 = vpop.permute.xlu0 %3883  ;;  %v4939_v53 = vor.u32 %v4938_v44, %v4935_v16 }
 0x37f   :  { %v4041_v40 = vsel %vm3950_vm4, %v12609_v11, %v3884_v28  ;;  %v4916_v28 = vrot.slane %v4914_v55, 5 }
 0x380   :  { %8456 = vmatmul.mubr.msk.bf16.gmra.mrb[80].mxu1 %vm5799_vm6, %v12556_v63 }
 0x381   :  { %8459 = vmatprep.mubr.msk.bf16.mxu1 %vm5799_vm6, %v12565_v1 }
 0x385   :  { %v3882_v29 = vpop.permute.xlu1 %3881  ;;  %v3945_v4 = vpop.permute.xlu0 %3944 }
 0x386   :  { %v12943_v20 = vsel %vm4045_vm5, %v4035_v18, %v3945_v4  ;;  %v4038_v49 = vsel %vm3950_vm4, %v12286_v30, %v3882_v29  ;;  %v4942_v29 = vshll.u32 %v7614_v59, 16 }
 0x387   :  { %v7615_v41 = vcombine.low %v12943_v20, %v12943_v20  ;;  %v7616_v30 = vcombine.high %v12943_v20, %v12943_v20 }
 0x388   :  { %v4944_v1 = vrot.slane %v4942_v29, 5  ;;  %8460 = vmatmul.mubr.msk.bf16.gmra.mrb[84].mxu1 %vm5799_vm6, %v12949_v14 }
 0x389   :  { %v4947_v37 = vshrl.u32 %v7615_v41, 16  ;;  %v4950_v24 = vshll.u32 %v7615_v41, 16  ;;  %v4917_v41 = vsel %vm12289_vm12, %v4912_v10, %v4916_v28  ;;  %v4956_v59 = vshll.u32 %v7616_v30, 16 }
 0x38a   :  { %v3886_v5 = vpop.permute.xlu1 %3885  ;;  %v3949_v0 = vpop.permute.xlu0 %3948 }
 0x38b   :  { %v4044_v43 = vsel %vm3950_vm4, %v12554_v12, %v3886_v5  ;;  %v12964_v39 = vsel %vm4045_vm5, %v4041_v40, %v3949_v0  ;;  %v4949_v6 = vrot.slane %v4947_v37, 4  ;;  %v4952_v48 = vrot.slane %v4950_v24, 5 }
 0x38c   :  { %v12957_v15 = vsel %vm4045_vm5, %v4044_v43, %v14167_v8  ;;  %v4925_v8 = vor.u32 %v4924_v36, %v4921_v3  ;;  %v7619_v18 = vcombine.low %v12964_v39, %v12964_v39  ;;  %v4903_v5 = vsel %vm12289_vm12, %v4898_v26, %v4902_v33 }
 0x38d   :  { %v7621_v12 = vcombine.low %v12957_v15, %v12957_v15  ;;  %v4940_v43 = vrot.slane %v4939_v53, 4  ;;  %v4953_v37 = vor.u32 %v4952_v48, %v4949_v6  ;;  %v7620_v33 = vcombine.high %v12964_v39, %v12964_v39 }
 0x38e   :  { %v3947_v34 = vpop.permute.xlu1 %3946  ;;  %v4975_v16 = vshrl.u32 %v7619_v18, 16  ;;  %v4978_v44 = vshll.u32 %v7619_v18, 16  ;;  %v12991_v53 = vcombine.low %v4903_v5, %v4917_v41  ;;  %v4926_v30 = vrot.slane %v4925_v8, 4 }
 0x38f   :  { %v12967_v11 = vsel %vm4045_vm5, %v4038_v49, %v3947_v34  ;;  %v4989_v4 = vshrl.u32 %v7621_v12, 16  ;;  %v4992_v55 = vshll.u32 %v7621_v12, 16  ;;  %v4954_v6 = vrot.slane %v4953_v37, 4 }
 0x390   :  { %v7617_v36 = vcombine.low %v12967_v11, %v12967_v11  ;;  %v7618_v40 = vcombine.high %v12967_v11, %v12967_v11  ;;  %v4977_v24 = vrot.slane %v4975_v16, 4  ;;  %v4980_v0 = vrot.slane %v4978_v44, 5  ;;  %8463 = vmatprep.mubr.msk.bf16.mxu1 %vm5799_vm6, %v12991_v53 }
 0x391   :  { %v4991_v3 = vrot.slane %v4989_v4, 4  ;;  %v7701_v12 = vcombine.low %v12943_v20, %v12967_v11  ;;  %v4994_v18 = vrot.slane %v4992_v55, 5  ;;  %v7622_v48 = vcombine.high %v12957_v15, %v12957_v15  ;;  %v14202_v20 = vld [vmem:[#allocation81_spill] sm:$0xff]  ;;  %v14205_v11 = vld [vmem:[#allocation99_spill] sm:$0xff] }
 0x392   :  { %v4961_v49 = vshrl.u32 %v7617_v36, 16  ;;  %v4964_v34 = vshll.u32 %v7617_v36, 16  ;;  %v4970_v28 = vshll.u32 %v7618_v40, 16  ;;  %v4981_v4 = vor.u32 %v4980_v0, %v4977_v24 }
 0x393   :  { %v4930_v16 = vrot.slane %v4928_v9, 5  ;;  %v4958_v55 = vrot.slane %v4956_v59, 5  ;;  %v4984_v44 = vshll.u32 %v7620_v33, 16  ;;  %v4995_v40 = vor.u32 %v4994_v18, %v4991_v3 }
 0x394   :  { %v4963_v26 = vrot.slane %v4961_v49, 4  ;;  %v4966_v10 = vrot.slane %v4964_v34, 5  ;;  %v4972_v41 = vrot.slane %v4970_v28, 5  ;;  %v4945_v8 = vsel %vm12289_vm12, %v4940_v43, %v4944_v1 }
 0x395   :  { %v4931_v29 = vsel %vm12289_vm12, %v4926_v30, %v4930_v16  ;;  %v4998_v49 = vshll.u32 %v7622_v48, 16  ;;  %v4982_v37 = vrot.slane %v4981_v4, 4  ;;  %v4959_v24 = vsel %vm12289_vm12, %v4954_v6, %v4958_v55  ;;  %v14208_v16 = vld [vmem:[#allocation31_spill] sm:$0xff]  ;;  %v14209_v55 = vld [vmem:[#allocation49_spill] sm:$0xff] }
 0x396   :  { %v4967_v36 = vor.u32 %v4966_v10, %v4963_v26  ;;  %v13007_v9 = vcombine.low %v4931_v29, %v4945_v8  ;;  %v4996_v3 = vrot.slane %v4995_v40, 4  ;;  %v4986_v34 = vrot.slane %v4984_v44, 5  ;;  %v8902_v10 = vld [vmem:[%s13512_s7 + $0x68] sm:$0xff]   ;;  %v14210_v44 = vld [vmem:[#allocation14_spill] sm:$0xff]  ;;  %v14211_v40 = vld [vmem:[#allocation16_spill] sm:$0xff] }
 0x397   :  { %v5000_v1 = vrot.slane %v4998_v49, 5  ;;  %v14176_v18 = vcombine.low %v12649_v60, %v12658_v47  ;;  %v14177_v28 = vcombine.low %v12669_v61, %v12678_v21  ;;  %v8903_v60 = vld [vmem:[%s13512_s7 + $0x70] sm:$0xff]   ;;  %v8904_v47 = vld [vmem:[%s13512_s7 + $0x78] sm:$0xff]   ;;  %v14179_v61 = vcombine.low %v12723_v17, %v12734_v25  ;;  %v8905_v21 = vld [vmem:[%s13512_s7 + $0x80] sm:$0xff]  }
 0x398   :  { %v4968_v5 = vrot.slane %v4967_v36, 4  ;;  %8464 = vmatmul.mubr.msk.bf16.gmra.mrb[88].mxu1 %vm5799_vm6, %v13007_v9  ;;  %v4987_v43 = vsel %vm12289_vm12, %v4982_v37, %v4986_v34  ;;  %v14182_v17 = vcombine.low %v12809_v22, %v12822_v31  ;;  %v14183_v25 = vcombine.low %v12848_v56, %v12815_v13  ;;  %v14190_v22 = vld [vmem:[#allocation30_spill] sm:$0xff]  ;;  %v14191_v31 = vld [vmem:[#allocation33_spill] sm:$0xff]  ;;  %v14207_v36 = vld [vmem:[#allocation20_spill] sm:$0xff] }
 0x399   :  { %v5001_v33 = vsel %vm12289_vm12, %v4996_v3, %v5000_v1  ;;  %v14189_v6 = vcombine.low %v14187_v23, %v14188_v7  ;;  %v14192_v48 = vcombine.low %v14190_v22, %v14191_v31  ;;  %v14193_v13 = vcombine.low %v12841_v51, %v12865_v58  ;;  %v14197_v58 = vld [vmem:[#allocation34_spill] sm:$0xff]  ;;  %v14214_v8 = vld [vmem:[#allocation28_spill] sm:$0xff]  ;;  %v14215_v29 = vld [vmem:[#allocation35_spill] sm:$0xff] }
 0x39a   :  { %v4973_v0 = vsel %vm12289_vm12, %v4968_v5, %v4972_v41  ;;  %v13019_v26 = vcombine.low %v4987_v43, %v5001_v33  ;;  %v14194_v56 = vcombine.low %v12884_v57, %v12902_v46  ;;  %v14195_v4 = vcombine.low %v12895_v35, %v12921_v54  ;;  %v14198_v57 = vld [vmem:[#allocation43_spill] sm:$0xff]  ;;  %v14199_v46 = vld [vmem:[#allocation56_spill] sm:$0xff]  ;;  %v14201_v54 = vld [vmem:[#allocation73_spill] sm:$0xff] }
 0x39b   :  { %v13009_v59 = vcombine.low %v4959_v24, %v4973_v0  ;;  %v14196_v51 = vcombine.low %v12964_v39, %v12957_v15  ;;  %v14200_v35 = vld [vmem:[#allocation63_spill] sm:$0xff]  ;;  %v14204_v39 = vld [vmem:[#allocation93_spill] sm:$0xff]  ;;  %v14212_v5 = vld [vmem:[#allocation118_spill] sm:$0xff] }
 0x39c   :  { %v14203_v15 = vld [vmem:[#allocation91_spill] sm:$0xff]  ;;  %v14213_v41 = vld [vmem:[#allocation106_spill] sm:$0xff]  ;;  %v14226_v0 = vld [vmem:[#allocation53_spill] sm:$0xff] }
 0x39d   :  { %8467 = vmatprep.mubr.msk.bf16.mxu1 %vm5799_vm6, %v13009_v59  ;;  %v14216_v49 = vld [vmem:[#allocation38_spill] sm:$0xff]  ;;  %v14231_v1 = vld [vmem:[#allocation61_spill] sm:$0xff] }
 0x39e   :  { %v14217_v37 = vld [vmem:[#allocation46_spill] sm:$0xff]  ;;  %v14255_v31 = vld [vmem:[#allocation89_spill] sm:$0xff] }
 0x39f   :  { %v14223_v24 = vld [vmem:[#allocation42_spill] sm:$0xff] }
 0x3a0   :  { %8468 = vmatmul.mubr.msk.bf16.gmra.mrb[92].mxu1 %vm5799_vm6, %v13019_v26  ;;  %v14232_v43 = vld [vmem:[#allocation62_spill] sm:$0xff] }
 0x3a1   :  { %8483 = vmatprep.mubr.msk.bf16.mxu1 %vm5799_vm6, %v14176_v18  ;;  %v14233_v33 = vcombine.low %v14231_v1, %v14232_v43  ;;  %v14235_v18 = vld [vmem:[#allocation68_spill] sm:$0xff]  ;;  %v14252_v7 = vld [vmem:[#allocation82_spill] sm:$0xff] }
 0x3a2   :  { %v13276_v43 = vld [vmem:[%s13513_s8] ss:$0 sm:$0xff] }
 0x3a8   :  { %8484 = vmatmul.mubr.msk.bf16.vlgmr.msra.gmra.mrb[32].mxu1 %vm5799_vm6, %v14177_v28  ;;  %v14237_v28 = vld [vmem:[#allocation115_spill] sm:$0xff] }
 0x3a9   :  { %8548 = vmatpush3.bf16.msra.mxu1 %v12642_v32  ;;  %8487 = vmatprep.mubr.msk.bf16.mxu1 %vm5799_vm6, %v14178_v52  ;;  %v14180_v32 = vcombine.low %v12751_v42, %v12762_v19  ;;  %v14184_v42 = vld [vmem:[#allocation17_spill] sm:$0xff]  ;;  %v14185_v19 = vld [vmem:[#allocation18_spill] sm:$0xff]  ;;  %v14238_v52 = vld [vmem:[#allocation116_spill] sm:$0xff] }
 0x3aa   :  { %8549 = vmatprep.subr.bf16.mxu1 %v8902_v10  ;;  %v14186_v30 = vcombine.low %v14184_v42, %v14185_v19  ;;  %v14249_v19 = vld [vmem:[#allocation79_spill] sm:$0xff] }
 0x3ad   :  { %8550 = vmatpush3.bf16.msra.mxu1 %v8902_v10 }
 0x3ae   :  { %8551 = vmatprep.subr.bf16.mxu1 %v8903_v60 }
 0x3b0   :  { %8488 = vmatmul.mubr.msk.bf16.gmra.mrb[36].mxu1 %vm5799_vm6, %v14179_v61  ;;  %v14241_v61 = vld [vmem:[#allocation21_spill] sm:$0xff] }
 0x3b1   :  { %8491 = vmatprep.mubr.msk.bf16.mxu1 %vm5799_vm6, %v14180_v32  ;;  %8552 = vmatpush3.bf16.msra.mxu1 %v8903_v60  ;;  %v14239_v60 = vcombine.low %v14237_v28, %v14238_v52  ;;  %v13288_v28 = vld [vmem:[%s13514_s9] ss:$0 sm:$0xff] }
 0x3b2   :  { %8553 = vmatprep.subr.bf16.mxu1 %v8904_v47 }
 0x3b5   :  { %8554 = vmatpush3.bf16.msra.mxu1 %v8904_v47  ;;  %v14240_v47 = vld [vmem:[#allocation70_spill] sm:$0xff] }
 0x3b6   :  { %8555 = vmatprep.subr.bf16.mxu1 %v8905_v21  ;;  %v14242_v32 = vcombine.low %v14240_v47, %v14241_v61 }
 0x3b8   :  { %8492 = vmatmul.mubr.msk.bf16.gmra.mrb[40].mxu1 %vm5799_vm6, %v14181_v2 }
 0x3b9   :  { %8495 = vmatprep.mubr.msk.bf16.mxu1 %vm5799_vm6, %v14182_v17  ;;  %8556 = vmatpush3.bf16.msra.mxu1 %v8905_v21  ;;  %v14243_v21 = vld [vmem:[#allocation117_spill] sm:$0xff]  ;;  %v14246_v17 = vld [vmem:[#allocation75_spill] sm:$0xff] }
 0x3ba   :  { %8557 = vmatprep.subr.bf16.mxu1 %v8906_v27 }
 0x3bd   :  { %8558 = vmatpush3.bf16.msra.mxu1 %v8906_v27  ;;  %v14244_v27 = vld [vmem:[#allocation72_spill] sm:$0xff] }
 0x3be   :  { %v14245_v2 = vcombine.low %v14243_v21, %v14244_v27 }
 0x3c0   :  { %8496 = vmatmul.mubr.msk.bf16.gmra.mrb[44].mxu1 %vm5799_vm6, %v14183_v25  ;;  %v14247_v25 = vld [vmem:[#allocation78_spill] sm:$0xff] }
 0x3c1   :  { %8499 = vmatprep.mubr.msk.bf16.mxu1 %vm5799_vm6, %v14186_v30  ;;  %v14248_v42 = vcombine.low %v14246_v17, %v14247_v25  ;;  %v14250_v30 = vld [vmem:[#allocation80_spill] sm:$0xff] }
 0x3c2   :  { %v14251_v23 = vcombine.low %v14249_v19, %v14250_v30 }
 0x3c8   :  { %8500 = vmatmul.mubr.msk.bf16.gmra.mrb[48].mxu1 %vm5799_vm6, %v14189_v6  ;;  %v14253_v6 = vld [vmem:[#allocation88_spill] sm:$0xff] }
 0x3c9   :  { %8503 = vmatprep.mubr.msk.bf16.mxu1 %vm5799_vm6, %v14192_v48  ;;  %v14254_v22 = vcombine.low %v14252_v7, %v14253_v6  ;;  %v14256_v48 = vld [vmem:[#allocation105_spill] sm:$0xff] }
 0x3d0   :  { %8504 = vmatmul.mubr.msk.bf16.gmra.mrb[52].mxu1 %vm5799_vm6, %v14193_v13  ;;  %v14257_v13 = vcombine.low %v14255_v31, %v14256_v48 }
 0x3d1   :  { %8507 = vmatprep.mubr.msk.bf16.mxu1 %vm5799_vm6, %v14194_v56  ;;  %v14258_v56 = vld [vmem:[#allocation4_spill] sm:$0xff] }
 0x3d8   :  { %8508 = vmatmul.mubr.msk.bf16.gmra.mrb[56].mxu1 %vm5799_vm6, %v14195_v4  ;;  %v14259_v4 = vld [vmem:[#allocation6_spill] sm:$0xff] }
 0x3d9   :  { %8511 = vmatprep.mubr.msk.bf16.mxu1 %vm5799_vm6, %v7701_v12  ;;  %v14206_v12 = vld [vmem:[#allocation102_spill] sm:$0xff] }
 0x3e0   :  { %8512 = vmatmul.mubr.msk.bf16.gmra.mrb[60].mxu1 %vm5799_vm6, %v14196_v51  ;;  %v14260_v51 = vcombine.low %v14258_v56, %v14259_v4 }
 0x3e1   :  { %8515 = vmatprep.mubr.msk.bf16.mxu1 %vm5799_vm6, %v14197_v58  ;;  %v14261_v58 = vld [vmem:[#allocation10_spill] sm:$0xff] }
 0x3e8   :  { %8516 = vmatmul.mubr.msk.bf16.gmra.mrb[64].mxu1 %vm5799_vm6, %v14198_v57  ;;  %v14262_v57 = vld [vmem:[#allocation8_spill] sm:$0xff] }
 0x3e9   :  { %8519 = vmatprep.mubr.msk.bf16.mxu1 %vm5799_vm6, %v14199_v46  ;;  %v14263_v46 = vcombine.low %v14261_v58, %v14262_v57 }
 0x3f0   :  { %8520 = vmatmul.mubr.msk.bf16.gmra.mrb[68].mxu1 %vm5799_vm6, %v14200_v35  ;;  %v14264_v35 = vld [vmem:[#allocation37_spill] sm:$0xff] }
 0x3f1   :  { %8523 = vmatprep.mubr.msk.bf16.mxu1 %vm5799_vm6, %v14201_v54  ;;  %v14265_v54 = vld [vmem:[#allocation50_spill] sm:$0xff] }
 0x3f8   :  { %8524 = vmatmul.mubr.msk.bf16.gmra.mrb[72].mxu1 %vm5799_vm6, %v14202_v20  ;;  %v14266_v20 = vcombine.low %v14264_v35, %v14265_v54 }
 0x3f9   :  { %8527 = vmatprep.mubr.msk.bf16.mxu1 %vm5799_vm6, %v14203_v15 }
 0x400   :  { %8528 = vmatmul.mubr.msk.bf16.gmra.mrb[76].mxu1 %vm5799_vm6, %v14204_v39 }
 0x401   :  { %8531 = vmatprep.mubr.msk.bf16.mxu1 %vm5799_vm6, %v14205_v11 }
 0x408   :  { %8532 = vmatmul.mubr.msk.bf16.gmra.mrb[80].mxu1 %vm5799_vm6, %v14206_v12 }
 0x409   :  { %8535 = vmatprep.mubr.msk.bf16.mxu1 %vm5799_vm6, %v14207_v36 }
 0x410   :  { %8536 = vmatmul.mubr.msk.bf16.gmra.mrb[84].mxu1 %vm5799_vm6, %v14208_v16 }
 0x411   :  { %8539 = vmatprep.mubr.msk.bf16.mxu1 %vm5799_vm6, %v14209_v55 }
 0x418   :  { %8540 = vmatmul.mubr.msk.bf16.gmra.mrb[88].mxu1 %vm5799_vm6, %v14210_v44 }
 0x419   :  { %8543 = vmatprep.mubr.msk.bf16.mxu1 %vm5799_vm6, %v14211_v40 }
 0x420   :  { %8544 = vmatmul.mubr.msk.bf16.gmra.mrb[92].mxu1 %vm5799_vm6, %v14212_v5 }
 0x421   :  { %8559 = vmatprep.mubr.msk.bf16.mxu1 %vm5799_vm6, %v12692_v38  ;;  %v14222_v38 = vld [vmem:[#allocation41_spill] sm:$0xff] }
 0x428   :  { %8560 = vmatmul.mubr.msk.bf16.vlgmr.msra.gmra.mrb[32].mxu1 %vm5799_vm6, %v12720_v45  ;;  %v14220_v45 = vld [vmem:[#allocation40_spill] sm:$0xff] }
 0x429   :  { %8563 = vmatprep.mubr.msk.bf16.mxu1 %vm5799_vm6, %v12748_v62  ;;  %v14218_v62 = vld [vmem:[#allocation109_spill] sm:$0xff] }
 0x430   :  { %8564 = vmatmul.mubr.msk.bf16.gmra.mrb[36].mxu1 %vm5799_vm6, %v14213_v41 }
 0x431   :  { %8567 = vmatprep.mubr.msk.bf16.mxu1 %vm5799_vm6, %v14214_v8 }
 0x438   :  { %8568 = vmatmul.mubr.msk.bf16.gmra.mrb[40].mxu1 %vm5799_vm6, %v14215_v29 }
 0x439   :  { %8571 = vmatprep.mubr.msk.bf16.mxu1 %vm5799_vm6, %v14216_v49 }
 0x440   :  { %8572 = vmatmul.mubr.msk.bf16.gmra.mrb[44].mxu1 %vm5799_vm6, %v14217_v37 }
 0x441   :  { %8575 = vmatprep.mubr.msk.bf16.mxu1 %vm5799_vm6, %v12422_v50  ;;  %v14219_v50 = vld [vmem:[#allocation39_spill] sm:$0xff] }
 0x448   :  { %8576 = vmatmul.mubr.msk.bf16.gmra.mrb[48].mxu1 %vm5799_vm6, %v12556_v63  ;;  %v14221_v63 = vcombine.low %v14219_v50, %v14220_v45 }
 0x449   :  { %8579 = vmatprep.mubr.msk.bf16.mxu1 %vm5799_vm6, %v14218_v62 }
 0x450   :  { %8580 = vmatmul.mubr.msk.bf16.gmra.mrb[52].mxu1 %vm5799_vm6, %v12949_v14  ;;  %v14224_v14 = vcombine.low %v14222_v38, %v14223_v24 }
 0x451   :  { %8583 = vmatprep.mubr.msk.bf16.mxu1 %vm5799_vm6, %v12991_v53  ;;  %v14225_v53 = vld [vmem:[#allocation52_spill] sm:$0xff] }
 0x452   :  { %v14227_v3 = vcombine.low %v14225_v53, %v14226_v0 }
 0x458   :  { %8584 = vmatmul.mubr.msk.bf16.gmra.mrb[56].mxu1 %vm5799_vm6, %v13007_v9  ;;  %v14228_v9 = vld [vmem:[#allocation54_spill] sm:$0xff] }
 0x459   :  { %8587 = vmatprep.mubr.msk.bf16.mxu1 %vm5799_vm6, %v13009_v59  ;;  %v14229_v59 = vld [vmem:[#allocation57_spill] sm:$0xff] }
 0x45a   :  { %v14230_v34 = vcombine.low %v14228_v9, %v14229_v59 }
 0x460   :  { %8588 = vmatmul.mubr.msk.bf16.gmra.mrb[60].mxu1 %vm5799_vm6, %v13019_v26  ;;  %v14234_v26 = vld [vmem:[#allocation67_spill] sm:$0xff] }
 0x461   :  { %8591 = vmatprep.mubr.msk.bf16.mxu1 %vm5799_vm6, %v14221_v63  ;;  %v14236_v10 = vcombine.low %v14234_v26, %v14235_v18 }
 0x468   :  { %8592 = vmatmul.mubr.msk.bf16.gmra.mrb[64].mxu1 %vm5799_vm6, %v14224_v14 }
 0x469   :  { %8595 = vmatprep.mubr.msk.bf16.mxu1 %vm5799_vm6, %v14227_v3 }
 0x470   :  { %8596 = vmatmul.mubr.msk.bf16.gmra.mrb[68].mxu1 %vm5799_vm6, %v14230_v34 }
 0x471   :  { %8599 = vmatprep.mubr.msk.bf16.mxu1 %vm5799_vm6, %v14233_v33 }
 0x478   :  { %8600 = vmatmul.mubr.msk.bf16.gmra.mrb[72].mxu1 %vm5799_vm6, %v14236_v10 }
 0x479   :  { %8603 = vmatprep.mubr.msk.bf16.mxu1 %vm5799_vm6, %v14239_v60 }
 0x480   :  { %8604 = vmatmul.mubr.msk.bf16.gmra.mrb[76].mxu1 %vm5799_vm6, %v14242_v32 }
 0x481   :  { %8607 = vmatprep.mubr.msk.bf16.mxu1 %vm5799_vm6, %v14245_v2 }
 0x488   :  { %8608 = vmatmul.mubr.msk.bf16.gmra.mrb[80].mxu1 %vm5799_vm6, %v14248_v42 }
 0x489   :  { %8611 = vmatprep.mubr.msk.bf16.mxu1 %vm5799_vm6, %v14251_v23 }
 0x490   :  { %8612 = vmatmul.mubr.msk.bf16.gmra.mrb[84].mxu1 %vm5799_vm6, %v14254_v22 }
 0x491   :  { %8615 = vmatprep.mubr.msk.bf16.mxu1 %vm5799_vm6, %v14257_v13 }
 0x498   :  { %8616 = vmatmul.mubr.msk.bf16.gmra.mrb[88].mxu1 %vm5799_vm6, %v14260_v51 }
 0x499   :  { %8619 = vmatprep.mubr.msk.bf16.mxu1 %vm5799_vm6, %v14263_v46 }
 0x4a0   :  { %8620 = vmatmul.mubr.msk.bf16.gmra.mrb[92].mxu1 %vm5799_vm6, %v14266_v20 }
 0x4fb   :  { %v8561_v15 = vpop.f32.mrb[32].mxu1 }
 0x4fc   :  { %v6689_v39 = vpop.f32.mrb[33].mxu1  ;;  %v7017_v10 = vmul.f32 %v8561_v15, %v13276_v43 }
 0x4fd   :  { %v8562_v11 = vpop.f32.mrb[34].mxu1  ;;  %v7015_v52 = vmul.f32 %v13276_v43, %v6689_v39 }
 0x4fe   :  { %v6692_v12 = vpop.f32.mrb[35].mxu1  ;;  %v7018_v60 = vmul.f32 %v8562_v11, %v13276_v43  ;;  %v7088_v47 = vadd.f32 %v13288_v28, %v7017_v10 }
 0x4ff   :  { %v7016_v61 = vmul.f32 %v13276_v43, %v6692_v12  ;;  %v7086_v17 = vadd.f32 %v13288_v28, %v7015_v52 }
 0x500   :  { %v7089_v30 = vadd.f32 %v13288_v28, %v7018_v60  ;;  %v7152_v22 = vmax.f32 %v7088_v47, 0.0 }
 0x501   :  { %v7087_v31 = vadd.f32 %v13288_v28, %v7016_v61  ;;  %v7150_v57 = vmax.f32 %v7086_v17, 0.0 }
 0x502   :  { %v7153_v20 = vmax.f32 %v7089_v30, 0.0 }
 0x503   :  { %v8565_v36 = vpop.f32.mrb[36].mxu1  ;;  %v7151_v12 = vmax.f32 %v7087_v31, 0.0 }
 0x504   :  { %v6705_v16 = vpop.f32.mrb[37].mxu1  ;;  %v7021_v21 = vmul.f32 %v8565_v36, %v13276_v43 }
 0x505   :  { %v8566_v55 = vpop.f32.mrb[38].mxu1  ;;  %v7019_v25 = vmul.f32 %v13276_v43, %v6705_v16 }
 0x506   :  { %v6708_v44 = vpop.f32.mrb[39].mxu1  ;;  %v7092_v56 = vadd.f32 %v13288_v28, %v7021_v21  ;;  %v7022_v4 = vmul.f32 %v8566_v55, %v13276_v43 }
 0x507   :  { %v7090_v46 = vadd.f32 %v13288_v28, %v7019_v25  ;;  %v7020_v15 = vmul.f32 %v13276_v43, %v6708_v44 }
 0x508   :  { %v7156_v52 = vmax.f32 %v7092_v56, 0.0  ;;  %v7093_v60 = vadd.f32 %v13288_v28, %v7022_v4 }
 0x509   :  { %v7154_v21 = vmax.f32 %v7090_v46, 0.0 }
 0x50b   :  { %v13231_v40 = vpop.f32.mrb[40].mxu1 }
 0x50c   :  { %v13233_v5 = vpop.f32.mrb[41].mxu1  ;;  %v7025_v36 = vmul.f32 %v13231_v40, %v13276_v43  ;;  %v7091_v40 = vadd.f32 %v13288_v28, %v7020_v15 }
 0x50d   :  { %v13235_v41 = vpop.f32.mrb[42].mxu1  ;;  %v7023_v44 = vmul.f32 %v13276_v43, %v13233_v5 }
 0x50e   :  { %v13237_v8 = vpop.f32.mrb[43].mxu1  ;;  %v7026_v5 = vmul.f32 %v13235_v41, %v13276_v43 }
 0x50f   :  { %v7094_v56 = vadd.f32 %v13288_v28, %v7023_v44  ;;  %v7024_v46 = vmul.f32 %v13276_v43, %v13237_v8 }
 0x513   :  { %v13239_v29 = vpop.f32.mrb[44].mxu1 }
 0x514   :  { %v13241_v49 = vpop.f32.mrb[45].mxu1 }
 0x515   :  { %v13243_v37 = vpop.f32.mrb[46].mxu1 }
 0x516   :  { %v13245_v62 = vpop.f32.mrb[47].mxu1 }
 0x51b   :  { %v13247_v50 = vpop.f32.mrb[48].mxu1 }
 0x51c   :  { %v13249_v45 = vpop.f32.mrb[49].mxu1 }
 0x51d   :  { %v13251_v63 = vpop.f32.mrb[50].mxu1 }
 0x51e   :  { %v13253_v38 = vpop.f32.mrb[51].mxu1 }
 0x523   :  { %v13255_v24 = vpop.f32.mrb[52].mxu1 }
 0x524   :  { %v13257_v14 = vpop.f32.mrb[53].mxu1 }
 0x525   :  { %v13259_v53 = vpop.f32.mrb[54].mxu1 }
 0x526   :  { %v13261_v0 = vpop.f32.mrb[55].mxu1 }
 0x52b   :  { %v13263_v3 = vpop.f32.mrb[56].mxu1 }
 0x52c   :  { %v13265_v9 = vpop.f32.mrb[57].mxu1 }
 0x52d   :  { %v13267_v59 = vpop.f32.mrb[58].mxu1 }
 0x52e   :  { %v13269_v34 = vpop.f32.mrb[59].mxu1 }
 0x533   :  { %v13271_v1 = vpop.f32.mrb[60].mxu1 }
 0x534   :  { %v13278_v33 = vpop.f32.mrb[61].mxu1 }
 0x535   :  { %v13280_v26 = vpop.f32.mrb[62].mxu1 }
 0x536   :  { %v13282_v18 = vpop.f32.mrb[63].mxu1 }
 0x53b   :  { %v8593_v32 = vpop.f32.mrb[64].mxu1 }
 0x53c   :  { %v7049_v27 = vmul.f32 %v8593_v32, %v13276_v43  ;;  %v6817_v2 = vpop.f32.mrb[65].mxu1 }
 0x53d   :  { %v7047_v42 = vmul.f32 %v13276_v43, %v6817_v2  ;;  %v8594_v19 = vpop.f32.mrb[66].mxu1 }
 0x53e   :  { %v7120_v23 = vadd.f32 %v13288_v28, %v7049_v27  ;;  %v7050_v7 = vmul.f32 %v8594_v19, %v13276_v43  ;;  %v6820_v6 = vpop.f32.mrb[67].mxu1 }
 0x53f   :  { %v7118_v48 = vadd.f32 %v13288_v28, %v7047_v42  ;;  %v7048_v13 = vmul.f32 %v13276_v43, %v6820_v6 }
 0x540   :  { %v7184_v51 = vmax.f32 %v7120_v23, 0.0  ;;  %v7121_v58 = vadd.f32 %v13288_v28, %v7050_v7  ;;  %v7096_v23 = vadd.f32 %v13288_v28, %v7025_v36 }
 0x541   :  { %v7182_v35 = vmax.f32 %v7118_v48, 0.0  ;;  %v7119_v54 = vadd.f32 %v13288_v28, %v7048_v13 }
 0x542   :  { %v7216_v39 = vmax.f32 %v7152_v22, %v7184_v51  ;;  %v7185_v11 = vmax.f32 %v7121_v58, 0.0  ;;  %v7160_v8 = vmax.f32 %v7096_v23, 0.0 }
 0x543   :  { %v7214_v16 = vmax.f32 %v7150_v57, %v7182_v35  ;;  %v7183_v55 = vmax.f32 %v7119_v54, 0.0  ;;  %v8597_v10 = vpop.f32.mrb[68].mxu1  ;;  %v7157_v57 = vmax.f32 %v7093_v60, 0.0  ;;  %v7155_v54 = vmax.f32 %v7091_v40, 0.0 }
 0x544   :  { %v7217_v47 = vmax.f32 %v7153_v20, %v7185_v11  ;;  %v7053_v61 = vmul.f32 %v8597_v10, %v13276_v43  ;;  %v6833_v32 = vpop.f32.mrb[69].mxu1  ;;  %v7029_v20 = vmul.f32 %v13239_v29, %v13276_v43  ;;  %v7158_v10 = vmax.f32 %v7094_v56, 0.0 }
 0x545   :  { %v7215_v27 = vmax.f32 %v7151_v12, %v7183_v55  ;;  %v7051_v2 = vmul.f32 %v13276_v43, %v6833_v32  ;;  %v8598_v17 = vpop.f32.mrb[70].mxu1  ;;  %v7097_v12 = vadd.f32 %v13288_v28, %v7026_v5  ;;  %v7033_v56 = vmul.f32 %v13247_v50, %v13276_v43 }
 0x546   :  { %v7247_v25 = vmax.f32 %v7216_v39, %v7217_v47  ;;  %v7124_v42 = vadd.f32 %v13288_v28, %v7053_v61  ;;  %v7054_v19 = vmul.f32 %v8598_v17, %v13276_v43  ;;  %v6836_v30 = vpop.f32.mrb[71].mxu1  ;;  %v7095_v61 = vadd.f32 %v13288_v28, %v7024_v46 }
 0x547   :  { %v7246_v7 = vmax.f32 %v7214_v16, %v7215_v27  ;;  %v7122_v6 = vadd.f32 %v13288_v28, %v7051_v2  ;;  %v7052_v22 = vmul.f32 %v13276_v43, %v6836_v30  ;;  %v7100_v2 = vadd.f32 %v13288_v28, %v7029_v20 }
 0x548   :  { %v7263_v31 = vpack.c.bf16 %v7247_v25, %v7247_v25  ;;  %v7188_v48 = vmax.f32 %v7124_v42, 0.0  ;;  %v7125_v13 = vadd.f32 %v13288_v28, %v7054_v19  ;;  %v7161_v5 = vmax.f32 %v7097_v12, 0.0 }
 0x549   :  { %v7262_v4 = vpack.c.bf16 %v7246_v7, %v7246_v7  ;;  %v7186_v51 = vmax.f32 %v7122_v6, 0.0  ;;  %v7123_v58 = vadd.f32 %v13288_v28, %v7052_v22  ;;  %v7031_v20 = vmul.f32 %v13276_v43, %v13249_v45 }
 0x54a   :  { %7280 = vst.msk [vmem:[%s13515_s10 + $0x4] sm:$0xf] %vm7278_vm13, %v7263_v31  ;;  %v7220_v41 = vmax.f32 %v7156_v52, %v7188_v48  ;;  %v7189_v35 = vmax.f32 %v7125_v13, 0.0  ;;  %v7027_v52 = vmul.f32 %v13276_v43, %v13241_v49  ;;  %v7030_v49 = vmul.f32 %v13243_v37, %v13276_v43 }
 0x54b   :  { %7279 = vst.msk [vmem:[%s13515_s10] sm:$0xf] %vm7278_vm13, %v7262_v4  ;;  %v7218_v15 = vmax.f32 %v7154_v21, %v7186_v51  ;;  %v7187_v39 = vmax.f32 %v7123_v58, 0.0  ;;  %v8601_v11 = vpop.f32.mrb[72].mxu1  ;;  %v7028_v31 = vmul.f32 %v13276_v43, %v13245_v62  ;;  %v7159_v13 = vmax.f32 %v7095_v61, 0.0 }
 0x54c   :  { %v7221_v36 = vmax.f32 %v7157_v57, %v7189_v35  ;;  %v7057_v16 = vmul.f32 %v8601_v11, %v13276_v43  ;;  %v6849_v55 = vpop.f32.mrb[73].mxu1  ;;  %v7098_v23 = vadd.f32 %v13288_v28, %v7027_v52  ;;  %v7164_v62 = vmax.f32 %v7100_v2, 0.0 }
 0x54d   :  { %v7219_v29 = vmax.f32 %v7155_v54, %v7187_v39  ;;  %v7055_v60 = vmul.f32 %v13276_v43, %v6849_v55  ;;  %v8602_v47 = vpop.f32.mrb[74].mxu1  ;;  %v7101_v57 = vadd.f32 %v13288_v28, %v7030_v49  ;;  %v7099_v11 = vadd.f32 %v13288_v28, %v7028_v31 }
 0x54e   :  { %v7249_v32 = vmax.f32 %v7220_v41, %v7221_v36  ;;  %v7128_v21 = vadd.f32 %v13288_v28, %v7057_v16  ;;  %v7058_v44 = vmul.f32 %v8602_v47, %v13276_v43  ;;  %v6852_v27 = vpop.f32.mrb[75].mxu1  ;;  %v7162_v54 = vmax.f32 %v7098_v23, 0.0 }
 0x54f   :  { %v7248_v17 = vmax.f32 %v7218_v15, %v7219_v29  ;;  %v7126_v40 = vadd.f32 %v13288_v28, %v7055_v60  ;;  %v7056_v25 = vmul.f32 %v13276_v43, %v6852_v27  ;;  %v7104_v55 = vadd.f32 %v13288_v28, %v7033_v56 }
 0x550   :  { %v7265_v42 = vpack.c.bf16 %v7249_v32, %v7249_v32  ;;  %v7192_v19 = vmax.f32 %v7128_v21, 0.0  ;;  %v7129_v30 = vadd.f32 %v13288_v28, %v7058_v44  ;;  %v7034_v45 = vmul.f32 %v13251_v63, %v13276_v43 }
 0x551   :  { %v7264_v7 = vpack.c.bf16 %v7248_v17, %v7248_v17  ;;  %v7190_v6 = vmax.f32 %v7126_v40, 0.0  ;;  %v7127_v22 = vadd.f32 %v13288_v28, %v7056_v25  ;;  %v7102_v32 = vadd.f32 %v13288_v28, %v7031_v20 }
 0x552   :  { %7282 = vst.msk [vmem:[%s13515_s10 + $0xc] sm:$0xf] %vm7278_vm13, %v7265_v42  ;;  %v7224_v37 = vmax.f32 %v7160_v8, %v7192_v19  ;;  %v7193_v48 = vmax.f32 %v7129_v30, 0.0  ;;  %v7165_v2 = vmax.f32 %v7101_v57, 0.0  ;;  %v7032_v17 = vmul.f32 %v13276_v43, %v13253_v38 }
 0x553   :  { %7281 = vst.msk [vmem:[%s13515_s10 + $0x8] sm:$0xf] %vm7278_vm13, %v7264_v7  ;;  %v7222_v4 = vmax.f32 %v7158_v10, %v7190_v6  ;;  %v7191_v51 = vmax.f32 %v7127_v22, 0.0  ;;  %v8605_v58 = vpop.f32.mrb[76].mxu1  ;;  %v7163_v25 = vmax.f32 %v7099_v11, 0.0  ;;  %v7037_v49 = vmul.f32 %v13255_v24, %v13276_v43 }
 0x554   :  { %v7225_v46 = vmax.f32 %v7161_v5, %v7193_v48  ;;  %v7061_v41 = vmul.f32 %v8605_v58, %v13276_v43  ;;  %v6865_v35 = vpop.f32.mrb[77].mxu1  ;;  %v7168_v38 = vmax.f32 %v7104_v55, 0.0  ;;  %v7105_v23 = vadd.f32 %v13288_v28, %v7034_v45 }
 0x555   :  { %v7223_v50 = vmax.f32 %v7159_v13, %v7191_v51  ;;  %v7059_v15 = vmul.f32 %v13276_v43, %v6865_v35  ;;  %v8606_v39 = vpop.f32.mrb[78].mxu1  ;;  %v7166_v5 = vmax.f32 %v7102_v32, 0.0  ;;  %v7035_v31 = vmul.f32 %v13276_v43, %v13257_v14 }
 0x556   :  { %v7251_v8 = vmax.f32 %v7224_v37, %v7225_v46  ;;  %v7132_v12 = vadd.f32 %v13288_v28, %v7061_v41  ;;  %v7062_v36 = vmul.f32 %v8606_v39, %v13276_v43  ;;  %v6868_v16 = vpop.f32.mrb[79].mxu1  ;;  %v7103_v13 = vadd.f32 %v13288_v28, %v7032_v17 }
 0x557   :  { %v7250_v10 = vmax.f32 %v7222_v4, %v7223_v50  ;;  %v7130_v52 = vadd.f32 %v13288_v28, %v7059_v15  ;;  %v7060_v29 = vmul.f32 %v13276_v43, %v6868_v16  ;;  %v7038_v14 = vmul.f32 %v13259_v53, %v13276_v43 }
 0x558   :  { %v7267_v60 = vpack.c.bf16 %v7251_v8, %v7251_v8  ;;  %v7196_v47 = vmax.f32 %v7132_v12, 0.0  ;;  %v7133_v61 = vadd.f32 %v13288_v28, %v7062_v36  ;;  %v7106_v50 = vadd.f32 %v13288_v28, %v7035_v31 }
 0x559   :  { %v7266_v21 = vpack.c.bf16 %v7250_v10, %v7250_v10  ;;  %v7194_v44 = vmax.f32 %v7130_v52, 0.0  ;;  %v7131_v27 = vadd.f32 %v13288_v28, %v7060_v29  ;;  %v7169_v8 = vmax.f32 %v7105_v23, 0.0 }
 0x55a   :  { %7284 = vst.msk [vmem:[%s13515_s10 + $0x14] sm:$0xf] %vm7278_vm13, %v7267_v60  ;;  %v7228_v63 = vmax.f32 %v7164_v62, %v7196_v47  ;;  %v7197_v40 = vmax.f32 %v7133_v61, 0.0  ;;  %v7108_v62 = vadd.f32 %v13288_v28, %v7037_v49  ;;  %v7167_v16 = vmax.f32 %v7103_v13, 0.0 }
 0x55b   :  { %7283 = vst.msk [vmem:[%s13515_s10 + $0x10] sm:$0xf] %vm7278_vm13, %v7266_v21  ;;  %v7226_v42 = vmax.f32 %v7162_v54, %v7194_v44  ;;  %v7195_v19 = vmax.f32 %v7131_v27, 0.0  ;;  %v8609_v30 = vpop.f32.mrb[80].mxu1  ;;  %v7036_v53 = vmul.f32 %v13276_v43, %v13261_v0  ;;  %v7041_v45 = vmul.f32 %v13263_v3, %v13276_v43 }
 0x55c   :  { %v7229_v7 = vmax.f32 %v7165_v2, %v7197_v40  ;;  %v7065_v6 = vmul.f32 %v8609_v30, %v13276_v43  ;;  %v6881_v22 = vpop.f32.mrb[81].mxu1  ;;  %v7172_v29 = vmax.f32 %v7108_v62, 0.0  ;;  %v7170_v32 = vmax.f32 %v7106_v50, 0.0 }
 0x55d   :  { %v7227_v24 = vmax.f32 %v7163_v25, %v7195_v19  ;;  %v7063_v37 = vmul.f32 %v13276_v43, %v6881_v22  ;;  %v8610_v48 = vpop.f32.mrb[82].mxu1  ;;  %v7109_v21 = vadd.f32 %v13288_v28, %v7038_v14  ;;  %v7039_v2 = vmul.f32 %v13276_v43, %v13265_v9 }
 0x55e   :  { %v7253_v56 = vmax.f32 %v7228_v63, %v7229_v7  ;;  %v7136_v4 = vadd.f32 %v13288_v28, %v7065_v6  ;;  %v7066_v51 = vmul.f32 %v8610_v48, %v13276_v43  ;;  %v6884_v58 = vpop.f32.mrb[83].mxu1  ;;  %v7107_v25 = vadd.f32 %v13288_v28, %v7036_v53 }
 0x55f   :  { %v7252_v57 = vmax.f32 %v7226_v42, %v7227_v24  ;;  %v7134_v46 = vadd.f32 %v13288_v28, %v7063_v37  ;;  %v7064_v41 = vmul.f32 %v13276_v43, %v6884_v58  ;;  %v7112_v30 = vadd.f32 %v13288_v28, %v7041_v45 }
 0x560   :  { %v7269_v35 = vpack.c.bf16 %v7253_v56, %v7253_v56  ;;  %v7200_v54 = vmax.f32 %v7136_v4, 0.0  ;;  %v7137_v20 = vadd.f32 %v13288_v28, %v7066_v51  ;;  %v7042_v9 = vmul.f32 %v13267_v59, %v13276_v43 }
 0x561   :  { %v7268_v15 = vpack.c.bf16 %v7252_v57, %v7252_v57  ;;  %v7198_v39 = vmax.f32 %v7134_v46, 0.0  ;;  %v7135_v11 = vadd.f32 %v13288_v28, %v7064_v41  ;;  %v7173_v31 = vmax.f32 %v7109_v21, 0.0 }
 0x562   :  { %7286 = vst.msk [vmem:[%s13515_s10 + $0x1c] sm:$0xf] %vm7278_vm13, %v7269_v35  ;;  %v7232_v12 = vmax.f32 %v7168_v38, %v7200_v54  ;;  %v7201_v36 = vmax.f32 %v7137_v20, 0.0  ;;  %v7110_v24 = vadd.f32 %v13288_v28, %v7039_v2  ;;  %v7171_v13 = vmax.f32 %v7107_v25, 0.0 }
 0x563   :  { %7285 = vst.msk [vmem:[%s13515_s10 + $0x18] sm:$0xf] %vm7278_vm13, %v7268_v15  ;;  %v7230_v55 = vmax.f32 %v7166_v5, %v7198_v39  ;;  %v7199_v10 = vmax.f32 %v7135_v11, 0.0  ;;  %v8613_v52 = vpop.f32.mrb[84].mxu1  ;;  %v7040_v56 = vmul.f32 %v13276_v43, %v13269_v34  ;;  %v7176_v46 = vmax.f32 %v7112_v30, 0.0 }
 0x564   :  { %v7233_v60 = vmax.f32 %v7169_v8, %v7201_v36  ;;  %v7069_v47 = vmul.f32 %v8613_v52, %v13276_v43  ;;  %v6897_v61 = vpop.f32.mrb[85].mxu1  ;;  %v7113_v41 = vadd.f32 %v13288_v28, %v7042_v9  ;;  %v7174_v34 = vmax.f32 %v7110_v24, 0.0 }
 0x565   :  { %v7231_v0 = vmax.f32 %v7167_v16, %v7199_v10  ;;  %v7067_v44 = vmul.f32 %v13276_v43, %v6897_v61  ;;  %v8614_v27 = vpop.f32.mrb[86].mxu1  ;;  %v7111_v11 = vadd.f32 %v13288_v28, %v7040_v56  ;;  %v7045_v16 = vmul.f32 %v13271_v1, %v13276_v43 }
 0x566   :  { %v7255_v17 = vmax.f32 %v7232_v12, %v7233_v60  ;;  %v7140_v63 = vadd.f32 %v13288_v28, %v7069_v47  ;;  %v7070_v40 = vmul.f32 %v8614_v27, %v13276_v43  ;;  %v6900_v3 = vpop.f32.mrb[87].mxu1  ;;  %v7043_v52 = vmul.f32 %v13276_v43, %v13278_v33 }
 0x567   :  { %v7254_v49 = vmax.f32 %v7230_v55, %v7231_v0  ;;  %v7138_v42 = vadd.f32 %v13288_v28, %v7067_v44  ;;  %v7068_v19 = vmul.f32 %v13276_v43, %v6900_v3  ;;  %v7177_v47 = vmax.f32 %v7113_v41, 0.0 }
 0x568   :  { %v7271_v38 = vpack.c.bf16 %v7255_v17, %v7255_v17  ;;  %v7204_v23 = vmax.f32 %v7140_v63, 0.0  ;;  %v7141_v7 = vadd.f32 %v13288_v28, %v7070_v40  ;;  %v7046_v61 = vmul.f32 %v13280_v26, %v13276_v43 }
 0x569   :  { %v7270_v6 = vpack.c.bf16 %v7254_v49, %v7254_v49  ;;  %v7202_v22 = vmax.f32 %v7138_v42, 0.0  ;;  %v7139_v5 = vadd.f32 %v13288_v28, %v7068_v19  ;;  %v7175_v21 = vmax.f32 %v7111_v11, 0.0 }
 0x56a   :  { %7288 = vst.msk [vmem:[%s13515_s10 + $0x24] sm:$0xf] %vm7278_vm13, %v7271_v38  ;;  %v7236_v37 = vmax.f32 %v7172_v29, %v7204_v23  ;;  %v7205_v48 = vmax.f32 %v7141_v7, 0.0  ;;  %v7044_v0 = vmul.f32 %v13276_v43, %v13282_v18  ;;  %v7116_v26 = vadd.f32 %v13288_v28, %v7045_v16 }
 0x56b   :  { %7287 = vst.msk [vmem:[%s13515_s10 + $0x20] sm:$0xf] %vm7278_vm13, %v7270_v6  ;;  %v7234_v59 = vmax.f32 %v7170_v32, %v7202_v22  ;;  %v7203_v4 = vmax.f32 %v7139_v5, 0.0  ;;  %v8617_v51 = vpop.f32.mrb[88].mxu1  ;;  %v7114_v40 = vadd.f32 %v13288_v28, %v7043_v52  ;;  %v7117_v49 = vadd.f32 %v13288_v28, %v7046_v61 }
 0x56c   :  { %v7237_v58 = vmax.f32 %v7173_v31, %v7205_v48  ;;  %v7073_v62 = vmul.f32 %v8617_v51, %v13276_v43  ;;  %v6913_v57 = vpop.f32.mrb[89].mxu1  ;;  %v7115_v23 = vadd.f32 %v13288_v28, %v7044_v0  ;;  %v7180_v22 = vmax.f32 %v7116_v26, 0.0 }
 0x56d   :  { %v7235_v14 = vmax.f32 %v7171_v13, %v7203_v4  ;;  %v7071_v35 = vmul.f32 %v13276_v43, %v6913_v57  ;;  %v8618_v54 = vpop.f32.mrb[90].mxu1 }
 0x56e   :  { %v7257_v20 = vmax.f32 %v7236_v37, %v7237_v58  ;;  %v7144_v50 = vadd.f32 %v13288_v28, %v7073_v62  ;;  %v7074_v15 = vmul.f32 %v8618_v54, %v13276_v43  ;;  %v6916_v39 = vpop.f32.mrb[91].mxu1  ;;  %v7178_v37 = vmax.f32 %v7114_v40, 0.0 }
 0x56f   :  { %v7256_v8 = vmax.f32 %v7234_v59, %v7235_v14  ;;  %v7142_v12 = vadd.f32 %v13288_v28, %v7071_v35  ;;  %v7072_v36 = vmul.f32 %v13276_v43, %v6916_v39  ;;  %v7181_v59 = vmax.f32 %v7117_v49, 0.0 }
 0x570   :  { %v7273_v53 = vpack.c.bf16 %v7257_v20, %v7257_v20  ;;  %v7208_v55 = vmax.f32 %v7144_v50, 0.0  ;;  %v7145_v10 = vadd.f32 %v13288_v28, %v7074_v15  ;;  %v7179_v58 = vmax.f32 %v7115_v23, 0.0 }
 0x571   :  { %v7272_v29 = vpack.c.bf16 %v7256_v8, %v7256_v8  ;;  %v7206_v45 = vmax.f32 %v7142_v12, 0.0  ;;  %v7143_v60 = vadd.f32 %v13288_v28, %v7072_v36 }
 0x572   :  { %7290 = vst.msk [vmem:[%s13515_s10 + $0x2c] sm:$0xf] %vm7278_vm13, %v7273_v53  ;;  %v7240_v1 = vmax.f32 %v7176_v46, %v7208_v55  ;;  %v7209_v32 = vmax.f32 %v7145_v10, 0.0 }
 0x573   :  { %7289 = vst.msk [vmem:[%s13515_s10 + $0x28] sm:$0xf] %vm7278_vm13, %v7272_v29  ;;  %v7238_v33 = vmax.f32 %v7174_v34, %v7206_v45  ;;  %v7207_v44 = vmax.f32 %v7143_v60, 0.0  ;;  %v8621_v27 = vpop.f32.mrb[92].mxu1 }
 0x574   :  { %v7241_v2 = vmax.f32 %v7177_v47, %v7209_v32  ;;  %v7077_v17 = vmul.f32 %v8621_v27, %v13276_v43  ;;  %v6929_v63 = vpop.f32.mrb[93].mxu1 }
 0x575   :  { %v7239_v3 = vmax.f32 %v7175_v21, %v7207_v44  ;;  %v7075_v25 = vmul.f32 %v13276_v43, %v6929_v63  ;;  %v8622_v18 = vpop.f32.mrb[94].mxu1 }
 0x576   :  { %v7259_v42 = vmax.f32 %v7240_v1, %v7241_v2  ;;  %v7148_v19 = vadd.f32 %v13288_v28, %v7077_v17  ;;  %v7078_v30 = vmul.f32 %v8622_v18, %v13276_v43  ;;  %v6932_v38 = vpop.f32.mrb[95].mxu1 }
 0x577   :  { %v7258_v7 = vmax.f32 %v7238_v33, %v7239_v3  ;;  %v7146_v9 = vadd.f32 %v13288_v28, %v7075_v25  ;;  %v7076_v6 = vmul.f32 %v13276_v43, %v6932_v38 }
 0x578   :  { %v7275_v5 = vpack.c.bf16 %v7259_v42, %v7259_v42  ;;  %v7212_v31 = vmax.f32 %v7148_v19, 0.0  ;;  %v7149_v24 = vadd.f32 %v13288_v28, %v7078_v30 }
 0x579   :  { %v7274_v48 = vpack.c.bf16 %v7258_v7, %v7258_v7  ;;  %v7210_v13 = vmax.f32 %v7146_v9, 0.0  ;;  %v7147_v56 = vadd.f32 %v13288_v28, %v7076_v6 }
 0x57a   :  { %7292 = vst.msk [vmem:[%s13515_s10 + $0x34] sm:$0xf] %vm7278_vm13, %v7275_v5  ;;  %v7244_v4 = vmax.f32 %v7180_v22, %v7212_v31  ;;  %v7213_v51 = vmax.f32 %v7149_v24, 0.0 }
 0x57b   :  { %7291 = vst.msk [vmem:[%s13515_s10 + $0x30] sm:$0xf] %vm7278_vm13, %v7274_v48  ;;  %v7242_v43 = vmax.f32 %v7178_v37, %v7210_v13  ;;  %v7211_v62 = vmax.f32 %v7147_v56, 0.0 }
 0x57c   :  { %v7245_v57 = vmax.f32 %v7181_v59, %v7213_v51 }
 0x57d   :  { %v7243_v46 = vmax.f32 %v7179_v58, %v7211_v62 }
 0x57e   :  { %v7261_v41 = vmax.f32 %v7244_v4, %v7245_v57 }
 0x57f   :  { %v7260_v28 = vmax.f32 %v7242_v43, %v7243_v46 }
 0x580   :  { %v7277_v14 = vpack.c.bf16 %v7261_v41, %v7261_v41 }
 0x581   :  { %v7276_v35 = vpack.c.bf16 %v7260_v28, %v7260_v28 }
 0x582   :  { %7294 = vst.msk [vmem:[%s13515_s10 + $0x3c] sm:$0xf] %vm7278_vm13, %v7277_v14 }
 0x583   :  { %7293 = vst.msk [vmem:[%s13515_s10 + $0x38] sm:$0xf] %vm7278_vm13, %v7276_v35 }

</bundles_post_ra>
